<compile_context>
chip_gen: v6e
topology: v6e:2x2x1
jax: 0.10.0
libtpu: 0.0.40
codegen_flags: <defaults>
</compile_context>

<pallas_src>
import functools

import jax
import jax.numpy as jnp
from jax.experimental import pallas as pl
from jax.experimental.pallas import tpu as pltpu


# ---------------------------------------------------------------------------
# Pallas kernel: ApplySingleAttention forward for a block of graphs
# ---------------------------------------------------------------------------
def _apply_single_attention_kernel(v_ref, q_ref, atten_ref,
                                   wv_ref, bv_ref, wq_ref, bq_ref,
                                   wa_ref, ba_ref, out_ref):
    bg, nv, nq = atten_ref.shape
    mid = wv_ref.shape[1]

    # FCNet(..., activate='relu'): Linear + ReLU; dropout(0.0) = identity.
    # v_ref / q_ref arrive already row-stacked as (bg*Nv, Dv) / (bg*Nq, Dq)
    # bf16 slabs -> one well-filled bf16 MXU matmul each, f32 accumulation.
    vh = jnp.maximum(
        jnp.dot(v_ref[...], wv_ref[...],
                preferred_element_type=jnp.float32) + bv_ref[...], 0.0)
    qh = jnp.maximum(
        jnp.dot(q_ref[...], wq_ref[...],
                preferred_element_type=jnp.float32) + bq_ref[...], 0.0)
    vh = vh.reshape(bg, nv, mid)          # f32, sublane-aligned reshape
    qh = qh.reshape(bg, nq, mid)          # f32, sublane-aligned reshape

    # Intended contraction of the reference:
    #   h[b, m] = sum_v sum_q vh[b,v,m] * atten[b,v,q] * qh[b,q,m]
    # Done on the VPU in f32 (unrolled over the tiny q axis) so the MXU stays
    # dedicated to the weight matmuls and atten needs no MXU relayout.
    atten_f = atten_ref[...]                                   # (bg, nv, nq) f32
    aq = jnp.zeros((bg, nv, mid), jnp.float32)
    for qi in range(nq):                                        # nq is small (8)
        aq = aq + atten_f[:, :, qi][:, :, None] * qh[:, qi, :][:, None, :]
    h = jnp.sum(vh * aq, axis=1)                                # (bg, mid) f32

    # lin_atten: Linear only (no activation); bf16 MXU operands, f32 bias add.
    out_ref[...] = (jnp.dot(h.astype(jnp.bfloat16), wa_ref[...],
                            preferred_element_type=jnp.float32) + ba_ref[...])


def apply_single_attention(v, q, atten, params, *, block_graphs=16):
    """v: (B, Nv, Dv), q: (B, Nq, Dq), atten: (B, Nv, Nq) -> (B, 1, mid)."""
    B, Nv, Dv = v.shape
    _, Nq, Dq = q.shape
    mid = params["wv"].shape[1]

    bg = block_graphs
    # Pad batch to a multiple of bg (cropped after the kernel) so bg can be
    # chosen for MXU fill rather than as a divisor of B.
    B_pad = ((B + bg - 1) // bg) * bg
    pad = B_pad - B
    if pad:
        v = jnp.pad(v, ((0, pad), (0, 0), (0, 0)))
        q = jnp.pad(q, ((0, pad), (0, 0), (0, 0)))
        atten = jnp.pad(atten, ((0, pad), (0, 0), (0, 0)))

    # Stream the dominant activation bytes (v, q) in bf16, pre-flattened so
    # the DMA delivers matmul-ready 2D slabs. atten stays f32: its bytes are
    # negligible and it feeds the f32 VPU path directly.
    v_flat = v.astype(jnp.bfloat16).reshape(B_pad * Nv, Dv)
    q_flat = q.astype(jnp.bfloat16).reshape(B_pad * Nq, Dq)
    atten_f = atten.astype(jnp.float32)

    grid = (B_pad // bg,)
    const2 = lambda b: (0, 0)     # weights/biases: same block every step -> resident
    row2 = lambda b: (b, 0)       # per-graph-block 2D slabs
    blk3 = lambda b: (b, 0, 0)    # per-graph-block atten

    out2 = pl.pallas_call(
        _apply_single_attention_kernel,
        out_shape=jax.ShapeDtypeStruct((B_pad, mid), jnp.float32),
        grid_spec=pltpu.PrefetchScalarGridSpec(
            num_scalar_prefetch=0,
            grid=grid,
            in_specs=[
                pl.BlockSpec((bg * Nv, Dv), row2),   # v  (bf16, row-stacked)
                pl.BlockSpec((bg * Nq, Dq), row2),   # q  (bf16, row-stacked)
                pl.BlockSpec((bg, Nv, Nq), blk3),    # atten (f32)
                pl.BlockSpec((Dv, mid), const2),     # wv (bf16, resident)
                pl.BlockSpec((1, mid), const2),      # bv (f32)
                pl.BlockSpec((Dq, mid), const2),     # wq (bf16, resident)
                pl.BlockSpec((1, mid), const2),      # bq (f32)
                pl.BlockSpec((mid, mid), const2),    # wa (bf16, resident)
                pl.BlockSpec((1, mid), const2),      # ba (f32)
            ],
            # Lane-dense output slab: (bg, mid) with bg>=8 sublanes, 256 lanes.
            out_specs=pl.BlockSpec((bg, mid), row2),
        ),
        compiler_params=pltpu.CompilerParams(
            dimension_semantics=("parallel",)),
    )(v_flat, q_flat, atten_f,
      params["wv"], params["bv"], params["wq"], params["bq"],
      params["wa"], params["ba"])

    # Crop padded graphs and restore the PyTorch (B, 1, mid) output shape.
    return out2[:B, None, :]


# ---------------------------------------------------------------------------
# Plain-JAX reference (same math, same bf16 rounding points) for a sanity check
# ---------------------------------------------------------------------------
def reference(v, q, atten, params):
    vb = v.astype(jnp.bfloat16)
    qb = q.astype(jnp.bfloat16)
    vh = jax.nn.relu(
        jnp.einsum('bnd,dm->bnm', vb, params["wv"],
                   preferred_element_type=jnp.float32) + params["bv"])
    qh = jax.nn.relu(
        jnp.einsum('bnd,dm->bnm', qb, params["wq"],
                   preferred_element_type=jnp.float32) + params["bq"])
    # h[b,m] = sum_v sum_q vh[b,v,m] * atten[b,v,q] * qh[b,q,m]
    aq = jnp.einsum('bvq,bqm->bvm', atten.astype(jnp.float32), qh)
    h = jnp.sum(vh * aq, axis=1)
    out = jnp.einsum('bm,mk->bk', h.astype(jnp.bfloat16), params["wa"],
                     preferred_element_type=jnp.float32) + params["ba"]
    return out[:, None, :]


def init_params(key, dv, dq, mid, weight_dtype=jnp.bfloat16):
    ks = jax.random.split(key, 6)

    def lin(k, fan_in, shape):
        bound = 1.0 / (fan_in ** 0.5)
        return jax.random.uniform(k, shape, jnp.float32, -bound, bound)

    return {
        "wv": lin(ks[0], dv, (dv, mid)).astype(weight_dtype),    # lin_v
        "bv": lin(ks[1], dv, (1, mid)),
        "wq": lin(ks[2], dq, (dq, mid)).astype(weight_dtype),    # lin_q
        "bq": lin(ks[3], dq, (1, mid)),
        "wa": lin(ks[4], mid, (mid, mid)).astype(weight_dtype),  # lin_atten
        "ba": lin(ks[5], mid, (1, mid)),
    }


if __name__ == "__main__":
    root = jax.random.PRNGKey(0)
    kp, kv, kq, ka = jax.random.split(root, 4)

    # Small shapes consistent with the module: v = (B, num_obj, v_features),
    # q = (B, que_len, q_features), atten = (B, v_num, q_num).
    # B=20 is deliberately NOT a multiple of block_graphs=16 to exercise the
    # padding path; padded batch 32 -> grid (2,), bg*Nv = 256 MXU rows.
    B, Nv, Nq = 20, 16, 8
    Dv, Dq, MID = 384, 256, 256

    params = init_params(kp, Dv, Dq, MID)
    v = jax.random.normal(kv, (B, Nv, Dv), jnp.float32)
    q = jax.random.normal(kq, (B, Nq, Dq), jnp.float32)
    atten = jax.random.uniform(ka, (B, Nv, Nq), jnp.float32)

    fwd = jax.jit(functools.partial(apply_single_attention, block_graphs=16))
    out = jax.block_until_ready(fwd(v, q, atten, params))

    ref = reference(v, q, atten, params)
    assert out.shape == (B, 1, MID)
    assert bool(jnp.isfinite(out).all())
    assert bool(jnp.allclose(out, ref, atol=5e-3, rtol=5e-3)), \
        float(jnp.max(jnp.abs(out - ref)))
    print("KERNEL_OK")
</pallas_src>

<mosaic_0001>
module attributes {stable_mosaic.version = 11 : i64} {
  func.func @_apply_single_attention_kernel(%arg0: i32, %arg1: memref<256x384xbf16, #tpu.memory_space<vmem>>, %arg2: memref<128x256xbf16, #tpu.memory_space<vmem>>, %arg3: memref<16x16x8xf32, #tpu.memory_space<vmem>>, %arg4: memref<384x256xbf16, #tpu.memory_space<vmem>>, %arg5: memref<1x256xf32, #tpu.memory_space<vmem>>, %arg6: memref<256x256xbf16, #tpu.memory_space<vmem>>, %arg7: memref<1x256xf32, #tpu.memory_space<vmem>>, %arg8: memref<256x256xbf16, #tpu.memory_space<vmem>>, %arg9: memref<1x256xf32, #tpu.memory_space<vmem>>, %arg10: memref<16x256xf32, #tpu.memory_space<vmem>>) attributes {dimension_semantics = [#tpu.dimension_semantics<parallel>], iteration_bounds = array<i64: 2>, scalar_prefetch = 0 : i64, scratch_operands = 0 : i64, tpu.core_type = #tpu.core_type<tc>, window_params = [{transform_indices = @transform_0, window_bounds = array<i64: 256, 384>}, {transform_indices = @transform_1, window_bounds = array<i64: 128, 256>}, {transform_indices = @transform_2, window_bounds = array<i64: 16, 16, 8>}, {pipeline_mode = #tpu.pipeline_mode<synchronous>, transform_indices = @transform_3, window_bounds = array<i64: 384, 256>}, {pipeline_mode = #tpu.pipeline_mode<synchronous>, transform_indices = @transform_4, window_bounds = array<i64: 1, 256>}, {pipeline_mode = #tpu.pipeline_mode<synchronous>, transform_indices = @transform_5, window_bounds = array<i64: 256, 256>}, {pipeline_mode = #tpu.pipeline_mode<synchronous>, transform_indices = @transform_6, window_bounds = array<i64: 1, 256>}, {pipeline_mode = #tpu.pipeline_mode<synchronous>, transform_indices = @transform_7, window_bounds = array<i64: 256, 256>}, {pipeline_mode = #tpu.pipeline_mode<synchronous>, transform_indices = @transform_8, window_bounds = array<i64: 1, 256>}, {transform_indices = @transform_9, window_bounds = array<i64: 16, 256>}]} {
    %c0 = arith.constant 0 : index
    %c0_0 = arith.constant 0 : index
    %0 = vector.load %arg1[%c0, %c0_0] : memref<256x384xbf16, #tpu.memory_space<vmem>>, vector<256x384xbf16>
    %c0_1 = arith.constant 0 : index
    %c0_2 = arith.constant 0 : index
    %1 = vector.load %arg4[%c0_1, %c0_2] : memref<384x256xbf16, #tpu.memory_space<vmem>>, vector<384x256xbf16>
    %cst = arith.constant dense<0.000000e+00> : vector<256x256xf32>
    %2 = tpu.matmul %0, %1, %cst {dimension_numbers = #tpu.dot_dimension_numbers<[1], [0], [0], [1], [0, 0, 1, 1], [], []>} : vector<256x384xbf16>, vector<384x256xbf16>, vector<256x256xf32> -> vector<256x256xf32>
    %c0_3 = arith.constant 0 : index
    %c0_4 = arith.constant 0 : index
    %3 = vector.load %arg5[%c0_3, %c0_4] : memref<1x256xf32, #tpu.memory_space<vmem>>, vector<1x256xf32>
    %4 = vector.broadcast %3 : vector<1x256xf32> to vector<256x256xf32>
    %5 = arith.addf %2, %4 : vector<256x256xf32>
    %cst_5 = arith.constant 0.000000e+00 : f32
    %6 = vector.broadcast %cst_5 : f32 to vector<256x256xf32>
    %7 = arith.maximumf %5, %6 : vector<256x256xf32>
    %c0_6 = arith.constant 0 : index
    %c0_7 = arith.constant 0 : index
    %8 = vector.load %arg2[%c0_6, %c0_7] : memref<128x256xbf16, #tpu.memory_space<vmem>>, vector<128x256xbf16>
    %c0_8 = arith.constant 0 : index
    %c0_9 = arith.constant 0 : index
    %9 = vector.load %arg6[%c0_8, %c0_9] : memref<256x256xbf16, #tpu.memory_space<vmem>>, vector<256x256xbf16>
    %cst_10 = arith.constant dense<0.000000e+00> : vector<128x256xf32>
    %10 = tpu.matmul %8, %9, %cst_10 {dimension_numbers = #tpu.dot_dimension_numbers<[1], [0], [0], [1], [0, 0, 1, 1], [], []>} : vector<128x256xbf16>, vector<256x256xbf16>, vector<128x256xf32> -> vector<128x256xf32>
    %c0_11 = arith.constant 0 : index
    %c0_12 = arith.constant 0 : index
    %11 = vector.load %arg7[%c0_11, %c0_12] : memref<1x256xf32, #tpu.memory_space<vmem>>, vector<1x256xf32>
    %12 = vector.broadcast %11 : vector<1x256xf32> to vector<128x256xf32>
    %13 = arith.addf %10, %12 : vector<128x256xf32>
    %cst_13 = arith.constant 0.000000e+00 : f32
    %14 = vector.broadcast %cst_13 : f32 to vector<128x256xf32>
    %15 = arith.maximumf %13, %14 : vector<128x256xf32>
    %16 = vector.shape_cast %7 : vector<256x256xf32> to vector<16x16x256xf32>
    %17 = vector.shape_cast %15 : vector<128x256xf32> to vector<16x8x256xf32>
    %c0_14 = arith.constant 0 : index
    %c0_15 = arith.constant 0 : index
    %c0_16 = arith.constant 0 : index
    %18 = vector.load %arg3[%c0_14, %c0_15, %c0_16] : memref<16x16x8xf32, #tpu.memory_space<vmem>>, vector<16x16x8xf32>
    %cst_17 = arith.constant 0.000000e+00 : f32
    %19 = vector.broadcast %cst_17 : f32 to vector<16x16x256xf32>
    %20 = vector.extract_strided_slice %18 {offsets = [0, 0, 0], sizes = [16, 16, 1], strides = [1, 1, 1]} : vector<16x16x8xf32> to vector<16x16x1xf32>
    %21 = vector.shape_cast %20 : vector<16x16x1xf32> to vector<16x16xf32>
    %22 = vector.shape_cast %21 : vector<16x16xf32> to vector<16x16x1xf32>
    %23 = vector.extract_strided_slice %17 {offsets = [0, 0, 0], sizes = [16, 1, 256], strides = [1, 1, 1]} : vector<16x8x256xf32> to vector<16x1x256xf32>
    %24 = vector.shape_cast %23 : vector<16x1x256xf32> to vector<16x256xf32>
    %25 = vector.shape_cast %24 : vector<16x256xf32> to vector<16x1x256xf32>
    %26 = vector.broadcast %22 : vector<16x16x1xf32> to vector<16x16x256xf32>
    %27 = vector.broadcast %25 : vector<16x1x256xf32> to vector<16x16x256xf32>
    %28 = arith.mulf %26, %27 : vector<16x16x256xf32>
    %29 = arith.addf %19, %28 : vector<16x16x256xf32>
    %30 = vector.extract_strided_slice %18 {offsets = [0, 0, 1], sizes = [16, 16, 1], strides = [1, 1, 1]} : vector<16x16x8xf32> to vector<16x16x1xf32>
    %31 = vector.shape_cast %30 : vector<16x16x1xf32> to vector<16x16xf32>
    %32 = vector.shape_cast %31 : vector<16x16xf32> to vector<16x16x1xf32>
    %33 = vector.extract_strided_slice %17 {offsets = [0, 1, 0], sizes = [16, 1, 256], strides = [1, 1, 1]} : vector<16x8x256xf32> to vector<16x1x256xf32>
    %34 = vector.shape_cast %33 : vector<16x1x256xf32> to vector<16x256xf32>
    %35 = vector.shape_cast %34 : vector<16x256xf32> to vector<16x1x256xf32>
    %36 = vector.broadcast %32 : vector<16x16x1xf32> to vector<16x16x256xf32>
    %37 = vector.broadcast %35 : vector<16x1x256xf32> to vector<16x16x256xf32>
    %38 = arith.mulf %36, %37 : vector<16x16x256xf32>
    %39 = arith.addf %29, %38 : vector<16x16x256xf32>
    %40 = vector.extract_strided_slice %18 {offsets = [0, 0, 2], sizes = [16, 16, 1], strides = [1, 1, 1]} : vector<16x16x8xf32> to vector<16x16x1xf32>
    %41 = vector.shape_cast %40 : vector<16x16x1xf32> to vector<16x16xf32>
    %42 = vector.shape_cast %41 : vector<16x16xf32> to vector<16x16x1xf32>
    %43 = vector.extract_strided_slice %17 {offsets = [0, 2, 0], sizes = [16, 1, 256], strides = [1, 1, 1]} : vector<16x8x256xf32> to vector<16x1x256xf32>
    %44 = vector.shape_cast %43 : vector<16x1x256xf32> to vector<16x256xf32>
    %45 = vector.shape_cast %44 : vector<16x256xf32> to vector<16x1x256xf32>
    %46 = vector.broadcast %42 : vector<16x16x1xf32> to vector<16x16x256xf32>
    %47 = vector.broadcast %45 : vector<16x1x256xf32> to vector<16x16x256xf32>
    %48 = arith.mulf %46, %47 : vector<16x16x256xf32>
    %49 = arith.addf %39, %48 : vector<16x16x256xf32>
    %50 = vector.extract_strided_slice %18 {offsets = [0, 0, 3], sizes = [16, 16, 1], strides = [1, 1, 1]} : vector<16x16x8xf32> to vector<16x16x1xf32>
    %51 = vector.shape_cast %50 : vector<16x16x1xf32> to vector<16x16xf32>
    %52 = vector.shape_cast %51 : vector<16x16xf32> to vector<16x16x1xf32>
    %53 = vector.extract_strided_slice %17 {offsets = [0, 3, 0], sizes = [16, 1, 256], strides = [1, 1, 1]} : vector<16x8x256xf32> to vector<16x1x256xf32>
    %54 = vector.shape_cast %53 : vector<16x1x256xf32> to vector<16x256xf32>
    %55 = vector.shape_cast %54 : vector<16x256xf32> to vector<16x1x256xf32>
    %56 = vector.broadcast %52 : vector<16x16x1xf32> to vector<16x16x256xf32>
    %57 = vector.broadcast %55 : vector<16x1x256xf32> to vector<16x16x256xf32>
    %58 = arith.mulf %56, %57 : vector<16x16x256xf32>
    %59 = arith.addf %49, %58 : vector<16x16x256xf32>
    %60 = vector.extract_strided_slice %18 {offsets = [0, 0, 4], sizes = [16, 16, 1], strides = [1, 1, 1]} : vector<16x16x8xf32> to vector<16x16x1xf32>
    %61 = vector.shape_cast %60 : vector<16x16x1xf32> to vector<16x16xf32>
    %62 = vector.shape_cast %61 : vector<16x16xf32> to vector<16x16x1xf32>
    %63 = vector.extract_strided_slice %17 {offsets = [0, 4, 0], sizes = [16, 1, 256], strides = [1, 1, 1]} : vector<16x8x256xf32> to vector<16x1x256xf32>
    %64 = vector.shape_cast %63 : vector<16x1x256xf32> to vector<16x256xf32>
    %65 = vector.shape_cast %64 : vector<16x256xf32> to vector<16x1x256xf32>
    %66 = vector.broadcast %62 : vector<16x16x1xf32> to vector<16x16x256xf32>
    %67 = vector.broadcast %65 : vector<16x1x256xf32> to vector<16x16x256xf32>
    %68 = arith.mulf %66, %67 : vector<16x16x256xf32>
    %69 = arith.addf %59, %68 : vector<16x16x256xf32>
    %70 = vector.extract_strided_slice %18 {offsets = [0, 0, 5], sizes = [16, 16, 1], strides = [1, 1, 1]} : vector<16x16x8xf32> to vector<16x16x1xf32>
    %71 = vector.shape_cast %70 : vector<16x16x1xf32> to vector<16x16xf32>
    %72 = vector.shape_cast %71 : vector<16x16xf32> to vector<16x16x1xf32>
    %73 = vector.extract_strided_slice %17 {offsets = [0, 5, 0], sizes = [16, 1, 256], strides = [1, 1, 1]} : vector<16x8x256xf32> to vector<16x1x256xf32>
    %74 = vector.shape_cast %73 : vector<16x1x256xf32> to vector<16x256xf32>
    %75 = vector.shape_cast %74 : vector<16x256xf32> to vector<16x1x256xf32>
    %76 = vector.broadcast %72 : vector<16x16x1xf32> to vector<16x16x256xf32>
    %77 = vector.broadcast %75 : vector<16x1x256xf32> to vector<16x16x256xf32>
    %78 = arith.mulf %76, %77 : vector<16x16x256xf32>
    %79 = arith.addf %69, %78 : vector<16x16x256xf32>
    %80 = vector.extract_strided_slice %18 {offsets = [0, 0, 6], sizes = [16, 16, 1], strides = [1, 1, 1]} : vector<16x16x8xf32> to vector<16x16x1xf32>
    %81 = vector.shape_cast %80 : vector<16x16x1xf32> to vector<16x16xf32>
    %82 = vector.shape_cast %81 : vector<16x16xf32> to vector<16x16x1xf32>
    %83 = vector.extract_strided_slice %17 {offsets = [0, 6, 0], sizes = [16, 1, 256], strides = [1, 1, 1]} : vector<16x8x256xf32> to vector<16x1x256xf32>
    %84 = vector.shape_cast %83 : vector<16x1x256xf32> to vector<16x256xf32>
    %85 = vector.shape_cast %84 : vector<16x256xf32> to vector<16x1x256xf32>
    %86 = vector.broadcast %82 : vector<16x16x1xf32> to vector<16x16x256xf32>
    %87 = vector.broadcast %85 : vector<16x1x256xf32> to vector<16x16x256xf32>
    %88 = arith.mulf %86, %87 : vector<16x16x256xf32>
    %89 = arith.addf %79, %88 : vector<16x16x256xf32>
    %90 = vector.extract_strided_slice %18 {offsets = [0, 0, 7], sizes = [16, 16, 1], strides = [1, 1, 1]} : vector<16x16x8xf32> to vector<16x16x1xf32>
    %91 = vector.shape_cast %90 : vector<16x16x1xf32> to vector<16x16xf32>
    %92 = vector.shape_cast %91 : vector<16x16xf32> to vector<16x16x1xf32>
    %93 = vector.extract_strided_slice %17 {offsets = [0, 7, 0], sizes = [16, 1, 256], strides = [1, 1, 1]} : vector<16x8x256xf32> to vector<16x1x256xf32>
    %94 = vector.shape_cast %93 : vector<16x1x256xf32> to vector<16x256xf32>
    %95 = vector.shape_cast %94 : vector<16x256xf32> to vector<16x1x256xf32>
    %96 = vector.broadcast %92 : vector<16x16x1xf32> to vector<16x16x256xf32>
    %97 = vector.broadcast %95 : vector<16x1x256xf32> to vector<16x16x256xf32>
    %98 = arith.mulf %96, %97 : vector<16x16x256xf32>
    %99 = arith.addf %89, %98 : vector<16x16x256xf32>
    %100 = arith.mulf %16, %99 : vector<16x16x256xf32>
    %cst_18 = arith.constant dense<0.000000e+00> : vector<16x256xf32>
    %101 = vector.multi_reduction <add>, %100, %cst_18 [1] : vector<16x16x256xf32> to vector<16x256xf32>
    %102 = arith.truncf %101 : vector<16x256xf32> to vector<16x256xbf16>
    %c0_19 = arith.constant 0 : index
    %c0_20 = arith.constant 0 : index
    %103 = vector.load %arg8[%c0_19, %c0_20] : memref<256x256xbf16, #tpu.memory_space<vmem>>, vector<256x256xbf16>
    %cst_21 = arith.constant dense<0.000000e+00> : vector<16x256xf32>
    %104 = tpu.matmul %102, %103, %cst_21 {dimension_numbers = #tpu.dot_dimension_numbers<[1], [0], [0], [1], [0, 0, 1, 1], [], []>} : vector<16x256xbf16>, vector<256x256xbf16>, vector<16x256xf32> -> vector<16x256xf32>
    %c0_22 = arith.constant 0 : index
    %c0_23 = arith.constant 0 : index
    %105 = vector.load %arg9[%c0_22, %c0_23] : memref<1x256xf32, #tpu.memory_space<vmem>>, vector<1x256xf32>
    %106 = vector.broadcast %105 : vector<1x256xf32> to vector<16x256xf32>
    %107 = arith.addf %104, %106 : vector<16x256xf32>
    %c0_24 = arith.constant 0 : index
    %c0_25 = arith.constant 0 : index
    %108 = vector.load %arg10[%c0_24, %c0_25] : memref<16x256xf32, #tpu.memory_space<vmem>>, vector<16x256xf32>
    tpu.vector_store %arg10[%c0_24, %c0_25], %107 {strides = array<i32>} : memref<16x256xf32, #tpu.memory_space<vmem>>, vector<16x256xf32>,
    return
  }
  func.func @transform_0(%arg0: i32) -> (i32, i32) {
    %c0_i32 = arith.constant 0 : i32
    %c0_i32_0 = arith.constant 0 : i32
    return %arg0, %c0_i32 : i32, i32
  }
  func.func @transform_1(%arg0: i32) -> (i32, i32) {
    %c0_i32 = arith.constant 0 : i32
    %c0_i32_0 = arith.constant 0 : i32
    return %arg0, %c0_i32 : i32, i32
  }
  func.func @transform_2(%arg0: i32) -> (i32, i32, i32) {
    %c0_i32 = arith.constant 0 : i32
    %c0_i32_0 = arith.constant 0 : i32
    %c0_i32_1 = arith.constant 0 : i32
    return %arg0, %c0_i32, %c0_i32_0 : i32, i32, i32
  }
  func.func @transform_3(%arg0: i32) -> (i32, i32) {
    %c0_i32 = arith.constant 0 : i32
    %c0_i32_0 = arith.constant 0 : i32
    %c0_i32_1 = arith.constant 0 : i32
    return %c0_i32, %c0_i32_0 : i32, i32
  }
  func.func @transform_4(%arg0: i32) -> (i32, i32) {
    %c0_i32 = arith.constant 0 : i32
    %c0_i32_0 = arith.constant 0 : i32
    %c0_i32_1 = arith.constant 0 : i32
    return %c0_i32, %c0_i32_0 : i32, i32
  }
  func.func @transform_5(%arg0: i32) -> (i32, i32) {
    %c0_i32 = arith.constant 0 : i32
    %c0_i32_0 = arith.constant 0 : i32
    %c0_i32_1 = arith.constant 0 : i32
    return %c0_i32, %c0_i32_0 : i32, i32
  }
  func.func @transform_6(%arg0: i32) -> (i32, i32) {
    %c0_i32 = arith.constant 0 : i32
    %c0_i32_0 = arith.constant 0 : i32
    %c0_i32_1 = arith.constant 0 : i32
    return %c0_i32, %c0_i32_0 : i32, i32
  }
  func.func @transform_7(%arg0: i32) -> (i32, i32) {
    %c0_i32 = arith.constant 0 : i32
    %c0_i32_0 = arith.constant 0 : i32
    %c0_i32_1 = arith.constant 0 : i32
    return %c0_i32, %c0_i32_0 : i32, i32
  }
  func.func @transform_8(%arg0: i32) -> (i32, i32) {
    %c0_i32 = arith.constant 0 : i32
    %c0_i32_0 = arith.constant 0 : i32
    %c0_i32_1 = arith.constant 0 : i32
    return %c0_i32, %c0_i32_0 : i32, i32
  }
  func.func @transform_9(%arg0: i32) -> (i32, i32) {
    %c0_i32 = arith.constant 0 : i32
    %c0_i32_0 = arith.constant 0 : i32
    return %arg0, %c0_i32 : i32, i32
  }
}

</mosaic_0001>

<bundles_post_ra>
// kernel: apply_single_attention.1
= control target key start
LH: loop header
LB: loop body
LE: loop exit
PB: predicated region body
PF: predicated region fallthrough
CT: control target
= control target key end

     0   :  { %s6432_s30 = smov 0   ;;  %s11363_s0 = inlined_call_operand.vmem [shape: bf16[512,384], index: 0, kind: input, shape index: {}]   ;;  %s11364_s1 = inlined_call_operand.vmem [shape: bf16[256,256], index: 1, kind: input, shape index: {}]   ;;  %s11365_s2 = inlined_call_operand.vmem [shape: f32[32,16,8], index: 2, kind: input, shape index: {}]   ;;  %s11366_s3 = inlined_call_operand.vmem [shape: bf16[384,256], index: 3, kind: input, shape index: {}]   ;;  %s11367_s4 = inlined_call_operand.vmem [shape: f32[1,256], index: 4, kind: input, shape index: {}]   ;;  %s11368_s5 = inlined_call_operand.vmem [shape: bf16[256,256], index: 5, kind: input, shape index: {}]   ;;  %s11369_s6 = inlined_call_operand.vmem [shape: f32[1,256], index: 6, kind: input, shape index: {}]   ;;  %s11370_s7 = inlined_call_operand.vmem [shape: bf16[256,256], index: 7, kind: input, shape index: {}]   ;;  %s11371_s8 = inlined_call_operand.vmem [shape: f32[1,256], index: 8, kind: input, shape index: {}]   ;;  %s11372_s9 = inlined_call_operand.vmem [shape: f32[32,256], index: 9, kind: output, shape index: {}]  }
   0x1 LB: > { %s6438_s10 = sadd.s32 4294967295, %s6372_s30   ;;  %p5803_p0 = scmp.ge.s32.totalorder %s6372_s30, 1  ;;  %s6372_s30 = sphi %s6432_s30, %s19_s30  }
   0x2   : > { %p313_p1 = scmp.lt.s32.totalorder %s6372_s30, 3 }
   0x4   : > { %p314_p2 = pnand %p5803_p0, %p313_p1 }
   0x6   : > { %317 = sbr.rel (%p314_p2) target bundleno = 1088 (0x440), region = 56 }
   0xb   : > { %v6043_v0 = vld [vmem:[%s11366_s3 + $0x174] ss:$8 sps:$4 sm:$0xff]   ;;  %s5806_s13 = sshll.u32 %s6438_s10, 4  ;;  %v6045_v1 = vld [vmem:[%s11366_s3 + $0x170] ss:$8 sps:$4 sm:$0xff]   ;;  %v6374_v2 = vmov 0  }
   0xc   : > { %6014 = vset.pattern.permute.xlu1 %v6374_v2  ;;  %6013 = vset.pattern.permute.xlu0 %v6374_v2  ;;  %p371_p3 = scmp.lt.s32.totalorder %s5806_s13, 31  ;;  %s5804_s16 = sshll.u32 %s6438_s10, 5  ;;  %v6046_v3 = vld [vmem:[%s11366_s3 + $0x164] ss:$8 sps:$4 sm:$0xff]   ;;  %v6048_v4 = vld [vmem:[%s11366_s3 + $0x160] ss:$8 sps:$4 sm:$0xff]  }
   0xd   : > { %1205 = vmatprep.subr.bf16.mxu1 %v6043_v0  ;;  %1237 = vmatprep.mubr.bf16.mxu1 %v6374_v2  ;;  %p364_p4 = scmp.lt.s32.totalorder %s5804_s16, 63  ;;  %v6049_v5 = vld [vmem:[%s11366_s3 + $0x154] ss:$8 sps:$4 sm:$0xff]   ;;  %v6051_v8 = vld [vmem:[%s11366_s3 + $0x150] ss:$8 sps:$4 sm:$0xff]   ;;  %vm5471_vm0 = vcmask 1041409  }
   0xe   : > { %1206 = vmatpush1.bf16.msra.mxu1 %v6045_v1  ;;  %s12992_s13 = smov (!%p371_p3, %s5806_s13), 31  ;;  %v6052_v9 = vld [vmem:[%s11366_s3 + $0x144] ss:$8 sps:$4 sm:$0xff]   ;;  %v6054_v12 = vld [vmem:[%s11366_s3 + $0x140] ss:$8 sps:$4 sm:$0xff]   ;;  %vm5473_vm1 = vcmask 1042434  }
   0xf   : > { %1207 = vmatprep.subr.bf16.mxu1 %v6046_v3  ;;  %s12994_s16 = smov (!%p364_p4, %s5804_s16), 63  ;;  %s5994_s21 = sshll.u32 %s12992_s13, 4  ;;  %v6055_v14 = vld [vmem:[%s11366_s3 + $0x134] ss:$8 sps:$4 sm:$0xff]   ;;  %v6057_v16 = vld [vmem:[%s11366_s3 + $0x130] ss:$8 sps:$4 sm:$0xff]  }
  0x10   : > { %s6468_s26 = scalar_lea.vmem %s11365_s2, %s5994_s21  ;;  %s5996_s12 = smul.u32 12, %s12994_s16  ;;  %v6058_v19 = vld [vmem:[%s11366_s3 + $0x124] ss:$8 sps:$4 sm:$0xff]   ;;  %v6060_v20 = vld [vmem:[%s11366_s3 + $0x120] ss:$8 sps:$4 sm:$0xff]   ;;  %vm5475_vm2 = vcmask 1043459  }
  0x11   : > { %v6471_v6 = vld [vmem:[%s6468_s26 + $0x10] sm:$0xff]  ;;  %v6474_v7 = vld [vmem:[%s6468_s26] sm:$0xff]  ;;  %v6485_v10 = vld [vmem:[%s6468_s26 + $0x18] sm:$0xff]  ;;  %s5993_s11 = sshll.u32 %s12992_s13, 3  ;;  %vm5477_vm3 = vcmask 1044484   ;;  %vm5479_vm4 = vcmask 1045509  }
  0x12   : > { %1208 = vmatpush1.bf16.msra.mxu1 %v6048_v4  ;;  %1951 = vperm.xlu1 %6014, %v6471_v6   ;;  %v6488_v11 = vld [vmem:[%s6468_s26 + $0x8] sm:$0xff]  ;;  %v6502_v15 = vld [vmem:[%s6468_s26 + $0x20] sm:$0xff]  ;;  %s6507_s20 = scalar_lea.vmem %s11363_s0, %s5996_s12  ;;  %v6515_v17 = vld [vmem:[%s6468_s26 + $0x38] sm:$0xff]  ;;  %s6674_s16 = scalar_lea.vmem %s11364_s1, %s5993_s11  ;;  %vm5481_vm5 = vcmask 1046534   ;;  %vm5483_vm6 = vcmask 1047559  }
  0x13   : > { %1941 = vperm.xlu0 %6013, %v6474_v7   ;;  %1209 = vmatprep.subr.bf16.mxu1 %v6049_v5  ;;  %v6496_v13 = vld [vmem:[%s6468_s26 + $0x28] sm:$0xff]  ;;  %v6518_v18 = vld [vmem:[%s6468_s26 + $0x30] sm:$0xff]  ;;  %v6532_v22 = vld [vmem:[%s6468_s26 + $0x40] sm:$0xff]  ;;  %s5812_s12 = sshll.u32 %s6438_s10, 1 }
  0x14   : > { %v6529_v21 = vld [vmem:[%s6468_s26 + $0x48] sm:$0xff]  ;;  %v6061_v23 = vld [vmem:[%s11366_s3 + $0x114] ss:$8 sps:$4 sm:$0xff]   ;;  %v6063_v24 = vld [vmem:[%s11366_s3 + $0x110] ss:$8 sps:$4 sm:$0xff]   ;;  %p385_p5 = scmp.lt.s32.totalorder %s5812_s12, 3 }
  0x15   : > { %v6543_v25 = vld [vmem:[%s6468_s26 + $0x58] sm:$0xff]  ;;  %v6546_v26 = vld [vmem:[%s6468_s26 + $0x50] sm:$0xff]  ;;  %v6064_v27 = vld [vmem:[%s11366_s3 + $0x104] ss:$8 sps:$4 sm:$0xff]  }
  0x16   : > { %1210 = vmatpush1.bf16.msra.mxu1 %v6051_v8  ;;  %1956 = vperm.xlu1 %6014, %v6485_v10   ;;  %v6066_v28 = vld [vmem:[%s11366_s3 + $0x100] ss:$8 sps:$4 sm:$0xff]   ;;  %v6076_v32 = vld [vmem:[%s11368_s5 + $0x70] ss:$8 sps:$4 sm:$0xff]   ;;  %v6078_v33 = vld [vmem:[%s11368_s5 + $0x74] ss:$8 sps:$4 sm:$0xff]  }
  0x17   : > { %1946 = vperm.xlu0 %6013, %v6488_v11   ;;  %1211 = vmatprep.subr.bf16.mxu1 %v6052_v9  ;;  %v6557_v29 = vld [vmem:[%s6468_s26 + $0x68] sm:$0xff]  ;;  %v6560_v30 = vld [vmem:[%s6468_s26 + $0x60] sm:$0xff]  ;;  %v6572_v34 = vld [vmem:[%s6468_s26 + $0x78] sm:$0xff]  ;;  %s12996_s12 = smov (!%p385_p5, %s5812_s12), 3 }
  0x18   : > { %v6067_v31 = vld [vmem:[%s6507_s20 + $0x8] ss:$12 sps:$4 sm:$0xff]   ;;  %v6081_v36 = vld [vmem:[%s11368_s5 + $0x64] ss:$8 sps:$4 sm:$0xff]   ;;  %v6597_v42 = vld [vmem:[%s6468_s26 + $0x98] sm:$0xff]  ;;  %s5995_s17 = sshll.u32 %s12996_s12, 4 }
  0x19   : > { %v6575_v35 = vld [vmem:[%s6468_s26 + $0x70] sm:$0xff]  ;;  %v6079_v37 = vld [vmem:[%s11368_s5 + $0x60] ss:$8 sps:$4 sm:$0xff]   ;;  %v6088_v45 = vld [vmem:[%s11368_s5 + $0x44] ss:$8 sps:$4 sm:$0xff]   ;;  %s389_s19 = scalar_lea.vmem %s11372_s9, %s5995_s17 }
  0x1a   : > { %1212 = vmatpush1.bf16.msra.mxu1 %v6054_v12  ;;  %1966 = vperm.xlu1 %6014, %v6496_v13   ;;  %v6587_v38 = vld [vmem:[%s6468_s26 + $0x88] sm:$0xff]  ;;  %v6590_v39 = vld [vmem:[%s6468_s26 + $0x80] sm:$0xff]  ;;  %v6085_v40 = vld [vmem:[%s11368_s5 + $0x54] ss:$8 sps:$4 sm:$0xff]  }
  0x1b   : > { %1961 = vperm.xlu0 %6013, %v6502_v15   ;;  %1213 = vmatprep.subr.bf16.mxu1 %v6055_v14  ;;  %v6068_v41 = vld [vmem:[%s6507_s20 + $0x20] ss:$12 sps:$4 sm:$0xff]   ;;  %v6083_v43 = vld [vmem:[%s11368_s5 + $0x50] ss:$8 sps:$4 sm:$0xff]   ;;  %v6092_v49 = vld [vmem:[%s11368_s5 + $0x34] ss:$8 sps:$4 sm:$0xff]  }
  0x1c   : > { %v6605_v44 = vld [vmem:[%s6468_s26 + $0x90] sm:$0xff]  ;;  %v6611_v46 = vld [vmem:[%s6468_s26 + $0xa8] sm:$0xff]  ;;  %v6620_v48 = vld [vmem:[%s6468_s26 + $0xa0] sm:$0xff] }
  0x1d   : > { %v6086_v47 = vld [vmem:[%s11368_s5 + $0x40] ss:$8 sps:$4 sm:$0xff]   ;;  %v6069_v50 = vld [vmem:[%s6507_s20 + $0x38] ss:$12 sps:$4 sm:$0xff]   ;;  %v6635_v53 = vld [vmem:[%s6468_s26 + $0xb0] sm:$0xff] }
  0x1e   : > { %1214 = vmatpush1.bf16.msra.mxu1 %v6057_v16  ;;  %1976 = vperm.xlu1 %6014, %v6515_v17   ;;  %v6090_v51 = vld [vmem:[%s11368_s5 + $0x30] ss:$8 sps:$4 sm:$0xff]   ;;  %v6095_v54 = vld [vmem:[%s11368_s5 + $0x24] ss:$8 sps:$4 sm:$0xff]   ;;  %v6093_v55 = vld [vmem:[%s11368_s5 + $0x20] ss:$8 sps:$4 sm:$0xff]  }
  0x1f   : > { %1971 = vperm.xlu0 %6013, %v6518_v18   ;;  %1215 = vmatprep.subr.bf16.mxu1 %v6058_v19  ;;  %v6632_v52 = vld [vmem:[%s6468_s26 + $0xb8] sm:$0xff]  ;;  %v6647_v56 = vld [vmem:[%s6468_s26 + $0xc8] sm:$0xff]  ;;  %v6650_v57 = vld [vmem:[%s6468_s26 + $0xc0] sm:$0xff] }
  0x20   : > { %v6099_v58 = vld [vmem:[%s11368_s5 + $0x14] ss:$8 sps:$4 sm:$0xff]   ;;  %v6097_v61 = vld [vmem:[%s11368_s5 + $0x10] ss:$8 sps:$4 sm:$0xff]   ;;  %v6102_v63 = vld [vmem:[%s11368_s5 + $0x4] ss:$8 sps:$4 sm:$0xff]  }
  0x21   : > { %v6070_v59 = vld [vmem:[%s6507_s20 + $0x50] ss:$12 sps:$4 sm:$0xff]   ;;  %v6677_v0 = vld [vmem:[%s6468_s26 + $0xe8] sm:$0xff]  ;;  %v6686_v3 = vld [vmem:[%s6468_s26 + $0xe0] sm:$0xff] }
  0x22   : > { %1216 = vmatpush1.bf16.msra.mxu1 %v6060_v20  ;;  %1986 = vperm.xlu1 %6014, %v6529_v21   ;;  %v6658_v60 = vld [vmem:[%s6468_s26 + $0xd8] sm:$0xff]  ;;  %v6666_v62 = vld [vmem:[%s6468_s26 + $0xd0] sm:$0xff]  ;;  %v6100_v1 = vld [vmem:[%s11368_s5] ss:$8 sps:$4 sm:$0xff]  }
  0x23   : > { %1981 = vperm.xlu0 %6013, %v6532_v22   ;;  %1217 = vmatprep.subr.bf16.mxu1 %v6061_v23  ;;  %v6106_v4 = vld [vmem:[%s11368_s5 + $0xf4] ss:$8 sps:$4 sm:$0xff]   ;;  %v6104_v9 = vld [vmem:[%s11368_s5 + $0xf0] ss:$8 sps:$4 sm:$0xff]   ;;  %v6107_v14 = vld [vmem:[%s11368_s5 + $0xe0] ss:$8 sps:$4 sm:$0xff]  }
  0x24   : > { %v6071_v5 = vld [vmem:[%s6507_s20 + $0x68] ss:$12 sps:$4 sm:$0xff]   ;;  %v6693_v8 = vld [vmem:[%s6468_s26 + $0xf8] sm:$0xff]  ;;  %v6109_v16 = vld [vmem:[%s11368_s5 + $0xe4] ss:$8 sps:$4 sm:$0xff]  }
  0x25   : > { %v6701_v12 = vld [vmem:[%s6468_s26 + $0xf0] sm:$0xff]  ;;  %v6072_v19 = vld [vmem:[%s6507_s20 + $0x80] ss:$12 sps:$4 sm:$0xff]  }
  0x26   : > { %1218 = vmatpush1.bf16.msra.mxu1 %v6063_v24  ;;  %1996 = vperm.xlu1 %6014, %v6543_v25   ;;  %v6113_v20 = vld [vmem:[%s11368_s5 + $0xd4] ss:$8 sps:$4 sm:$0xff]   ;;  %v6111_v23 = vld [vmem:[%s11368_s5 + $0xd0] ss:$8 sps:$4 sm:$0xff]   ;;  %v6375_v24 = vmov 1  }
  0x27   : > { %1991 = vperm.xlu0 %6013, %v6546_v26   ;;  %1219 = vmatprep.subr.bf16.mxu1 %v6064_v27  ;;  %v6116_v27 = vld [vmem:[%s11368_s5 + $0xc4] ss:$8 sps:$4 sm:$0xff]  }
  0x2a   : > { %1220 = vmatpush1.bf16.msra.mxu1 %v6066_v28  ;;  %2006 = vperm.xlu1 %6014, %v6557_v29   ;;  %v6114_v28 = vld [vmem:[%s11368_s5 + $0xc0] ss:$8 sps:$4 sm:$0xff]  }
  0x2b   : > { %2001 = vperm.xlu0 %6013, %v6560_v30   ;;  %1762 = vmatprep.subr.bf16.mxu1 %v6078_v33  ;;  %v6118_v33 = vld [vmem:[%s11368_s5 + $0xb0] ss:$8 sps:$4 sm:$0xff]  }
  0x2d   : > { %1238 = vmatmul.mubr.bf16.vlgmr.msra.gmra.mxu1 %v6067_v31  ;;  %v6120_v31 = vld [vmem:[%s11368_s5 + $0xb4] ss:$8 sps:$4 sm:$0xff]  }
  0x2e   : > { %1247 = vmatprep.mubr.bf16.mxu1 %v6374_v2  ;;  %1763 = vmatpush1.bf16.msra.mxu1 %v6076_v32  ;;  %v6073_v32 = vld [vmem:[%s6507_s20 + $0x98] ss:$12 sps:$4 sm:$0xff]  }
  0x2f   : > { %2016 = vperm.xlu1 %6014, %v6572_v34   ;;  %2011 = vperm.xlu0 %6013, %v6575_v35  }
  0x30   : > { %1764 = vmatprep.subr.bf16.mxu1 %v6081_v36  ;;  %v6123_v36 = vld [vmem:[%s11368_s5 + $0xa4] ss:$8 sps:$4 sm:$0xff]  }
  0x32   : > { %1765 = vmatpush1.bf16.msra.mxu1 %v6079_v37  ;;  %v6121_v37 = vld [vmem:[%s11368_s5 + $0xa0] ss:$8 sps:$4 sm:$0xff]  }
  0x33   : > { %2026 = vperm.xlu1 %6014, %v6587_v38   ;;  %2021 = vperm.xlu0 %6013, %v6590_v39  }
  0x34   : > { %1766 = vmatprep.subr.bf16.mxu1 %v6085_v40  ;;  %v6127_v40 = vld [vmem:[%s11368_s5 + $0x94] ss:$8 sps:$4 sm:$0xff]  }
  0x35   : > { %1248 = vmatmul.mubr.bf16.gmra.mxu1 %v6068_v41  ;;  %v6074_v41 = vld [vmem:[%s6507_s20 + $0xb0] ss:$12 sps:$4 sm:$0xff]  }
  0x36   : > { %1257 = vmatprep.mubr.bf16.mxu1 %v6374_v2  ;;  %1767 = vmatpush1.bf16.msra.mxu1 %v6083_v43  ;;  %v6125_v43 = vld [vmem:[%s11368_s5 + $0x90] ss:$8 sps:$4 sm:$0xff]  }
  0x37   : > { %2036 = vperm.xlu1 %6014, %v6597_v42   ;;  %2031 = vperm.xlu0 %6013, %v6605_v44  }
  0x38   : > { %1768 = vmatprep.subr.bf16.mxu1 %v6088_v45  ;;  %v6130_v45 = vld [vmem:[%s11368_s5 + $0x84] ss:$8 sps:$4 sm:$0xff]  }
  0x3a   : > { %1769 = vmatpush1.bf16.msra.mxu1 %v6086_v47  ;;  %v6128_v47 = vld [vmem:[%s11368_s5 + $0x80] ss:$8 sps:$4 sm:$0xff]  }
  0x3b   : > { %2046 = vperm.xlu1 %6014, %v6611_v46   ;;  %2041 = vperm.xlu0 %6013, %v6620_v48  }
  0x3c   : > { %1770 = vmatprep.subr.bf16.mxu1 %v6092_v49  ;;  %v6075_v49 = vld [vmem:[%s6507_s20 + $0xc8] ss:$12 sps:$4 sm:$0xff]  }
  0x3d   : > { %1258 = vmatmul.mubr.bf16.gmra.mxu1 %v6069_v50  ;;  %v6155_v50 = vld [vmem:[%s11366_s3 + $0x74] ss:$8 sps:$4 sm:$0xff]  }
  0x3e   : > { %1267 = vmatprep.mubr.bf16.mxu1 %v6374_v2  ;;  %1771 = vmatpush1.bf16.msra.mxu1 %v6090_v51  ;;  %v6157_v51 = vld [vmem:[%s11366_s3 + $0x70] ss:$8 sps:$4 sm:$0xff]  }
  0x3f   : > { %2056 = vperm.xlu1 %6014, %v6632_v52   ;;  %2051 = vperm.xlu0 %6013, %v6635_v53  }
  0x40   : > { %1772 = vmatprep.subr.bf16.mxu1 %v6095_v54  ;;  %1012 = vmatprep.subr.bf16.mxu0 %v6155_v50  ;;  %v6158_v54 = vld [vmem:[%s11366_s3 + $0x64] ss:$8 sps:$4 sm:$0xff]   ;;  %v6376_v50 = vmov 2  }
  0x41   : > { %1013 = vmatpush1.bf16.msra.mxu0 %v6157_v51  ;;  %v6188_v51 = vld [vmem:[%s11366_s3 + $0xc4] ss:$8 sps:$4 sm:$0xff]  }
  0x42   : > { %1773 = vmatpush1.bf16.msra.mxu1 %v6093_v55  ;;  %v6160_v55 = vld [vmem:[%s11366_s3 + $0x60] ss:$8 sps:$4 sm:$0xff]   ;;  %1014 = vmatprep.subr.bf16.mxu0 %v6158_v54 }
  0x43   : > { %2066 = vperm.xlu1 %6014, %v6647_v56   ;;  %2061 = vperm.xlu0 %6013, %v6650_v57   ;;  %v6190_v54 = vld [vmem:[%s11366_s3 + $0xc0] ss:$8 sps:$4 sm:$0xff]  }
  0x44   : > { %1774 = vmatprep.subr.bf16.mxu1 %v6099_v58  ;;  %v6082_v58 = vld [vmem:[%s6507_s20 + $0xe0] ss:$12 sps:$4 sm:$0xff]  }
  0x45   : > { %1268 = vmatmul.mubr.bf16.gmra.mxu1 %v6070_v59  ;;  %1015 = vmatpush1.bf16.msra.mxu0 %v6160_v55  ;;  %v6161_v59 = vld [vmem:[%s11366_s3 + $0x54] ss:$8 sps:$4 sm:$0xff]  }
  0x46   : > { %1277 = vmatprep.mubr.bf16.mxu1 %v6374_v2  ;;  %1775 = vmatpush1.bf16.msra.mxu1 %v6097_v61  ;;  %v6163_v61 = vld [vmem:[%s11366_s3 + $0x50] ss:$8 sps:$4 sm:$0xff]  }
  0x47   : > { %2076 = vperm.xlu1 %6014, %v6658_v60   ;;  %2071 = vperm.xlu0 %6013, %v6666_v62  }
  0x48   : > { %1776 = vmatprep.subr.bf16.mxu1 %v6102_v63  ;;  %1016 = vmatprep.subr.bf16.mxu0 %v6161_v59  ;;  %v6164_v63 = vld [vmem:[%s11366_s3 + $0x44] ss:$8 sps:$4 sm:$0xff]   ;;  %v6191_v59 = vld [vmem:[%s11366_s3 + $0xb4] ss:$8 sps:$4 sm:$0xff]  }
  0x49   : > { %1017 = vmatpush1.bf16.msra.mxu0 %v6163_v61  ;;  %v6193_v61 = vld [vmem:[%s11366_s3 + $0xb0] ss:$8 sps:$4 sm:$0xff]  }
  0x4a   : > { %1777 = vmatpush1.bf16.msra.mxu1 %v6100_v1  ;;  %v6166_v1 = vld [vmem:[%s11366_s3 + $0x40] ss:$8 sps:$4 sm:$0xff]   ;;  %1018 = vmatprep.subr.bf16.mxu0 %v6164_v63  ;;  %v6117_v63 = vld [vmem:[%s6507_s20 + $0x158] ss:$12 sps:$4 sm:$0xff]  }
  0x4b   : > { %2086 = vperm.xlu1 %6014, %v6677_v0   ;;  %2081 = vperm.xlu0 %6013, %v6686_v3  }
  0x4c   : > { %1778 = vmatprep.subr.bf16.mxu1 %v6106_v4  ;;  %v6167_v4 = vld [vmem:[%s11366_s3 + $0x34] ss:$8 sps:$4 sm:$0xff]  }
  0x4d   : > { %1278 = vmatmul.mubr.bf16.gmra.mxu1 %v6071_v5  ;;  %1019 = vmatpush1.bf16.msra.mxu0 %v6166_v1  ;;  %v6169_v5 = vld [vmem:[%s11366_s3 + $0x30] ss:$8 sps:$4 sm:$0xff]   ;;  %v6194_v1 = vld [vmem:[%s11366_s3 + $0xa4] ss:$8 sps:$4 sm:$0xff]  }
  0x4e   : > { %1287 = vmatprep.mubr.bf16.mxu1 %v6374_v2  ;;  %1779 = vmatpush2.bf16.msra.mxu1 %v6104_v9  ;;  %v6089_v9 = vld [vmem:[%s6507_s20 + $0xf8] ss:$12 sps:$4 sm:$0xff]  }
  0x4f   : > { %2096 = vperm.xlu1 %6014, %v6693_v8   ;;  %2091 = vperm.xlu0 %6013, %v6701_v12  }
  0x50   : > { %1780 = vmatprep.subr.bf16.mxu1 %v6109_v16  ;;  %1020 = vmatprep.subr.bf16.mxu0 %v6167_v4  ;;  %v6172_v16 = vld [vmem:[%s11366_s3 + $0x20] ss:$8 sps:$4 sm:$0xff]  }
  0x51   : > { %1021 = vmatpush1.bf16.msra.mxu0 %v6169_v5  ;;  %v6196_v4 = vld [vmem:[%s11366_s3 + $0xa0] ss:$8 sps:$4 sm:$0xff]   ;;  %v6197_v5 = vld [vmem:[%s11366_s3 + $0x94] ss:$8 sps:$4 sm:$0xff]  }
  0x52   : > { %1781 = vmatpush2.bf16.msra.mxu1 %v6107_v14  ;;  %v6170_v14 = vld [vmem:[%s11366_s3 + $0x24] ss:$8 sps:$4 sm:$0xff]  }
  0x53   : > { %6016 = vset.pattern.permute.xlu1 %v6375_v24  ;;  %6015 = vset.pattern.permute.xlu0 %v6375_v24  ;;  %v6176_v24 = vld [vmem:[%s11366_s3 + $0x4] ss:$8 sps:$4 sm:$0xff]  }
  0x54   : > { %2360 = vperm.xlu1 %6016, %v6488_v11   ;;  %2356 = vperm.xlu0 %6015, %v6474_v7  }
  0x55   : > { %1288 = vmatmul.mubr.bf16.gmra.mxu1 %v6072_v19  ;;  %1782 = vmatprep.subr.bf16.mxu1 %v6113_v20  ;;  %v6173_v19 = vld [vmem:[%s11366_s3 + $0x14] ss:$8 sps:$4 sm:$0xff]   ;;  %v6175_v20 = vld [vmem:[%s11366_s3 + $0x10] ss:$8 sps:$4 sm:$0xff]  }
  0x56   : > { %1297 = vmatprep.mubr.bf16.mxu1 %v6374_v2  ;;  %1783 = vmatpush2.bf16.msra.mxu1 %v6111_v23  ;;  %v6096_v23 = vld [vmem:[%s6507_s20 + $0x110] ss:$12 sps:$4 sm:$0xff]  }
  0x57   : > { %1784 = vmatprep.subr.bf16.mxu1 %v6116_v27  ;;  %1022 = vmatprep.subr.bf16.mxu0 %v6170_v14  ;;  %v6178_v27 = vld [vmem:[%s11366_s3] ss:$8 sps:$4 sm:$0xff]   ;;  %v6133_v14 = vld [vmem:[%s6674_s16 + $0x4] ss:$8 sps:$4 sm:$0xff]  }
  0x58   : > { %2364 = vperm.xlu1 %6016, %v6471_v6   ;;  %2368 = vperm.xlu0 %6015, %v6485_v10  }
  0x59   : > { %1023 = vmatpush1.bf16.msra.mxu0 %v6172_v16  ;;  %v6200_v16 = vld [vmem:[%s11366_s3 + $0x84] ss:$8 sps:$4 sm:$0xff]  }
  0x5a   : > { %1785 = vmatpush2.bf16.msra.mxu1 %v6114_v28  ;;  %1024 = vmatprep.subr.bf16.mxu0 %v6173_v19  ;;  %v6179_v28 = vld [vmem:[%s11366_s3 + $0xf4] ss:$8 sps:$4 sm:$0xff]  }
  0x5b   : > { %1786 = vmatprep.subr.bf16.mxu1 %v6120_v31  ;;  %v6181_v31 = vld [vmem:[%s11366_s3 + $0xf0] ss:$8 sps:$4 sm:$0xff]  }
  0x5c   : > { %2372 = vperm.xlu1 %6016, %v6502_v15   ;;  %2376 = vperm.xlu0 %6015, %v6496_v13  }
  0x5d   : > { %1298 = vmatmul.mubr.bf16.gmra.mxu1 %v6073_v32  ;;  %1025 = vmatpush1.bf16.msra.mxu0 %v6175_v20  ;;  %v6103_v32 = vld [vmem:[%s6507_s20 + $0x128] ss:$12 sps:$4 sm:$0xff]   ;;  %v6203_v20 = vld [vmem:[%s6507_s20] ss:$12 sps:$4 sm:$0xff]  }
  0x5e   : > { %1307 = vmatprep.mubr.bf16.mxu1 %v6374_v2  ;;  %1787 = vmatpush2.bf16.msra.mxu1 %v6118_v33  ;;  %v6182_v33 = vld [vmem:[%s11366_s3 + $0xe4] ss:$8 sps:$4 sm:$0xff]  }
  0x5f   : > { %1788 = vmatprep.subr.bf16.mxu1 %v6123_v36  ;;  %1026 = vmatprep.subr.bf16.mxu0 %v6176_v24  ;;  %v6184_v36 = vld [vmem:[%s11366_s3 + $0xe0] ss:$8 sps:$4 sm:$0xff]  }
  0x60   : > { %2380 = vperm.xlu1 %6016, %v6518_v18   ;;  %2384 = vperm.xlu0 %6015, %v6515_v17   ;;  %v6131_v24 = vld [vmem:[%s6674_s16] ss:$8 sps:$4 sm:$0xff]  }
  0x61   : > { %1027 = vmatpush1.bf16.msra.mxu0 %v6178_v27  ;;  %v6134_v27 = vld [vmem:[%s6674_s16 + $0x14] ss:$8 sps:$4 sm:$0xff]  }
  0x62   : > { %1789 = vmatpush2.bf16.msra.mxu1 %v6121_v37  ;;  %1028 = vmatprep.subr.bf16.mxu0 %v6179_v28 }
  0x63   : > { %1790 = vmatprep.subr.bf16.mxu1 %v6127_v40 }
  0x64   : > { %2388 = vperm.xlu1 %6016, %v6532_v22   ;;  %2392 = vperm.xlu0 %6015, %v6529_v21  }
  0x65   : > { %1308 = vmatmul.mubr.bf16.gmra.mxu1 %v6074_v41  ;;  %1029 = vmatpush2.bf16.msra.mxu0 %v6181_v31  ;;  %v6185_v41 = vld [vmem:[%s11366_s3 + $0xd4] ss:$8 sps:$4 sm:$0xff]   ;;  %v6208_v31 = vld [vmem:[%s6507_s20 + $0x18] ss:$12 sps:$4 sm:$0xff]  }
  0x66   : > { %1317 = vmatprep.mubr.bf16.mxu1 %v6374_v2  ;;  %1791 = vmatpush2.bf16.msra.mxu1 %v6125_v43  ;;  %v6187_v43 = vld [vmem:[%s11366_s3 + $0xd0] ss:$8 sps:$4 sm:$0xff]  }
  0x67   : > { %1792 = vmatprep.subr.bf16.mxu1 %v6130_v45  ;;  %1030 = vmatprep.subr.bf16.mxu0 %v6182_v33 }
  0x68   : > { %2396 = vperm.xlu1 %6016, %v6546_v26   ;;  %2400 = vperm.xlu0 %6015, %v6543_v25  }
  0x69   : > { %1031 = vmatpush2.bf16.msra.mxu0 %v6184_v36 }
  0x6a   : > { %1793 = vmatpush2.bf16.msra.mxu1 %v6128_v47  ;;  %1032 = vmatprep.subr.bf16.mxu0 %v6185_v41  ;;  %v6211_v41 = vld [vmem:[%s6507_s20 + $0x30] ss:$12 sps:$4 sm:$0xff]  }
  0x6c   : > { %2404 = vperm.xlu1 %6016, %v6560_v30   ;;  %2408 = vperm.xlu0 %6015, %v6557_v29  }
  0x6d   : > { %1318 = vmatmul.mubr.bf16.gmra.mxu1 %v6075_v49  ;;  %v6110_v49 = vld [vmem:[%s6507_s20 + $0x140] ss:$12 sps:$4 sm:$0xff]   ;;  %1033 = vmatpush2.bf16.msra.mxu0 %v6187_v43 }
  0x6e   : > { %1327 = vmatprep.mubr.bf16.mxu1 %v6374_v2  ;;  %1034 = vmatprep.subr.bf16.mxu0 %v6188_v51  ;;  %v6214_v51 = vld [vmem:[%s6507_s20 + $0x48] ss:$12 sps:$4 sm:$0xff]  }
  0x70   : > { %2412 = vperm.xlu1 %6016, %v6575_v35   ;;  %2416 = vperm.xlu0 %6015, %v6572_v34  }
  0x71   : > { %1035 = vmatpush2.bf16.msra.mxu0 %v6190_v54 }
  0x72   : > { %1036 = vmatprep.subr.bf16.mxu0 %v6191_v59 }
  0x74   : > { %2420 = vperm.xlu1 %6016, %v6590_v39   ;;  %2424 = vperm.xlu0 %6015, %v6587_v38  }
  0x75   : > { %1328 = vmatmul.mubr.bf16.gmra.mxu1 %v6082_v58  ;;  %1037 = vmatpush2.bf16.msra.mxu0 %v6193_v61 }
  0x76   : > { %1337 = vmatprep.mubr.bf16.mxu1 %v6374_v2  ;;  %1038 = vmatprep.subr.bf16.mxu0 %v6194_v1 }
  0x78   : > { %2428 = vperm.xlu1 %6016, %v6605_v44   ;;  %2432 = vperm.xlu0 %6015, %v6597_v42  }
  0x79   : > { %1039 = vmatpush2.bf16.msra.mxu0 %v6196_v4 }
  0x7a   : > { %1040 = vmatprep.subr.bf16.mxu0 %v6197_v5 }
  0x7c   : > { %2436 = vperm.xlu1 %6016, %v6620_v48   ;;  %2440 = vperm.xlu0 %6015, %v6611_v46  }
  0x7d   : > { %1338 = vmatmul.mubr.bf16.gmra.mxu1 %v6089_v9 }
  0x7e   : > { %1347 = vmatprep.mubr.bf16.mxu1 %v6374_v2 }
  0x80   : > { %2444 = vperm.xlu1 %6016, %v6635_v53   ;;  %2448 = vperm.xlu0 %6015, %v6632_v52  }
  0x84   : > { %2452 = vperm.xlu1 %6016, %v6650_v57   ;;  %2456 = vperm.xlu0 %6015, %v6647_v56  }
  0x85   : > { %1348 = vmatmul.mubr.bf16.gmra.mxu1 %v6096_v23  ;;  %v6205_v23 = vld [vmem:[%s6507_s20 + $0x4] ss:$12 sps:$4 sm:$0xff]  }
  0x86   : > { %1357 = vmatprep.mubr.bf16.mxu1 %v6374_v2  ;;  %1044 = vmatprep.mubr.bf16.mxu0 %v6205_v23 }
  0x88   : > { %2460 = vperm.xlu1 %6016, %v6666_v62   ;;  %2464 = vperm.xlu0 %6015, %v6658_v60  }
  0x8c   : > { %2468 = vperm.xlu1 %6016, %v6686_v3   ;;  %2472 = vperm.xlu0 %6015, %v6677_v0  }
  0x8d   : > { %1358 = vmatmul.mubr.bf16.gmra.mxu1 %v6103_v32  ;;  %v6853_v37 = vpop.permute.xlu1 %1951 }
  0x8e   : > { %11742 = vst [vmem:[#allocation2_spill] sm:$0xff] %v6853_v37  ;;  %v6855_v40 = vpop.permute.xlu0 %1941  ;;  %1367 = vmatprep.mubr.bf16.mxu1 %v6374_v2 }
  0x90   : > { %2476 = vperm.xlu1 %6016, %v6701_v12   ;;  %2480 = vperm.xlu0 %6015, %v6693_v8  }
  0x91   : > { %v6866_v45 = vpop.permute.xlu1 %1956 }
  0x92   : > { %11743 = vst [vmem:[#allocation3_spill] sm:$0xff] %v6866_v45  ;;  %v6868_v47 = vpop.permute.xlu0 %1946 }
  0x94   : > { %6017 = vset.pattern.permute.xlu1 %v6376_v50  ;;  %6018 = vset.pattern.permute.xlu0 %v6376_v50 }
  0x95   : > { %2740 = vperm.xlu1 %6017, %v6474_v7   ;;  %2744 = vperm.xlu0 %6018, %v6488_v11   ;;  %v6879_v55 = vpop.permute.xlu1 %1966 }
  0x96   : > { %11744 = vst [vmem:[#allocation4_spill] sm:$0xff] %v6879_v55  ;;  %1368 = vmatmul.mubr.bf16.gmra.mxu1 %v6110_v49  ;;  %v6881_v58 = vpop.permute.xlu0 %1961  ;;  %v6245_v55 = vld [vmem:[%s6507_s20 + $0x154] ss:$12 sps:$4 sm:$0xff]  }
  0x97   : > { %1377 = vmatprep.mubr.bf16.mxu1 %v6374_v2 }
  0x99   : > { %2748 = vperm.xlu1 %6017, %v6471_v6   ;;  %2756 = vperm.xlu0 %6018, %v6502_v15   ;;  %v6892_v7 = vpop.permute.xlu1 %1976 }
  0x9a   : > { %11745 = vst [vmem:[#allocation5_spill] sm:$0xff] %v6892_v7  ;;  %v6894_v11 = vpop.permute.xlu0 %1971  ;;  %v6244_v7 = vld [vmem:[%s6507_s20 + $0x138] ss:$12 sps:$4 sm:$0xff]  }
  0x9d   : > { %2752 = vperm.xlu1 %6017, %v6485_v10   ;;  %2764 = vperm.xlu0 %6018, %v6518_v18   ;;  %v6905_v6 = vpop.permute.xlu1 %1986  ;;  %v6199_v10 = vld [vmem:[%s11366_s3 + $0x90] ss:$8 sps:$4 sm:$0xff]  }
  0x9e   : > { %11746 = vst [vmem:[#allocation6_spill] sm:$0xff] %v6905_v6  ;;  %1378 = vmatmul.mubr.bf16.gmra.mxu1 %v6117_v63  ;;  %v6907_v15 = vpop.permute.xlu0 %1981  ;;  %1041 = vmatpush2.bf16.msra.mxu0 %v6199_v10  ;;  %v6217_v63 = vld [vmem:[%s6507_s20 + $0x60] ss:$12 sps:$4 sm:$0xff]   ;;  %v6220_v10 = vld [vmem:[%s6507_s20 + $0x78] ss:$12 sps:$4 sm:$0xff]   ;;  %v7272_v6 = vld [vmem:[%s6468_s26 + $0xf0] sm:$0xff] }
  0x9f   : > { %11747 = vst [vmem:[#allocation7_spill] sm:$0xff] %v6907_v15  ;;  %1387 = vmatprep.mubr.bf16.mxu1 %v6374_v2  ;;  %v6124_v2 = vld [vmem:[%s6507_s20 + $0x170] ss:$12 sps:$4 sm:$0xff]   ;;  %1042 = vmatprep.subr.bf16.mxu0 %v6200_v16 }
  0xa1   : > { %2760 = vperm.xlu1 %6017, %v6496_v13   ;;  %2772 = vperm.xlu0 %6018, %v6532_v22   ;;  %v6918_v18 = vpop.permute.xlu1 %1996  ;;  %v6202_v13 = vld [vmem:[%s11366_s3 + $0x80] ss:$8 sps:$4 sm:$0xff]  }
  0xa2   : > { %11748 = vst [vmem:[#allocation8_spill] sm:$0xff] %v6918_v18  ;;  %v6920_v9 = vpop.permute.xlu0 %1991  ;;  %1043 = vmatpush2.bf16.msra.mxu0 %v6202_v13  ;;  %v6149_v13 = vld [vmem:[%s6674_s16 + $0x64] ss:$8 sps:$4 sm:$0xff]  }
  0xa3   : > { %11749 = vst [vmem:[#allocation9_spill] sm:$0xff] %v6920_v9 }
  0xa5   : > { %2768 = vperm.xlu1 %6017, %v6515_v17   ;;  %2780 = vperm.xlu0 %6018, %v6546_v26   ;;  %v6932_v22 = vpop.permute.xlu1 %2006 }
  0xa6   : > { %11750 = vst [vmem:[#allocation10_spill] sm:$0xff] %v6932_v22  ;;  %1388 = vmatmul.mubr.bf16.gmra.mxu1 %v6124_v2  ;;  %v6934_v19 = vpop.permute.xlu0 %2001  ;;  %1045 = vmatmul.mubr.bf16.vlgmr.msra.gmra.mxu0 %v6203_v20  ;;  %v6377_v2 = vmov 3   ;;  %v7212_v22 = vld [vmem:[%s6468_s26 + $0xb0] sm:$0xff] }
  0xa7   : > { %11751 = vst [vmem:[#allocation11_spill] sm:$0xff] %v6934_v19  ;;  %1794 = vmatprep.mubr.bf16.mxu1 %v6133_v14  ;;  %v7020_v14 = vld [vmem:[%s6468_s26] sm:$0xff] }
  0xa9   : > { %2776 = vperm.xlu1 %6017, %v6529_v21   ;;  %2788 = vperm.xlu0 %6018, %v6560_v30   ;;  %v6206_v30 = vld [vmem:[%s6507_s20 + $0x1c] ss:$12 sps:$4 sm:$0xff]  }
  0xaa   : > { %v6940_v17 = vpop.permute.xlu1 %2016  ;;  %v6943_v26 = vpop.permute.xlu0 %2011  ;;  %1054 = vmatprep.mubr.bf16.mxu0 %v6206_v30  ;;  %v7041_v30 = vld [vmem:[%s6468_s26 + $0x8] sm:$0xff] }
  0xab   : > { %11752 = vst [vmem:[#allocation12_spill] sm:$0xff] %v6940_v17  ;;  %11753 = vst [vmem:[#allocation13_spill] sm:$0xff] %v6943_v26  ;;  %v7178_v17 = vld [vmem:[%s6468_s26 + $0x90] sm:$0xff] }
  0xad   : > { %2784 = vperm.xlu1 %6017, %v6543_v25   ;;  %2796 = vperm.xlu0 %6018, %v6575_v35   ;;  %v6136_v25 = vld [vmem:[%s6674_s16 + $0x10] ss:$8 sps:$4 sm:$0xff]   ;;  %v6137_v35 = vld [vmem:[%s6674_s16 + $0x24] ss:$8 sps:$4 sm:$0xff]  }
  0xae   : > { %v6948_v28 = vpop.permute.xlu1 %2026  ;;  %1795 = vmatmul.mubr.bf16.vlgmr.msra.gmra.mxu1 %v6131_v24  ;;  %v6950_v21 = vpop.permute.xlu0 %2021  ;;  %1055 = vmatmul.mubr.bf16.gmra.mxu0 %v6208_v31  ;;  %v6221_v24 = vld [vmem:[%s6507_s20 + $0x94] ss:$12 sps:$4 sm:$0xff]   ;;  %v7045_v31 = vld [vmem:[%s6468_s26 + $0x28] sm:$0xff] }
  0xaf   : > { %11754 = vst [vmem:[#allocation14_spill] sm:$0xff] %v6948_v28  ;;  %11755 = vst [vmem:[#allocation15_spill] sm:$0xff] %v6950_v21  ;;  %1804 = vmatprep.mubr.bf16.mxu1 %v6134_v27  ;;  %v6223_v27 = vld [vmem:[%s6507_s20 + $0x90] ss:$12 sps:$4 sm:$0xff]   ;;  %v6241_v21 = vld [vmem:[%s6507_s20 + $0x120] ss:$12 sps:$4 sm:$0xff]  }
  0xb0   : > { %11774 = vst [vmem:[#allocation34_spill] sm:$0xff] %v7045_v31 }
  0xb1   : > { %2792 = vperm.xlu1 %6017, %v6557_v29   ;;  %2804 = vperm.xlu0 %6018, %v6590_v39   ;;  %v6209_v39 = vld [vmem:[%s6507_s20 + $0x34] ss:$12 sps:$4 sm:$0xff]  }
  0xb2   : > { %v6956_v32 = vpop.permute.xlu1 %2036  ;;  %v6958_v33 = vpop.permute.xlu0 %2031  ;;  %1064 = vmatprep.mubr.bf16.mxu0 %v6209_v39  ;;  %v6151_v39 = vld [vmem:[%s6674_s16 + $0x60] ss:$8 sps:$4 sm:$0xff]  }
  0xb3   : > { %11756 = vst [vmem:[#allocation16_spill] sm:$0xff] %v6956_v32  ;;  %11757 = vst [vmem:[#allocation17_spill] sm:$0xff] %v6958_v33  ;;  %v7144_v32 = vld [vmem:[%s6468_s26 + $0x70] sm:$0xff] }
  0xb5   : > { %2800 = vperm.xlu1 %6017, %v6572_v34   ;;  %2812 = vperm.xlu0 %6018, %v6605_v44   ;;  %v6139_v34 = vld [vmem:[%s6674_s16 + $0x20] ss:$8 sps:$4 sm:$0xff]   ;;  %v6140_v44 = vld [vmem:[%s6674_s16 + $0x34] ss:$8 sps:$4 sm:$0xff]  }
  0xb6   : > { %v6964_v36 = vpop.permute.xlu1 %2046  ;;  %1805 = vmatmul.mubr.bf16.gmra.mxu1 %v6136_v25  ;;  %v6966_v29 = vpop.permute.xlu0 %2041  ;;  %1065 = vmatmul.mubr.bf16.gmra.mxu0 %v6211_v41  ;;  %v6152_v41 = vld [vmem:[%s6674_s16 + $0x74] ss:$8 sps:$4 sm:$0xff]  }
  0xb7   : > { %11758 = vst [vmem:[#allocation18_spill] sm:$0xff] %v6964_v36  ;;  %11759 = vst [vmem:[#allocation19_spill] sm:$0xff] %v6966_v29  ;;  %1814 = vmatprep.mubr.bf16.mxu1 %v6137_v35 }
  0xb9   : > { %2808 = vperm.xlu1 %6017, %v6587_v38   ;;  %2820 = vperm.xlu0 %6018, %v6620_v48   ;;  %v6212_v48 = vld [vmem:[%s6507_s20 + $0x4c] ss:$12 sps:$4 sm:$0xff]  }
  0xba   : > { %v6972_v43 = vpop.permute.xlu1 %2056  ;;  %v6974_v49 = vpop.permute.xlu0 %2051  ;;  %1074 = vmatprep.mubr.bf16.mxu0 %v6212_v48 }
  0xbb   : > { %11760 = vst [vmem:[#allocation20_spill] sm:$0xff] %v6972_v43  ;;  %11761 = vst [vmem:[#allocation21_spill] sm:$0xff] %v6974_v49  ;;  %v7128_v43 = vld [vmem:[%s6468_s26 + $0x60] sm:$0xff]  ;;  %v7166_v49 = vld [vmem:[%s6468_s26 + $0xa8] sm:$0xff] }
  0xbd   : > { %2816 = vperm.xlu1 %6017, %v6597_v42   ;;  %2828 = vperm.xlu0 %6018, %v6635_v53   ;;  %v6142_v42 = vld [vmem:[%s6674_s16 + $0x30] ss:$8 sps:$4 sm:$0xff]   ;;  %v6143_v53 = vld [vmem:[%s6674_s16 + $0x44] ss:$8 sps:$4 sm:$0xff]  }
  0xbe   : > { %v6980_v50 = vpop.permute.xlu1 %2066  ;;  %1815 = vmatmul.mubr.bf16.gmra.mxu1 %v6139_v34  ;;  %v6982_v38 = vpop.permute.xlu0 %2061  ;;  %1075 = vmatmul.mubr.bf16.gmra.mxu0 %v6214_v51  ;;  %v7055_v34 = vld [vmem:[%s6468_s26 + $0x10] sm:$0xff] }
  0xbf   : > { %11762 = vst [vmem:[#allocation22_spill] sm:$0xff] %v6980_v50  ;;  %11763 = vst [vmem:[#allocation23_spill] sm:$0xff] %v6982_v38  ;;  %1824 = vmatprep.mubr.bf16.mxu1 %v6140_v44  ;;  %v7059_v44 = vld [vmem:[%s6468_s26 + $0x38] sm:$0xff] }
  0xc0   : > { %11776 = vst [vmem:[#allocation36_spill] sm:$0xff] %v7055_v34  ;;  %v7148_v38 = vld [vmem:[%s6468_s26 + $0x98] sm:$0xff] }
  0xc1   : > { %2824 = vperm.xlu1 %6017, %v6611_v46   ;;  %2836 = vperm.xlu0 %6018, %v6650_v57   ;;  %v6215_v57 = vld [vmem:[%s6507_s20 + $0x64] ss:$12 sps:$4 sm:$0xff]   ;;  %11795 = vst [vmem:[#allocation55_spill] sm:$0xff] %v7148_v38 }
  0xc2   : > { %v6988_v54 = vpop.permute.xlu1 %2076  ;;  %v6990_v59 = vpop.permute.xlu0 %2071  ;;  %1084 = vmatprep.mubr.bf16.mxu0 %v6215_v57  ;;  %v7069_v57 = vld [vmem:[%s6468_s26 + $0x20] sm:$0xff] }
  0xc3   : > { %11764 = vst [vmem:[#allocation24_spill] sm:$0xff] %v6988_v54  ;;  %11765 = vst [vmem:[#allocation25_spill] sm:$0xff] %v6990_v59 }
  0xc5   : > { %2832 = vperm.xlu1 %6017, %v6632_v52   ;;  %2844 = vperm.xlu0 %6018, %v6666_v62   ;;  %v6145_v52 = vld [vmem:[%s6674_s16 + $0x40] ss:$8 sps:$4 sm:$0xff]   ;;  %v6146_v62 = vld [vmem:[%s6674_s16 + $0x54] ss:$8 sps:$4 sm:$0xff]  }
  0xc6   : > { %v6996_v61 = vpop.permute.xlu1 %2086  ;;  %1825 = vmatmul.mubr.bf16.gmra.mxu1 %v6142_v42  ;;  %v6998_v46 = vpop.permute.xlu0 %2081  ;;  %1085 = vmatmul.mubr.bf16.gmra.mxu0 %v6217_v63  ;;  %v6224_v42 = vld [vmem:[%s6507_s20 + $0xac] ss:$12 sps:$4 sm:$0xff]  }
  0xc7   : > { %11766 = vst [vmem:[#allocation26_spill] sm:$0xff] %v6996_v61  ;;  %11767 = vst [vmem:[#allocation27_spill] sm:$0xff] %v6998_v46  ;;  %1834 = vmatprep.mubr.bf16.mxu1 %v6143_v53  ;;  %v6226_v53 = vld [vmem:[%s6507_s20 + $0xa8] ss:$12 sps:$4 sm:$0xff]   ;;  %v7114_v61 = vld [vmem:[%s6468_s26 + $0x78] sm:$0xff] }
  0xc8   : > { %v7073_v63 = vld [vmem:[%s6468_s26 + $0x48] sm:$0xff] }
  0xc9   : > { %2840 = vperm.xlu1 %6017, %v6647_v56   ;;  %2852 = vperm.xlu0 %6018, %v6686_v3   ;;  %v6218_v3 = vld [vmem:[%s6507_s20 + $0x7c] ss:$12 sps:$4 sm:$0xff]  }
  0xca   : > { %v7004_v1 = vpop.permute.xlu1 %2096  ;;  %v7006_v4 = vpop.permute.xlu0 %2091  ;;  %1094 = vmatprep.mubr.bf16.mxu0 %v6218_v3  ;;  %v6154_v3 = vld [vmem:[%s6674_s16 + $0x70] ss:$8 sps:$4 sm:$0xff]   ;;  %v7132_v46 = vld [vmem:[%s6468_s26 + $0x88] sm:$0xff] }
  0xcb   : > { %11768 = vst [vmem:[#allocation28_spill] sm:$0xff] %v7004_v1  ;;  %11769 = vst [vmem:[#allocation29_spill] sm:$0xff] %v7006_v4  ;;  %v7110_v1 = vld [vmem:[%s6468_s26 + $0x50] sm:$0xff] }
  0xcc   : > { %11790 = vst [vmem:[#allocation50_spill] sm:$0xff] %v7132_v46 }
  0xcd   : > { %2848 = vperm.xlu1 %6017, %v6658_v60   ;;  %2860 = vperm.xlu0 %6018, %v6701_v12   ;;  %v6148_v60 = vld [vmem:[%s6674_s16 + $0x50] ss:$8 sps:$4 sm:$0xff]  }
  0xce   : > { %1835 = vmatmul.mubr.bf16.gmra.mxu1 %v6145_v52  ;;  %1095 = vmatmul.mubr.bf16.gmra.mxu0 %v6220_v10  ;;  %v7082_v10 = vld [vmem:[%s6468_s26 + $0x30] sm:$0xff] }
  0xcf   : > { %v7012_v5 = vpop.permute.xlu1 %2360  ;;  %v7014_v56 = vpop.permute.xlu0 %2356  ;;  %1844 = vmatprep.mubr.bf16.mxu1 %v6146_v62  ;;  %1104 = vmatprep.mubr.bf16.mxu0 %v6221_v24  ;;  %v6227_v24 = vld [vmem:[%s6507_s20 + $0xc4] ss:$12 sps:$4 sm:$0xff]  }
  0xd1   : > { %2856 = vperm.xlu1 %6017, %v6677_v0   ;;  %6019 = vset.pattern.permute.xlu0 %v6377_v2  ;;  %v7031_v0 = vld [vmem:[%s6468_s26 + $0x18] sm:$0xff] }
  0xd2   : > { %3124 = vperm.xlu0 %6019, %v7020_v14   ;;  %11772 = vst [vmem:[#allocation32_spill] sm:$0xff] %v7031_v0 }
  0xd3   : > { %v7024_v12 = vpop.permute.xlu1 %2364  ;;  %v7026_v16 = vpop.permute.xlu0 %2368 }
  0xd4   : > { %11770 = vst [vmem:[#allocation30_spill] sm:$0xff] %v7024_v12  ;;  %11771 = vst [vmem:[#allocation31_spill] sm:$0xff] %v7026_v16 }
  0xd5   : > { %2864 = vperm.xlu1 %6017, %v6693_v8  }
  0xd6   : > { %3136 = vperm.xlu0 %6019, %v7031_v0   ;;  %1845 = vmatmul.mubr.bf16.gmra.mxu1 %v6148_v60 }
  0xd7   : > { %v7034_v20 = vpop.permute.xlu1 %2372  ;;  %v7036_v23 = vpop.permute.xlu0 %2376  ;;  %1854 = vmatprep.mubr.bf16.mxu1 %v6149_v13  ;;  %1105 = vmatmul.mubr.bf16.gmra.mxu0 %v6223_v27  ;;  %v6229_v27 = vld [vmem:[%s6507_s20 + $0xc0] ss:$12 sps:$4 sm:$0xff]  }
  0xd8   : > { %11773 = vst [vmem:[#allocation33_spill] sm:$0xff] %v7036_v23  ;;  %1114 = vmatprep.mubr.bf16.mxu0 %v6224_v42 }
  0xd9   : > { %6020 = vset.pattern.permute.xlu1 %v6377_v2  ;;  %v7086_v2 = vld [vmem:[%s6468_s26 + $0x58] sm:$0xff] }
  0xda   : > { %3128 = vperm.xlu1 %6020, %v7041_v30   ;;  %3144 = vperm.xlu0 %6019, %v7045_v31  }
  0xdb   : > { %v7048_v25 = vpop.permute.xlu1 %2380  ;;  %v7050_v35 = vpop.permute.xlu0 %2384 }
  0xdc   : > { %11775 = vst [vmem:[#allocation35_spill] sm:$0xff] %v7050_v35 }
  0xde   : > { %3132 = vperm.xlu1 %6020, %v7055_v34   ;;  %3152 = vperm.xlu0 %6019, %v7059_v44  }
  0xdf   : > { %1855 = vmatmul.mubr.bf16.gmra.mxu1 %v6151_v39  ;;  %v7062_v48 = vpop.permute.xlu1 %2388  ;;  %v7064_v51 = vpop.permute.xlu0 %2392  ;;  %1115 = vmatmul.mubr.bf16.gmra.mxu0 %v6226_v53  ;;  %v7096_v39 = vld [vmem:[%s6468_s26 + $0x40] sm:$0xff] }
  0xe0   : > { %11777 = vst [vmem:[#allocation37_spill] sm:$0xff] %v7062_v48  ;;  %11778 = vst [vmem:[#allocation38_spill] sm:$0xff] %v7064_v51  ;;  %1864 = vmatprep.mubr.bf16.mxu1 %v6152_v41  ;;  %v7100_v41 = vld [vmem:[%s6468_s26 + $0x68] sm:$0xff]  ;;  %1124 = vmatprep.mubr.bf16.mxu0 %v6227_v24 }
  0xe1   : > { %v6230_v24 = vld [vmem:[%s6507_s20 + $0xdc] ss:$12 sps:$4 sm:$0xff]  }
  0xe2   : > { %3140 = vperm.xlu1 %6020, %v7069_v57   ;;  %3160 = vperm.xlu0 %6019, %v7073_v63  }
  0xe3   : > { %v7076_v52 = vpop.permute.xlu1 %2396  ;;  %v7078_v62 = vpop.permute.xlu0 %2400 }
  0xe4   : > { %11779 = vst [vmem:[#allocation39_spill] sm:$0xff] %v7076_v52  ;;  %11780 = vst [vmem:[#allocation40_spill] sm:$0xff] %v7078_v62  ;;  %v11894_v52 = vmov 5  }
  0xe6   : > { %3148 = vperm.xlu1 %6020, %v7082_v10   ;;  %3168 = vperm.xlu0 %6019, %v7086_v2  }
  0xe7   : > { %1865 = vmatmul.mubr.bf16.gmra.mxu1 %v6154_v3  ;;  %v7089_v60 = vpop.permute.xlu1 %2404  ;;  %v7091_v13 = vpop.permute.xlu0 %2408  ;;  %1125 = vmatmul.mubr.bf16.gmra.mxu0 %v6229_v27 }
  0xe8   : > { %11781 = vst [vmem:[#allocation41_spill] sm:$0xff] %v7089_v60  ;;  %11782 = vst [vmem:[#allocation42_spill] sm:$0xff] %v7091_v13  ;;  %1134 = vmatprep.mubr.bf16.mxu0 %v6230_v24  ;;  %v7200_v13 = vld [vmem:[%s6468_s26 + $0xc8] sm:$0xff] }
  0xe9   : > { %11808 = vst [vmem:[#allocation68_spill] sm:$0xff] %v7200_v13 }
  0xea   : > { %3156 = vperm.xlu1 %6020, %v7096_v39   ;;  %3176 = vperm.xlu0 %6019, %v7100_v41  }
  0xeb   : > { %v7103_v42 = vpop.permute.xlu1 %2412  ;;  %v7105_v53 = vpop.permute.xlu0 %2416 }
  0xec   : > { %11783 = vst [vmem:[#allocation43_spill] sm:$0xff] %v7103_v42  ;;  %11784 = vst [vmem:[#allocation44_spill] sm:$0xff] %v7105_v53 }
  0xed   : > { %v7107_v3 = vpop.f32.mrf.mxu1 }
  0xee   : > { %11785 = vst [vmem:[#allocation45_spill] sm:$0xff] %v7107_v3  ;;  %3164 = vperm.xlu1 %6020, %v7110_v1   ;;  %3184 = vperm.xlu0 %6019, %v7114_v61   ;;  %v6232_v3 = vld [vmem:[%s6507_s20 + $0xd8] ss:$12 sps:$4 sm:$0xff]  }
  0xef   : > { %v7117_v54 = vpop.permute.xlu1 %2420  ;;  %v7119_v50 = vpop.f32.mrf.mxu1  ;;  %1135 = vmatmul.mubr.bf16.gmra.mxu0 %v6232_v3 }
  0xf0   : > { %11786 = vst [vmem:[#allocation46_spill] sm:$0xff] %v7117_v54  ;;  %11787 = vst [vmem:[#allocation47_spill] sm:$0xff] %v7119_v50  ;;  %v7121_v4 = vpop.permute.xlu0 %2424 }
  0xf1   : > { %11788 = vst [vmem:[#allocation48_spill] sm:$0xff] %v7121_v4  ;;  %v7124_v27 = vpop.f32.mrf.mxu1 }
  0xf2   : > { %11789 = vst [vmem:[#allocation49_spill] sm:$0xff] %v7124_v27  ;;  %3172 = vperm.xlu1 %6020, %v7128_v43   ;;  %3192 = vperm.xlu0 %6019, %v7132_v46  }
  0xf3   : > { %v7135_v36 = vpop.permute.xlu1 %2428  ;;  %v7137_v50 = vpop.f32.mrf.mxu1 }
  0xf4   : > { %11791 = vst [vmem:[#allocation51_spill] sm:$0xff] %v7135_v36  ;;  %11792 = vst [vmem:[#allocation52_spill] sm:$0xff] %v7137_v50  ;;  %v7139_v59 = vpop.permute.xlu0 %2432  ;;  %v6233_v50 = vld [vmem:[%s6507_s20 + $0xf4] ss:$12 sps:$4 sm:$0xff]   ;;  %v7216_v36 = vld [vmem:[%s6468_s26 + $0xd8] sm:$0xff] }
  0xf5   : > { %11793 = vst [vmem:[#allocation53_spill] sm:$0xff] %v7139_v59  ;;  %v7141_v27 = vpop.f32.mrf.mxu1  ;;  %v7162_v59 = vld [vmem:[%s6468_s26 + $0x80] sm:$0xff]  ;;  %1144 = vmatprep.mubr.bf16.mxu0 %v6233_v50 }
  0xf6   : > { %11794 = vst [vmem:[#allocation54_spill] sm:$0xff] %v7141_v27  ;;  %3180 = vperm.xlu1 %6020, %v7144_v32   ;;  %3200 = vperm.xlu0 %6019, %v7148_v38   ;;  %v6235_v27 = vld [vmem:[%s6507_s20 + $0xf0] ss:$12 sps:$4 sm:$0xff]  }
  0xf7   : > { %v7151_v4 = vpop.permute.xlu1 %2436  ;;  %v7153_v28 = vpop.f32.mrf.mxu1  ;;  %1145 = vmatmul.mubr.bf16.gmra.mxu0 %v6235_v27 }
  0xf8   : > { %11796 = vst [vmem:[#allocation56_spill] sm:$0xff] %v7151_v4  ;;  %11797 = vst [vmem:[#allocation57_spill] sm:$0xff] %v7153_v28  ;;  %v7155_v24 = vpop.permute.xlu0 %2440  ;;  %v7182_v4 = vld [vmem:[%s6468_s26 + $0xb8] sm:$0xff] }
  0xf9   : > { %11798 = vst [vmem:[#allocation58_spill] sm:$0xff] %v7155_v24  ;;  %v7158_v3 = vpop.f32.mrf.mxu1 }
  0xfa   : > { %11799 = vst [vmem:[#allocation59_spill] sm:$0xff] %v7158_v3  ;;  %3188 = vperm.xlu1 %6020, %v7162_v59   ;;  %3208 = vperm.xlu0 %6019, %v7166_v49  }
  0xfb   : > { %v7169_v53 = vpop.permute.xlu1 %2444  ;;  %v7171_v28 = vpop.f32.mrf.mxu1 }
  0xfc   : > { %11800 = vst [vmem:[#allocation60_spill] sm:$0xff] %v7169_v53  ;;  %11801 = vst [vmem:[#allocation61_spill] sm:$0xff] %v7171_v28  ;;  %v7173_v24 = vpop.permute.xlu0 %2448  ;;  %v6236_v28 = vld [vmem:[%s6507_s20 + $0x10c] ss:$12 sps:$4 sm:$0xff]  }
  0xfd   : > { %11802 = vst [vmem:[#allocation62_spill] sm:$0xff] %v7173_v24  ;;  %v7175_v3 = vpop.f32.mrf.mxu1  ;;  %v7196_v24 = vld [vmem:[%s6468_s26 + $0xa0] sm:$0xff]  ;;  %1154 = vmatprep.mubr.bf16.mxu0 %v6236_v28 }
  0xfe   : > { %11803 = vst [vmem:[#allocation63_spill] sm:$0xff] %v7175_v3  ;;  %3196 = vperm.xlu1 %6020, %v7178_v17   ;;  %3216 = vperm.xlu0 %6019, %v7182_v4   ;;  %v6238_v3 = vld [vmem:[%s6507_s20 + $0x108] ss:$12 sps:$4 sm:$0xff]  }
  0xff   : > { %v7185_v29 = vpop.permute.xlu1 %2452  ;;  %v7187_v53 = vpop.f32.mrf.mxu1  ;;  %1155 = vmatmul.mubr.bf16.gmra.mxu0 %v6238_v3  ;;  %v7228_v3 = vld [vmem:[%s6468_s26 + $0xc0] sm:$0xff] }
 0x100   : > { %11804 = vst [vmem:[#allocation64_spill] sm:$0xff] %v7185_v29  ;;  %11805 = vst [vmem:[#allocation65_spill] sm:$0xff] %v7187_v53  ;;  %v7189_v50 = vpop.permute.xlu0 %2456 }
 0x101   : > { %11806 = vst [vmem:[#allocation66_spill] sm:$0xff] %v7189_v50  ;;  %v7192_v27 = vpop.f32.mrf.mxu1 }
 0x102   : > { %11807 = vst [vmem:[#allocation67_spill] sm:$0xff] %v7192_v27  ;;  %3204 = vperm.xlu1 %6020, %v7196_v24   ;;  %3224 = vperm.xlu0 %6019, %v7200_v13  }
 0x103   : > { %v7203_v29 = vpop.permute.xlu1 %2460  ;;  %v7205_v53 = vpop.f32.mrf.mxu1 }
 0x104   : > { %11809 = vst [vmem:[#allocation69_spill] sm:$0xff] %v7203_v29  ;;  %11810 = vst [vmem:[#allocation70_spill] sm:$0xff] %v7205_v53  ;;  %v7207_v50 = vpop.permute.xlu0 %2464 }
 0x105   : > { %11811 = vst [vmem:[#allocation71_spill] sm:$0xff] %v7207_v50  ;;  %v7209_v27 = vpop.f32.mrf.mxu1 }
 0x106   : > { %11812 = vst [vmem:[#allocation72_spill] sm:$0xff] %v7209_v27  ;;  %3212 = vperm.xlu1 %6020, %v7212_v22   ;;  %3232 = vperm.xlu0 %6019, %v7216_v36   ;;  %v7232_v27 = vld [vmem:[%s6468_s26 + $0xe8] sm:$0xff] }
 0x107   : > { %v7219_v33 = vpop.permute.xlu1 %2468  ;;  %v7221_v29 = vpop.f32.mrf.mxu1 }
 0x108   : > { %11813 = vst [vmem:[#allocation73_spill] sm:$0xff] %v7219_v33  ;;  %11814 = vst [vmem:[#allocation74_spill] sm:$0xff] %v7221_v29  ;;  %v7223_v53 = vpop.permute.xlu0 %2472 }
 0x109   : > { %11815 = vst [vmem:[#allocation75_spill] sm:$0xff] %v7223_v53  ;;  %v7225_v28 = vpop.f32.mrf.mxu1 }
 0x10a   : > { %11816 = vst [vmem:[#allocation76_spill] sm:$0xff] %v7225_v28  ;;  %3220 = vperm.xlu1 %6020, %v7228_v3   ;;  %3240 = vperm.xlu0 %6019, %v7232_v27   ;;  %v7244_v28 = vld [vmem:[%s6468_s26 + $0xd0] sm:$0xff] }
 0x10b   : > { %v7235_v50 = vpop.permute.xlu1 %2476  ;;  %v7237_v33 = vpop.f32.mrf.mxu1 }
 0x10c   : > { %11817 = vst [vmem:[#allocation77_spill] sm:$0xff] %v7235_v50  ;;  %11818 = vst [vmem:[#allocation78_spill] sm:$0xff] %v7237_v33  ;;  %v7239_v29 = vpop.permute.xlu0 %2480  ;;  %v6239_v33 = vld [vmem:[%s6507_s20 + $0x124] ss:$12 sps:$4 sm:$0xff]  }
 0x10d   : > { %11819 = vst [vmem:[#allocation79_spill] sm:$0xff] %v7239_v29  ;;  %v7241_v53 = vpop.f32.mrf.mxu1  ;;  %v7259_v29 = vld [vmem:[%s6468_s26 + $0xe0] sm:$0xff]  ;;  %1164 = vmatprep.mubr.bf16.mxu0 %v6239_v33 }
 0x10e   : > { %11820 = vst [vmem:[#allocation80_spill] sm:$0xff] %v7241_v53  ;;  %3228 = vperm.xlu1 %6020, %v7244_v28   ;;  %3248 = vperm.xlu0 %6019, %v6693_v8   ;;  %v6378_v53 = vmov 4  }
 0x10f   : > { %v7248_v62 = vpop.f32.mrf.mxu1  ;;  %1165 = vmatmul.mubr.bf16.gmra.mxu0 %v6241_v21 }
 0x110   : > { %11821 = vst [vmem:[#allocation81_spill] sm:$0xff] %v7248_v62  ;;  %v7250_v18 = vpop.permute.xlu1 %2740  ;;  %v7252_v54 = vpop.permute.xlu0 %2744 }
 0x111   : > { %v7254_v50 = vpop.f32.mrf.mxu1 }
 0x112   : > { %11822 = vst [vmem:[#allocation82_spill] sm:$0xff] %v7254_v50  ;;  %3236 = vperm.xlu1 %6020, %v7259_v29   ;;  %6022 = vset.pattern.permute.xlu0 %v6378_v53 }
 0x113   : > { %3512 = vperm.xlu0 %6022, %v7041_v30   ;;  %v7263_v8 = vpop.f32.mrf.mxu1 }
 0x114   : > { %11823 = vst [vmem:[#allocation83_spill] sm:$0xff] %v7263_v8  ;;  %v7265_v62 = vpop.permute.xlu1 %2748  ;;  %v7267_v51 = vpop.permute.xlu0 %2756  ;;  %v6242_v8 = vld [vmem:[%s6507_s20 + $0x13c] ss:$12 sps:$4 sm:$0xff]  }
 0x115   : > { %11824 = vst [vmem:[#allocation84_spill] sm:$0xff] %v7265_v62  ;;  %v7269_v50 = vpop.f32.mrf.mxu1  ;;  %1174 = vmatprep.mubr.bf16.mxu0 %v6242_v8 }
 0x116   : > { %11825 = vst [vmem:[#allocation85_spill] sm:$0xff] %v7269_v50  ;;  %3244 = vperm.xlu1 %6020, %v7272_v6  }
 0x117   : > { %3524 = vperm.xlu0 %6022, %v7069_v57   ;;  %v7276_v42 = vpop.f32.mrf.mxu1  ;;  %1175 = vmatmul.mubr.bf16.gmra.mxu0 %v6244_v7 }
 0x118   : > { %11826 = vst [vmem:[#allocation86_spill] sm:$0xff] %v7276_v42  ;;  %v7278_v26 = vpop.permute.xlu1 %2752  ;;  %v7280_v35 = vpop.permute.xlu0 %2764  ;;  %1184 = vmatprep.mubr.bf16.mxu0 %v6245_v55 }
 0x119   : > { %11827 = vst [vmem:[#allocation87_spill] sm:$0xff] %v7278_v26  ;;  %v7282_v33 = vpop.f32.mrf.mxu1 }
 0x11a   : > { %11828 = vst [vmem:[#allocation88_spill] sm:$0xff] %v7282_v33  ;;  %6021 = vset.pattern.permute.xlu1 %v6378_v53 }
 0x11b   : > { %3508 = vperm.xlu1 %6021, %v7020_v14   ;;  %3532 = vperm.xlu0 %6022, %v7082_v10   ;;  %v7288_v21 = vpop.f32.mrf.mxu1 }
 0x11c   : > { %11829 = vst [vmem:[#allocation89_spill] sm:$0xff] %v7288_v21  ;;  %v7290_v50 = vpop.permute.xlu1 %2760  ;;  %v7292_v60 = vpop.permute.xlu0 %2772 }
 0x11d   : > { %11830 = vst [vmem:[#allocation90_spill] sm:$0xff] %v7290_v50  ;;  %11831 = vst [vmem:[#allocation91_spill] sm:$0xff] %v7292_v60  ;;  %v7294_v42 = vpop.f32.mrf.mxu1 }
 0x11e   : > { %11832 = vst [vmem:[#allocation92_spill] sm:$0xff] %v7294_v42 }
 0x11f   : > { %3516 = vperm.xlu1 %6021, %v7055_v34   ;;  %3540 = vperm.xlu0 %6022, %v7096_v39   ;;  %v7298_v53 = vpop.f32.mrf.mxu1 }
 0x120   : > { %11833 = vst [vmem:[#allocation93_spill] sm:$0xff] %v7298_v53  ;;  %v7300_v33 = vpop.permute.xlu1 %2768  ;;  %v7302_v19 = vpop.permute.xlu0 %2780 }
 0x121   : > { %11834 = vst [vmem:[#allocation94_spill] sm:$0xff] %v7300_v33  ;;  %11835 = vst [vmem:[#allocation95_spill] sm:$0xff] %v7302_v19  ;;  %v7304_v23 = vpop.f32.mrf.mxu1 }
 0x122   : > { %11836 = vst [vmem:[#allocation96_spill] sm:$0xff] %v7304_v23 }
 0x123   : > { %3520 = vperm.xlu1 %6021, %v7031_v0   ;;  %3548 = vperm.xlu0 %6022, %v7110_v1   ;;  %v7308_v8 = vpop.f32.mrf.mxu1 }
 0x124   : > { %11837 = vst [vmem:[#allocation97_spill] sm:$0xff] %v7308_v8  ;;  %v7310_v42 = vpop.permute.xlu1 %2776  ;;  %v7312_v7 = vpop.permute.xlu0 %2788 }
 0x125   : > { %11838 = vst [vmem:[#allocation98_spill] sm:$0xff] %v7310_v42  ;;  %11839 = vst [vmem:[#allocation99_spill] sm:$0xff] %v7312_v7  ;;  %v7314_v21 = vpop.f32.mrf.mxu1 }
 0x126   : > { %11840 = vst [vmem:[#allocation100_spill] sm:$0xff] %v7314_v21 }
 0x127   : > { %3528 = vperm.xlu1 %6021, %v7045_v31   ;;  %3556 = vperm.xlu0 %6022, %v7128_v43   ;;  %v7318_v53 = vpop.f32.mrf.mxu1 }
 0x128   : > { %11841 = vst [vmem:[#allocation101_spill] sm:$0xff] %v7318_v53  ;;  %v7320_v33 = vpop.permute.xlu1 %2784  ;;  %v7322_v23 = vpop.permute.xlu0 %2796 }
 0x129   : > { %11842 = vst [vmem:[#allocation102_spill] sm:$0xff] %v7320_v33  ;;  %11843 = vst [vmem:[#allocation103_spill] sm:$0xff] %v7322_v23  ;;  %v7324_v50 = vpop.f32.mrf.mxu1 }
 0x12a   : > { %11844 = vst [vmem:[#allocation104_spill] sm:$0xff] %v7324_v50 }
 0x12b   : > { %3536 = vperm.xlu1 %6021, %v7059_v44   ;;  %3564 = vperm.xlu0 %6022, %v7144_v32   ;;  %v7328_v8 = vpop.f32.mrf.mxu1 }
 0x12c   : > { %11845 = vst [vmem:[#allocation105_spill] sm:$0xff] %v7328_v8  ;;  %v7330_v21 = vpop.permute.xlu1 %2792  ;;  %v7332_v42 = vpop.permute.xlu0 %2804 }
 0x12d   : > { %11846 = vst [vmem:[#allocation106_spill] sm:$0xff] %v7330_v21  ;;  %11847 = vst [vmem:[#allocation107_spill] sm:$0xff] %v7332_v42  ;;  %v7334_v7 = vpop.f32.mrf.mxu1 }
 0x12e   : > { %11848 = vst [vmem:[#allocation108_spill] sm:$0xff] %v7334_v7 }
 0x12f   : > { %3544 = vperm.xlu1 %6021, %v7073_v63   ;;  %3572 = vperm.xlu0 %6022, %v7162_v59   ;;  %v7338_v53 = vpop.f32.mrf.mxu1 }
 0x130   : > { %11849 = vst [vmem:[#allocation109_spill] sm:$0xff] %v7338_v53  ;;  %v7340_v50 = vpop.permute.xlu1 %2800  ;;  %v7342_v33 = vpop.permute.xlu0 %2812  ;;  %v6247_v53 = vld [vmem:[%s6507_s20 + $0x150] ss:$12 sps:$4 sm:$0xff]  }
 0x131   : > { %11850 = vst [vmem:[#allocation110_spill] sm:$0xff] %v7340_v50  ;;  %11851 = vst [vmem:[#allocation111_spill] sm:$0xff] %v7342_v33  ;;  %v7344_v23 = vpop.f32.mrf.mxu1  ;;  %1185 = vmatmul.mubr.bf16.gmra.mxu0 %v6247_v53 }
 0x132   : > { %11852 = vst [vmem:[#allocation112_spill] sm:$0xff] %v7344_v23 }
 0x133   : > { %3552 = vperm.xlu1 %6021, %v7086_v2   ;;  %3580 = vperm.xlu0 %6022, %v7178_v17   ;;  %v7348_v8 = vpop.f32.mrf.mxu1 }
 0x134   : > { %11853 = vst [vmem:[#allocation113_spill] sm:$0xff] %v7348_v8  ;;  %v7350_v21 = vpop.permute.xlu1 %2808  ;;  %v7352_v7 = vpop.permute.xlu0 %2820 }
 0x135   : > { %11854 = vst [vmem:[#allocation114_spill] sm:$0xff] %v7350_v21  ;;  %11855 = vst [vmem:[#allocation115_spill] sm:$0xff] %v7352_v7  ;;  %v7354_v42 = vpop.f32.mrf.mxu1 }
 0x136   : > { %11856 = vst [vmem:[#allocation116_spill] sm:$0xff] %v7354_v42 }
 0x137   : > { %3560 = vperm.xlu1 %6021, %v7100_v41   ;;  %3588 = vperm.xlu0 %6022, %v7196_v24   ;;  %v7360_v50 = vpop.f32.mrf.mxu1 }
 0x138   : > { %11857 = vst [vmem:[#allocation117_spill] sm:$0xff] %v7360_v50  ;;  %v7362_v23 = vpop.permute.xlu1 %2816  ;;  %v7364_v33 = vpop.permute.xlu0 %2828 }
 0x139   : > { %11858 = vst [vmem:[#allocation118_spill] sm:$0xff] %v7362_v23  ;;  %11859 = vst [vmem:[#allocation119_spill] sm:$0xff] %v7364_v33  ;;  %v7366_v8 = vpop.f32.mrf.mxu1 }
 0x13a   : > { %11860 = vst [vmem:[#allocation120_spill] sm:$0xff] %v7366_v8 }
 0x13b   : > { %3568 = vperm.xlu1 %6021, %v7114_v61   ;;  %3596 = vperm.xlu0 %6022, %v7212_v22   ;;  %v7370_v42 = vpop.f32.mrf.mxu1 }
 0x13c   : > { %11861 = vst [vmem:[#allocation121_spill] sm:$0xff] %v7370_v42  ;;  %v7372_v21 = vpop.permute.xlu1 %2824  ;;  %v7374_v7 = vpop.permute.xlu0 %2836 }
 0x13d   : > { %11862 = vst [vmem:[#allocation122_spill] sm:$0xff] %v7372_v21  ;;  %11863 = vst [vmem:[#allocation123_spill] sm:$0xff] %v7374_v7  ;;  %v7376_v19 = vpop.f32.mrf.mxu1 }
 0x13e   : > { %11864 = vst [vmem:[#allocation124_spill] sm:$0xff] %v7376_v19 }
 0x13f   : > { %3576 = vperm.xlu1 %6021, %v7132_v46   ;;  %3604 = vperm.xlu0 %6022, %v7228_v3   ;;  %v7380_v55 = vpop.f32.mrf.mxu1 }
 0x140   : > { %11865 = vst [vmem:[#allocation125_spill] sm:$0xff] %v7380_v55  ;;  %v7382_v8 = vpop.permute.xlu1 %2832  ;;  %v7384_v53 = vpop.permute.xlu0 %2844 }
 0x141   : > { %11866 = vst [vmem:[#allocation126_spill] sm:$0xff] %v7382_v8  ;;  %11867 = vst [vmem:[#allocation127_spill] sm:$0xff] %v7384_v53  ;;  %v7386_v50 = vpop.f32.mrf.mxu1 }
 0x142   : > { %11868 = vst [vmem:[#allocation128_spill] sm:$0xff] %v7386_v50 }
 0x143   : > { %3584 = vperm.xlu1 %6021, %v7148_v38   ;;  %3612 = vperm.xlu0 %6022, %v7244_v28   ;;  %v7390_v42 = vpop.f32.mrf.mxu1 }
 0x144   : > { %11869 = vst [vmem:[#allocation129_spill] sm:$0xff] %v7390_v42  ;;  %v7392_v19 = vpop.permute.xlu1 %2840  ;;  %v7394_v21 = vpop.permute.xlu0 %2852 }
 0x145   : > { %11870 = vst [vmem:[#allocation130_spill] sm:$0xff] %v7392_v19  ;;  %11871 = vst [vmem:[#allocation131_spill] sm:$0xff] %v7394_v21  ;;  %v7396_v23 = vpop.f32.mrf.mxu1 }
 0x146   : > { %11872 = vst [vmem:[#allocation132_spill] sm:$0xff] %v7396_v23 }
 0x147   : > { %3592 = vperm.xlu1 %6021, %v7166_v49   ;;  %3620 = vperm.xlu0 %6022, %v7259_v29   ;;  %v7400_v55 = vpop.f32.mrf.mxu1  ;;  %v6248_v29 = vld [vmem:[%s6507_s20 + $0x16c] ss:$12 sps:$4 sm:$0xff]  }
 0x148   : > { %11873 = vst [vmem:[#allocation133_spill] sm:$0xff] %v7400_v55  ;;  %v7402_v50 = vpop.permute.xlu1 %2848  ;;  %v7404_v8 = vpop.permute.xlu0 %2860  ;;  %v6250_v55 = vld [vmem:[%s6507_s20 + $0x168] ss:$12 sps:$4 sm:$0xff]   ;;  %1194 = vmatprep.mubr.bf16.mxu0 %v6248_v29 }
 0x149   : > { %11874 = vst [vmem:[#allocation134_spill] sm:$0xff] %v7402_v50  ;;  %11875 = vst [vmem:[#allocation135_spill] sm:$0xff] %v7404_v8  ;;  %v7406_v53 = vpop.f32.mrf.mxu1  ;;  %v11443_v50 = vmov 5   ;;  %1195 = vmatmul.mubr.bf16.gmra.mxu0 %v6250_v55 }
 0x14a   : > { %11876 = vst [vmem:[#allocation136_spill] sm:$0xff] %v7406_v53 }
 0x14b   : > { %3600 = vperm.xlu1 %6021, %v7182_v4   ;;  %3628 = vperm.xlu0 %6022, %v7272_v6   ;;  %v7410_v42 = vpop.f32.mrf.mxu1 }
 0x14c   : > { %11877 = vst [vmem:[#allocation137_spill] sm:$0xff] %v7410_v42  ;;  %v7412_v19 = vpop.permute.xlu1 %2856 }
 0x14d   : > { %11878 = vst [vmem:[#allocation138_spill] sm:$0xff] %v7412_v19  ;;  %v7414_v23 = vpop.permute.xlu0 %3124  ;;  %v7416_v21 = vpop.f32.mrf.mxu1 }
 0x14e   : > { %11879 = vst [vmem:[#allocation139_spill] sm:$0xff] %v7416_v21 }
 0x14f   : > { %3608 = vperm.xlu1 %6021, %v7200_v13   ;;  %6023 = vset.pattern.permute.xlu0 %v11443_v50  ;;  %v7422_v53 = vpop.f32.mrf.mxu1 }
 0x150   : > { %11880 = vst [vmem:[#allocation140_spill] sm:$0xff] %v7422_v53  ;;  %v7424_v8 = vpop.permute.xlu1 %2864  ;;  %3892 = vperm.xlu0 %6023, %v7020_v14  }
 0x151   : > { %11881 = vst [vmem:[#allocation141_spill] sm:$0xff] %v7424_v8  ;;  %v7427_v42 = vpop.permute.xlu0 %3136  ;;  %v7429_v19 = vpop.f32.mrf.mxu1 }
 0x152   : > { %11882 = vst [vmem:[#allocation142_spill] sm:$0xff] %v7427_v42  ;;  %11883 = vst [vmem:[#allocation143_spill] sm:$0xff] %v7429_v19 }
 0x153   : > { %3616 = vperm.xlu1 %6021, %v7216_v36   ;;  %v7432_v21 = vpop.f32.mrf.mxu1 }
 0x154   : > { %11884 = vst [vmem:[#allocation144_spill] sm:$0xff] %v7432_v21  ;;  %3904 = vperm.xlu0 %6023, %v7031_v0   ;;  %v6330_v21 = vld [vmem:[%s6468_s26 + $0xf8] sm:$0xff] }
 0x155   : > { %v7435_v50 = vpop.permute.xlu1 %3128  ;;  %v7437_v53 = vpop.permute.xlu0 %3144 }
 0x156   : > { %11885 = vst [vmem:[#allocation145_spill] sm:$0xff] %v7437_v53  ;;  %v7439_v8 = vpop.f32.mrf.mxu1 }
 0x157   : > { %11886 = vst [vmem:[#allocation146_spill] sm:$0xff] %v7439_v8  ;;  %3624 = vperm.xlu1 %6021, %v7232_v27  }
 0x158   : > { %3912 = vperm.xlu0 %6023, %v7045_v31   ;;  %v7443_v29 = vpop.f32.mrf.mxu1 }
 0x159   : > { %11887 = vst [vmem:[#allocation147_spill] sm:$0xff] %v7443_v29  ;;  %v7445_v19 = vpop.permute.xlu1 %3132  ;;  %v7447_v55 = vpop.permute.xlu0 %3152  ;;  %v506_v29 = vlaneseq }
 0x15a   : > { %11888 = vst [vmem:[#allocation148_spill] sm:$0xff] %v7445_v19  ;;  %11889 = vst [vmem:[#allocation149_spill] sm:$0xff] %v7447_v55  ;;  %v7449_v36 = vpop.f32.mrf.mxu1 }
 0x15b   : > { %11890 = vst [vmem:[#allocation150_spill] sm:$0xff] %v7449_v36  ;;  %3632 = vperm.xlu1 %6021, %v6330_v21   ;;  %v7472_v55 = vshrl.u32 %v506_v29, 7 }
 0x15c   : > { %3920 = vperm.xlu0 %6023, %v7059_v44   ;;  %v7453_v7 = vpop.f32.mrf.mxu1 }
 0x15d   : > { %11891 = vst [vmem:[#allocation151_spill] sm:$0xff] %v7453_v7  ;;  %v7455_v33 = vpop.permute.xlu1 %3140  ;;  %v7457_v8 = vpop.permute.xlu0 %3160  ;;  %11899 = vst [vmem:[#allocation158_spill] sm:$0xff] %v7472_v55  ;;  %v7552_v16 = vsub.s32 4, %v7472_v55 }
 0x15e   : > { %11892 = vst [vmem:[#allocation152_spill] sm:$0xff] %v7457_v8  ;;  %v7459_v53 = vpop.f32.mrf.mxu1 }
 0x15f   : > { %11893 = vst [vmem:[#allocation153_spill] sm:$0xff] %v7459_v53  ;;  %6024 = vset.pattern.permute.xlu1 %v11894_v52 }
 0x160   : > { %3896 = vperm.xlu1 %6024, %v7041_v30   ;;  %3928 = vperm.xlu0 %6023, %v7073_v63   ;;  %v7464_v36 = vpop.f32.mrf.mxu1 }
 0x161   : > { %11895 = vst [vmem:[#allocation154_spill] sm:$0xff] %v7464_v36  ;;  %v7466_v21 = vpop.permute.xlu1 %3148  ;;  %v7468_v44 = vpop.permute.xlu0 %3168  ;;  %v7485_v36 = vsub.s32 0, %v7472_v55 }
 0x162   : > { %11896 = vst [vmem:[#allocation155_spill] sm:$0xff] %v7466_v21  ;;  %11897 = vst [vmem:[#allocation156_spill] sm:$0xff] %v7468_v44  ;;  %v7470_v7 = vpop.f32.mrf.mxu1 }
 0x163   : > { %11898 = vst [vmem:[#allocation157_spill] sm:$0xff] %v7470_v7  ;;  %11904 = vst [vmem:[#allocation163_spill] sm:$0xff] %v7485_v36 }
 0x164   : > { %3900 = vperm.xlu1 %6024, %v7055_v34   ;;  %3936 = vperm.xlu0 %6023, %v7086_v2   ;;  %v7476_v53 = vpop.f32.mrf.mxu1  ;;  %v1510_v2 = vld [vmem:[%s11369_s6] sm:$0x3] }
 0x165   : > { %11900 = vst [vmem:[#allocation159_spill] sm:$0xff] %v7476_v53  ;;  %v7478_v8 = vpop.permute.xlu1 %3156  ;;  %v7480_v9 = vpop.permute.xlu0 %3176  ;;  %v7504_v44 = vrot.slane %v1510_v2, %v7485_v36 }
 0x166   : > { %11901 = vst [vmem:[#allocation160_spill] sm:$0xff] %v7478_v8  ;;  %11902 = vst [vmem:[#allocation161_spill] sm:$0xff] %v7480_v9  ;;  %v7482_v63 = vpop.f32.mrf.mxu1  ;;  %v7499_v9 = vsub.s32 1, %v7472_v55 }
 0x167   : > { %11903 = vst [vmem:[#allocation162_spill] sm:$0xff] %v7482_v63 }
 0x168   : > { %3908 = vperm.xlu1 %6024, %v7069_v57   ;;  %3944 = vperm.xlu0 %6023, %v7100_v41   ;;  %v7489_v29 = vpop.f32.mrf.mxu1  ;;  %11908 = vst [vmem:[#allocation167_spill] sm:$0xff] %v7499_v9 }
 0x169   : > { %11905 = vst [vmem:[#allocation164_spill] sm:$0xff] %v7489_v29  ;;  %v7494_v53 = vpop.permute.xlu1 %3164  ;;  %v7496_v7 = vpop.permute.xlu0 %3184 }
 0x16a   : > { %11906 = vst [vmem:[#allocation165_spill] sm:$0xff] %v7494_v53  ;;  %11907 = vst [vmem:[#allocation166_spill] sm:$0xff] %v7496_v7  ;;  %v7501_v63 = vpop.f32.mrf.mxu1  ;;  %v7515_v7 = vrot.slane %v1510_v2, %v7499_v9  ;;  %v7530_v2 = vsub.s32 2, %v7472_v55 }
 0x16b   : > { %11909 = vst [vmem:[#allocation168_spill] sm:$0xff] %v7501_v63 }
 0x16c   : > { %3916 = vperm.xlu1 %6024, %v7082_v10   ;;  %3952 = vperm.xlu0 %6023, %v7114_v61   ;;  %v7508_v57 = vpop.f32.mrf.mxu1 }
 0x16d   : > { %11910 = vst [vmem:[#allocation169_spill] sm:$0xff] %v7508_v57  ;;  %v7510_v41 = vpop.permute.xlu1 %3172  ;;  %v7512_v29 = vpop.permute.xlu0 %3192 }
 0x16e   : > { %11911 = vst [vmem:[#allocation170_spill] sm:$0xff] %v7510_v41  ;;  %11912 = vst [vmem:[#allocation171_spill] sm:$0xff] %v7512_v29  ;;  %v1796_v53 = vpop.f32.mrf.mxu1 }
 0x16f   : > { %v1797_v42 = vadd.f32 %v1796_v53, %v7504_v44 }
 0x170   : > { %3924 = vperm.xlu1 %6024, %v7096_v39   ;;  %3960 = vperm.xlu0 %6023, %v7132_v46   ;;  %v1798_v63 = vpop.f32.mrf.mxu1 }
 0x171   : > { %v7520_v10 = vmax.f32 %v1797_v42, 0.0  ;;  %v1799_v61 = vadd.f32 %v1798_v63, %v7515_v7  ;;  %v7523_v57 = vpop.permute.xlu1 %3180  ;;  %v7525_v41 = vpop.permute.xlu0 %3200  ;;  %v7541_v63 = vsub.s32 3, %v7472_v55 }
 0x172   : > { %11914 = vst [vmem:[#allocation173_spill] sm:$0xff] %v7523_v57  ;;  %11915 = vst [vmem:[#allocation174_spill] sm:$0xff] %v7525_v41  ;;  %v1800_v29 = vpop.f32.mrf.mxu1 }
 0x173   : > { %11913 = vst [vmem:[#allocation172_spill] sm:$0xff] %v7520_v10  ;;  %v7527_v26 = vmax.f32 %v1799_v61, 0.0  ;;  %v2102_v39 = vrot.slane %v7520_v10, %v7485_v36  ;;  %v7536_v53 = vrot.slane %v7520_v10, %v7499_v9  ;;  %v7565_v45 = vrot.slane %v7520_v10, %v7530_v2 }
 0x174   : > { %3932 = vperm.xlu1 %6024, %v7110_v1   ;;  %3968 = vperm.xlu0 %6023, %v7148_v38   ;;  %v1802_v42 = vpop.f32.mrf.mxu1  ;;  %v7575_v38 = vrot.slane %v7520_v10, %v7541_v63 }
 0x175   : > { %11916 = vst [vmem:[#allocation175_spill] sm:$0xff] %v7527_v26  ;;  %v7543_v61 = vpop.permute.xlu1 %3188  ;;  %v7545_v41 = vpop.permute.xlu0 %3208  ;;  %v7549_v57 = vrot.slane %v7527_v26, %v7485_v36  ;;  %v2229_v1 = vmul.f32 %v2102_v39, %v6868_v47  ;;  %v7557_v8 = vrot.slane %v7527_v26, %v7499_v9  ;;  %v2613_v52 = vmul.f32 %v7536_v53, %v7012_v5 }
 0x176   : > { %11917 = vst [vmem:[#allocation176_spill] sm:$0xff] %v7543_v61  ;;  %11918 = vst [vmem:[#allocation177_spill] sm:$0xff] %v7545_v41  ;;  %v1806_v13 = vpop.f32.mrf.mxu1  ;;  %v1801_v61 = vadd.f32 %v1800_v29, %v7504_v44  ;;  %v7571_v60 = vrot.slane %v7527_v26, %v7530_v2  ;;  %v1803_v19 = vadd.f32 %v1802_v42, %v7515_v7 }
 0x177   : > { %v1807_v41 = vadd.f32 %v1806_v13, %v7504_v44  ;;  %v7579_v13 = vrot.slane %v7527_v26, %v7541_v63  ;;  %v2230_v15 = vmul.f32 %v7549_v57, %v6868_v47  ;;  %v2614_v31 = vmul.f32 %v7557_v8, %v7012_v5 }
 0x178   : > { %3940 = vperm.xlu1 %6024, %v7128_v43   ;;  %3976 = vperm.xlu0 %6023, %v7166_v49   ;;  %v1808_v55 = vpop.f32.mrf.mxu1  ;;  %v2677_v62 = vadd.f32 %v2613_v52, %v2229_v1  ;;  %v7609_v5 = vmax.f32 %v1801_v61, 0.0  ;;  %v3381_v42 = vmul.f32 %v7575_v38, %v7435_v50 }
 0x179   : > { %v7581_v29 = vmax.f32 %v1807_v41, 0.0  ;;  %v1809_v48 = vadd.f32 %v1808_v55, %v7515_v7  ;;  %v7584_v43 = vpop.permute.xlu1 %3196  ;;  %v7586_v49 = vpop.permute.xlu0 %3216  ;;  %v7595_v41 = vrot.slane %v7520_v10, %v7552_v16  ;;  %v2997_v55 = vmul.f32 %v7565_v45, %v7252_v54 }
 0x17a   : > { %11920 = vst [vmem:[#allocation179_spill] sm:$0xff] %v7584_v43  ;;  %11921 = vst [vmem:[#allocation180_spill] sm:$0xff] %v7586_v49  ;;  %v1810_v46 = vpop.f32.mrf.mxu1  ;;  %v3382_v1 = vmul.f32 %v7579_v13, %v7435_v50  ;;  %v2678_v61 = vadd.f32 %v2614_v31, %v2230_v15 }
 0x17b   : > { %11919 = vst [vmem:[#allocation178_spill] sm:$0xff] %v7581_v29  ;;  %v7597_v0 = vmax.f32 %v1809_v48, 0.0  ;;  %v7603_v49 = vrot.slane %v7581_v29, %v7485_v36  ;;  %v7607_v47 = vrot.slane %v7581_v29, %v7499_v9  ;;  %11925 = vst [vmem:[#allocation184_spill] sm:$0xff] %v7609_v5  ;;  %v2998_v48 = vmul.f32 %v7571_v60, %v7252_v54 }
 0x17c   : > { %3948 = vperm.xlu1 %6024, %v7144_v32   ;;  %3984 = vperm.xlu0 %6023, %v7182_v4   ;;  %v1812_v52 = vpop.f32.mrf.mxu1  ;;  %v7631_v54 = vrot.slane %v7581_v29, %v7530_v2  ;;  %v3061_v37 = vadd.f32 %v2997_v55, %v2677_v62  ;;  %v2227_v55 = vmul.f32 %v2102_v39, %v6855_v40 }
 0x17d   : > { %11922 = vst [vmem:[#allocation181_spill] sm:$0xff] %v7597_v0  ;;  %11923 = vst [vmem:[#allocation182_spill] sm:$0xff] %v7603_v49  ;;  %v7619_v10 = vpop.permute.xlu1 %3204  ;;  %v7621_v43 = vpop.permute.xlu0 %3224  ;;  %v7625_v32 = vrot.slane %v7597_v0, %v7485_v36  ;;  %v2235_v4 = vmul.f32 %v7603_v49, %v6881_v58  ;;  %v7635_v50 = vrot.slane %v7597_v0, %v7499_v9  ;;  %v7651_v49 = vmax.f32 %v1803_v19, 0.0 }
 0x17e   : > { %11924 = vst [vmem:[#allocation183_spill] sm:$0xff] %v7607_v47  ;;  %11926 = vst [vmem:[#allocation185_spill] sm:$0xff] %v7619_v10  ;;  %v1816_v12 = vpop.f32.mrf.mxu1  ;;  %v2619_v15 = vmul.f32 %v7607_v47, %v7034_v20  ;;  %v7641_v31 = vrot.slane %v7597_v0, %v7530_v2  ;;  %v7646_v10 = vrot.slane %v7527_v26, %v7552_v16 }
 0x17f   : > { %11927 = vst [vmem:[#allocation186_spill] sm:$0xff] %v7621_v43  ;;  %11928 = vst [vmem:[#allocation187_spill] sm:$0xff] %v7625_v32  ;;  %v1811_v43 = vadd.f32 %v1810_v46, %v7504_v44  ;;  %v2236_v62 = vmul.f32 %v7625_v32, %v6881_v58  ;;  %v1813_v34 = vadd.f32 %v1812_v52, %v7515_v7 }
 0x180   : > { %11929 = vst [vmem:[#allocation188_spill] sm:$0xff] %v7631_v54  ;;  %11930 = vst [vmem:[#allocation189_spill] sm:$0xff] %v7635_v50  ;;  %3956 = vperm.xlu1 %6024, %v7162_v59   ;;  %3988 = vperm.xlu0 %6023, %v7228_v3   ;;  %v1818_v47 = vpop.f32.mrf.mxu1  ;;  %v2620_v46 = vmul.f32 %v7635_v50, %v7034_v20  ;;  %v2683_v5 = vadd.f32 %v2619_v15, %v2235_v4 }
 0x181   : > { %11931 = vst [vmem:[#allocation190_spill] sm:$0xff] %v7651_v49  ;;  %v7658_v26 = vpop.permute.xlu1 %3212  ;;  %v7660_v21 = vpop.permute.xlu0 %3232  ;;  %v3062_v58 = vadd.f32 %v2998_v48, %v2678_v61  ;;  %v3003_v19 = vmul.f32 %v7631_v54, %v7267_v51  ;;  %v7666_v39 = vrot.slane %v7581_v29, %v7541_v63  ;;  %v7670_v52 = vrot.slane %v7597_v0, %v7541_v63 }
 0x182   : > { %11932 = vst [vmem:[#allocation191_spill] sm:$0xff] %v7658_v26  ;;  %11933 = vst [vmem:[#allocation192_spill] sm:$0xff] %v7660_v21  ;;  %v1817_v32 = vadd.f32 %v1816_v12, %v7504_v44  ;;  %v1820_v20 = vpop.f32.mrf.mxu1  ;;  %v7673_v4 = vadd.f32 %v3381_v42, %v3061_v37  ;;  %v2684_v15 = vadd.f32 %v2620_v46, %v2236_v62  ;;  %v7677_v61 = vmax.f32 %v1811_v43, 0.0 }
 0x183   : > { %v3004_v48 = vmul.f32 %v7641_v31, %v7267_v51  ;;  %v1819_v21 = vadd.f32 %v1818_v47, %v7515_v7  ;;  %v1821_v26 = vadd.f32 %v1820_v20, %v7504_v44  ;;  %v3067_v54 = vadd.f32 %v3003_v19, %v2683_v5 }
 0x184   : > { %11934 = vst [vmem:[#allocation193_spill] sm:$0xff] %v7677_v61  ;;  %v7681_v50 = vmax.f32 %v1813_v34, 0.0  ;;  %3964 = vperm.xlu1 %6024, %v7178_v17   ;;  %3996 = vperm.xlu0 %6023, %v7244_v28   ;;  %v1822_v12 = vpop.f32.mrf.mxu1  ;;  %v3387_v42 = vmul.f32 %v7666_v39, %v7455_v33  ;;  %v2611_v51 = vmul.f32 %v7536_v53, %v7014_v56  ;;  %v7700_v46 = vmax.f32 %v1817_v32, 0.0 }
 0x185   : > { %v3068_v37 = vadd.f32 %v3004_v48, %v2684_v15  ;;  %v1823_v43 = vadd.f32 %v1822_v12, %v7515_v7  ;;  %v7690_v47 = vpop.permute.xlu1 %3220  ;;  %v7692_v62 = vpop.permute.xlu0 %3240  ;;  %v3388_v34 = vmul.f32 %v7670_v52, %v7455_v33  ;;  %v2228_v28 = vmul.f32 %v7549_v57, %v6855_v40 }
 0x186   : > { %11935 = vst [vmem:[#allocation194_spill] sm:$0xff] %v7681_v50  ;;  %11936 = vst [vmem:[#allocation195_spill] sm:$0xff] %v7690_v47  ;;  %v2612_v5 = vmul.f32 %v7557_v8, %v7014_v56  ;;  %v1826_v19 = vpop.f32.mrf.mxu1  ;;  %v7702_v20 = vadd.f32 %v3382_v1, %v3062_v58  ;;  %v7706_v53 = vrot.slane %v7581_v29, %v7552_v16  ;;  %v7712_v33 = vmax.f32 %v1819_v21, 0.0 }
 0x187   : > { %11937 = vst [vmem:[#allocation196_spill] sm:$0xff] %v7692_v62  ;;  %11938 = vst [vmem:[#allocation197_spill] sm:$0xff] %v7700_v46  ;;  %v7710_v15 = vrot.slane %v7597_v0, %v7552_v16  ;;  %v7714_v48 = vadd.f32 %v3387_v42, %v3067_v54  ;;  %v7716_v40 = vadd.f32 %v3388_v34, %v3068_v37  ;;  %v7718_v8 = vmax.f32 %v1821_v26, 0.0 }
 0x188   : > { %11939 = vst [vmem:[#allocation198_spill] sm:$0xff] %v7712_v33  ;;  %v2675_v56 = vadd.f32 %v2611_v51, %v2227_v55  ;;  %v1827_v57 = vadd.f32 %v1826_v19, %v7504_v44  ;;  %3972 = vperm.xlu1 %6024, %v7196_v24   ;;  %4008 = vperm.xlu0 %6023, %v7232_v27   ;;  %v1828_v1 = vpop.f32.mrf.mxu1  ;;  %v7729_v54 = vmax.f32 %v1823_v43, 0.0 }
 0x189   : > { %11940 = vst [vmem:[#allocation199_spill] sm:$0xff] %v7718_v8  ;;  %v2995_v32 = vmul.f32 %v7565_v45, %v7250_v18  ;;  %v7727_v21 = vrot.slane %v7677_v61, %v7485_v36  ;;  %v7731_v58 = vpop.permute.xlu1 %3228  ;;  %v7733_v26 = vpop.permute.xlu0 %3248  ;;  %v2676_v55 = vadd.f32 %v2612_v5, %v2228_v28  ;;  %v2996_v24 = vmul.f32 %v7571_v60, %v7250_v18 }
 0x18a   : > { %11941 = vst [vmem:[#allocation200_spill] sm:$0xff] %v7729_v54  ;;  %11942 = vst [vmem:[#allocation201_spill] sm:$0xff] %v7731_v58  ;;  %v7739_v27 = vrot.slane %v7681_v50, %v7485_v36  ;;  %v1830_v12 = vpop.f32.mrf.mxu1  ;;  %v3379_v45 = vmul.f32 %v7575_v38, %v7414_v23  ;;  %v7747_v42 = vrot.slane %v7677_v61, %v7499_v9  ;;  %v7758_v34 = vmax.f32 %v1827_v57, 0.0  ;;  %v11949_v58 = vld [vmem:[#allocation155_spill] sm:$0xff] }
 0x18b   : > { %11943 = vst [vmem:[#allocation202_spill] sm:$0xff] %v7733_v26  ;;  %v2239_v37 = vmul.f32 %v7727_v21, %v6894_v11  ;;  %v7751_v51 = vrot.slane %v7681_v50, %v7499_v9  ;;  %v1829_v18 = vadd.f32 %v1828_v1, %v7515_v7  ;;  %v3059_v60 = vadd.f32 %v2995_v32, %v2675_v56 }
 0x18c   : > { %v3380_v43 = vmul.f32 %v7579_v13, %v7414_v23  ;;  %v2240_v38 = vmul.f32 %v7739_v27, %v6894_v11  ;;  %11944 = vst [vmem:[#allocation203_spill] sm:$0xff] %v7758_v34  ;;  %3980 = vperm.xlu1 %6024, %v7212_v22   ;;  %4012 = vperm.xlu0 %6023, %v7272_v6   ;;  %v1832_v28 = vpop.f32.mrf.mxu1 }
 0x18d   : > { %v2623_v5 = vmul.f32 %v7747_v42, %v7048_v25  ;;  %v2624_v19 = vmul.f32 %v7751_v51, %v7048_v25  ;;  %v7768_v56 = vrot.slane %v7677_v61, %v7530_v2  ;;  %v1831_v23 = vadd.f32 %v1830_v12, %v7504_v44  ;;  %v7771_v11 = vpop.permute.xlu1 %3236 }
 0x18e   : > { %11945 = vst [vmem:[#allocation204_spill] sm:$0xff] %v7771_v11  ;;  %v3060_v13 = vadd.f32 %v2996_v24, %v2676_v55  ;;  %v7775_v22 = vrot.slane %v7681_v50, %v7530_v2  ;;  %v7779_v6 = vrot.slane %v7677_v61, %v7541_v63  ;;  %v1833_v57 = vadd.f32 %v1832_v28, %v7515_v7  ;;  %v3513_v25 = vpop.permute.xlu0 %3512  ;;  %v1836_v1 = vpop.f32.mrf.mxu1 }
 0x18f   : > { %v2687_v32 = vadd.f32 %v2623_v5, %v2239_v37  ;;  %v2688_v26 = vadd.f32 %v2624_v19, %v2240_v38  ;;  %v3007_v12 = vmul.f32 %v7768_v56, %v7280_v35  ;;  %v3765_v0 = vmul.f32 %v7595_v41, %v3513_v25 }
 0x190   : > { %v3766_v55 = vmul.f32 %v7646_v10, %v3513_v25  ;;  %v1837_v24 = vadd.f32 %v1836_v1, %v7504_v44  ;;  %v7789_v29 = vrot.slane %v7681_v50, %v7541_v63  ;;  %v7791_v62 = vmax.f32 %v1829_v18, 0.0  ;;  %v1838_v37 = vpop.f32.mrf.mxu1 }
 0x191   : > { %v11508_v28 = vmov 6   ;;  %v3443_v38 = vadd.f32 %v3379_v45, %v3059_v60  ;;  %v3008_v5 = vmul.f32 %v7775_v22, %v7280_v35  ;;  %v3071_v19 = vadd.f32 %v3007_v12, %v2687_v32  ;;  %v7801_v11 = vpop.permute.xlu1 %3244 }
 0x192   : > { %11946 = vst [vmem:[#allocation205_spill] sm:$0xff] %v7791_v62  ;;  %6025 = vset.pattern.permute.xlu1 %v11508_v28  ;;  %6034 = vset.pattern.permute.xlu0 %v11508_v28  ;;  %v7797_v25 = vmax.f32 %v1831_v23, 0.0  ;;  %v1839_v1 = vadd.f32 %v1838_v37, %v7515_v7  ;;  %11948 = vst [vmem:[#allocation207_spill] sm:$0xff] %v7801_v11  ;;  %v3444_v18 = vadd.f32 %v3380_v43, %v3060_v13  ;;  %v3525_v60 = vpop.permute.xlu0 %3524  ;;  %v1840_v23 = vpop.f32.mrf.mxu1  ;;  %v11958_v37 = vld [vmem:[#allocation36_spill] sm:$0xff]  ;;  %v11961_v11 = vld [vmem:[#allocation30_spill] sm:$0xff] }
 0x193   : > { %4276 = vperm.xlu1 %6025, %v7020_v14   ;;  %4280 = vperm.xlu0 %6034, %v7041_v30   ;;  %v3391_v28 = vmul.f32 %v7779_v6, %v11949_v58  ;;  %v7806_v47 = vmax.f32 %v1833_v57, 0.0  ;;  %v7809_v45 = vadd.f32 %v3765_v0, %v7673_v4  ;;  %v7812_v35 = vadd.f32 %v3766_v55, %v7702_v20  ;;  %v11956_v20 = vld [vmem:[#allocation184_spill] sm:$0xff] }
 0x194   : > { %11947 = vst [vmem:[#allocation206_spill] sm:$0xff] %v7797_v25  ;;  %v3072_v32 = vadd.f32 %v3008_v5, %v2688_v26  ;;  %v7814_v14 = vmax.f32 %v1837_v24, 0.0  ;;  %v3392_v30 = vmul.f32 %v7789_v29, %v11949_v58  ;;  %v7820_v13 = vrot.slane %v7677_v61, %v7552_v16  ;;  %v1842_v0 = vpop.f32.mrf.mxu1  ;;  %v11984_v25 = vld [vmem:[#allocation91_spill] sm:$0xff] }
 0x195   : > { %11950 = vst [vmem:[#allocation155_spill] sm:$0xff] %v7806_v47  ;;  %11951 = vst [vmem:[#allocation208_spill] sm:$0xff] %v7809_v45  ;;  %v3455_v43 = vadd.f32 %v3391_v28, %v3071_v19  ;;  %v3771_v57 = vmul.f32 %v7706_v53, %v3525_v60  ;;  %v7825_v4 = vrot.slane %v7681_v50, %v7552_v16  ;;  %v7835_v58 = vmax.f32 %v1839_v1, 0.0  ;;  %v11959_v45 = vld [vmem:[#allocation2_spill] sm:$0xff] }
 0x196   : > { %11952 = vst [vmem:[#allocation209_spill] sm:$0xff] %v7812_v35  ;;  %11953 = vst [vmem:[#allocation210_spill] sm:$0xff] %v7814_v14  ;;  %v7829_v26 = vrot.slane %v11956_v20, %v7485_v36  ;;  %v7833_v12 = vrot.slane %v7651_v49, %v7485_v36  ;;  %v3772_v55 = vmul.f32 %v7710_v15, %v3525_v60  ;;  %v3509_v5 = vpop.permute.xlu1 %3508  ;;  %v3533_v19 = vpop.permute.xlu0 %3532 }
 0x197   : > { %11954 = vst [vmem:[#allocation211_spill] sm:$0xff] %v7820_v13  ;;  %11955 = vst [vmem:[#allocation212_spill] sm:$0xff] %v7825_v4  ;;  %v1841_v24 = vadd.f32 %v1840_v23, %v7504_v44  ;;  %v1843_v28 = vadd.f32 %v1842_v0, %v7515_v7  ;;  %4284 = vperm.xlu1 %6025, %v11958_v37   ;;  %4340 = vperm.xlu0 %6034, %v7162_v59   ;;  %v1846_v37 = vpop.f32.mrf.mxu1 }
 0x198   : > { %11957 = vst [vmem:[#allocation213_spill] sm:$0xff] %v7835_v58  ;;  %v3456_v35 = vadd.f32 %v3392_v30, %v3072_v32  ;;  %v2231_v50 = vmul.f32 %v7829_v26, %v11959_v45  ;;  %v7846_v1 = vrot.slane %v11956_v20, %v7499_v9  ;;  %v7850_v60 = vrot.slane %v7651_v49, %v7499_v9 }
 0x199   : > { %v3763_v23 = vmul.f32 %v7595_v41, %v3509_v5  ;;  %v3764_v0 = vmul.f32 %v7646_v10, %v3509_v5  ;;  %v3775_v59 = vmul.f32 %v7820_v13, %v3533_v19  ;;  %v2232_v32 = vmul.f32 %v7833_v12, %v11959_v45  ;;  %v1848_v13 = vpop.f32.mrf.mxu1 }
 0x19a   : > { %v7858_v30 = vadd.f32 %v3771_v57, %v7714_v48  ;;  %v3776_v61 = vmul.f32 %v7825_v4, %v3533_v19  ;;  %v2615_v58 = vmul.f32 %v7846_v1, %v11961_v11  ;;  %v2616_v14 = vmul.f32 %v7850_v60, %v11961_v11  ;;  %v11965_v48 = vld [vmem:[#allocation32_spill] sm:$0xff]  ;;  %v3517_v11 = vpop.permute.xlu1 %3516 }
 0x19b   : > { %v7866_v41 = vadd.f32 %v3772_v55, %v7716_v40  ;;  %v7868_v10 = vmax.f32 %v1841_v24, 0.0  ;;  %v7870_v5 = vmax.f32 %v1843_v28, 0.0  ;;  %v1847_v45 = vadd.f32 %v1846_v37, %v7504_v44  ;;  %4288 = vperm.xlu1 %6025, %v11965_v48   ;;  %4348 = vperm.xlu0 %6034, %v7178_v17  }
 0x19c   : > { %11960 = vst [vmem:[#allocation36_spill] sm:$0xff] %v7858_v30  ;;  %v7875_v57 = vadd.f32 %v3763_v23, %v3443_v38  ;;  %v7877_v19 = vadd.f32 %v3764_v0, %v3444_v18  ;;  %v7879_v30 = vadd.f32 %v3775_v59, %v3455_v43  ;;  %v2679_v40 = vadd.f32 %v2615_v58, %v2231_v50  ;;  %v11970_v43 = vld [vmem:[#allocation84_spill] sm:$0xff] }
 0x19d   : > { %11962 = vst [vmem:[#allocation2_spill] sm:$0xff] %v7866_v41  ;;  %11963 = vst [vmem:[#allocation30_spill] sm:$0xff] %v7868_v10  ;;  %v2680_v55 = vadd.f32 %v2616_v14, %v2232_v32  ;;  %v7883_v24 = vrot.slane %v11956_v20, %v7530_v2  ;;  %v7887_v28 = vrot.slane %v7651_v49, %v7530_v2  ;;  %v11973_v0 = vld [vmem:[#allocation148_spill] sm:$0xff]  ;;  %v11983_v10 = vld [vmem:[#allocation55_spill] sm:$0xff] }
 0x19e   : > { %11964 = vst [vmem:[#allocation214_spill] sm:$0xff] %v7870_v5  ;;  %11966 = vst [vmem:[#allocation32_spill] sm:$0xff] %v7875_v57  ;;  %v7891_v17 = vrot.slane %v11956_v20, %v7541_v63  ;;  %v7893_v38 = vadd.f32 %v3776_v61, %v3456_v35  ;;  %v1849_v18 = vadd.f32 %v1848_v13, %v7515_v7  ;;  %v11972_v13 = vld [vmem:[#allocation50_spill] sm:$0xff]  ;;  %v11982_v5 = vld [vmem:[#allocation37_spill] sm:$0xff] }
 0x19f   : > { %11967 = vst [vmem:[#allocation215_spill] sm:$0xff] %v7877_v19  ;;  %11968 = vst [vmem:[#allocation216_spill] sm:$0xff] %v7879_v30  ;;  %v7898_v50 = vrot.slane %v7651_v49, %v7541_v63  ;;  %v7902_v14 = vrot.slane %v11956_v20, %v7552_v16  ;;  %v2999_v58 = vmul.f32 %v7883_v24, %v11970_v43  ;;  %4344 = vperm.xlu1 %6025, %v11972_v13   ;;  %v7927_v30 = vpop.permute.xlu1 %3520  ;;  %v11976_v13 = vld [vmem:[#allocation7_spill] sm:$0xff] }
 0x1a0   : > { %11969 = vst [vmem:[#allocation217_spill] sm:$0xff] %v7893_v38  ;;  %v3000_v23 = vmul.f32 %v7887_v28, %v11970_v43  ;;  %v7910_v61 = vrot.slane %v7651_v49, %v7552_v16  ;;  %v7914_v35 = vrot.slane %v7700_v46, %v7485_v36  ;;  %v3383_v59 = vmul.f32 %v7891_v17, %v11973_v0  ;;  %v1850_v43 = vpop.f32.mrf.mxu1  ;;  %v11975_v38 = vld [vmem:[#allocation34_spill] sm:$0xff] }
 0x1a1   : > { %v3384_v37 = vmul.f32 %v7898_v50, %v11973_v0  ;;  %v3767_v32 = vmul.f32 %v7902_v14, %v3517_v11  ;;  %v7924_v48 = vrot.slane %v7712_v33, %v7485_v36  ;;  %4296 = vperm.xlu0 %6034, %v11975_v38   ;;  %v3063_v41 = vadd.f32 %v2999_v58, %v2679_v40 }
 0x1a2   : > { %11971 = vst [vmem:[#allocation84_spill] sm:$0xff] %v7914_v35  ;;  %v3064_v19 = vadd.f32 %v3000_v23, %v2680_v55  ;;  %v2243_v57 = vmul.f32 %v7914_v35, %v11976_v13  ;;  %v7933_v0 = vrot.slane %v7700_v46, %v7499_v9  ;;  %v7939_v20 = vrot.slane %v7712_v33, %v7499_v9 }
 0x1a3   : > { %11974 = vst [vmem:[#allocation50_spill] sm:$0xff] %v7924_v48  ;;  %v2244_v49 = vmul.f32 %v7924_v48, %v11976_v13  ;;  %v7943_v38 = vrot.slane %v7700_v46, %v7530_v2  ;;  %v7947_v40 = vrot.slane %v7712_v33, %v7530_v2  ;;  %v7949_v55 = vmax.f32 %v1847_v45, 0.0  ;;  %4352 = vperm.xlu1 %6025, %v11983_v10   ;;  %v1852_v45 = vpop.f32.mrf.mxu1 }
 0x1a4   : > { %11977 = vst [vmem:[#allocation148_spill] sm:$0xff] %v7933_v0  ;;  %v7951_v58 = vmax.f32 %v1849_v18, 0.0  ;;  %v3768_v23 = vmul.f32 %v7910_v61, %v3517_v11  ;;  %v2627_v13 = vmul.f32 %v7933_v0, %v11982_v5  ;;  %v3447_v48 = vadd.f32 %v3383_v59, %v3063_v41  ;;  %v7964_v18 = vpop.permute.xlu1 %3528  ;;  %v3541_v11 = vpop.permute.xlu0 %3540 }
 0x1a5   : > { %11978 = vst [vmem:[#allocation34_spill] sm:$0xff] %v7943_v38  ;;  %11979 = vst [vmem:[#allocation7_spill] sm:$0xff] %v7947_v40  ;;  %v3448_v35 = vadd.f32 %v3384_v37, %v3064_v19  ;;  %v2628_v4 = vmul.f32 %v7939_v20, %v11982_v5  ;;  %v7961_v47 = vrot.slane %v7700_v46, %v7541_v63 }
 0x1a6   : > { %11980 = vst [vmem:[#allocation218_spill] sm:$0xff] %v7949_v55  ;;  %11981 = vst [vmem:[#allocation219_spill] sm:$0xff] %v7951_v58  ;;  %v6331_v55 = vld [vmem:[%s6468_s26 + $0x38] sm:$0xff]  ;;  %v2691_v58 = vadd.f32 %v2627_v13, %v2243_v57  ;;  %v3011_v0 = vmul.f32 %v7943_v38, %v11984_v25  ;;  %v3012_v41 = vmul.f32 %v7947_v40, %v11984_v25  ;;  %v11986_v13 = vld [vmem:[#allocation3_spill] sm:$0xff]  ;;  %v11987_v38 = vmov 5  }
 0x1a7   : > { %4304 = vperm.xlu0 %6034, %v6331_v55   ;;  %v7972_v10 = vrot.slane %v7712_v33, %v7541_v63  ;;  %v7974_v5 = vadd.f32 %v3767_v32, %v3447_v48  ;;  %v2692_v19 = vadd.f32 %v2628_v4, %v2244_v49  ;;  %v7978_v59 = vrot.slane %v7700_v46, %v7552_v16  ;;  %v11988_v49 = vld [vmem:[#allocation160_spill] sm:$0xff] }
 0x1a8   : > { %v7982_v57 = vrot.slane %v7712_v33, %v7552_v16  ;;  %v3075_v37 = vadd.f32 %v3011_v0, %v2691_v58  ;;  %v1851_v55 = vadd.f32 %v1850_v43, %v7504_v44  ;;  %v1853_v25 = vadd.f32 %v1852_v45, %v7515_v7  ;;  %6026 = vset.pattern.permute.xlu1 %v11987_v38  ;;  %v7995_v0 = vpop.permute.xlu1 %3536  ;;  %v11990_v45 = vld [vmem:[#allocation31_spill] sm:$0xff] }
 0x1a9   : > { %11985 = vst [vmem:[#allocation37_spill] sm:$0xff] %v7974_v5  ;;  %v2233_v40 = vmul.f32 %v7829_v26, %v11986_v13  ;;  %v3076_v32 = vadd.f32 %v3012_v41, %v2692_v19  ;;  %v3395_v4 = vmul.f32 %v7961_v47, %v11988_v49  ;;  %v3779_v48 = vmul.f32 %v7978_v59, %v3541_v11  ;;  %v11991_v19 = vld [vmem:[#allocation68_spill] sm:$0xff] }
 0x1aa   : > { %v2234_v5 = vmul.f32 %v7833_v12, %v11986_v13  ;;  %v7997_v43 = vadd.f32 %v3768_v23, %v3448_v35  ;;  %v3396_v26 = vmul.f32 %v7972_v10, %v11988_v49  ;;  %v3780_v58 = vmul.f32 %v7982_v57, %v3541_v11  ;;  %3992 = vperm.xlu1 %6026, %v11991_v19   ;;  %v11994_v13 = vld [vmem:[#allocation87_spill] sm:$0xff]  ;;  %v11996_v19 = vld [vmem:[#allocation142_spill] sm:$0xff] }
 0x1ab   : > { %4372 = vperm.xlu0 %6034, %v7228_v3   ;;  %v2617_v41 = vmul.f32 %v7846_v1, %v11990_v45  ;;  %v3459_v33 = vadd.f32 %v3395_v4, %v3075_v37  ;;  %v8005_v46 = vmax.f32 %v1851_v55, 0.0  ;;  %v8007_v12 = vmax.f32 %v1853_v25, 0.0  ;;  %v6332_v25 = vld [vmem:[%s6468_s26 + $0x58] sm:$0xff] }
 0x1ac   : > { %11989 = vst [vmem:[#allocation55_spill] sm:$0xff] %v7997_v43  ;;  %v2618_v3 = vmul.f32 %v7850_v60, %v11990_v45  ;;  %v3460_v35 = vadd.f32 %v3396_v26, %v3076_v32  ;;  %v3001_v49 = vmul.f32 %v7883_v24, %v11994_v13  ;;  %v3002_v11 = vmul.f32 %v7887_v28, %v11994_v13  ;;  %v8022_v60 = vpop.permute.xlu1 %3544  ;;  %v8052_v26 = vld [vmem:[%s6468_s26 + $0x20] sm:$0xff] }
 0x1ad   : > { %11992 = vst [vmem:[#allocation91_spill] sm:$0xff] %v8005_v46  ;;  %11993 = vst [vmem:[#allocation3_spill] sm:$0xff] %v8007_v12  ;;  %v2681_v23 = vadd.f32 %v2617_v41, %v2233_v40  ;;  %v8015_v43 = vadd.f32 %v3779_v48, %v3459_v33  ;;  %v3385_v37 = vmul.f32 %v7891_v17, %v11996_v19  ;;  %v1856_v17 = vpop.f32.mrf.mxu1  ;;  %v12001_v41 = vld [vmem:[#allocation9_spill] sm:$0xff]  ;;  %v8094_v12 = vld [vmem:[%s6468_s26 + $0xa0] sm:$0xff] }
 0x1ae   : > { %v2682_v1 = vadd.f32 %v2618_v3, %v2234_v5  ;;  %v3386_v55 = vmul.f32 %v7898_v50, %v11996_v19  ;;  %v8026_v24 = vrot.slane %v7718_v8, %v7485_v36  ;;  %v8030_v33 = vrot.slane %v7729_v54, %v7485_v36  ;;  %12000 = vst [vmem:[#allocation87_spill] sm:$0xff] %v8052_v26 }
 0x1af   : > { %11995 = vst [vmem:[#allocation160_spill] sm:$0xff] %v8015_v43  ;;  %4320 = vperm.xlu0 %6034, %v6332_v25   ;;  %v3065_v40 = vadd.f32 %v3001_v49, %v2681_v23  ;;  %v8034_v28 = vrot.slane %v7718_v8, %v7499_v9  ;;  %v11997_v5 = vmov 6   ;;  %v8037_v50 = vadd.f32 %v3780_v58, %v3460_v35  ;;  %v12002_v35 = vld [vmem:[#allocation39_spill] sm:$0xff]  ;;  %12008 = vst [vmem:[#allocation220_spill] sm:$0xff] %v8094_v12 }
 0x1b0   : > { %6027 = vset.pattern.permute.xlu1 %v11997_v5  ;;  %v8041_v32 = vrot.slane %v7729_v54, %v7499_v9  ;;  %v8045_v4 = vrot.slane %v7718_v8, %v7530_v2  ;;  %v8049_v48 = vrot.slane %v7729_v54, %v7530_v2  ;;  %v3066_v45 = vadd.f32 %v3002_v11, %v2682_v1  ;;  %v8068_v1 = vld [vmem:[%s6468_s26 + $0x68] sm:$0xff]  ;;  %v8071_v25 = vpop.permute.xlu1 %3552 }
 0x1b1   : > { %11998 = vst [vmem:[#allocation31_spill] sm:$0xff] %v8037_v50  ;;  %4292 = vperm.xlu1 %6027, %v8052_v26   ;;  %v2247_v58 = vmul.f32 %v8026_v24, %v12001_v41  ;;  %v2248_v3 = vmul.f32 %v8030_v33, %v12001_v41  ;;  %v2631_v23 = vmul.f32 %v8034_v28, %v12002_v35  ;;  %12003 = vst [vmem:[#allocation142_spill] sm:$0xff] %v8068_v1  ;;  %v3549_v41 = vpop.permute.xlu0 %3548  ;;  %v12005_v43 = vld [vmem:[#allocation95_spill] sm:$0xff] }
 0x1b2   : > { %11999 = vst [vmem:[#allocation68_spill] sm:$0xff] %v8049_v48  ;;  %v3449_v13 = vadd.f32 %v3385_v37, %v3065_v40  ;;  %v3769_v49 = vmul.f32 %v7902_v14, %v7927_v30  ;;  %v3770_v19 = vmul.f32 %v7910_v61, %v7927_v30  ;;  %v2632_v11 = vmul.f32 %v8041_v32, %v12002_v35  ;;  %v1858_v61 = vpop.f32.mrf.mxu1 }
 0x1b3   : > { %4328 = vperm.xlu0 %6034, %v8068_v1   ;;  %12004 = vst [vmem:[#allocation9_spill] sm:$0xff] %v8071_v25  ;;  %v2695_v50 = vadd.f32 %v2631_v23, %v2247_v58  ;;  %v3015_v37 = vmul.f32 %v8045_v4, %v12005_v43  ;;  %v8077_v14 = vrot.slane %v7718_v8, %v7541_v63  ;;  %v12009_v1 = vld [vmem:[#allocation165_spill] sm:$0xff] }
 0x1b4   : > { %v8081_v30 = vrot.slane %v7729_v54, %v7541_v63  ;;  %v2696_v40 = vadd.f32 %v2632_v11, %v2248_v3  ;;  %v3016_v35 = vmul.f32 %v8049_v48, %v12005_v43  ;;  %v8087_v58 = vrot.slane %v7718_v8, %v7552_v16  ;;  %v8105_v48 = vld [vmem:[%s6468_s26 + $0x78] sm:$0xff] }
 0x1b5   : > { %12006 = vst [vmem:[#allocation39_spill] sm:$0xff] %v8077_v14  ;;  %v8091_v23 = vrot.slane %v7729_v54, %v7552_v16  ;;  %4356 = vperm.xlu1 %6027, %v8094_v12   ;;  %v3450_v46 = vadd.f32 %v3386_v55, %v3066_v45  ;;  %v3079_v26 = vadd.f32 %v3015_v37, %v2695_v50  ;;  %12011 = vst [vmem:[#allocation221_spill] sm:$0xff] %v8105_v48  ;;  %v8108_v12 = vpop.permute.xlu1 %3560  ;;  %v12013_v45 = vld [vmem:[#allocation4_spill] sm:$0xff] }
 0x1b6   : > { %12007 = vst [vmem:[#allocation95_spill] sm:$0xff] %v8087_v58  ;;  %v3399_v3 = vmul.f32 %v8077_v14, %v12009_v1  ;;  %v1857_v11 = vadd.f32 %v1856_v17, %v7504_v44  ;;  %v8100_v43 = vadd.f32 %v3769_v49, %v3449_v13  ;;  %v3080_v8 = vadd.f32 %v3016_v35, %v2696_v40  ;;  %v12014_v17 = vld [vmem:[#allocation182_spill] sm:$0xff]  ;;  %v12015_v13 = vld [vmem:[#allocation187_spill] sm:$0xff]  ;;  %v12017_v35 = vld [vmem:[#allocation33_spill] sm:$0xff] }
 0x1b7   : > { %v3783_v25 = vmul.f32 %v8087_v58, %v3549_v41  ;;  %v1859_v54 = vadd.f32 %v1858_v61, %v7515_v7  ;;  %4336 = vperm.xlu0 %6034, %v8105_v48   ;;  %12012 = vst [vmem:[#allocation222_spill] sm:$0xff] %v8108_v12  ;;  %v3400_v55 = vmul.f32 %v8081_v30, %v12009_v1  ;;  %v12019_v48 = vld [vmem:[#allocation189_spill] sm:$0xff]  ;;  %v8124_v14 = vld [vmem:[%s6468_s26 + $0xa8] sm:$0xff] }
 0x1b8   : > { %12010 = vst [vmem:[#allocation165_spill] sm:$0xff] %v8100_v43  ;;  %v3463_v50 = vadd.f32 %v3399_v3, %v3079_v26  ;;  %v2237_v37 = vmul.f32 %v12014_v17, %v12013_v45  ;;  %v2238_v49 = vmul.f32 %v12015_v13, %v12013_v45  ;;  %v8116_v40 = vadd.f32 %v3770_v19, %v3450_v46  ;;  %v12018_v43 = vld [vmem:[#allocation183_spill] sm:$0xff]  ;;  %v12024_v45 = vld [vmem:[#allocation90_spill] sm:$0xff]  ;;  %v12025_v17 = vld [vmem:[#allocation188_spill] sm:$0xff] }
 0x1b9   : > { %v3784_v61 = vmul.f32 %v8091_v23, %v3549_v41  ;;  %v2621_v58 = vmul.f32 %v12018_v43, %v12017_v35  ;;  %v2622_v12 = vmul.f32 %v12019_v48, %v12017_v35  ;;  %12020 = vst [vmem:[#allocation182_spill] sm:$0xff] %v8124_v14  ;;  %4360 = vperm.xlu1 %6027, %v8124_v14   ;;  %v8129_v3 = vmax.f32 %v1857_v11, 0.0  ;;  %v8138_v35 = vpop.permute.xlu1 %3568  ;;  %v6338_v11 = vld [vmem:[%s6468_s26] sm:$0xff]  ;;  %v12036_v14 = vld [vmem:[#allocation99_spill] sm:$0xff] }
 0x1ba   : > { %12016 = vst [vmem:[#allocation4_spill] sm:$0xff] %v8116_v40  ;;  %v3464_v26 = vadd.f32 %v3400_v55, %v3080_v8  ;;  %v8127_v1 = vadd.f32 %v3783_v25, %v3463_v50  ;;  %v8131_v46 = vmax.f32 %v1859_v54, 0.0  ;;  %v3005_v43 = vmul.f32 %v12025_v17, %v12024_v45  ;;  %12026 = vst [vmem:[#allocation189_spill] sm:$0xff] %v8138_v35  ;;  %v12027_v8 = vld [vmem:[#allocation145_spill] sm:$0xff] }
 0x1bb   : > { %12022 = vst [vmem:[#allocation33_spill] sm:$0xff] %v8129_v3  ;;  %v2685_v19 = vadd.f32 %v2621_v58, %v2237_v37  ;;  %v2686_v41 = vadd.f32 %v2622_v12, %v2238_v49  ;;  %v3006_v48 = vmul.f32 %v7641_v31, %v12024_v45  ;;  %v11553_v13 = vmov 7   ;;  %v1860_v31 = vpop.f32.mrf.mxu1  ;;  %v3557_v37 = vpop.permute.xlu0 %3556  ;;  %v12028_v49 = vld [vmem:[#allocation11_spill] sm:$0xff] }
 0x1bc   : > { %12021 = vst [vmem:[#allocation187_spill] sm:$0xff] %v8127_v1  ;;  %12023 = vst [vmem:[#allocation183_spill] sm:$0xff] %v8131_v46  ;;  %6041 = vset.pattern.permute.xlu0 %v11553_v13  ;;  %v3389_v25 = vmul.f32 %v7666_v39, %v12027_v8  ;;  %v3390_v54 = vmul.f32 %v7670_v52, %v12027_v8  ;;  %v8146_v12 = vrot.slane %v7758_v34, %v7485_v36 }
 0x1bd   : > { %v8150_v58 = vrot.slane %v7791_v62, %v7485_v36  ;;  %4660 = vperm.xlu0 %6041, %v6338_v11   ;;  %v3069_v55 = vadd.f32 %v3005_v43, %v2685_v19  ;;  %v3070_v50 = vadd.f32 %v3006_v48, %v2686_v41  ;;  %v8155_v39 = vrot.slane %v7758_v34, %v7499_v9  ;;  %v8175_v43 = vld [vmem:[%s6468_s26 + $0xd8] sm:$0xff]  ;;  %v8186_v1 = vpop.permute.xlu1 %3576 }
 0x1be   : > { %v8159_v52 = vrot.slane %v7791_v62, %v7499_v9  ;;  %6028 = vset.pattern.permute.xlu1 %v11987_v38  ;;  %v2251_v45 = vmul.f32 %v8146_v12, %v12028_v49  ;;  %v8168_v19 = vrot.slane %v7758_v34, %v7530_v2  ;;  %v8172_v41 = vrot.slane %v7791_v62, %v7530_v2  ;;  %v12032_v11 = vld [vmem:[#allocation41_spill] sm:$0xff] }
 0x1bf   : > { %v2252_v17 = vmul.f32 %v8150_v58, %v12028_v49  ;;  %12030 = vst [vmem:[#allocation188_spill] sm:$0xff] %v8175_v43  ;;  %4000 = vperm.xlu1 %6028, %v8175_v43   ;;  %v8178_v48 = vadd.f32 %v3784_v61, %v3464_v26  ;;  %v3773_v8 = vmul.f32 %v7706_v53, %v7964_v18  ;;  %12033 = vst [vmem:[#allocation11_spill] sm:$0xff] %v8186_v1  ;;  %v1862_v53 = vpop.f32.mrf.mxu1  ;;  %v6340_v26 = vld [vmem:[%s6468_s26 + $0x18] sm:$0xff] }
 0x1c0   : > { %12029 = vst [vmem:[#allocation90_spill] sm:$0xff] %v8172_v41  ;;  %v2635_v49 = vmul.f32 %v8155_v39, %v12032_v11  ;;  %v2636_v13 = vmul.f32 %v8159_v52, %v12032_v11  ;;  %v3453_v40 = vadd.f32 %v3389_v25, %v3069_v55  ;;  %v3774_v46 = vmul.f32 %v7710_v15, %v7964_v18  ;;  %v12037_v55 = vld [vmem:[#allocation170_spill] sm:$0xff] }
 0x1c1   : > { %12031 = vst [vmem:[#allocation145_spill] sm:$0xff] %v8178_v48  ;;  %v8192_v3 = vrot.slane %v7758_v34, %v7541_v63  ;;  %v8196_v61 = vrot.slane %v7791_v62, %v7541_v63  ;;  %4672 = vperm.xlu0 %6041, %v6340_v26   ;;  %v3019_v25 = vmul.f32 %v8168_v19, %v12036_v14 }
 0x1c2   : > { %v2699_v48 = vadd.f32 %v2635_v49, %v2251_v45  ;;  %v2700_v11 = vadd.f32 %v2636_v13, %v2252_v17  ;;  %v3020_v15 = vmul.f32 %v8172_v41, %v12036_v14  ;;  %v3454_v18 = vadd.f32 %v3390_v54, %v3070_v50  ;;  %v8216_v54 = vpop.permute.xlu0 %3564  ;;  %v8219_v50 = vld [vmem:[%s6468_s26 + $0x30] sm:$0xff]  ;;  %v8222_v49 = vpop.permute.xlu1 %3584 }
 0x1c3   : > { %12034 = vst [vmem:[#allocation41_spill] sm:$0xff] %v8192_v3  ;;  %12035 = vst [vmem:[#allocation223_spill] sm:$0xff] %v8196_v61  ;;  %v3403_v1 = vmul.f32 %v8192_v3, %v12037_v55  ;;  %v8207_v35 = vrot.slane %v7758_v34, %v7552_v16  ;;  %v8211_v26 = vrot.slane %v7791_v62, %v7552_v16  ;;  %6029 = vset.pattern.permute.xlu1 %v11997_v5  ;;  %v12040_v3 = vld [vmem:[#allocation5_spill] sm:$0xff] }
 0x1c4   : > { %v3083_v13 = vadd.f32 %v3019_v25, %v2699_v48  ;;  %v3084_v45 = vadd.f32 %v3020_v15, %v2700_v11  ;;  %v1861_v17 = vadd.f32 %v1860_v31, %v7504_v44  ;;  %v1863_v14 = vadd.f32 %v1862_v53, %v7515_v7  ;;  %4300 = vperm.xlu1 %6029, %v8219_v50   ;;  %v6342_v53 = vld [vmem:[%s6468_s26 + $0x88] sm:$0xff] }
 0x1c5   : > { %12038 = vst [vmem:[#allocation99_spill] sm:$0xff] %v8207_v35  ;;  %12039 = vst [vmem:[#allocation170_spill] sm:$0xff] %v8222_v49  ;;  %v3404_v62 = vmul.f32 %v8196_v61, %v12037_v55  ;;  %v3787_v34 = vmul.f32 %v8207_v35, %v3557_v37  ;;  %v2241_v48 = vmul.f32 %v7727_v21, %v12040_v3  ;;  %4728 = vperm.xlu0 %6041, %v6342_v53   ;;  %v12044_v35 = vld [vmem:[#allocation35_spill] sm:$0xff] }
 0x1c6   : > { %v2242_v31 = vmul.f32 %v7739_v27, %v12040_v3  ;;  %v8232_v11 = vadd.f32 %v3773_v8, %v3453_v40  ;;  %v8234_v25 = vadd.f32 %v3774_v46, %v3454_v18  ;;  %v3467_v15 = vadd.f32 %v3403_v1, %v3083_v13  ;;  %v12047_v40 = vld [vmem:[#allocation94_spill] sm:$0xff]  ;;  %v12050_v18 = vld [vmem:[#allocation149_spill] sm:$0xff]  ;;  %v12052_v13 = vld [vmem:[#allocation155_spill] sm:$0xff] }
 0x1c7   : > { %v3788_v49 = vmul.f32 %v8211_v26, %v3557_v37  ;;  %v3468_v55 = vadd.f32 %v3404_v62, %v3084_v45  ;;  %v8237_v61 = vmax.f32 %v1861_v17, 0.0  ;;  %v2625_v21 = vmul.f32 %v7747_v42, %v12044_v35  ;;  %v8252_v37 = vld [vmem:[%s6468_s26 + $0xb0] sm:$0xff]  ;;  %v8255_v62 = vpop.permute.xlu1 %3592  ;;  %v8278_v17 = vpop.permute.xlu0 %3572 }
 0x1c8   : > { %12041 = vst [vmem:[#allocation5_spill] sm:$0xff] %v8232_v11  ;;  %12042 = vst [vmem:[#allocation224_spill] sm:$0xff] %v8234_v25  ;;  %v2626_v41 = vmul.f32 %v7751_v51, %v12044_v35  ;;  %v8243_v27 = vadd.f32 %v3787_v34, %v3467_v15  ;;  %v8245_v3 = vmax.f32 %v1863_v14, 0.0  ;;  %v3009_v46 = vmul.f32 %v7768_v56, %v12047_v40  ;;  %v6344_v35 = vld [vmem:[%s6468_s26 + $0x98] sm:$0xff]  ;;  %v12051_v56 = vld [vmem:[#allocation206_spill] sm:$0xff] }
 0x1c9   : > { %12043 = vst [vmem:[#allocation225_spill] sm:$0xff] %v8237_v61  ;;  %v3010_v1 = vmul.f32 %v7775_v22, %v12047_v40  ;;  %12048 = vst [vmem:[#allocation94_spill] sm:$0xff] %v8252_v37  ;;  %4364 = vperm.xlu1 %6029, %v8252_v37   ;;  %v2689_v42 = vadd.f32 %v2625_v21, %v2241_v48  ;;  %v3393_v51 = vmul.f32 %v7779_v6, %v12050_v18  ;;  %v12055_v15 = vld [vmem:[#allocation13_spill] sm:$0xff]  ;;  %v12060_v11 = vld [vmem:[#allocation103_spill] sm:$0xff] }
 0x1ca   : > { %12045 = vst [vmem:[#allocation35_spill] sm:$0xff] %v8243_v27  ;;  %12046 = vst [vmem:[#allocation226_spill] sm:$0xff] %v8245_v3  ;;  %v2690_v8 = vadd.f32 %v2626_v41, %v2242_v31  ;;  %v3394_v34 = vmul.f32 %v7789_v29, %v12050_v18  ;;  %4736 = vperm.xlu0 %6041, %v6344_v35   ;;  %v8264_v22 = vrot.slane %v12051_v56, %v7485_v36  ;;  %v1866_v29 = vpop.f32.mrf.mxu1  ;;  %v12056_v18 = vld [vmem:[#allocation43_spill] sm:$0xff] }
 0x1cb   : > { %12049 = vst [vmem:[#allocation227_spill] sm:$0xff] %v8255_v62  ;;  %v8268_v45 = vrot.slane %v12052_v13, %v7485_v36  ;;  %v8272_v41 = vrot.slane %v12051_v56, %v7499_v9  ;;  %v8276_v6 = vrot.slane %v12052_v13, %v7499_v9  ;;  %v3073_v14 = vadd.f32 %v3009_v46, %v2689_v42  ;;  %v8297_v42 = vpop.permute.xlu1 %3600  ;;  %v12059_v27 = vld [vmem:[#allocation211_spill] sm:$0xff] }
 0x1cc   : > { %v3074_v48 = vadd.f32 %v3010_v1, %v2690_v8  ;;  %v8282_v31 = vrot.slane %v12051_v56, %v7530_v2  ;;  %v8286_v53 = vrot.slane %v12052_v13, %v7530_v2  ;;  %v2255_v21 = vmul.f32 %v8264_v22, %v12055_v15  ;;  %v6345_v1 = vld [vmem:[%s6468_s26 + $0xb8] sm:$0xff]  ;;  %12057 = vst [vmem:[#allocation13_spill] sm:$0xff] %v8297_v42  ;;  %v6346_v37 = vld [vmem:[%s6468_s26 + $0x28] sm:$0xff] }
 0x1cd   : > { %v2256_v40 = vmul.f32 %v8268_v45, %v12055_v15  ;;  %v2639_v35 = vmul.f32 %v8272_v41, %v12056_v18  ;;  %v2640_v46 = vmul.f32 %v8276_v6, %v12056_v18  ;;  %4368 = vperm.xlu1 %6029, %v6345_v1   ;;  %v8299_v8 = vadd.f32 %v3788_v49, %v3468_v55  ;;  %v1868_v55 = vpop.f32.mrf.mxu1 }
 0x1ce   : > { %12053 = vst [vmem:[#allocation149_spill] sm:$0xff] %v8282_v31  ;;  %12054 = vst [vmem:[#allocation228_spill] sm:$0xff] %v8286_v53  ;;  %v3777_v25 = vmul.f32 %v12059_v27, %v7995_v0  ;;  %v3023_v62 = vmul.f32 %v8282_v31, %v12060_v11  ;;  %v3024_v15 = vmul.f32 %v8286_v53, %v12060_v11  ;;  %4680 = vperm.xlu0 %6041, %v6346_v37   ;;  %v8328_v31 = vpop.permute.xlu0 %3580 }
 0x1cf   : > { %12058 = vst [vmem:[#allocation43_spill] sm:$0xff] %v8299_v8  ;;  %v2703_v3 = vadd.f32 %v2639_v35, %v2255_v21  ;;  %v2704_v61 = vadd.f32 %v2640_v46, %v2256_v40  ;;  %v8310_v18 = vrot.slane %v12051_v56, %v7541_v63  ;;  %v8314_v49 = vrot.slane %v12052_v13, %v7541_v63  ;;  %v12061_v8 = vld [vmem:[#allocation212_spill] sm:$0xff]  ;;  %v12064_v46 = vld [vmem:[#allocation173_spill] sm:$0xff] }
 0x1d0   : > { %v3457_v27 = vadd.f32 %v3393_v51, %v3073_v14  ;;  %v3778_v42 = vmul.f32 %v12061_v8, %v7995_v0  ;;  %v8320_v11 = vrot.slane %v12051_v56, %v7552_v16  ;;  %v8324_v37 = vrot.slane %v12052_v13, %v7552_v16  ;;  %v8331_v14 = vpop.permute.xlu1 %3608 }
 0x1d1   : > { %v3458_v21 = vadd.f32 %v3394_v34, %v3074_v48  ;;  %v3087_v40 = vadd.f32 %v3023_v62, %v2703_v3  ;;  %v3088_v35 = vadd.f32 %v3024_v15, %v2704_v61  ;;  %v3407_v53 = vmul.f32 %v8310_v18, %v12064_v46  ;;  %12066 = vst [vmem:[#allocation212_spill] sm:$0xff] %v8331_v14  ;;  %v6347_v3 = vld [vmem:[%s6468_s26 + $0x8] sm:$0xff]  ;;  %v12068_v48 = vld [vmem:[#allocation6_spill] sm:$0xff]  ;;  %v12069_v15 = vld [vmem:[#allocation84_spill] sm:$0xff] }
 0x1d2   : > { %12062 = vst [vmem:[#allocation211_spill] sm:$0xff] %v8320_v11  ;;  %12063 = vst [vmem:[#allocation103_spill] sm:$0xff] %v8324_v37  ;;  %v12065_v51 = vmov 7   ;;  %v8333_v0 = vadd.f32 %v3777_v25, %v3457_v27  ;;  %v3791_v8 = vmul.f32 %v8320_v11, %v8216_v54  ;;  %v1867_v13 = vadd.f32 %v1866_v29, %v7504_v44  ;;  %v12070_v25 = vld [vmem:[#allocation50_spill] sm:$0xff]  ;;  %4684 = vperm.xlu0 %6041, %v8219_v50  }
 0x1d3   : > { %6030 = vset.pattern.permute.xlu1 %v12065_v51  ;;  %v1869_v34 = vadd.f32 %v1868_v55, %v7515_v7  ;;  %v3408_v61 = vmul.f32 %v8314_v49, %v12064_v46  ;;  %v3471_v62 = vadd.f32 %v3407_v53, %v3087_v40  ;;  %v2245_v56 = vmul.f32 %v12069_v15, %v12068_v48  ;;  %v12072_v55 = vld [vmem:[#allocation38_spill] sm:$0xff] }
 0x1d4   : > { %12067 = vst [vmem:[#allocation173_spill] sm:$0xff] %v8333_v0  ;;  %4664 = vperm.xlu1 %6030, %v6347_v3   ;;  %v2246_v27 = vmul.f32 %v12070_v25, %v12068_v48  ;;  %v8347_v0 = vadd.f32 %v3778_v42, %v3458_v21  ;;  %v3792_v29 = vmul.f32 %v8324_v37, %v8216_v54  ;;  %v12073_v3 = vld [vmem:[#allocation148_spill] sm:$0xff]  ;;  %v8357_v15 = vmax.f32 %v1867_v13, 0.0  ;;  %v12077_v42 = vld [vmem:[#allocation98_spill] sm:$0xff]  ;;  %v12079_v54 = vld [vmem:[#allocation7_spill] sm:$0xff] }
 0x1d5   : > { %v2629_v14 = vmul.f32 %v12073_v3, %v12072_v55  ;;  %v2630_v53 = vmul.f32 %v7939_v20, %v12072_v55  ;;  %v3472_v40 = vadd.f32 %v3408_v61, %v3088_v35  ;;  %v8355_v46 = vadd.f32 %v3791_v8, %v3471_v62  ;;  %v12078_v21 = vld [vmem:[#allocation34_spill] sm:$0xff]  ;;  %v6348_v37 = vld [vmem:[%s6468_s26 + $0x10] sm:$0xff]  ;;  %v8366_v3 = vpop.permute.xlu1 %3616  ;;  %v1870_v61 = vpop.f32.mrf.mxu1  ;;  %v12085_v55 = vld [vmem:[#allocation15_spill] sm:$0xff] }
 0x1d6   : > { %12071 = vst [vmem:[#allocation6_spill] sm:$0xff] %v8347_v0  ;;  %12075 = vst [vmem:[#allocation50_spill] sm:$0xff] %v8357_v15  ;;  %v8359_v11 = vmax.f32 %v1869_v34, 0.0  ;;  %v3013_v25 = vmul.f32 %v12078_v21, %v12077_v42  ;;  %v3014_v0 = vmul.f32 %v12079_v54, %v12077_v42  ;;  %v12081_v20 = vld [vmem:[#allocation152_spill] sm:$0xff]  ;;  %v12082_v8 = vld [vmem:[#allocation210_spill] sm:$0xff]  ;;  %v8380_v62 = vpop.permute.xlu0 %3588  ;;  %4752 = vperm.xlu0 %6041, %v6345_v1  }
 0x1d7   : > { %12074 = vst [vmem:[#allocation84_spill] sm:$0xff] %v8355_v46  ;;  %v2693_v48 = vadd.f32 %v2629_v14, %v2245_v56  ;;  %v2694_v50 = vadd.f32 %v2630_v53, %v2246_v27  ;;  %12080 = vst [vmem:[#allocation148_spill] sm:$0xff] %v8366_v3  ;;  %v3397_v35 = vmul.f32 %v7961_v47, %v12081_v20  ;;  %v12083_v14 = vld [vmem:[#allocation213_spill] sm:$0xff]  ;;  %v12088_v21 = vld [vmem:[#allocation46_spill] sm:$0xff] }
 0x1d8   : > { %12076 = vst [vmem:[#allocation38_spill] sm:$0xff] %v8359_v11  ;;  %4668 = vperm.xlu1 %6030, %v6348_v37   ;;  %v3398_v13 = vmul.f32 %v7972_v10, %v12081_v20  ;;  %v8374_v56 = vrot.slane %v12082_v8, %v7485_v36  ;;  %v8378_v34 = vrot.slane %v12083_v14, %v7485_v36  ;;  %v6349_v20 = vld [vmem:[%s6468_s26 + $0x80] sm:$0xff]  ;;  %v12092_v11 = vld [vmem:[#allocation176_spill] sm:$0xff] }
 0x1d9   : > { %v3077_v37 = vadd.f32 %v3013_v25, %v2693_v48  ;;  %v3078_v27 = vadd.f32 %v3014_v0, %v2694_v50  ;;  %v8384_v47 = vrot.slane %v12082_v8, %v7499_v9  ;;  %v8388_v10 = vrot.slane %v12083_v14, %v7499_v9 }
 0x1da   : > { %v2259_v53 = vmul.f32 %v8374_v56, %v12085_v55  ;;  %v2260_v42 = vmul.f32 %v8378_v34, %v12085_v55  ;;  %v8396_v1 = vrot.slane %v12082_v8, %v7530_v2  ;;  %v8400_v0 = vrot.slane %v12083_v14, %v7530_v2 }
 0x1db   : > { %12084 = vst [vmem:[#allocation98_spill] sm:$0xff] %v8388_v10  ;;  %v8402_v48 = vadd.f32 %v3792_v29, %v3472_v40  ;;  %v3781_v50 = vmul.f32 %v7978_v59, %v8022_v60  ;;  %v2643_v25 = vmul.f32 %v8384_v47, %v12088_v21  ;;  %v2644_v54 = vmul.f32 %v8388_v10, %v12088_v21  ;;  %v1872_v59 = vpop.f32.mrf.mxu1  ;;  %v8422_v40 = vld [vmem:[%s6468_s26 + $0x40] sm:$0xff] }
 0x1dc   : > { %12086 = vst [vmem:[#allocation34_spill] sm:$0xff] %v8400_v0  ;;  %4724 = vperm.xlu1 %6030, %v6349_v20   ;;  %v3461_v55 = vadd.f32 %v3397_v35, %v3077_v37  ;;  %v3782_v46 = vmul.f32 %v7982_v57, %v8022_v60  ;;  %v8415_v3 = vrot.slane %v12082_v8, %v7541_v63  ;;  %v12090_v35 = vld [vmem:[#allocation107_spill] sm:$0xff]  ;;  %v8429_v60 = vpop.permute.xlu1 %3624 }
 0x1dd   : > { %12087 = vst [vmem:[#allocation7_spill] sm:$0xff] %v8402_v48  ;;  %v8419_v29 = vrot.slane %v12083_v14, %v7541_v63  ;;  %4692 = vperm.xlu0 %6041, %v8422_v40   ;;  %v2707_v21 = vadd.f32 %v2643_v25, %v2259_v53  ;;  %v2708_v20 = vadd.f32 %v2644_v54, %v2260_v42  ;;  %12091 = vst [vmem:[#allocation15_spill] sm:$0xff] %v8429_v60  ;;  %v8441_v42 = vpop.permute.xlu0 %3596 }
 0x1de   : > { %12089 = vst [vmem:[#allocation152_spill] sm:$0xff] %v8415_v3  ;;  %v3027_v37 = vmul.f32 %v8396_v1, %v12090_v35  ;;  %v3028_v57 = vmul.f32 %v8400_v0, %v12090_v35  ;;  %v3462_v48 = vadd.f32 %v3398_v13, %v3078_v27  ;;  %v3411_v15 = vmul.f32 %v8415_v3, %v12092_v11  ;;  %v6351_v13 = vld [vmem:[%s6468_s26 + $0x90] sm:$0xff] }
 0x1df   : > { %v8435_v10 = vrot.slane %v12082_v8, %v7552_v16  ;;  %v8439_v53 = vrot.slane %v12083_v14, %v7552_v16  ;;  %v1871_v35 = vadd.f32 %v1870_v61, %v7504_v44  ;;  %v1873_v60 = vadd.f32 %v1872_v59, %v7515_v7  ;;  %v12093_v3 = vld [vmem:[#allocation8_spill] sm:$0xff] }
 0x1e0   : > { %v3091_v25 = vadd.f32 %v3027_v37, %v2707_v21  ;;  %v3092_v54 = vadd.f32 %v3028_v57, %v2708_v20  ;;  %4732 = vperm.xlu1 %6030, %v6351_v13   ;;  %v3412_v27 = vmul.f32 %v8419_v29, %v12092_v11  ;;  %v2249_v14 = vmul.f32 %v8026_v24, %v12093_v3  ;;  %v8455_v21 = vld [vmem:[%s6468_s26 + $0xc8] sm:$0xff]  ;;  %v12097_v24 = vld [vmem:[#allocation40_spill] sm:$0xff] }
 0x1e1   : > { %v3795_v8 = vmul.f32 %v8435_v10, %v8278_v17  ;;  %v2250_v0 = vmul.f32 %v8030_v33, %v12093_v3  ;;  %4760 = vperm.xlu0 %6041, %v8455_v21   ;;  %v8458_v44 = vadd.f32 %v3781_v50, %v3461_v55  ;;  %v8460_v7 = vadd.f32 %v3782_v46, %v3462_v48  ;;  %v12100_v46 = vld [vmem:[#allocation102_spill] sm:$0xff]  ;;  %v8478_v55 = vpop.permute.xlu1 %3632 }
 0x1e2   : > { %v3475_v61 = vadd.f32 %v3411_v15, %v3091_v25  ;;  %v3796_v11 = vmul.f32 %v8439_v53, %v8278_v17  ;;  %v3476_v59 = vadd.f32 %v3412_v27, %v3092_v54  ;;  %v8464_v20 = vmax.f32 %v1871_v35, 0.0  ;;  %v12101_v17 = vld [vmem:[#allocation68_spill] sm:$0xff]  ;;  %12102 = vst [vmem:[#allocation102_spill] sm:$0xff] %v8478_v55  ;;  %v12104_v54 = vld [vmem:[#allocation39_spill] sm:$0xff]  ;;  %v12106_v27 = vld [vmem:[#allocation214_spill] sm:$0xff] }
 0x1e3   : > { %12094 = vst [vmem:[#allocation46_spill] sm:$0xff] %v8458_v44  ;;  %12095 = vst [vmem:[#allocation107_spill] sm:$0xff] %v8460_v7  ;;  %v2633_v37 = vmul.f32 %v8034_v28, %v12097_v24  ;;  %v2634_v33 = vmul.f32 %v8041_v32, %v12097_v24  ;;  %v8472_v50 = vmax.f32 %v1873_v60, 0.0  ;;  %v3017_v15 = vmul.f32 %v8045_v4, %v12100_v46  ;;  %v12103_v25 = vld [vmem:[#allocation156_spill] sm:$0xff]  ;;  %v8485_v60 = vpop.permute.xlu0 %3604  ;;  %v12105_v4 = vld [vmem:[#allocation30_spill] sm:$0xff] }
 0x1e4   : > { %12096 = vst [vmem:[#allocation176_spill] sm:$0xff] %v8464_v20  ;;  %v8470_v3 = vadd.f32 %v3795_v8, %v3475_v61  ;;  %v3018_v48 = vmul.f32 %v12101_v17, %v12100_v46  ;;  %6031 = vset.pattern.permute.xlu1 %v11987_v38  ;;  %v3401_v32 = vmul.f32 %v12104_v54, %v12103_v25  ;;  %v8488_v35 = vld [vmem:[%s6468_s26 + $0x50] sm:$0xff]  ;;  %v8508_v61 = vld [vmem:[%s6468_s26 + $0xe0] sm:$0xff]  ;;  %v12109_v17 = vld [vmem:[#allocation17_spill] sm:$0xff] }
 0x1e5   : > { %12099 = vst [vmem:[#allocation40_spill] sm:$0xff] %v8472_v50  ;;  %v2697_v57 = vadd.f32 %v2633_v37, %v2249_v14  ;;  %v2698_v28 = vadd.f32 %v2634_v33, %v2250_v0  ;;  %v3402_v8 = vmul.f32 %v8081_v30, %v12103_v25  ;;  %4700 = vperm.xlu0 %6041, %v8488_v35   ;;  %12108 = vst [vmem:[#allocation156_spill] sm:$0xff] %v8508_v61  ;;  %v12113_v55 = vld [vmem:[#allocation111_spill] sm:$0xff] }
 0x1e6   : > { %12098 = vst [vmem:[#allocation8_spill] sm:$0xff] %v8470_v3  ;;  %v8493_v13 = vrot.slane %v12105_v4, %v7485_v36  ;;  %v8497_v14 = vrot.slane %v12106_v27, %v7485_v36  ;;  %v8501_v0 = vrot.slane %v12105_v4, %v7499_v9  ;;  %v8505_v30 = vrot.slane %v12106_v27, %v7499_v9  ;;  %v12110_v3 = vld [vmem:[#allocation51_spill] sm:$0xff] }
 0x1e7   : > { %4004 = vperm.xlu1 %6031, %v8508_v61   ;;  %v3081_v24 = vadd.f32 %v3017_v15, %v2697_v57  ;;  %v3082_v37 = vadd.f32 %v3018_v48, %v2698_v28  ;;  %v8513_v33 = vrot.slane %v12105_v4, %v7530_v2  ;;  %v8517_v46 = vrot.slane %v12106_v27, %v7530_v2  ;;  %v12111_v48 = vld [vmem:[#allocation9_spill] sm:$0xff]  ;;  %v12112_v57 = vld [vmem:[#allocation95_spill] sm:$0xff] }
 0x1e8   : > { %12107 = vst [vmem:[#allocation68_spill] sm:$0xff] %v8501_v0  ;;  %v2263_v25 = vmul.f32 %v8493_v13, %v12109_v17  ;;  %v2264_v54 = vmul.f32 %v8497_v14, %v12109_v17  ;;  %v2647_v7 = vmul.f32 %v8501_v0, %v12110_v3  ;;  %v2648_v15 = vmul.f32 %v8505_v30, %v12110_v3 }
 0x1e9   : > { %v3785_v28 = vmul.f32 %v12112_v57, %v12111_v48  ;;  %v3786_v44 = vmul.f32 %v8091_v23, %v12111_v48  ;;  %v3031_v50 = vmul.f32 %v8513_v33, %v12113_v55  ;;  %v3032_v20 = vmul.f32 %v8517_v46, %v12113_v55  ;;  %4768 = vperm.xlu0 %6041, %v8175_v43   ;;  %v8544_v57 = vpop.permute.xlu1 %3896  ;;  %v12116_v43 = vld [vmem:[#allocation179_spill] sm:$0xff] }
 0x1ea   : > { %v2711_v17 = vadd.f32 %v2647_v7, %v2263_v25  ;;  %v2712_v61 = vadd.f32 %v2648_v15, %v2264_v54  ;;  %v8538_v0 = vrot.slane %v12105_v4, %v7541_v63  ;;  %v8542_v3 = vrot.slane %v12106_v27, %v7541_v63  ;;  %12114 = vst [vmem:[#allocation39_spill] sm:$0xff] %v8544_v57  ;;  %v8557_v25 = vpop.permute.xlu0 %3612 }
 0x1eb   : > { %6032 = vset.pattern.permute.xlu1 %v11997_v5  ;;  %v8547_v23 = vadd.f32 %v3796_v11, %v3476_v59  ;;  %v3465_v48 = vadd.f32 %v3401_v32, %v3081_v24  ;;  %v8551_v55 = vrot.slane %v12105_v4, %v7552_v16  ;;  %v8555_v7 = vrot.slane %v12106_v27, %v7552_v16  ;;  %v12117_v24 = vld [vmem:[#allocation10_spill] sm:$0xff] }
 0x1ec   : > { %4308 = vperm.xlu1 %6032, %v8422_v40   ;;  %v3466_v54 = vadd.f32 %v3402_v8, %v3082_v37  ;;  %v3095_v15 = vadd.f32 %v3031_v50, %v2711_v17  ;;  %v3096_v57 = vadd.f32 %v3032_v20, %v2712_v61  ;;  %v3415_v11 = vmul.f32 %v8538_v0, %v12116_v43  ;;  %v12118_v40 = vld [vmem:[#allocation142_spill] sm:$0xff] }
 0x1ed   : > { %12115 = vst [vmem:[#allocation17_spill] sm:$0xff] %v8547_v23  ;;  %v3416_v59 = vmul.f32 %v8542_v3, %v12116_v43  ;;  %v3799_v32 = vmul.f32 %v8551_v55, %v8328_v31  ;;  %v2253_v23 = vmul.f32 %v8146_v12, %v12117_v24  ;;  %v2254_v27 = vmul.f32 %v8150_v58, %v12117_v24  ;;  %v12121_v8 = vld [vmem:[#allocation42_spill] sm:$0xff]  ;;  %v8584_v24 = vld [vmem:[%s6468_s26 + $0x48] sm:$0xff] }
 0x1ee   : > { %4712 = vperm.xlu0 %6041, %v12118_v40   ;;  %v8571_v50 = vadd.f32 %v3785_v28, %v3465_v48  ;;  %v8573_v20 = vadd.f32 %v3786_v44, %v3466_v54  ;;  %v2637_v61 = vmul.f32 %v8155_v39, %v12121_v8  ;;  %v2638_v43 = vmul.f32 %v8159_v52, %v12121_v8  ;;  %v12122_v4 = vld [vmem:[#allocation106_spill] sm:$0xff]  ;;  %v12125_v54 = vld [vmem:[#allocation161_spill] sm:$0xff] }
 0x1ef   : > { %v3479_v37 = vadd.f32 %v3415_v11, %v3095_v15  ;;  %v3480_v17 = vadd.f32 %v3416_v59, %v3096_v57  ;;  %v3800_v12 = vmul.f32 %v8555_v7, %v8328_v31  ;;  %v3021_v58 = vmul.f32 %v8168_v19, %v12122_v4  ;;  %12123 = vst [vmem:[#allocation95_spill] sm:$0xff] %v8584_v24  ;;  %v12124_v39 = vld [vmem:[#allocation90_spill] sm:$0xff]  ;;  %v12126_v52 = vld [vmem:[#allocation41_spill] sm:$0xff]  ;;  %v8591_v57 = vpop.permute.xlu1 %3900  ;;  %v8593_v11 = vpop.f32.mrf.mxu0  ;;  %v12130_v19 = vld [vmem:[#allocation223_spill] sm:$0xff] }
 0x1f0   : > { %12119 = vst [vmem:[#allocation51_spill] sm:$0xff] %v8571_v50  ;;  %12120 = vst [vmem:[#allocation9_spill] sm:$0xff] %v8573_v20  ;;  %4312 = vperm.xlu1 %6032, %v8584_v24   ;;  %v2701_v44 = vadd.f32 %v2637_v61, %v2253_v23  ;;  %v2702_v28 = vadd.f32 %v2638_v43, %v2254_v27  ;;  %v3022_v48 = vmul.f32 %v12124_v39, %v12122_v4  ;;  %v12131_v40 = vld [vmem:[#allocation218_spill] sm:$0xff]  ;;  %v12132_v27 = vld [vmem:[#allocation219_spill] sm:$0xff]  ;;  %v8607_v4 = vpop.permute.xlu0 %3620 }
 0x1f1   : > { %v3405_v15 = vmul.f32 %v12126_v52, %v12125_v54  ;;  %12127 = vst [vmem:[#allocation111_spill] sm:$0xff] %v8591_v57  ;;  %12128 = vst [vmem:[#allocation179_spill] sm:$0xff] %v8593_v11  ;;  %v8595_v31 = vadd.f32 %v3799_v32, %v3479_v37  ;;  %v3406_v59 = vmul.f32 %v12130_v19, %v12125_v54  ;;  %v8610_v61 = vld [vmem:[%s6468_s26 + $0xe8] sm:$0xff]  ;;  %v12140_v20 = vld [vmem:[#allocation56_spill] sm:$0xff]  ;;  %v8642_v57 = vpop.f32.mrf.mxu0 }
 0x1f2   : > { %v8601_v8 = vrot.slane %v12131_v40, %v7485_v36  ;;  %v8605_v23 = vrot.slane %v12132_v27, %v7485_v36  ;;  %12133 = vst [vmem:[#allocation142_spill] sm:$0xff] %v8607_v4  ;;  %12134 = vst [vmem:[#allocation42_spill] sm:$0xff] %v8610_v61  ;;  %4776 = vperm.xlu0 %6041, %v8610_v61   ;;  %v3085_v43 = vadd.f32 %v3021_v58, %v2701_v44  ;;  %v12135_v54 = vld [vmem:[#allocation19_spill] sm:$0xff] }
 0x1f3   : > { %12129 = vst [vmem:[#allocation10_spill] sm:$0xff] %v8595_v31  ;;  %v3086_v32 = vadd.f32 %v3022_v48, %v2702_v28  ;;  %v8615_v37 = vrot.slane %v12131_v40, %v7499_v9  ;;  %v8619_v39 = vrot.slane %v12132_v27, %v7499_v9  ;;  %v8627_v31 = vrot.slane %v12131_v40, %v7530_v2  ;;  %v12138_v28 = vld [vmem:[#allocation222_spill] sm:$0xff]  ;;  %v12139_v48 = vld [vmem:[#allocation99_spill] sm:$0xff] }
 0x1f4   : > { %v2267_v52 = vmul.f32 %v8601_v8, %v12135_v54  ;;  %v2268_v19 = vmul.f32 %v8605_v23, %v12135_v54  ;;  %v8631_v58 = vrot.slane %v12132_v27, %v7530_v2  ;;  %4376 = vperm.xlu1 %6032, %v8455_v21   ;;  %v8634_v44 = vadd.f32 %v3800_v12, %v3480_v17  ;;  %v12142_v4 = vld [vmem:[#allocation115_spill] sm:$0xff]  ;;  %v12144_v12 = vld [vmem:[#allocation221_spill] sm:$0xff] }
 0x1f5   : > { %12136 = vst [vmem:[#allocation106_spill] sm:$0xff] %v8627_v31  ;;  %v3789_v11 = vmul.f32 %v12139_v48, %v12138_v28  ;;  %v2651_v50 = vmul.f32 %v8615_v37, %v12140_v20  ;;  %v2652_v54 = vmul.f32 %v8619_v39, %v12140_v20  ;;  %12141 = vst [vmem:[#allocation161_spill] sm:$0xff] %v8642_v57 }
 0x1f6   : > { %12137 = vst [vmem:[#allocation90_spill] sm:$0xff] %v8634_v44  ;;  %v3469_v24 = vadd.f32 %v3405_v15, %v3085_v43  ;;  %v3790_v61 = vmul.f32 %v8211_v26, %v12138_v28  ;;  %v3035_v21 = vmul.f32 %v8627_v31, %v12142_v4  ;;  %v8650_v17 = vrot.slane %v12131_v40, %v7541_v63  ;;  %v8659_v43 = vpop.permute.xlu1 %3908  ;;  %v12146_v28 = vld [vmem:[#allocation185_spill] sm:$0xff] }
 0x1f7   : > { %4720 = vperm.xlu0 %6041, %v12144_v12   ;;  %v2715_v48 = vadd.f32 %v2651_v50, %v2267_v52  ;;  %v2716_v44 = vadd.f32 %v2652_v54, %v2268_v19  ;;  %v3036_v20 = vmul.f32 %v8631_v58, %v12142_v4  ;;  %v8657_v15 = vrot.slane %v12132_v27, %v7541_v63  ;;  %v8671_v4 = vpop.permute.xlu0 %3628  ;;  %v12150_v54 = vld [vmem:[#allocation12_spill] sm:$0xff]  ;;  %v12151_v12 = vld [vmem:[#allocation87_spill] sm:$0xff] }
 0x1f8   : > { %12143 = vst [vmem:[#allocation41_spill] sm:$0xff] %v8650_v17  ;;  %12145 = vst [vmem:[#allocation223_spill] sm:$0xff] %v8659_v43  ;;  %v3470_v26 = vadd.f32 %v3406_v59, %v3086_v32  ;;  %v3419_v57 = vmul.f32 %v8650_v17, %v12146_v28  ;;  %v8665_v31 = vrot.slane %v12131_v40, %v7552_v16  ;;  %6033 = vset.pattern.permute.xlu1 %v12065_v51  ;;  %v8679_v40 = vpop.f32.mrf.mxu0 }
 0x1f9   : > { %v8669_v50 = vrot.slane %v12132_v27, %v7552_v16  ;;  %12149 = vst [vmem:[#allocation99_spill] sm:$0xff] %v8671_v4  ;;  %v3099_v52 = vadd.f32 %v3035_v21, %v2715_v48  ;;  %v3100_v19 = vadd.f32 %v3036_v20, %v2716_v44  ;;  %v2257_v59 = vmul.f32 %v8264_v22, %v12150_v54  ;;  %v12154_v4 = vld [vmem:[#allocation44_spill] sm:$0xff]  ;;  %v8690_v21 = vld [vmem:[%s6468_s26 + $0xf8] sm:$0xff] }
 0x1fa   : > { %12147 = vst [vmem:[#allocation19_spill] sm:$0xff] %v8665_v31  ;;  %v2258_v32 = vmul.f32 %v8268_v45, %v12150_v54  ;;  %4676 = vperm.xlu1 %6033, %v12151_v12   ;;  %12152 = vst [vmem:[#allocation56_spill] sm:$0xff] %v8679_v40  ;;  %v8681_v43 = vadd.f32 %v3789_v11, %v3469_v24  ;;  %v3803_v27 = vmul.f32 %v8665_v31, %v8380_v62  ;;  %v12157_v54 = vld [vmem:[#allocation110_spill] sm:$0xff]  ;;  %v12178_v31 = vld [vmem:[#allocation119_spill] sm:$0xff] }
 0x1fb   : > { %12148 = vst [vmem:[#allocation222_spill] sm:$0xff] %v8669_v50  ;;  %v2641_v17 = vmul.f32 %v8272_v41, %v12154_v4  ;;  %v2642_v44 = vmul.f32 %v8276_v6, %v12154_v4  ;;  %12155 = vst [vmem:[#allocation221_spill] sm:$0xff] %v8690_v21  ;;  %4784 = vperm.xlu0 %6041, %v8690_v21   ;;  %v8693_v22 = vadd.f32 %v3790_v61, %v3470_v26  ;;  %v12158_v41 = vld [vmem:[#allocation149_spill] sm:$0xff]  ;;  %v12159_v6 = vld [vmem:[#allocation228_spill] sm:$0xff] }
 0x1fc   : > { %12153 = vst [vmem:[#allocation115_spill] sm:$0xff] %v8681_v43  ;;  %v3420_v45 = vmul.f32 %v8657_v15, %v12146_v28  ;;  %v3483_v24 = vadd.f32 %v3419_v57, %v3099_v52  ;;  %v3804_v11 = vmul.f32 %v8669_v50, %v8380_v62  ;;  %v3025_v12 = vmul.f32 %v12158_v41, %v12157_v54  ;;  %v12161_v61 = vld [vmem:[#allocation166_spill] sm:$0xff]  ;;  %v8709_v28 = vpop.permute.xlu1 %3916  ;;  %v8711_v62 = vpop.f32.mrf.mxu0 }
 0x1fd   : > { %12156 = vst [vmem:[#allocation185_spill] sm:$0xff] %v8693_v22  ;;  %v2705_v48 = vadd.f32 %v2641_v17, %v2257_v59  ;;  %v2706_v20 = vadd.f32 %v2642_v44, %v2258_v32  ;;  %v3026_v4 = vmul.f32 %v12159_v6, %v12157_v54  ;;  %v3409_v26 = vmul.f32 %v8310_v18, %v12161_v61  ;;  %v12164_v17 = vld [vmem:[#allocation220_spill] sm:$0xff]  ;;  %v12165_v32 = vld [vmem:[#allocation91_spill] sm:$0xff]  ;;  %v8722_v18 = vpop.permute.xlu0 %3892 }
 0x1fe   : > { %v3484_v40 = vadd.f32 %v3420_v45, %v3100_v19  ;;  %v8703_v43 = vadd.f32 %v3803_v27, %v3483_v24  ;;  %v3410_v57 = vmul.f32 %v8314_v49, %v12161_v61  ;;  %12162 = vst [vmem:[#allocation87_spill] sm:$0xff] %v8709_v28  ;;  %12163 = vst [vmem:[#allocation44_spill] sm:$0xff] %v8711_v62  ;;  %4740 = vperm.xlu1 %6033, %v12164_v17   ;;  %v12166_v27 = vld [vmem:[#allocation3_spill] sm:$0xff]  ;;  %v12175_v22 = vld [vmem:[#allocation60_spill] sm:$0xff]  ;;  %v8752_v50 = vpop.f32.mrf.mxu0 }
 0x1ff   : > { %v3089_v52 = vadd.f32 %v3025_v12, %v2705_v48  ;;  %v3090_v59 = vadd.f32 %v3026_v4, %v2706_v20  ;;  %v8716_v44 = vrot.slane %v12165_v32, %v7485_v36  ;;  %v8720_v19 = vrot.slane %v12166_v27, %v7485_v36  ;;  %12167 = vst [vmem:[#allocation110_spill] sm:$0xff] %v8722_v18  ;;  %v12171_v20 = vld [vmem:[#allocation189_spill] sm:$0xff]  ;;  %v12172_v54 = vld [vmem:[#allocation211_spill] sm:$0xff] }
 0x200   : > { %12160 = vst [vmem:[#allocation12_spill] sm:$0xff] %v8703_v43  ;;  %v8726_v49 = vrot.slane %v12165_v32, %v7499_v9  ;;  %v8730_v45 = vrot.slane %v12166_v27, %v7499_v9  ;;  %v8734_v24 = vrot.slane %v12165_v32, %v7530_v2  ;;  %v8738_v48 = vrot.slane %v12166_v27, %v7530_v2  ;;  %v12173_v12 = vld [vmem:[#allocation103_spill] sm:$0xff]  ;;  %v12174_v4 = vld [vmem:[#allocation21_spill] sm:$0xff] }
 0x201   : > { %v3793_v41 = vmul.f32 %v12172_v54, %v12171_v20  ;;  %v3794_v6 = vmul.f32 %v12173_v12, %v12171_v20  ;;  %v2271_v61 = vmul.f32 %v8716_v44, %v12174_v4  ;;  %v2272_v17 = vmul.f32 %v8720_v19, %v12174_v4  ;;  %12176 = vst [vmem:[#allocation220_spill] sm:$0xff] %v8752_v50  ;;  %v12177_v54 = vld [vmem:[#allocation182_spill] sm:$0xff] }
 0x202   : > { %12168 = vst [vmem:[#allocation149_spill] sm:$0xff] %v8730_v45  ;;  %12169 = vst [vmem:[#allocation228_spill] sm:$0xff] %v8734_v24  ;;  %v3473_v43 = vadd.f32 %v3409_v26, %v3089_v52  ;;  %v3474_v62 = vadd.f32 %v3410_v57, %v3090_v59  ;;  %v2655_v28 = vmul.f32 %v8726_v49, %v12175_v22  ;;  %4744 = vperm.xlu1 %6033, %v12177_v54   ;;  %v8775_v54 = vpop.permute.xlu1 %3924 }
 0x203   : > { %12170 = vst [vmem:[#allocation166_spill] sm:$0xff] %v8738_v48  ;;  %v2656_v18 = vmul.f32 %v8730_v45, %v12175_v22  ;;  %v3039_v20 = vmul.f32 %v8734_v24, %v12178_v31  ;;  %v3040_v12 = vmul.f32 %v8738_v48, %v12178_v31  ;;  %v8761_v26 = vrot.slane %v12165_v32, %v7541_v63  ;;  %v12182_v48 = vld [vmem:[#allocation14_spill] sm:$0xff] }
 0x204   : > { %v8765_v57 = vrot.slane %v12166_v27, %v7541_v63  ;;  %v2719_v52 = vadd.f32 %v2655_v28, %v2271_v61  ;;  %v8769_v59 = vrot.slane %v12165_v32, %v7552_v16  ;;  %v8773_v4 = vrot.slane %v12166_v27, %v7552_v16  ;;  %12179 = vst [vmem:[#allocation189_spill] sm:$0xff] %v8775_v54  ;;  %v12185_v27 = vld [vmem:[#allocation191_spill] sm:$0xff]  ;;  %v8791_v54 = vpop.f32.mrf.mxu0 }
 0x205   : > { %v2720_v22 = vadd.f32 %v2656_v18, %v2272_v17  ;;  %v8777_v31 = vadd.f32 %v3804_v11, %v3484_v40  ;;  %v8779_v50 = vadd.f32 %v3793_v41, %v3473_v43  ;;  %v2261_v24 = vmul.f32 %v8374_v56, %v12182_v48  ;;  %v8785_v18 = vpop.permute.xlu0 %3904  ;;  %12186 = vst [vmem:[#allocation182_spill] sm:$0xff] %v8791_v54  ;;  %v12188_v11 = vld [vmem:[#allocation98_spill] sm:$0xff] }
 0x206   : > { %v2262_v28 = vmul.f32 %v8378_v34, %v12182_v48  ;;  %12183 = vst [vmem:[#allocation21_spill] sm:$0xff] %v8785_v18  ;;  %v8787_v61 = vadd.f32 %v3794_v6, %v3474_v62  ;;  %v3103_v17 = vadd.f32 %v3039_v20, %v2719_v52  ;;  %v3423_v45 = vmul.f32 %v8761_v26, %v12185_v27  ;;  %v12187_v34 = vld [vmem:[#allocation48_spill] sm:$0xff]  ;;  %v12189_v6 = vld [vmem:[#allocation114_spill] sm:$0xff] }
 0x207   : > { %12180 = vst [vmem:[#allocation211_spill] sm:$0xff] %v8777_v31  ;;  %12181 = vst [vmem:[#allocation103_spill] sm:$0xff] %v8779_v50  ;;  %v3104_v32 = vadd.f32 %v3040_v12, %v2720_v22  ;;  %6035 = vset.pattern.permute.xlu1 %v11987_v38  ;;  %v3424_v40 = vmul.f32 %v8765_v57, %v12185_v27  ;;  %v3807_v56 = vmul.f32 %v8769_v59, %v8441_v42  ;;  %v12190_v27 = vld [vmem:[#allocation34_spill] sm:$0xff]  ;;  %v12191_v31 = vld [vmem:[#allocation171_spill] sm:$0xff] }
 0x208   : > { %12184 = vst [vmem:[#allocation60_spill] sm:$0xff] %v8787_v61  ;;  %v2645_v43 = vmul.f32 %v8384_v47, %v12187_v34  ;;  %v2646_v62 = vmul.f32 %v12188_v11, %v12187_v34  ;;  %4016 = vperm.xlu1 %6035, %v8690_v21   ;;  %v3487_v48 = vadd.f32 %v3423_v45, %v3103_v17  ;;  %v12192_v47 = vld [vmem:[#allocation152_spill] sm:$0xff]  ;;  %v12193_v11 = vld [vmem:[#allocation11_spill] sm:$0xff] }
 0x209   : > { %v3808_v41 = vmul.f32 %v8773_v4, %v8441_v42  ;;  %v3029_v38 = vmul.f32 %v8396_v1, %v12189_v6  ;;  %v3030_v20 = vmul.f32 %v12190_v27, %v12189_v6  ;;  %v3488_v12 = vadd.f32 %v3424_v40, %v3104_v32  ;;  %v12194_v42 = vld [vmem:[#allocation33_spill] sm:$0xff]  ;;  %v12195_v1 = vld [vmem:[#allocation183_spill] sm:$0xff]  ;;  %v8823_v32 = vpop.permute.xlu1 %3932 }
 0x20a   : > { %v2709_v52 = vadd.f32 %v2645_v43, %v2261_v24  ;;  %v2710_v22 = vadd.f32 %v2646_v62, %v2262_v28  ;;  %v3413_v54 = vmul.f32 %v12192_v47, %v12191_v31  ;;  %v3414_v34 = vmul.f32 %v8419_v29, %v12191_v31  ;;  %12196 = vst [vmem:[#allocation119_spill] sm:$0xff] %v8823_v32  ;;  %v8825_v24 = vpop.f32.mrf.mxu0  ;;  %v8835_v31 = vpop.permute.xlu0 %3912  ;;  %v12199_v43 = vld [vmem:[#allocation23_spill] sm:$0xff] }
 0x20b   : > { %v3797_v45 = vmul.f32 %v8435_v10, %v12193_v11  ;;  %v8817_v17 = vrot.slane %v12194_v42, %v7485_v36  ;;  %v8821_v61 = vrot.slane %v12195_v1, %v7485_v36  ;;  %12197 = vst [vmem:[#allocation14_spill] sm:$0xff] %v8825_v24  ;;  %v8829_v29 = vrot.slane %v12194_v42, %v7499_v9  ;;  %v12203_v50 = vld [vmem:[#allocation123_spill] sm:$0xff] }
 0x20c   : > { %v3093_v28 = vadd.f32 %v3029_v38, %v2709_v52  ;;  %v3094_v40 = vadd.f32 %v3030_v20, %v2710_v22  ;;  %v8833_v10 = vrot.slane %v12195_v1, %v7499_v9  ;;  %12198 = vst [vmem:[#allocation191_spill] sm:$0xff] %v8835_v31  ;;  %6036 = vset.pattern.permute.xlu1 %v11997_v5  ;;  %v12201_v22 = vld [vmem:[#allocation64_spill] sm:$0xff]  ;;  %v12257_v21 = vld [vmem:[#allocation131_spill] sm:$0xff] }
 0x20d   : > { %v2275_v62 = vmul.f32 %v8817_v17, %v12199_v43  ;;  %v2276_v6 = vmul.f32 %v8821_v61, %v12199_v43  ;;  %v8844_v38 = vrot.slane %v12194_v42, %v7530_v2  ;;  %v8848_v27 = vrot.slane %v12195_v1, %v7530_v2  ;;  %4316 = vperm.xlu1 %6036, %v8488_v35  }
 0x20e   : > { %v8851_v20 = vadd.f32 %v3807_v56, %v3487_v48  ;;  %v3798_v52 = vmul.f32 %v8439_v53, %v12193_v11  ;;  %v2659_v47 = vmul.f32 %v8829_v29, %v12201_v22  ;;  %v2660_v43 = vmul.f32 %v8833_v10, %v12201_v22  ;;  %v8867_v56 = vpop.f32.mrf.mxu0 }
 0x20f   : > { %v8859_v24 = vadd.f32 %v3808_v41, %v3488_v12  ;;  %v3477_v32 = vadd.f32 %v3413_v54, %v3093_v28  ;;  %v3043_v31 = vmul.f32 %v8844_v38, %v12203_v50  ;;  %v8865_v35 = vrot.slane %v12194_v42, %v7541_v63  ;;  %12204 = vst [vmem:[#allocation114_spill] sm:$0xff] %v8867_v56  ;;  %v12205_v54 = vld [vmem:[#allocation195_spill] sm:$0xff]  ;;  %v12211_v56 = vld [vmem:[#allocation53_spill] sm:$0xff] }
 0x210   : > { %12200 = vst [vmem:[#allocation48_spill] sm:$0xff] %v8851_v20  ;;  %v2723_v53 = vadd.f32 %v2659_v47, %v2275_v62  ;;  %v2724_v48 = vadd.f32 %v2660_v43, %v2276_v6  ;;  %v3044_v11 = vmul.f32 %v8848_v27, %v12203_v50  ;;  %v8873_v22 = vrot.slane %v12195_v1, %v7541_v63  ;;  %v8885_v62 = vpop.permute.xlu1 %3940  ;;  %v8888_v6 = vld [vmem:[%s6468_s26 + $0xd0] sm:$0xff]  ;;  %v8895_v20 = vpop.permute.xlu0 %3920 }
 0x211   : > { %12202 = vst [vmem:[#allocation98_spill] sm:$0xff] %v8859_v24  ;;  %v3478_v41 = vadd.f32 %v3414_v34, %v3094_v40  ;;  %v3427_v12 = vmul.f32 %v8865_v35, %v12205_v54  ;;  %v8879_v28 = vrot.slane %v12194_v42, %v7552_v16  ;;  %v8883_v24 = vrot.slane %v12195_v1, %v7552_v16  ;;  %v12208_v34 = vld [vmem:[#allocation16_spill] sm:$0xff] }
 0x212   : > { %12206 = vst [vmem:[#allocation34_spill] sm:$0xff] %v8885_v62  ;;  %12207 = vst [vmem:[#allocation171_spill] sm:$0xff] %v8888_v6  ;;  %4380 = vperm.xlu1 %6036, %v8888_v6   ;;  %v3107_v50 = vadd.f32 %v3043_v31, %v2723_v53  ;;  %v3108_v47 = vadd.f32 %v3044_v11, %v2724_v48  ;;  %v2265_v40 = vmul.f32 %v8493_v13, %v12208_v34  ;;  %v12212_v62 = vld [vmem:[#allocation68_spill] sm:$0xff]  ;;  %v8905_v53 = vpop.f32.mrf.mxu0 }
 0x213   : > { %v2266_v43 = vmul.f32 %v8497_v14, %v12208_v34  ;;  %12209 = vst [vmem:[#allocation152_spill] sm:$0xff] %v8895_v20  ;;  %v8897_v42 = vadd.f32 %v3797_v45, %v3477_v32  ;;  %v3811_v1 = vmul.f32 %v8879_v28, %v8485_v60  ;;  %v2649_v18 = vmul.f32 %v12212_v62, %v12211_v56  ;;  %v12215_v34 = vld [vmem:[#allocation118_spill] sm:$0xff] }
 0x214   : > { %v2650_v31 = vmul.f32 %v8505_v30, %v12211_v56  ;;  %12213 = vst [vmem:[#allocation23_spill] sm:$0xff] %v8905_v53  ;;  %v8907_v48 = vadd.f32 %v3798_v52, %v3478_v41  ;;  %v3428_v13 = vmul.f32 %v8873_v22, %v12205_v54  ;;  %v3491_v14 = vadd.f32 %v3427_v12, %v3107_v50  ;;  %v12216_v30 = vld [vmem:[#allocation188_spill] sm:$0xff]  ;;  %v12218_v41 = vld [vmem:[#allocation174_spill] sm:$0xff]  ;;  %v12219_v50 = vld [vmem:[#allocation225_spill] sm:$0xff] }
 0x215   : > { %12210 = vst [vmem:[#allocation11_spill] sm:$0xff] %v8897_v42  ;;  %v3812_v45 = vmul.f32 %v8883_v24, %v8485_v60  ;;  %v2713_v32 = vadd.f32 %v2649_v18, %v2265_v40  ;;  %v3033_v42 = vmul.f32 %v8513_v33, %v12215_v34  ;;  %v3034_v62 = vmul.f32 %v8517_v46, %v12215_v34  ;;  %v12220_v33 = vld [vmem:[#allocation226_spill] sm:$0xff] }
 0x216   : > { %12214 = vst [vmem:[#allocation64_spill] sm:$0xff] %v8907_v48  ;;  %v2714_v11 = vadd.f32 %v2650_v31, %v2266_v43  ;;  %4384 = vperm.xlu1 %6036, %v12216_v30   ;;  %v3492_v56 = vadd.f32 %v3428_v13, %v3108_v47  ;;  %v8918_v52 = vadd.f32 %v3811_v1, %v3491_v14  ;;  %v8932_v43 = vpop.permute.xlu1 %3948  ;;  %v8934_v1 = vpop.f32.mrf.mxu0  ;;  %v12224_v13 = vld [vmem:[#allocation170_spill] sm:$0xff] }
 0x217   : > { %v3417_v54 = vmul.f32 %v8538_v0, %v12218_v41  ;;  %v3418_v12 = vmul.f32 %v8542_v3, %v12218_v41  ;;  %v3097_v60 = vadd.f32 %v3033_v42, %v2713_v32  ;;  %v8926_v40 = vrot.slane %v12219_v50, %v7485_v36  ;;  %12221 = vst [vmem:[#allocation195_spill] sm:$0xff] %v8932_v43  ;;  %v8952_v31 = vpop.permute.xlu0 %3928  ;;  %v12227_v43 = vld [vmem:[#allocation127_spill] sm:$0xff] }
 0x218   : > { %12217 = vst [vmem:[#allocation123_spill] sm:$0xff] %v8918_v52  ;;  %v3098_v18 = vadd.f32 %v3034_v62, %v2714_v11  ;;  %v8930_v46 = vrot.slane %v12220_v33, %v7485_v36  ;;  %12222 = vst [vmem:[#allocation16_spill] sm:$0xff] %v8934_v1  ;;  %v8938_v0 = vrot.slane %v12219_v50, %v7499_v9  ;;  %v12225_v11 = vld [vmem:[#allocation25_spill] sm:$0xff] }
 0x219   : > { %v8942_v3 = vrot.slane %v12220_v33, %v7499_v9  ;;  %v8946_v42 = vrot.slane %v12219_v50, %v7530_v2  ;;  %v8950_v47 = vrot.slane %v12220_v33, %v7530_v2  ;;  %12223 = vst [vmem:[#allocation53_spill] sm:$0xff] %v8952_v31  ;;  %v3801_v14 = vmul.f32 %v8551_v55, %v12224_v13  ;;  %v12226_v52 = vld [vmem:[#allocation69_spill] sm:$0xff]  ;;  %v12231_v31 = vld [vmem:[#allocation18_spill] sm:$0xff] }
 0x21a   : > { %v3802_v32 = vmul.f32 %v8555_v7, %v12224_v13  ;;  %v2279_v34 = vmul.f32 %v8926_v40, %v12225_v11  ;;  %v2280_v62 = vmul.f32 %v8930_v46, %v12225_v11  ;;  %6037 = vset.pattern.permute.xlu1 %v12065_v51  ;;  %v3481_v30 = vadd.f32 %v3417_v54, %v3097_v60  ;;  %v6359_v55 = vld [vmem:[%s6468_s26 + $0x38] sm:$0xff] }
 0x21b   : > { %v3482_v41 = vadd.f32 %v3418_v12, %v3098_v18  ;;  %v2663_v1 = vmul.f32 %v8938_v0, %v12226_v52  ;;  %v2664_v53 = vmul.f32 %v8942_v3, %v12226_v52  ;;  %4688 = vperm.xlu1 %6037, %v6359_v55   ;;  %v3047_v7 = vmul.f32 %v8946_v42, %v12227_v43  ;;  %v8980_v12 = vpop.f32.mrf.mxu0  ;;  %v9004_v6 = vpop.permute.xlu0 %3936 }
 0x21c   : > { %v3048_v13 = vmul.f32 %v8950_v47, %v12227_v43  ;;  %v8974_v11 = vrot.slane %v12219_v50, %v7541_v63  ;;  %v8978_v54 = vrot.slane %v12220_v33, %v7541_v63  ;;  %12228 = vst [vmem:[#allocation68_spill] sm:$0xff] %v8980_v12  ;;  %v8984_v18 = vrot.slane %v12219_v50, %v7552_v16  ;;  %v12234_v50 = vld [vmem:[#allocation201_spill] sm:$0xff] }
 0x21d   : > { %v2727_v60 = vadd.f32 %v2663_v1, %v2279_v34  ;;  %v2728_v52 = vadd.f32 %v2664_v53, %v2280_v62  ;;  %v8988_v55 = vrot.slane %v12220_v33, %v7552_v16  ;;  %v8990_v43 = vadd.f32 %v3812_v45, %v3492_v56  ;;  %v8998_v1 = vpop.permute.xlu1 %3956  ;;  %12235 = vst [vmem:[#allocation25_spill] sm:$0xff] %v9004_v6  ;;  %v12236_v45 = vld [vmem:[#allocation94_spill] sm:$0xff] }
 0x21e   : > { %v8992_v48 = vadd.f32 %v3801_v14, %v3481_v30  ;;  %v2269_v20 = vmul.f32 %v8601_v8, %v12231_v31  ;;  %v2270_v12 = vmul.f32 %v8605_v23, %v12231_v31  ;;  %12232 = vst [vmem:[#allocation174_spill] sm:$0xff] %v8998_v1  ;;  %v9000_v53 = vadd.f32 %v3802_v32, %v3482_v41  ;;  %v12237_v23 = vld [vmem:[#allocation58_spill] sm:$0xff]  ;;  %v9015_v32 = vpop.f32.mrf.mxu0  ;;  %v12242_v1 = vld [vmem:[#allocation41_spill] sm:$0xff] }
 0x21f   : > { %12229 = vst [vmem:[#allocation118_spill] sm:$0xff] %v8990_v43  ;;  %v3111_v34 = vadd.f32 %v3047_v7, %v2727_v60  ;;  %v3112_v62 = vadd.f32 %v3048_v13, %v2728_v52  ;;  %v3431_v33 = vmul.f32 %v8974_v11, %v12234_v50  ;;  %4748 = vperm.xlu1 %6037, %v12236_v45   ;;  %12238 = vst [vmem:[#allocation69_spill] sm:$0xff] %v9015_v32  ;;  %v12239_v7 = vld [vmem:[#allocation122_spill] sm:$0xff] }
 0x220   : > { %12230 = vst [vmem:[#allocation188_spill] sm:$0xff] %v8992_v48  ;;  %12233 = vst [vmem:[#allocation170_spill] sm:$0xff] %v9000_v53  ;;  %v3432_v56 = vmul.f32 %v8978_v54, %v12234_v50  ;;  %v3815_v8 = vmul.f32 %v8984_v18, %v8557_v25  ;;  %v2653_v31 = vmul.f32 %v8615_v37, %v12237_v23  ;;  %v12240_v13 = vld [vmem:[#allocation106_spill] sm:$0xff]  ;;  %v12241_v37 = vld [vmem:[#allocation177_spill] sm:$0xff] }
 0x221   : > { %v2654_v14 = vmul.f32 %v8619_v39, %v12237_v23  ;;  %v3495_v30 = vadd.f32 %v3431_v33, %v3111_v34  ;;  %v3816_v41 = vmul.f32 %v8988_v55, %v8557_v25  ;;  %v3037_v60 = vmul.f32 %v12240_v13, %v12239_v7  ;;  %v12243_v33 = vld [vmem:[#allocation227_spill] sm:$0xff]  ;;  %v12245_v25 = vld [vmem:[#allocation50_spill] sm:$0xff] }
 0x222   : > { %v3038_v50 = vmul.f32 %v8631_v58, %v12239_v7  ;;  %v3496_v52 = vadd.f32 %v3432_v56, %v3112_v62  ;;  %v2717_v45 = vadd.f32 %v2653_v31, %v2269_v20  ;;  %v3421_v53 = vmul.f32 %v12242_v1, %v12241_v37  ;;  %v12244_v34 = vld [vmem:[#allocation19_spill] sm:$0xff]  ;;  %v12246_v13 = vld [vmem:[#allocation38_spill] sm:$0xff]  ;;  %v9046_v62 = vpop.permute.xlu1 %3964  ;;  %v9048_v56 = vpop.f32.mrf.mxu0 }
 0x223   : > { %v2718_v43 = vadd.f32 %v2654_v14, %v2270_v12  ;;  %v3422_v39 = vmul.f32 %v8657_v15, %v12241_v37  ;;  %v3805_v23 = vmul.f32 %v12244_v34, %v12243_v33  ;;  %v9031_v32 = vrot.slane %v12245_v25, %v7485_v36  ;;  %6038 = vset.pattern.permute.xlu1 %v11997_v5  ;;  %v9051_v31 = vld [vmem:[%s6468_s26 + $0x60] sm:$0xff]  ;;  %v12251_v14 = vld [vmem:[#allocation27_spill] sm:$0xff] }
 0x224   : > { %v9035_v58 = vrot.slane %v12246_v13, %v7485_v36  ;;  %v3101_v20 = vadd.f32 %v3037_v60, %v2717_v45  ;;  %v9040_v1 = vrot.slane %v12245_v25, %v7499_v9  ;;  %v9044_v15 = vrot.slane %v12246_v13, %v7499_v9  ;;  %12248 = vst [vmem:[#allocation18_spill] sm:$0xff] %v9046_v62  ;;  %v9066_v45 = vpop.permute.xlu0 %3944  ;;  %v12254_v34 = vld [vmem:[#allocation222_spill] sm:$0xff]  ;;  %v12255_v62 = vld [vmem:[#allocation73_spill] sm:$0xff] }
 0x225   : > { %v3102_v12 = vadd.f32 %v3038_v50, %v2718_v43  ;;  %12249 = vst [vmem:[#allocation201_spill] sm:$0xff] %v9048_v56  ;;  %12250 = vst [vmem:[#allocation94_spill] sm:$0xff] %v9051_v31  ;;  %4324 = vperm.xlu1 %6038, %v9051_v31   ;;  %v2283_v7 = vmul.f32 %v9031_v32, %v12251_v14  ;;  %v9060_v60 = vrot.slane %v12245_v25, %v7530_v2 }
 0x226   : > { %12247 = vst [vmem:[#allocation127_spill] sm:$0xff] %v9035_v58  ;;  %v2284_v43 = vmul.f32 %v9035_v58, %v12251_v14  ;;  %v9064_v50 = vrot.slane %v12246_v13, %v7530_v2  ;;  %12252 = vst [vmem:[#allocation58_spill] sm:$0xff] %v9066_v45  ;;  %v9068_v37 = vadd.f32 %v3815_v8, %v3495_v30 }
 0x227   : > { %v3806_v56 = vmul.f32 %v12254_v34, %v12243_v33  ;;  %v2667_v48 = vmul.f32 %v9040_v1, %v12255_v62  ;;  %v2668_v14 = vmul.f32 %v9044_v15, %v12255_v62  ;;  %v9076_v6 = vadd.f32 %v3816_v41, %v3496_v52  ;;  %v9090_v62 = vpop.f32.mrf.mxu0  ;;  %v12260_v41 = vld [vmem:[#allocation156_spill] sm:$0xff] }
 0x228   : > { %12253 = vst [vmem:[#allocation122_spill] sm:$0xff] %v9068_v37  ;;  %v3485_v31 = vadd.f32 %v3421_v53, %v3101_v20  ;;  %v3051_v58 = vmul.f32 %v9060_v60, %v12257_v21  ;;  %v9082_v45 = vrot.slane %v12245_v25, %v7541_v63  ;;  %v3052_v33 = vmul.f32 %v9064_v50, %v12257_v21  ;;  %v12261_v52 = vld [vmem:[#allocation204_spill] sm:$0xff] }
 0x229   : > { %12256 = vst [vmem:[#allocation106_spill] sm:$0xff] %v9076_v6  ;;  %v2731_v8 = vadd.f32 %v2667_v48, %v2283_v7  ;;  %v2732_v30 = vadd.f32 %v2668_v14, %v2284_v43  ;;  %v9088_v34 = vrot.slane %v12246_v13, %v7541_v63  ;;  %12259 = vst [vmem:[#allocation41_spill] sm:$0xff] %v9090_v62  ;;  %4388 = vperm.xlu1 %6038, %v12260_v41   ;;  %v12262_v43 = vld [vmem:[#allocation20_spill] sm:$0xff]  ;;  %v12265_v62 = vld [vmem:[#allocation142_spill] sm:$0xff] }
 0x22a   : > { %12258 = vst [vmem:[#allocation177_spill] sm:$0xff] %v9082_v45  ;;  %v3486_v53 = vadd.f32 %v3422_v39, %v3102_v12  ;;  %v3435_v20 = vmul.f32 %v9082_v45, %v12261_v52  ;;  %v9097_v6 = vrot.slane %v12245_v25, %v7552_v16  ;;  %v9101_v48 = vrot.slane %v12246_v13, %v7552_v16  ;;  %v9107_v39 = vpop.permute.xlu1 %3972  ;;  %v12266_v25 = vld [vmem:[#allocation62_spill] sm:$0xff]  ;;  %v12267_v13 = vld [vmem:[#allocation149_spill] sm:$0xff] }
 0x22b   : > { %v3115_v21 = vadd.f32 %v3051_v58, %v2731_v8  ;;  %v3116_v7 = vadd.f32 %v3052_v33, %v2732_v30  ;;  %v2273_v14 = vmul.f32 %v8716_v44, %v12262_v43  ;;  %v2274_v41 = vmul.f32 %v8720_v19, %v12262_v43  ;;  %12263 = vst [vmem:[#allocation227_spill] sm:$0xff] %v9107_v39  ;;  %v9117_v8 = vpop.permute.xlu0 %3952  ;;  %v12270_v33 = vld [vmem:[#allocation42_spill] sm:$0xff] }
 0x22c   : > { %v9109_v12 = vadd.f32 %v3805_v23, %v3485_v31  ;;  %v3819_v37 = vmul.f32 %v9097_v6, %v12265_v62  ;;  %v2657_v45 = vmul.f32 %v8726_v49, %v12266_v25  ;;  %v2658_v58 = vmul.f32 %v12267_v13, %v12266_v25  ;;  %v9125_v31 = vpop.f32.mrf.mxu0  ;;  %v12271_v39 = vld [vmem:[#allocation126_spill] sm:$0xff] }
 0x22d   : > { %v9119_v30 = vadd.f32 %v3806_v56, %v3486_v53  ;;  %v3436_v44 = vmul.f32 %v9088_v34, %v12261_v52  ;;  %v3499_v19 = vadd.f32 %v3435_v20, %v3115_v21  ;;  %v3820_v23 = vmul.f32 %v9101_v48, %v12265_v62  ;;  %12269 = vst [vmem:[#allocation222_spill] sm:$0xff] %v9125_v31  ;;  %v12273_v13 = vld [vmem:[#allocation166_spill] sm:$0xff]  ;;  %v12275_v52 = vld [vmem:[#allocation180_spill] sm:$0xff] }
 0x22e   : > { %12264 = vst [vmem:[#allocation19_spill] sm:$0xff] %v9109_v12  ;;  %4392 = vperm.xlu1 %6038, %v12270_v33   ;;  %v2721_v43 = vadd.f32 %v2657_v45, %v2273_v14  ;;  %v2722_v49 = vadd.f32 %v2658_v58, %v2274_v41  ;;  %v12272_v12 = vld [vmem:[#allocation228_spill] sm:$0xff]  ;;  %v3042_v56 = vmul.f32 %v12273_v13, %v12271_v39  ;;  %v9164_v58 = vpop.f32.mrf.mxu0  ;;  %v12283_v13 = vld [vmem:[#allocation95_spill] sm:$0xff] }
 0x22f   : > { %12268 = vst [vmem:[#allocation27_spill] sm:$0xff] %v9119_v30  ;;  %v3041_v25 = vmul.f32 %v12272_v12, %v12271_v39  ;;  %v3500_v53 = vadd.f32 %v3436_v44, %v3116_v7  ;;  %v9132_v30 = vadd.f32 %v3819_v37, %v3499_v19  ;;  %v3425_v20 = vmul.f32 %v8761_v26, %v12275_v52  ;;  %v12276_v45 = vld [vmem:[#allocation176_spill] sm:$0xff]  ;;  %v9162_v39 = vpop.permute.xlu1 %3980  ;;  %v12280_v44 = vld [vmem:[#allocation13_spill] sm:$0xff] }
 0x230   : > { %v3426_v62 = vmul.f32 %v8765_v57, %v12275_v52  ;;  %v3106_v31 = vadd.f32 %v3042_v56, %v2722_v49  ;;  %v9140_v14 = vrot.slane %v12276_v45, %v7485_v36  ;;  %v12277_v41 = vld [vmem:[#allocation40_spill] sm:$0xff]  ;;  %v9148_v37 = vrot.slane %v12276_v45, %v7499_v9  ;;  %12278 = vst [vmem:[#allocation131_spill] sm:$0xff] %v9162_v39 }
 0x231   : > { %12274 = vst [vmem:[#allocation73_spill] sm:$0xff] %v9132_v30  ;;  %v3105_v21 = vadd.f32 %v3041_v25, %v2721_v43  ;;  %v9144_v12 = vrot.slane %v12277_v41, %v7485_v36  ;;  %v9152_v26 = vrot.slane %v12277_v41, %v7499_v9  ;;  %v9156_v57 = vrot.slane %v12276_v45, %v7530_v2  ;;  %v12281_v43 = vld [vmem:[#allocation29_spill] sm:$0xff]  ;;  %v12288_v9 = vld [vmem:[#allocation22_spill] sm:$0xff] }
 0x232   : > { %v9160_v7 = vrot.slane %v12277_v41, %v7530_v2  ;;  %12279 = vst [vmem:[#allocation156_spill] sm:$0xff] %v9164_v58  ;;  %6039 = vset.pattern.permute.xlu1 %v12065_v51  ;;  %v3809_v19 = vmul.f32 %v8769_v59, %v12280_v44  ;;  %v3810_v33 = vmul.f32 %v8773_v4, %v12280_v44  ;;  %v9175_v2 = vpop.permute.xlu0 %3960  ;;  %v12284_v30 = vld [vmem:[#allocation77_spill] sm:$0xff]  ;;  %v12285_v4 = vld [vmem:[#allocation135_spill] sm:$0xff] }
 0x233   : > { %v2287_v49 = vmul.f32 %v9140_v14, %v12281_v43  ;;  %v2288_v25 = vmul.f32 %v9144_v12, %v12281_v43  ;;  %12282 = vst [vmem:[#allocation204_spill] sm:$0xff] %v9175_v2  ;;  %4696 = vperm.xlu1 %6039, %v12283_v13   ;;  %v3489_v56 = vadd.f32 %v3425_v20, %v3105_v21  ;;  %v9202_v13 = vpop.f32.mrf.mxu0 }
 0x234   : > { %v3490_v52 = vadd.f32 %v3426_v62, %v3106_v31  ;;  %v2671_v58 = vmul.f32 %v9148_v37, %v12284_v30  ;;  %v2672_v59 = vmul.f32 %v9152_v26, %v12284_v30  ;;  %v3055_v44 = vmul.f32 %v9156_v57, %v12285_v4  ;;  %12286 = vst [vmem:[#allocation20_spill] sm:$0xff] %v9202_v13  ;;  %v9217_v13 = vpop.permute.xlu1 %4276 }
 0x235   : > { %v3056_v39 = vmul.f32 %v9160_v7, %v12285_v4  ;;  %v9188_v43 = vrot.slane %v12276_v45, %v7541_v63  ;;  %v9192_v31 = vrot.slane %v12277_v41, %v7541_v63  ;;  %v9196_v21 = vrot.slane %v12276_v45, %v7552_v16  ;;  %12290 = vst [vmem:[#allocation62_spill] sm:$0xff] %v9217_v13 }
 0x236   : > { %v2735_v20 = vadd.f32 %v2671_v58, %v2287_v49  ;;  %v2736_v62 = vadd.f32 %v2672_v59, %v2288_v25  ;;  %v9200_v30 = vrot.slane %v12277_v41, %v7552_v16  ;;  %v9204_v4 = vadd.f32 %v3820_v23, %v3500_v53  ;;  %v6361_v49 = vld [vmem:[%s6468_s26 + $0xc0] sm:$0xff]  ;;  %v12289_v16 = vld [vmem:[#allocation207_spill] sm:$0xff] }
 0x237   : > { %v9206_v2 = vadd.f32 %v3809_v19, %v3489_v56  ;;  %v2277_v63 = vmul.f32 %v8817_v17, %v12288_v9  ;;  %v2278_v58 = vmul.f32 %v8821_v61, %v12288_v9  ;;  %4756 = vperm.xlu1 %6039, %v6361_v49   ;;  %v9213_v25 = vadd.f32 %v3810_v33, %v3490_v52  ;;  %v12291_v53 = vld [vmem:[#allocation99_spill] sm:$0xff]  ;;  %v12292_v19 = vld [vmem:[#allocation66_spill] sm:$0xff]  ;;  %v9227_v33 = vpop.permute.xlu0 %3968 }
 0x238   : > { %12287 = vst [vmem:[#allocation142_spill] sm:$0xff] %v9204_v4  ;;  %v3119_v59 = vadd.f32 %v3055_v44, %v2735_v20  ;;  %v3120_v45 = vadd.f32 %v3056_v39, %v2736_v62  ;;  %v3439_v41 = vmul.f32 %v9188_v43, %v12289_v16  ;;  %v3440_v23 = vmul.f32 %v9192_v31, %v12289_v16  ;;  %v12293_v52 = vld [vmem:[#allocation130_spill] sm:$0xff]  ;;  %v9235_v62 = vpop.f32.mrf.mxu0 }
 0x239   : > { %v3823_v17 = vmul.f32 %v9196_v21, %v12291_v53  ;;  %v2661_v9 = vmul.f32 %v8829_v29, %v12292_v19  ;;  %v2662_v61 = vmul.f32 %v8833_v10, %v12292_v19  ;;  %v3824_v56 = vmul.f32 %v9200_v30, %v12291_v53  ;;  %v12294_v4 = vld [vmem:[#allocation186_spill] sm:$0xff] }
 0x23a   : > { %v3503_v39 = vadd.f32 %v3439_v41, %v3119_v59  ;;  %v3045_v44 = vmul.f32 %v8844_v38, %v12293_v52  ;;  %v3046_v20 = vmul.f32 %v8848_v27, %v12293_v52  ;;  %v3504_v49 = vadd.f32 %v3440_v23, %v3120_v45  ;;  %v12295_v59 = vld [vmem:[#allocation212_spill] sm:$0xff]  ;;  %v12296_v38 = vld [vmem:[#allocation158_spill] sm:$0xff] }
 0x23b   : > { %v2725_v29 = vadd.f32 %v2661_v9, %v2277_v63  ;;  %v2726_v16 = vadd.f32 %v2662_v61, %v2278_v58  ;;  %v3429_v10 = vmul.f32 %v8865_v35, %v12294_v4  ;;  %6040 = vset.pattern.permute.xlu1 %v11997_v5  ;;  %v3430_v41 = vmul.f32 %v8873_v22, %v12294_v4  ;;  %v12297_v27 = vld [vmem:[#allocation24_spill] sm:$0xff]  ;;  %v12298_v58 = vld [vmem:[#allocation71_spill] sm:$0xff] }
 0x23c   : > { %v3813_v53 = vmul.f32 %v8879_v28, %v12295_v59  ;;  %v9245_v19 = vsub.s32 5, %v12296_v38  ;;  %v2281_v52 = vmul.f32 %v8926_v40, %v12297_v27  ;;  %v9250_v45 = vld [vmem:[%s6468_s26 + $0x70] sm:$0xff]  ;;  %v2282_v5 = vmul.f32 %v8930_v46, %v12297_v27  ;;  %v12300_v40 = vld [vmem:[#allocation175_spill] sm:$0xff]  ;;  %v9271_v46 = vpop.permute.xlu1 %4284 }
 0x23d   : > { %4332 = vperm.xlu1 %6040, %v9250_v45   ;;  %v3109_v63 = vadd.f32 %v3045_v44, %v2725_v29  ;;  %v3110_v35 = vadd.f32 %v3046_v20, %v2726_v16  ;;  %v2665_v22 = vmul.f32 %v8938_v0, %v12298_v58  ;;  %v3814_v28 = vmul.f32 %v8883_v24, %v12295_v59  ;;  %v12299_v4 = vld [vmem:[#allocation172_spill] sm:$0xff]  ;;  %v9269_v44 = vpop.f32.mrf.mxu0  ;;  %v12301_v24 = vld [vmem:[#allocation134_spill] sm:$0xff]  ;;  %v9277_v59 = vpop.permute.xlu0 %3976 }
 0x23e   : > { %v9261_v23 = vrot.slane %v12299_v4, %v9245_v19  ;;  %v9265_v9 = vrot.slane %v12300_v40, %v9245_v19  ;;  %v2666_v61 = vmul.f32 %v8942_v3, %v12298_v58  ;;  %v9273_v0 = vadd.f32 %v3823_v17, %v3503_v39  ;;  %v12302_v4 = vld [vmem:[#allocation192_spill] sm:$0xff]  ;;  %v12303_v39 = vld [vmem:[#allocation110_spill] sm:$0xff] }
 0x23f   : > { %v3493_v20 = vadd.f32 %v3429_v10, %v3109_v63  ;;  %v2729_v29 = vadd.f32 %v2665_v22, %v2281_v52  ;;  %v3049_v16 = vmul.f32 %v8946_v42, %v12301_v24  ;;  %v3494_v27 = vadd.f32 %v3430_v41, %v3110_v35  ;;  %v9284_v58 = vld [vmem:[%s6468_s26 + $0xf0] sm:$0xff] }
 0x240   : > { %v2730_v13 = vadd.f32 %v2666_v61, %v2282_v5  ;;  %v3050_v40 = vmul.f32 %v8950_v47, %v12301_v24  ;;  %v3433_v3 = vmul.f32 %v8974_v11, %v12302_v4  ;;  %v9287_v17 = vadd.f32 %v3824_v56, %v3504_v49  ;;  %v12306_v35 = vld [vmem:[#allocation148_spill] sm:$0xff]  ;;  %v9299_v5 = vpop.f32.mrf.mxu0  ;;  %v12311_v24 = vld [vmem:[#allocation75_spill] sm:$0xff] }
 0x241   : > { %4396 = vperm.xlu1 %6040, %v9284_v58   ;;  %v4147_v10 = vmul.f32 %v9261_v23, %v12303_v39  ;;  %v4148_v42 = vmul.f32 %v9265_v9, %v12303_v39  ;;  %v3113_v41 = vadd.f32 %v3049_v16, %v2729_v29  ;;  %v9293_v52 = vadd.f32 %v3813_v53, %v3493_v20  ;;  %v12307_v22 = vld [vmem:[#allocation184_spill] sm:$0xff]  ;;  %v12308_v53 = vld [vmem:[#allocation190_spill] sm:$0xff]  ;;  %v12310_v20 = vld [vmem:[#allocation127_spill] sm:$0xff] }
 0x242   : > { %v9295_v63 = vadd.f32 %v3814_v28, %v3494_v27  ;;  %v3114_v47 = vadd.f32 %v3050_v40, %v2730_v13  ;;  %v3817_v11 = vmul.f32 %v8984_v18, %v12306_v35  ;;  %v3434_v56 = vmul.f32 %v8978_v54, %v12302_v4  ;;  %v12309_v40 = vld [vmem:[#allocation26_spill] sm:$0xff]  ;;  %v9319_v4 = vpop.permute.xlu1 %4288  ;;  %v12313_v16 = vld [vmem:[#allocation32_spill] sm:$0xff]  ;;  %v12314_v39 = vld [vmem:[#allocation215_spill] sm:$0xff] }
 0x243   : > { %12304 = vst [vmem:[#allocation149_spill] sm:$0xff] %v9293_v52  ;;  %v3818_v49 = vmul.f32 %v8988_v55, %v12306_v35  ;;  %v9307_v61 = vrot.slane %v12307_v22, %v9245_v19  ;;  %v9311_v28 = vrot.slane %v12308_v53, %v9245_v19  ;;  %v3497_v13 = vadd.f32 %v3433_v3, %v3113_v41  ;;  %v12312_v55 = vld [vmem:[#allocation221_spill] sm:$0xff]  ;;  %v9330_v41 = vpop.permute.xlu0 %3984  ;;  %v12317_v52 = vld [vmem:[#allocation138_spill] sm:$0xff] }
 0x244   : > { %12305 = vst [vmem:[#allocation42_spill] sm:$0xff] %v9295_v63  ;;  %v2285_v18 = vmul.f32 %v9031_v32, %v12309_v40  ;;  %v2286_v29 = vmul.f32 %v12310_v20, %v12309_v40  ;;  %v2669_v54 = vmul.f32 %v9040_v1, %v12311_v24  ;;  %v9323_v27 = vadd.f32 %v4147_v10, %v12313_v16  ;;  %v12316_v20 = vld [vmem:[#allocation21_spill] sm:$0xff] }
 0x245   : > { %4400 = vperm.xlu1 %6040, %v12312_v55   ;;  %v9326_v35 = vadd.f32 %v4148_v42, %v12314_v39  ;;  %v3498_v3 = vadd.f32 %v3434_v56, %v3114_v47  ;;  %v2670_v32 = vmul.f32 %v9044_v15, %v12311_v24  ;;  %v9332_v40 = vadd.f32 %v3817_v11, %v3497_v13  ;;  %v9338_v55 = vpop.f32.mrf.mxu0  ;;  %v12319_v13 = vld [vmem:[#allocation196_spill] sm:$0xff]  ;;  %v12320_v24 = vld [vmem:[#allocation177_spill] sm:$0xff]  ;;  %v12322_v39 = vld [vmem:[#allocation178_spill] sm:$0xff] }
 0x246   : > { %v4153_v1 = vmul.f32 %v9307_v61, %v12316_v20  ;;  %v2733_v63 = vadd.f32 %v2669_v54, %v2285_v18  ;;  %v3053_v10 = vmul.f32 %v9060_v60, %v12317_v52  ;;  %v4154_v47 = vmul.f32 %v9311_v28, %v12316_v20  ;;  %v12321_v54 = vld [vmem:[#allocation15_spill] sm:$0xff]  ;;  %v12325_v20 = vld [vmem:[#allocation165_spill] sm:$0xff] }
 0x247   : > { %12315 = vst [vmem:[#allocation126_spill] sm:$0xff] %v9332_v40  ;;  %v9340_v42 = vadd.f32 %v3818_v49, %v3498_v3  ;;  %v2734_v15 = vadd.f32 %v2670_v32, %v2286_v29  ;;  %v3054_v11 = vmul.f32 %v9064_v50, %v12317_v52  ;;  %v3437_v16 = vmul.f32 %v12320_v24, %v12319_v13  ;;  %v12323_v29 = vld [vmem:[#allocation181_spill] sm:$0xff]  ;;  %v12324_v50 = vld [vmem:[#allocation28_spill] sm:$0xff] }
 0x248   : > { %v3117_v56 = vadd.f32 %v3053_v10, %v2733_v63  ;;  %v3438_v18 = vmul.f32 %v9088_v34, %v12319_v13  ;;  %v3821_v60 = vmul.f32 %v9097_v6, %v12321_v54  ;;  %v4038_v3 = vrot.slane %v12322_v39, %v9245_v19  ;;  %v6364_v63 = vld [vmem:[%s6468_s26 + $0x58] sm:$0xff]  ;;  %v12327_v34 = vld [vmem:[#allocation79_spill] sm:$0xff]  ;;  %v9371_v13 = vpop.permute.xlu1 %4344  ;;  %v12329_v24 = vld [vmem:[#allocation4_spill] sm:$0xff] }
 0x249   : > { %12318 = vst [vmem:[#allocation228_spill] sm:$0xff] %v9340_v42  ;;  %6042 = vset.pattern.permute.xlu1 %v12065_v51  ;;  %v3118_v49 = vadd.f32 %v3054_v11, %v2734_v15  ;;  %v4042_v32 = vrot.slane %v12323_v29, %v9245_v19  ;;  %v2289_v52 = vmul.f32 %v9140_v14, %v12324_v50  ;;  %v9369_v11 = vpop.f32.mrf.mxu0  ;;  %12328 = vst [vmem:[#allocation180_spill] sm:$0xff] %v9371_v13  ;;  %v12332_v29 = vld [vmem:[#allocation191_spill] sm:$0xff] }
 0x24a   : > { %4704 = vperm.xlu1 %6042, %v6364_v63   ;;  %v9361_v10 = vadd.f32 %v4153_v1, %v12325_v20  ;;  %v2290_v6 = vmul.f32 %v9144_v12, %v12324_v50  ;;  %v2673_v51 = vmul.f32 %v9148_v37, %v12327_v34  ;;  %v2674_v15 = vmul.f32 %v9152_v26, %v12327_v34  ;;  %v9378_v20 = vpop.permute.xlu0 %3988  ;;  %v12331_v37 = vld [vmem:[#allocation141_spill] sm:$0xff] }
 0x24b   : > { %v9374_v14 = vadd.f32 %v4154_v47, %v12329_v24  ;;  %v3501_v63 = vadd.f32 %v3437_v16, %v3117_v56  ;;  %v3502_v42 = vadd.f32 %v3438_v18, %v3118_v49  ;;  %v3822_v1 = vmul.f32 %v9101_v48, %v12321_v54  ;;  %v12333_v16 = vld [vmem:[#allocation202_spill] sm:$0xff]  ;;  %v12334_v48 = vld [vmem:[#allocation171_spill] sm:$0xff] }
 0x24c   : > { %12326 = vst [vmem:[#allocation166_spill] sm:$0xff] %v9361_v10  ;;  %v2737_v12 = vadd.f32 %v2673_v51, %v2289_v52  ;;  %v2738_v50 = vadd.f32 %v2674_v15, %v2290_v6  ;;  %v3057_v40 = vmul.f32 %v9156_v57, %v12331_v37  ;;  %v3058_v26 = vmul.f32 %v9160_v7, %v12331_v37  ;;  %v12335_v57 = vld [vmem:[#allocation102_spill] sm:$0xff]  ;;  %v9395_v7 = vpop.f32.mrf.mxu0  ;;  %v12339_v24 = vld [vmem:[#allocation39_spill] sm:$0xff]  ;;  %v9411_v37 = vpop.permute.xlu1 %4352 }
 0x24d   : > { %12330 = vst [vmem:[#allocation13_spill] sm:$0xff] %v9374_v14  ;;  %v9384_v34 = vadd.f32 %v3821_v60, %v3501_v63  ;;  %v4157_v47 = vmul.f32 %v4038_v3, %v12332_v29  ;;  %v4158_v56 = vmul.f32 %v4042_v32, %v12332_v29  ;;  %v3441_v18 = vmul.f32 %v9188_v43, %v12333_v16  ;;  %v12337_v29 = vld [vmem:[#allocation193_spill] sm:$0xff]  ;;  %v12338_v43 = vld [vmem:[#allocation194_spill] sm:$0xff] }
 0x24e   : > { %4764 = vperm.xlu1 %6042, %v12334_v48   ;;  %v3121_v54 = vadd.f32 %v3057_v40, %v2737_v12  ;;  %v3122_v49 = vadd.f32 %v3058_v26, %v2738_v50  ;;  %v3442_v52 = vmul.f32 %v9192_v31, %v12333_v16  ;;  %v3825_v6 = vmul.f32 %v9196_v21, %v12335_v57  ;;  %v12340_v12 = vld [vmem:[#allocation197_spill] sm:$0xff]  ;;  %v12342_v26 = vld [vmem:[#allocation152_spill] sm:$0xff] }
 0x24f   : > { %12336 = vst [vmem:[#allocation29_spill] sm:$0xff] %v9395_v7  ;;  %v3826_v60 = vmul.f32 %v9200_v30, %v12335_v57  ;;  %v4046_v51 = vrot.slane %v12337_v29, %v9245_v19  ;;  %v4050_v15 = vrot.slane %v12338_v43, %v9245_v19  ;;  %v4149_v40 = vmul.f32 %v9261_v23, %v12339_v24  ;;  %v12343_v57 = vld [vmem:[#allocation198_spill] sm:$0xff]  ;;  %v9417_v23 = vpop.permute.xlu0 %3996 }
 0x250   : > { %v9405_v63 = vadd.f32 %v3822_v1, %v3502_v42  ;;  %v3505_v31 = vadd.f32 %v3441_v18, %v3121_v54  ;;  %v4150_v21 = vmul.f32 %v9265_v9, %v12339_v24  ;;  %v4054_v50 = vrot.slane %v12340_v12, %v9245_v19  ;;  %12341 = vst [vmem:[#allocation95_spill] sm:$0xff] %v9411_v37  ;;  %v12344_v42 = vld [vmem:[#allocation94_spill] sm:$0xff]  ;;  %v12345_v1 = vld [vmem:[#allocation5_spill] sm:$0xff]  ;;  %v12347_v9 = vld [vmem:[#allocation224_spill] sm:$0xff] }
 0x251   : > { %v3506_v30 = vadd.f32 %v3442_v52, %v3122_v49  ;;  %v4161_v16 = vmul.f32 %v4046_v51, %v12342_v26  ;;  %v4162_v48 = vmul.f32 %v4050_v15, %v12342_v26  ;;  %v4058_v43 = vrot.slane %v12343_v57, %v9245_v19  ;;  %v12349_v24 = vld [vmem:[#allocation208_spill] sm:$0xff]  ;;  %v12350_v52 = vld [vmem:[#allocation53_spill] sm:$0xff]  ;;  %v9430_v26 = vpop.f32.mrf.mxu0  ;;  %v12354_v37 = vld [vmem:[#allocation111_spill] sm:$0xff] }
 0x252   : > { %4708 = vperm.xlu1 %6042, %v12344_v42   ;;  %v9421_v18 = vadd.f32 %v4157_v47, %v12345_v1  ;;  %v9424_v54 = vadd.f32 %v4158_v56, %v12347_v9  ;;  %v9427_v49 = vadd.f32 %v4149_v40, %v12349_v24  ;;  %v4165_v12 = vmul.f32 %v4054_v50, %v12350_v52  ;;  %v12355_v1 = vld [vmem:[#allocation209_spill] sm:$0xff]  ;;  %v12356_v9 = vld [vmem:[#allocation199_spill] sm:$0xff] }
 0x253   : > { %12351 = vst [vmem:[#allocation22_spill] sm:$0xff] %v9430_v26  ;;  %v9432_v29 = vadd.f32 %v3825_v6, %v3505_v31  ;;  %v9434_v57 = vadd.f32 %v3826_v60, %v3506_v30  ;;  %v4166_v42 = vmul.f32 %v4058_v43, %v12350_v52  ;;  %v4151_v47 = vmul.f32 %v9307_v61, %v12354_v37  ;;  %v12358_v31 = vld [vmem:[#allocation173_spill] sm:$0xff]  ;;  %v12360_v30 = vld [vmem:[#allocation6_spill] sm:$0xff] }
 0x254   : > { %12346 = vst [vmem:[#allocation77_spill] sm:$0xff] %v9421_v18  ;;  %12348 = vst [vmem:[#allocation135_spill] sm:$0xff] %v9424_v54  ;;  %v9440_v56 = vadd.f32 %v4150_v21, %v12355_v1  ;;  %v4152_v40 = vmul.f32 %v9311_v28, %v12354_v37  ;;  %v4062_v24 = vrot.slane %v12356_v9, %v9245_v19  ;;  %v12357_v54 = vld [vmem:[#allocation200_spill] sm:$0xff]  ;;  %v6365_v1 = vld [vmem:[%s6468_s26 + $0xe0] sm:$0xff] }
 0x255   : > { %12352 = vst [vmem:[#allocation207_spill] sm:$0xff] %v9432_v29  ;;  %12353 = vst [vmem:[#allocation99_spill] sm:$0xff] %v9434_v57  ;;  %v4066_v6 = vrot.slane %v12357_v54, %v9245_v19  ;;  %v9449_v60 = vadd.f32 %v4161_v16, %v12358_v31  ;;  %v9452_v52 = vadd.f32 %v4162_v48, %v12360_v30  ;;  %v12362_v57 = vld [vmem:[#allocation223_spill] sm:$0xff]  ;;  %v12363_v29 = vld [vmem:[#allocation46_spill] sm:$0xff]  ;;  %v9466_v31 = vpop.f32.mrf.mxu0  ;;  %v9468_v48 = vpop.permute.xlu1 %3992 }
 0x256   : > { %v4155_v61 = vmul.f32 %v4038_v3, %v12362_v57  ;;  %v4156_v21 = vmul.f32 %v4042_v32, %v12362_v57  ;;  %4772 = vperm.xlu1 %6042, %v6365_v1   ;;  %v9458_v28 = vadd.f32 %v4165_v12, %v12363_v29  ;;  %v12365_v37 = vld [vmem:[#allocation25_spill] sm:$0xff]  ;;  %v12366_v54 = vld [vmem:[#allocation203_spill] sm:$0xff]  ;;  %12367 = vst [vmem:[#allocation212_spill] sm:$0xff] %v9466_v31  ;;  %12368 = vst [vmem:[#allocation158_spill] sm:$0xff] %v9468_v48 }
 0x257   : > { %12359 = vst [vmem:[#allocation66_spill] sm:$0xff] %v9449_v60  ;;  %12361 = vst [vmem:[#allocation130_spill] sm:$0xff] %v9452_v52  ;;  %v4169_v9 = vmul.f32 %v4062_v24, %v12365_v37  ;;  %v4170_v18 = vmul.f32 %v4066_v6, %v12365_v37  ;;  %v9464_v16 = vrot.slane %v12366_v54, %v9245_v19  ;;  %v12369_v3 = vld [vmem:[#allocation107_spill] sm:$0xff]  ;;  %v12371_v32 = vld [vmem:[#allocation37_spill] sm:$0xff]  ;;  %v9482_v54 = vpop.permute.xlu0 %4008 }
 0x258   : > { %12364 = vst [vmem:[#allocation186_spill] sm:$0xff] %v9458_v28  ;;  %v9471_v30 = vadd.f32 %v4166_v42, %v12369_v3  ;;  %v9474_v57 = vadd.f32 %v4151_v47, %v12371_v32  ;;  %v12372_v29 = vld [vmem:[#allocation205_spill] sm:$0xff]  ;;  %v12373_v1 = vld [vmem:[#allocation87_spill] sm:$0xff]  ;;  %v504_v37 = vld [vmem:[%s11367_s4] sm:$0x3] }
 0x259   : > { %v4074_v12 = vrot.slane %v12372_v29, %v9245_v19  ;;  %v4159_v28 = vmul.f32 %v4046_v51, %v12373_v1  ;;  %v12374_v52 = vld [vmem:[#allocation55_spill] sm:$0xff]  ;;  %v12375_v48 = vld [vmem:[#allocation36_spill] sm:$0xff]  ;;  %v12377_v3 = vld [vmem:[#allocation2_spill] sm:$0xff]  ;;  %v4160_v29 = vmul.f32 %v4050_v15, %v12373_v1 }
 0x25a   : > { %12370 = vst [vmem:[#allocation24_spill] sm:$0xff] %v9471_v30  ;;  %v9485_v60 = vadd.f32 %v4152_v40, %v12374_v52  ;;  %v9488_v42 = vadd.f32 %v4155_v61, %v12375_v48  ;;  %v9491_v47 = vadd.f32 %v4156_v21, %v12377_v3  ;;  %v12379_v32 = vld [vmem:[#allocation58_spill] sm:$0xff]  ;;  %v12381_v40 = vld [vmem:[#allocation155_spill] sm:$0xff]  ;;  %4716 = vperm.xlu1 %6042, %v9250_v45   ;;  %v12384_v48 = vld [vmem:[#allocation9_spill] sm:$0xff] }
 0x25b   : > { %v4173_v30 = vmul.f32 %v9464_v16, %v12379_v32  ;;  %v4174_v51 = vmul.f32 %v4074_v12, %v12379_v32  ;;  %v12380_v31 = vld [vmem:[#allocation206_spill] sm:$0xff]  ;;  %v9503_v52 = vrot.slane %v12381_v40, %v9245_v19  ;;  %v12382_v61 = vld [vmem:[#allocation51_spill] sm:$0xff]  ;;  %v9510_v3 = vadd.f32 %v4170_v18, %v12384_v48  ;;  %v12386_v15 = vld [vmem:[#allocation189_spill] sm:$0xff] }
 0x25c   : > { %12376 = vst [vmem:[#allocation71_spill] sm:$0xff] %v9488_v42  ;;  %12378 = vst [vmem:[#allocation134_spill] sm:$0xff] %v9491_v47  ;;  %v9499_v39 = vrot.slane %v12380_v31, %v9245_v19  ;;  %v9507_v21 = vadd.f32 %v4169_v9, %v12382_v61  ;;  %v9513_v32 = vrot.slane %v504_v37, %v7485_v36  ;;  %v9516_v47 = vpop.f32.mrf.mxu0  ;;  %v12388_v31 = vld [vmem:[#allocation115_spill] sm:$0xff]  ;;  %v12390_v40 = vld [vmem:[#allocation216_spill] sm:$0xff] }
 0x25d   : > { %12385 = vst [vmem:[#allocation110_spill] sm:$0xff] %v9510_v3  ;;  %v4163_v1 = vmul.f32 %v4054_v50, %v12386_v15  ;;  %12387 = vst [vmem:[#allocation148_spill] sm:$0xff] %v9516_v47  ;;  %v9519_v42 = vadd.f32 %v4173_v30, %v12388_v31  ;;  %v9522_v13 = vadd.f32 %v4159_v28, %v12390_v40  ;;  %v12392_v9 = vld [vmem:[#allocation179_spill] sm:$0xff]  ;;  %v12393_v50 = vld [vmem:[#allocation210_spill] sm:$0xff]  ;;  %v9539_v28 = vpop.permute.xlu1 %4292 }
 0x25e   : > { %12383 = vst [vmem:[#allocation192_spill] sm:$0xff] %v9507_v21  ;;  %v4177_v45 = vmul.f32 %v9499_v39, %v9117_v8  ;;  %v4178_v18 = vmul.f32 %v9503_v52, %v9117_v8  ;;  %v1047_v61 = vadd.f32 %v12392_v9, %v9513_v32  ;;  %v4164_v48 = vmul.f32 %v4058_v43, %v12386_v15  ;;  %v12394_v31 = vld [vmem:[#allocation213_spill] sm:$0xff]  ;;  %v12400_v3 = vld [vmem:[#allocation160_spill] sm:$0xff]  ;;  %v12402_v43 = vld [vmem:[#allocation167_spill] sm:$0xff]  ;;  %v9553_v21 = vpop.permute.xlu0 %4012 }
 0x25f   : > { %12389 = vst [vmem:[#allocation184_spill] sm:$0xff] %v9519_v42  ;;  %12391 = vst [vmem:[#allocation190_spill] sm:$0xff] %v9522_v13  ;;  %v9533_v36 = vrot.slane %v12393_v50, %v9245_v19  ;;  %v9537_v30 = vrot.slane %v12394_v31, %v9245_v19  ;;  %v12396_v40 = vld [vmem:[#allocation185_spill] sm:$0xff]  ;;  %v9548_v9 = vadd.f32 %v4163_v1, %v12400_v3  ;;  %4780 = vperm.xlu1 %6042, %v9284_v58   ;;  %v9565_v1 = vpop.f32.mrf.mxu0 }
 0x260   : > { %12395 = vst [vmem:[#allocation26_spill] sm:$0xff] %v9539_v28  ;;  %v9542_v13 = vadd.f32 %v4174_v51, %v12396_v40  ;;  %v12398_v42 = vld [vmem:[#allocation217_spill] sm:$0xff]  ;;  %v9551_v15 = vrot.slane %v504_v37, %v12402_v43  ;;  %v12405_v28 = vld [vmem:[#allocation204_spill] sm:$0xff]  ;;  %12407 = vst [vmem:[#allocation215_spill] sm:$0xff] %v9565_v1 }
 0x261   : > { %v9545_v8 = vadd.f32 %v4160_v29, %v12398_v42  ;;  %12401 = vst [vmem:[#allocation221_spill] sm:$0xff] %v9548_v9  ;;  %v12403_v47 = vld [vmem:[#allocation45_spill] sm:$0xff]  ;;  %v4181_v51 = vmul.f32 %v9533_v36, %v12405_v28  ;;  %v4182_v29 = vmul.f32 %v9537_v30, %v12405_v28  ;;  %v12406_v42 = vld [vmem:[#allocation56_spill] sm:$0xff]  ;;  %v12408_v37 = vld [vmem:[#allocation103_spill] sm:$0xff] }
 0x262   : > { %12397 = vst [vmem:[#allocation127_spill] sm:$0xff] %v9542_v13  ;;  %v9557_v26 = vadd.f32 %v12403_v47, %v1047_v61  ;;  %v1051_v3 = vadd.f32 %v12406_v42, %v9513_v32  ;;  %v9568_v40 = vadd.f32 %v4177_v45, %v12408_v37  ;;  %v12410_v43 = vld [vmem:[#allocation161_spill] sm:$0xff]  ;;  %v12411_v9 = vld [vmem:[#allocation119_spill] sm:$0xff]  ;;  %v12412_v61 = vld [vmem:[#allocation30_spill] sm:$0xff] }
 0x263   : > { %12399 = vst [vmem:[#allocation75_spill] sm:$0xff] %v9545_v8  ;;  %v1049_v58 = vadd.f32 %v12410_v43, %v9551_v15  ;;  %v4167_v47 = vmul.f32 %v4062_v24, %v12411_v9  ;;  %v9575_v8 = vrot.slane %v12412_v61, %v9245_v19  ;;  %v12413_v13 = vld [vmem:[#allocation60_spill] sm:$0xff]  ;;  %v12415_v28 = vld [vmem:[#allocation31_spill] sm:$0xff]  ;;  %v12417_v42 = vld [vmem:[#allocation49_spill] sm:$0xff]  ;;  %v4168_v45 = vmul.f32 %v4066_v6, %v12411_v9 }
 0x264   : > { %12404 = vst [vmem:[#allocation32_spill] sm:$0xff] %v9557_v26  ;;  %12409 = vst [vmem:[#allocation21_spill] sm:$0xff] %v9568_v40  ;;  %v9578_v7 = vadd.f32 %v4178_v18, %v12413_v13  ;;  %v9581_v14 = vadd.f32 %v4164_v48, %v12415_v28  ;;  %v9584_v1 = vadd.f32 %v12417_v42, %v1051_v3  ;;  %v12419_v43 = vld [vmem:[#allocation11_spill] sm:$0xff]  ;;  %v12422_v61 = vld [vmem:[#allocation214_spill] sm:$0xff]  ;;  %v9607_v42 = vpop.f32.mrf.mxu0  ;;  %v9619_v26 = vpop.permute.xlu0 %4280 }
 0x265   : > { %v9589_v40 = vadd.f32 %v4181_v51, %v12419_v43  ;;  %v12420_v24 = vld [vmem:[#allocation47_spill] sm:$0xff]  ;;  %v9596_v13 = vrot.slane %v12422_v61, %v9245_v19  ;;  %v12423_v18 = vld [vmem:[#allocation64_spill] sm:$0xff]  ;;  %v4185_v3 = vmul.f32 %v9575_v8, %v9227_v33  ;;  %12426 = vst [vmem:[#allocation28_spill] sm:$0xff] %v9607_v42 }
 0x266   : > { %12414 = vst [vmem:[#allocation138_spill] sm:$0xff] %v9578_v7  ;;  %12416 = vst [vmem:[#allocation196_spill] sm:$0xff] %v9581_v14  ;;  %v9592_v10 = vadd.f32 %v12420_v24, %v1049_v58  ;;  %v9599_v48 = vadd.f32 %v4182_v29, %v12423_v18  ;;  %v12424_v6 = vld [vmem:[#allocation44_spill] sm:$0xff]  ;;  %v9609_v58 = vpop.permute.xlu1 %4356  ;;  %v12428_v43 = vld [vmem:[#allocation187_spill] sm:$0xff] }
 0x267   : > { %12418 = vst [vmem:[#allocation177_spill] sm:$0xff] %v9584_v1  ;;  %v1053_v9 = vadd.f32 %v12424_v6, %v9551_v15  ;;  %v12425_v28 = vld [vmem:[#allocation220_spill] sm:$0xff]  ;;  %12427 = vst [vmem:[#allocation165_spill] sm:$0xff] %v9609_v58  ;;  %v9612_v24 = vadd.f32 %v4167_v47, %v12428_v43  ;;  %v4186_v29 = vmul.f32 %v9596_v13, %v9227_v33  ;;  %v12430_v18 = vld [vmem:[#allocation34_spill] sm:$0xff] }
 0x268   : > { %12421 = vst [vmem:[#allocation15_spill] sm:$0xff] %v9592_v10  ;;  %v1057_v51 = vadd.f32 %v12425_v28, %v9513_v32  ;;  %v4171_v37 = vmul.f32 %v9464_v16, %v12430_v18  ;;  %v4172_v14 = vmul.f32 %v4074_v12, %v12430_v18  ;;  %v12431_v7 = vld [vmem:[#allocation145_spill] sm:$0xff]  ;;  %v12433_v47 = vld [vmem:[#allocation218_spill] sm:$0xff]  ;;  %v12436_v58 = vld [vmem:[#allocation52_spill] sm:$0xff] }
 0x269   : > { %12429 = vst [vmem:[#allocation79_spill] sm:$0xff] %v9612_v24  ;;  %v9624_v42 = vadd.f32 %v4168_v45, %v12431_v7  ;;  %v9628_v43 = vrot.slane %v12433_v47, %v9245_v19  ;;  %v12434_v24 = vld [vmem:[#allocation188_spill] sm:$0xff]  ;;  %v9634_v16 = vadd.f32 %v12436_v58, %v1053_v9  ;;  %v12438_v12 = vld [vmem:[#allocation54_spill] sm:$0xff]  ;;  %v12440_v6 = vld [vmem:[#allocation219_spill] sm:$0xff]  ;;  %v9653_v58 = vpop.f32.mrf.mxu0 }
 0x26a   : > { %v9631_v33 = vadd.f32 %v4185_v3, %v12434_v24  ;;  %v9637_v18 = vadd.f32 %v12438_v12, %v1057_v51  ;;  %v9641_v10 = vrot.slane %v12440_v6, %v9245_v19  ;;  %v12441_v28 = vld [vmem:[#allocation170_spill] sm:$0xff]  ;;  %v12443_v45 = vld [vmem:[#allocation35_spill] sm:$0xff]  ;;  %12446 = vst [vmem:[#allocation39_spill] sm:$0xff] %v9653_v58 }
 0x26b   : > { %12432 = vst [vmem:[#allocation4_spill] sm:$0xff] %v9624_v42  ;;  %12437 = vst [vmem:[#allocation191_spill] sm:$0xff] %v9634_v16  ;;  %v9644_v7 = vadd.f32 %v4186_v29, %v12441_v28  ;;  %v9647_v42 = vadd.f32 %v4171_v37, %v12443_v45  ;;  %v4189_v3 = vmul.f32 %v9628_v43, %v9277_v59  ;;  %v12445_v24 = vld [vmem:[#allocation182_spill] sm:$0xff]  ;;  %v12447_v51 = vld [vmem:[#allocation43_spill] sm:$0xff] }
 0x26c   : > { %12435 = vst [vmem:[#allocation141_spill] sm:$0xff] %v9631_v33  ;;  %12439 = vst [vmem:[#allocation202_spill] sm:$0xff] %v9637_v18  ;;  %v1059_v9 = vadd.f32 %v12445_v24, %v9551_v15  ;;  %v9656_v12 = vadd.f32 %v4172_v14, %v12447_v51  ;;  %v4190_v1 = vmul.f32 %v9641_v10, %v9277_v59  ;;  %v12449_v29 = vld [vmem:[#allocation14_spill] sm:$0xff]  ;;  %v12450_v6 = vld [vmem:[#allocation195_spill] sm:$0xff]  ;;  %v9677_v59 = vpop.permute.xlu1 %4360  ;;  %v9698_v18 = vpop.f32.mrf.mxu0 }
 0x26d   : > { %12442 = vst [vmem:[#allocation171_spill] sm:$0xff] %v9644_v7  ;;  %12444 = vst [vmem:[#allocation102_spill] sm:$0xff] %v9647_v42  ;;  %v1061_v28 = vadd.f32 %v12449_v29, %v9513_v32  ;;  %v4175_v37 = vmul.f32 %v9499_v39, %v12450_v6  ;;  %v12451_v45 = vld [vmem:[#allocation57_spill] sm:$0xff]  ;;  %v4176_v24 = vmul.f32 %v9503_v52, %v12450_v6  ;;  %v12453_v47 = vld [vmem:[#allocation91_spill] sm:$0xff]  ;;  %v9687_v52 = vpop.permute.xlu0 %4340 }
 0x26e   : > { %12448 = vst [vmem:[#allocation152_spill] sm:$0xff] %v9656_v12  ;;  %v9665_v42 = vadd.f32 %v12451_v45, %v1059_v9  ;;  %v9671_v58 = vrot.slane %v12453_v47, %v9245_v19  ;;  %v12454_v14 = vld [vmem:[#allocation3_spill] sm:$0xff]  ;;  %12455 = vst [vmem:[#allocation5_spill] sm:$0xff] %v9677_v59  ;;  %v12462_v29 = vld [vmem:[#allocation114_spill] sm:$0xff] }
 0x26f   : > { %v9675_v51 = vrot.slane %v12454_v14, %v9245_v19  ;;  %v12456_v12 = vld [vmem:[#allocation19_spill] sm:$0xff]  ;;  %v1063_v39 = vadd.f32 %v12462_v29, %v9551_v15  ;;  %12463 = vst [vmem:[#allocation111_spill] sm:$0xff] %v9698_v18  ;;  %v12467_v16 = vld [vmem:[#allocation174_spill] sm:$0xff]  ;;  %v12470_v29 = vld [vmem:[#allocation61_spill] sm:$0xff] }
 0x270   : > { %12452 = vst [vmem:[#allocation94_spill] sm:$0xff] %v9665_v42  ;;  %v9682_v9 = vadd.f32 %v4189_v3, %v12456_v12  ;;  %v12458_v45 = vld [vmem:[#allocation59_spill] sm:$0xff]  ;;  %v4193_v14 = vmul.f32 %v9671_v58, %v9330_v41  ;;  %v12464_v3 = vld [vmem:[#allocation84_spill] sm:$0xff] }
 0x271   : > { %v9685_v7 = vadd.f32 %v12458_v45, %v1061_v28  ;;  %v12460_v6 = vld [vmem:[#allocation27_spill] sm:$0xff]  ;;  %v4194_v59 = vmul.f32 %v9675_v51, %v9330_v41  ;;  %v9701_v12 = vadd.f32 %v4175_v37, %v12464_v3  ;;  %v9714_v33 = vadd.f32 %v12470_v29, %v1063_v39  ;;  %v12472_v37 = vld [vmem:[#allocation33_spill] sm:$0xff]  ;;  %v9760_v18 = vpop.permute.xlu0 %4348 }
 0x272   : > { %12457 = vst [vmem:[#allocation224_spill] sm:$0xff] %v9682_v9  ;;  %v9690_v47 = vadd.f32 %v4190_v1, %v12460_v6  ;;  %v12466_v28 = vld [vmem:[#allocation23_spill] sm:$0xff]  ;;  %v4179_v1 = vmul.f32 %v9533_v36, %v12467_v16  ;;  %v4180_v6 = vmul.f32 %v9537_v30, %v12467_v16  ;;  %v9718_v3 = vrot.slane %v12472_v37, %v9245_v19  ;;  %v6253_v36 = vld [vmem:[%s11370_s7 + $0x74] ss:$8 sps:$4 sm:$0xff]  }
 0x273   : > { %12459 = vst [vmem:[#allocation208_spill] sm:$0xff] %v9685_v7  ;;  %12465 = vst [vmem:[#allocation209_spill] sm:$0xff] %v9701_v12  ;;  %v1067_v45 = vadd.f32 %v12466_v28, %v9513_v32  ;;  %v12468_v41 = vld [vmem:[#allocation7_spill] sm:$0xff]  ;;  %v6251_v28 = vld [vmem:[%s11370_s7 + $0x70] ss:$8 sps:$4 sm:$0xff]   ;;  %v9728_v16 = vadd.f32 %v4193_v14, %v9206_v2  ;;  %v9746_v14 = vpop.f32.mrf.mxu0  ;;  %5670 = vmatprep.subr.bf16.mxu0 %v6253_v36 }
 0x274   : > { %12461 = vst [vmem:[#allocation53_spill] sm:$0xff] %v9690_v47  ;;  %v9711_v9 = vadd.f32 %v4176_v24, %v12468_v41  ;;  %12471 = vst [vmem:[#allocation6_spill] sm:$0xff] %v9714_v33  ;;  %v12474_v24 = vld [vmem:[#allocation63_spill] sm:$0xff]  ;;  %v9738_v47 = vadd.f32 %v4194_v59, %v9213_v25  ;;  %v12479_v12 = vld [vmem:[#allocation16_spill] sm:$0xff]  ;;  %5671 = vmatpush1.bf16.msra.mxu0 %v6251_v28 }
 0x275   : > { %12473 = vst [vmem:[#allocation223_spill] sm:$0xff] %v9728_v16  ;;  %v9731_v39 = vadd.f32 %v12474_v24, %v1067_v45  ;;  %v12476_v41 = vld [vmem:[#allocation183_spill] sm:$0xff]  ;;  %v1069_v42 = vadd.f32 %v12479_v12, %v9551_v15  ;;  %v12480_v30 = vld [vmem:[#allocation68_spill] sm:$0xff]  ;;  %12481 = vst [vmem:[#allocation37_spill] sm:$0xff] %v9746_v14  ;;  %v9748_v45 = vpop.permute.xlu1 %4000 }
 0x276   : > { %12469 = vst [vmem:[#allocation173_spill] sm:$0xff] %v9711_v9  ;;  %v9735_v29 = vrot.slane %v12476_v41, %v9245_v19  ;;  %12478 = vst [vmem:[#allocation107_spill] sm:$0xff] %v9738_v47  ;;  %v4195_v9 = vmul.f32 %v9718_v3, %v9378_v20  ;;  %v1071_v2 = vadd.f32 %v12480_v30, %v9513_v32  ;;  %v12483_v24 = vld [vmem:[#allocation8_spill] sm:$0xff]  ;;  %v12484_v7 = vld [vmem:[#allocation17_spill] sm:$0xff] }
 0x277   : > { %12475 = vst [vmem:[#allocation46_spill] sm:$0xff] %v9731_v39  ;;  %12482 = vst [vmem:[#allocation87_spill] sm:$0xff] %v9748_v45  ;;  %v9751_v16 = vadd.f32 %v4179_v1, %v12483_v24  ;;  %v9754_v25 = vadd.f32 %v4180_v6, %v12484_v7  ;;  %v12485_v47 = vld [vmem:[#allocation18_spill] sm:$0xff]  ;;  %v12486_v36 = vld [vmem:[#allocation225_spill] sm:$0xff] }
 0x278   : > { %12477 = vst [vmem:[#allocation25_spill] sm:$0xff] %v9735_v29  ;;  %v4196_v59 = vmul.f32 %v9735_v29, %v9378_v20  ;;  %v4183_v12 = vmul.f32 %v9575_v8, %v12485_v47  ;;  %v4184_v1 = vmul.f32 %v9596_v13, %v12485_v47  ;;  %v9768_v7 = vrot.slane %v12486_v36, %v9245_v19  ;;  %v12488_v6 = vld [vmem:[#allocation123_spill] sm:$0xff]  ;;  %v12490_v20 = vld [vmem:[#allocation65_spill] sm:$0xff]  ;;  %v12494_v28 = vld [vmem:[#allocation226_spill] sm:$0xff] }
 0x279   : > { %v9771_v24 = vadd.f32 %v4195_v9, %v12488_v6  ;;  %v9774_v14 = vadd.f32 %v12490_v20, %v1069_v42  ;;  %v12492_v8 = vld [vmem:[#allocation67_spill] sm:$0xff]  ;;  %v9781_v30 = vrot.slane %v12494_v28, %v9245_v19  ;;  %v12496_v45 = vld [vmem:[#allocation118_spill] sm:$0xff]  ;;  %v12499_v6 = vld [vmem:[#allocation69_spill] sm:$0xff]  ;;  %v9793_v20 = vpop.f32.mrf.mxu0 }
 0x27a   : > { %12487 = vst [vmem:[#allocation55_spill] sm:$0xff] %v9768_v7  ;;  %v9777_v29 = vadd.f32 %v12492_v8, %v1071_v2  ;;  %v9784_v39 = vadd.f32 %v4196_v59, %v12496_v45  ;;  %v12498_v13 = vld [vmem:[#allocation10_spill] sm:$0xff]  ;;  %v4199_v9 = vmul.f32 %v9768_v7, %v9417_v23  ;;  %v1073_v42 = vadd.f32 %v12499_v6, %v9551_v15  ;;  %v12500_v8 = vld [vmem:[#allocation201_spill] sm:$0xff]  ;;  %v12501_v36 = vld [vmem:[#allocation227_spill] sm:$0xff] }
 0x27b   : > { %12489 = vst [vmem:[#allocation36_spill] sm:$0xff] %v9771_v24  ;;  %12491 = vst [vmem:[#allocation2_spill] sm:$0xff] %v9774_v14  ;;  %v9787_v47 = vadd.f32 %v4183_v12, %v12498_v13  ;;  %v4200_v2 = vmul.f32 %v9781_v30, %v9417_v23  ;;  %v1077_v28 = vadd.f32 %v12500_v8, %v9513_v32  ;;  %v12502_v12 = vld [vmem:[#allocation90_spill] sm:$0xff]  ;;  %v9817_v8 = vpop.permute.xlu1 %4300  ;;  %v9838_v14 = vpop.f32.mrf.mxu0 }
 0x27c   : > { %12493 = vst [vmem:[#allocation58_spill] sm:$0xff] %v9777_v29  ;;  %12495 = vst [vmem:[#allocation51_spill] sm:$0xff] %v9781_v30  ;;  %v4187_v45 = vmul.f32 %v9628_v43, %v12501_v36  ;;  %v4188_v59 = vmul.f32 %v9641_v10, %v12501_v36  ;;  %v9804_v13 = vadd.f32 %v4184_v1, %v12502_v12  ;;  %v12503_v33 = vld [vmem:[#allocation70_spill] sm:$0xff]  ;;  %v12512_v12 = vld [vmem:[#allocation72_spill] sm:$0xff] }
 0x27d   : > { %12497 = vst [vmem:[#allocation9_spill] sm:$0xff] %v9784_v39  ;;  %v9807_v7 = vadd.f32 %v12503_v33, %v1073_v42  ;;  %v12505_v6 = vld [vmem:[#allocation50_spill] sm:$0xff]  ;;  %12509 = vst [vmem:[#allocation179_spill] sm:$0xff] %v9817_v8  ;;  %v9825_v33 = vadd.f32 %v12512_v12, %v1077_v28  ;;  %v9827_v42 = vpop.permute.xlu0 %4296  ;;  %v12516_v43 = vld [vmem:[#allocation41_spill] sm:$0xff] }
 0x27e   : > { %v9811_v39 = vrot.slane %v12505_v6, %v9245_v19  ;;  %v12507_v23 = vld [vmem:[#allocation38_spill] sm:$0xff]  ;;  %v1079_v10 = vadd.f32 %v12516_v43, %v9551_v15  ;;  %v12518_v28 = vld [vmem:[#allocation211_spill] sm:$0xff] }
 0x27f   : > { %12504 = vst [vmem:[#allocation189_spill] sm:$0xff] %v9807_v7  ;;  %v9815_v30 = vrot.slane %v12507_v23, %v9245_v19  ;;  %v12510_v36 = vld [vmem:[#allocation122_spill] sm:$0xff]  ;;  %12513 = vst [vmem:[#allocation213_spill] sm:$0xff] %v9825_v33  ;;  %v9844_v12 = vadd.f32 %v4188_v59, %v12518_v28  ;;  %v12543_v7 = vld [vmem:[#allocation172_spill] sm:$0xff] }
 0x280   : > { %12506 = vst [vmem:[#allocation115_spill] sm:$0xff] %v9811_v39  ;;  %v9822_v1 = vadd.f32 %v4199_v9, %v12510_v36  ;;  %v12514_v6 = vld [vmem:[#allocation106_spill] sm:$0xff]  ;;  %v4205_v23 = vmul.f32 %v9811_v39, %v9482_v54  ;;  %v12517_v9 = vld [vmem:[#allocation12_spill] sm:$0xff] }
 0x281   : > { %12508 = vst [vmem:[#allocation216_spill] sm:$0xff] %v9815_v30  ;;  %v9830_v24 = vadd.f32 %v4200_v2, %v12514_v6  ;;  %v4206_v8 = vmul.f32 %v9815_v30, %v9482_v54  ;;  %v9841_v36 = vadd.f32 %v4187_v45, %v12517_v9  ;;  %v12519_v2 = vld [vmem:[#allocation222_spill] sm:$0xff]  ;;  %v12521_v30 = vld [vmem:[#allocation176_spill] sm:$0xff] }
 0x282   : > { %12511 = vst [vmem:[#allocation210_spill] sm:$0xff] %v9822_v1  ;;  %v1081_v6 = vadd.f32 %v12519_v2, %v9513_v32  ;;  %v9856_v45 = vrot.slane %v12521_v30, %v9245_v19  ;;  %v9859_v59 = vadd.f32 %v4205_v23, %v9384_v34  ;;  %v12525_v28 = vld [vmem:[#allocation74_spill] sm:$0xff]  ;;  %v12529_v54 = vld [vmem:[#allocation76_spill] sm:$0xff] }
 0x283   : > { %12515 = vst [vmem:[#allocation185_spill] sm:$0xff] %v9830_v24  ;;  %v12520_v24 = vld [vmem:[#allocation131_spill] sm:$0xff]  ;;  %v9862_v9 = vadd.f32 %v4206_v8, %v9405_v63  ;;  %v9865_v2 = vadd.f32 %v12525_v28, %v1079_v10  ;;  %v12532_v23 = vld [vmem:[#allocation20_spill] sm:$0xff]  ;;  %v9880_v8 = vpop.f32.mrf.mxu0  ;;  %v9882_v10 = vpop.permute.xlu1 %4364 }
 0x284   : > { %v4191_v1 = vmul.f32 %v9671_v58, %v12520_v24  ;;  %v4192_v43 = vmul.f32 %v9675_v51, %v12520_v24  ;;  %12522 = vst [vmem:[#allocation217_spill] sm:$0xff] %v9856_v45  ;;  %12523 = vst [vmem:[#allocation160_spill] sm:$0xff] %v9859_v59  ;;  %v12527_v58 = vld [vmem:[#allocation40_spill] sm:$0xff]  ;;  %v9872_v33 = vadd.f32 %v12529_v54, %v1081_v6  ;;  %v9892_v54 = vsub.s32 6, %v12296_v38  ;;  %v12535_v59 = vld [vmem:[#allocation98_spill] sm:$0xff] }
 0x285   : > { %12524 = vst [vmem:[#allocation45_spill] sm:$0xff] %v9862_v9  ;;  %12526 = vst [vmem:[#allocation204_spill] sm:$0xff] %v9865_v2  ;;  %v9869_v39 = vrot.slane %v12527_v58, %v9245_v19  ;;  %v4207_v51 = vmul.f32 %v9856_v45, %v9553_v21  ;;  %v12531_v24 = vld [vmem:[#allocation156_spill] sm:$0xff]  ;;  %v1087_v63 = vadd.f32 %v12532_v23, %v9513_v32  ;;  %v12537_v58 = vld [vmem:[#allocation78_spill] sm:$0xff] }
 0x286   : > { %12530 = vst [vmem:[#allocation103_spill] sm:$0xff] %v9872_v33  ;;  %v1083_v34 = vadd.f32 %v12531_v24, %v9551_v15  ;;  %v12533_v28 = vld [vmem:[#allocation48_spill] sm:$0xff]  ;;  %v1089_v6 = vadd.f32 %v9235_v62, %v9551_v15  ;;  %v9894_v24 = vpop.permute.xlu0 %4304  ;;  %v9897_v23 = vadd.f32 %v4192_v43, %v12535_v59  ;;  %v12541_v62 = vld [vmem:[#allocation81_spill] sm:$0xff]  ;;  %v4406_v29 = vrot.slane %v12543_v7, %v9892_v54  ;;  %v12544_v43 = vld [vmem:[#allocation175_spill] sm:$0xff] }
 0x287   : > { %12528 = vst [vmem:[#allocation56_spill] sm:$0xff] %v9869_v39  ;;  %v9885_v9 = vadd.f32 %v4191_v1, %v12533_v28  ;;  %v4208_v19 = vmul.f32 %v9869_v39, %v9553_v21  ;;  %v12539_v45 = vld [vmem:[#allocation80_spill] sm:$0xff]  ;;  %v1091_v21 = vadd.f32 %v9269_v44, %v9513_v32  ;;  %v4410_v59 = vrot.slane %v12544_v43, %v9892_v54  ;;  %v9924_v28 = vpop.f32.mrf.mxu0  ;;  %v12549_v2 = vld [vmem:[#allocation62_spill] sm:$0xff] }
 0x288   : > { %12536 = vst [vmem:[#allocation119_spill] sm:$0xff] %v9897_v23  ;;  %v9900_v30 = vadd.f32 %v12537_v58, %v1083_v34  ;;  %v9903_v1 = vadd.f32 %v12539_v45, %v1087_v63  ;;  %v9909_v39 = vadd.f32 %v12541_v62, %v1089_v6  ;;  %v9917_v34 = vadd.f32 %v4207_v51, %v9273_v0  ;;  %v12546_v45 = vld [vmem:[#allocation82_spill] sm:$0xff]  ;;  %v12550_v62 = vld [vmem:[#allocation83_spill] sm:$0xff] }
 0x289   : > { %12534 = vst [vmem:[#allocation161_spill] sm:$0xff] %v9885_v9  ;;  %v9920_v63 = vadd.f32 %v12546_v45, %v1091_v21  ;;  %v1093_v44 = vadd.f32 %v9299_v5, %v9551_v15  ;;  %v9927_v6 = vadd.f32 %v4208_v19, %v9287_v17  ;;  %v4531_v23 = vmul.f32 %v4406_v29, %v12549_v2  ;;  %v9937_v45 = vpop.permute.xlu1 %4368 }
 0x28a   : > { %12538 = vst [vmem:[#allocation60_spill] sm:$0xff] %v9900_v30  ;;  %12540 = vst [vmem:[#allocation31_spill] sm:$0xff] %v9903_v1  ;;  %v4532_v58 = vmul.f32 %v4410_v59, %v12549_v2  ;;  %v4533_v21 = vmul.f32 %v4406_v29, %v9619_v26  ;;  %v4414_v5 = vrot.slane %v12307_v22, %v9892_v54  ;;  %v9946_v0 = vpop.permute.xlu0 %4372 }
 0x28b   : > { %12542 = vst [vmem:[#allocation49_spill] sm:$0xff] %v9909_v39  ;;  %12545 = vst [vmem:[#allocation11_spill] sm:$0xff] %v9917_v34  ;;  %v4534_v17 = vmul.f32 %v4410_v59, %v9619_v26  ;;  %v4418_v2 = vrot.slane %v12308_v53, %v9892_v54  ;;  %v9949_v51 = vadd.f32 %v4531_v23, %v9323_v27  ;;  %v9957_v59 = vpop.f32.mrf.mxu0  ;;  %v12558_v39 = vld [vmem:[#allocation86_spill] sm:$0xff] }
 0x28c   : > { %12547 = vst [vmem:[#allocation47_spill] sm:$0xff] %v9920_v63  ;;  %12548 = vst [vmem:[#allocation214_spill] sm:$0xff] %v9927_v6  ;;  %v9942_v6 = vadd.f32 %v12550_v62, %v1093_v44  ;;  %v9952_v29 = vadd.f32 %v4532_v58, %v9326_v35  ;;  %v4535_v34 = vmul.f32 %v4414_v5, %v9271_v46 }
 0x28d   : > { %v4470_v26 = vrot.slane %v12393_v50, %v9892_v54  ;;  %v4536_v44 = vmul.f32 %v4418_v2, %v9271_v46  ;;  %v4474_v62 = vrot.slane %v12394_v31, %v9892_v54  ;;  %v1097_v19 = vadd.f32 %v9338_v55, %v9513_v32 }
 0x28e   : > { %12551 = vst [vmem:[#allocation64_spill] sm:$0xff] %v9942_v6  ;;  %v1099_v27 = vadd.f32 %v9369_v11, %v9551_v15  ;;  %v9967_v35 = vadd.f32 %v4533_v21, %v9427_v49  ;;  %v4537_v58 = vmul.f32 %v4414_v5, %v9319_v4  ;;  %v4538_v63 = vmul.f32 %v4418_v2, %v9319_v4  ;;  %v12556_v49 = vld [vmem:[#allocation85_spill] sm:$0xff]  ;;  %v12560_v4 = vld [vmem:[#allocation30_spill] sm:$0xff]  ;;  %v9993_v2 = vpop.permute.xlu1 %4664 }
 0x28f   : > { %v4563_v23 = vmul.f32 %v4470_v26, %v9687_v52  ;;  %v9973_v46 = vadd.f32 %v4534_v17, %v9440_v56  ;;  %v9977_v33 = vadd.f32 %v4535_v34, %v9474_v57  ;;  %v9980_v55 = vadd.f32 %v4536_v44, %v9485_v60  ;;  %v9991_v17 = vpop.f32.mrf.mxu0  ;;  %12561 = vst [vmem:[#allocation52_spill] sm:$0xff] %v9993_v2  ;;  %v12563_v60 = vld [vmem:[#allocation166_spill] sm:$0xff] }
 0x290   : > { %12552 = vst [vmem:[#allocation44_spill] sm:$0xff] %v9967_v35  ;;  %v4564_v11 = vmul.f32 %v4474_v62, %v9687_v52  ;;  %v9984_v21 = vadd.f32 %v12556_v49, %v1097_v19  ;;  %v9987_v5 = vadd.f32 %v12558_v39, %v1099_v27  ;;  %v4478_v56 = vrot.slane %v12560_v4, %v9892_v54  ;;  %v12564_v52 = vld [vmem:[#allocation13_spill] sm:$0xff]  ;;  %v10006_v19 = vpop.permute.xlu0 %4320  ;;  %v12566_v6 = vld [vmem:[#allocation22_spill] sm:$0xff]  ;;  %v12571_v35 = vld [vmem:[#allocation88_spill] sm:$0xff] }
 0x291   : > { %12553 = vst [vmem:[#allocation220_spill] sm:$0xff] %v9973_v46  ;;  %12554 = vst [vmem:[#allocation187_spill] sm:$0xff] %v9977_v33  ;;  %v9996_v57 = vadd.f32 %v4563_v23, %v9751_v16  ;;  %v9999_v34 = vadd.f32 %v4537_v58, %v12563_v60  ;;  %v10002_v44 = vadd.f32 %v4538_v63, %v12564_v52  ;;  %v12565_v49 = vld [vmem:[#allocation29_spill] sm:$0xff]  ;;  %v12567_v23 = vld [vmem:[#allocation180_spill] sm:$0xff] }
 0x292   : > { %12555 = vst [vmem:[#allocation34_spill] sm:$0xff] %v9980_v55  ;;  %12557 = vst [vmem:[#allocation145_spill] sm:$0xff] %v9984_v21  ;;  %v4482_v39 = vrot.slane %v12422_v61, %v9892_v54  ;;  %v4567_v27 = vmul.f32 %v4478_v56, %v9760_v18  ;;  %v1101_v30 = vadd.f32 %v12565_v49, %v9513_v32  ;;  %v6254_v63 = vld [vmem:[%s11370_s7 + $0x60] ss:$8 sps:$4 sm:$0xff]   ;;  %v6256_v58 = vld [vmem:[%s11370_s7 + $0x64] ss:$8 sps:$4 sm:$0xff]  }
 0x293   : > { %12559 = vst [vmem:[#allocation188_spill] sm:$0xff] %v9987_v5  ;;  %12562 = vst [vmem:[#allocation54_spill] sm:$0xff] %v9996_v57  ;;  %v1103_v16 = vadd.f32 %v12566_v6, %v9551_v15  ;;  %v4565_v1 = vmul.f32 %v4470_v26, %v12567_v23  ;;  %v4566_v52 = vmul.f32 %v4474_v62, %v12567_v23  ;;  %v12568_v57 = vld [vmem:[#allocation178_spill] sm:$0xff]  ;;  %v12569_v6 = vld [vmem:[#allocation181_spill] sm:$0xff]  ;;  %5672 = vmatprep.subr.bf16.mxu0 %v6256_v58  ;;  %v10060_v58 = vpop.permute.xlu1 %4668 }
 0x294   : > { %v4568_v60 = vmul.f32 %v4482_v39, %v9760_v18  ;;  %v10024_v49 = vrot.slane %v12568_v57, %v9892_v54  ;;  %v10028_v55 = vrot.slane %v12569_v6, %v9892_v54  ;;  %v10031_v26 = vadd.f32 %v4564_v11, %v9754_v25  ;;  %v10038_v18 = vpop.f32.mrf.mxu0  ;;  %v12574_v23 = vld [vmem:[#allocation89_spill] sm:$0xff]  ;;  %5673 = vmatpush1.bf16.msra.mxu0 %v6254_v63  ;;  %v12580_v63 = vld [vmem:[#allocation95_spill] sm:$0xff]  ;;  %v12589_v21 = vld [vmem:[#allocation28_spill] sm:$0xff] }
 0x295   : > { %v10036_v2 = vadd.f32 %v12571_v35, %v1101_v30  ;;  %v10041_v62 = vadd.f32 %v4567_v27, %v9787_v47  ;;  %v10044_v9 = vadd.f32 %v12574_v23, %v1103_v16  ;;  %v10047_v6 = vadd.f32 %v4565_v1, %v9589_v40  ;;  %v12577_v35 = vld [vmem:[#allocation212_spill] sm:$0xff]  ;;  %12579 = vst [vmem:[#allocation195_spill] sm:$0xff] %v10060_v58  ;;  %v12583_v40 = vld [vmem:[#allocation93_spill] sm:$0xff] }
 0x296   : > { %12570 = vst [vmem:[#allocation170_spill] sm:$0xff] %v10031_v26  ;;  %v4541_v25 = vmul.f32 %v10024_v49, %v9827_v42  ;;  %v10052_v11 = vadd.f32 %v4568_v60, %v9804_v13  ;;  %v4542_v30 = vmul.f32 %v10028_v55, %v9827_v42  ;;  %v1107_v47 = vadd.f32 %v12577_v35, %v9513_v32  ;;  %v12578_v27 = vld [vmem:[#allocation148_spill] sm:$0xff]  ;;  %v10068_v60 = vpop.permute.xlu0 %4328  ;;  %v10090_v33 = vpop.f32.mrf.mxu0  ;;  %v12592_v58 = vld [vmem:[#allocation141_spill] sm:$0xff] }
 0x297   : > { %12572 = vst [vmem:[#allocation35_spill] sm:$0xff] %v10036_v2  ;;  %12573 = vst [vmem:[#allocation182_spill] sm:$0xff] %v10041_v62  ;;  %v1109_v16 = vadd.f32 %v12578_v27, %v9551_v15  ;;  %v10064_v1 = vadd.f32 %v4566_v52, %v9599_v48  ;;  %v4569_v23 = vmul.f32 %v4478_v56, %v12580_v63  ;;  %v6257_v42 = vld [vmem:[%s11370_s7 + $0x50] ss:$8 sps:$4 sm:$0xff]   ;;  %v6259_v35 = vld [vmem:[%s11370_s7 + $0x54] ss:$8 sps:$4 sm:$0xff]  }
 0x298   : > { %12575 = vst [vmem:[#allocation43_spill] sm:$0xff] %v10044_v9  ;;  %12576 = vst [vmem:[#allocation14_spill] sm:$0xff] %v10052_v11  ;;  %v4570_v13 = vmul.f32 %v4482_v39, %v12580_v63  ;;  %v12581_v27 = vld [vmem:[#allocation92_spill] sm:$0xff]  ;;  %v12585_v56 = vld [vmem:[#allocation193_spill] sm:$0xff]  ;;  %v1113_v11 = vadd.f32 %v12589_v21, %v9551_v15  ;;  %5674 = vmatprep.subr.bf16.mxu0 %v6259_v35  ;;  %v10142_v9 = vpop.permute.xlu1 %4724 }
 0x299   : > { %v10077_v46 = vadd.f32 %v12581_v27, %v1107_v47  ;;  %v10080_v48 = vadd.f32 %v12583_v40, %v1109_v16  ;;  %v10084_v52 = vrot.slane %v12585_v56, %v9892_v54  ;;  %v12586_v39 = vld [vmem:[#allocation194_spill] sm:$0xff]  ;;  %v12587_v27 = vld [vmem:[#allocation77_spill] sm:$0xff]  ;;  %v12588_v16 = vld [vmem:[#allocation215_spill] sm:$0xff]  ;;  %5675 = vmatpush1.bf16.msra.mxu0 %v6257_v42  ;;  %v10140_v47 = vpop.f32.mrf.mxu0  ;;  %12601 = vst [vmem:[#allocation174_spill] sm:$0xff] %v10142_v9 }
 0x29a   : > { %v10088_v63 = vrot.slane %v12586_v39, %v9892_v54  ;;  %v6262_v2 = vld [vmem:[%s11370_s7 + $0x44] ss:$8 sps:$4 sm:$0xff]   ;;  %v10097_v5 = vadd.f32 %v4541_v25, %v12587_v27  ;;  %v1111_v40 = vadd.f32 %v12588_v16, %v9513_v32  ;;  %v10107_v39 = vadd.f32 %v4569_v23, %v12592_v58  ;;  %v6260_v27 = vld [vmem:[%s11370_s7 + $0x40] ss:$8 sps:$4 sm:$0xff]   ;;  %v12593_v16 = vld [vmem:[#allocation96_spill] sm:$0xff] }
 0x29b   : > { %12582 = vst [vmem:[#allocation57_spill] sm:$0xff] %v10077_v46  ;;  %12584 = vst [vmem:[#allocation19_spill] sm:$0xff] %v10080_v48  ;;  %v12590_v62 = vld [vmem:[#allocation135_spill] sm:$0xff]  ;;  %v4545_v56 = vmul.f32 %v10084_v52, %v9894_v24  ;;  %v12595_v35 = vld [vmem:[#allocation97_spill] sm:$0xff]  ;;  %v10128_v58 = vrot.slane %v12476_v41, %v9892_v54  ;;  %5676 = vmatprep.subr.bf16.mxu0 %v6262_v2 }
 0x29c   : > { %v10104_v26 = vadd.f32 %v4542_v30, %v12590_v62  ;;  %v4546_v25 = vmul.f32 %v10088_v63, %v9894_v24  ;;  %v10117_v21 = vadd.f32 %v12593_v16, %v1111_v40  ;;  %v10120_v62 = vadd.f32 %v12595_v35, %v1113_v11  ;;  %v6265_v24 = vld [vmem:[%s11370_s7 + $0x34] ss:$8 sps:$4 sm:$0xff]   ;;  %v12599_v40 = vld [vmem:[#allocation171_spill] sm:$0xff]  ;;  %v12600_v16 = vld [vmem:[#allocation158_spill] sm:$0xff] }
 0x29d   : > { %v10124_v30 = vrot.slane %v12472_v37, %v9892_v54  ;;  %12598 = vst [vmem:[#allocation23_spill] sm:$0xff] %v10128_v58  ;;  %v10136_v11 = vadd.f32 %v4570_v13, %v12599_v40  ;;  %v4197_v35 = vmul.f32 %v9718_v3, %v12600_v16  ;;  %v12602_v41 = vld [vmem:[#allocation66_spill] sm:$0xff]  ;;  %v12606_v42 = vld [vmem:[#allocation25_spill] sm:$0xff]  ;;  %v4337_v13 = vpop.permute.xlu0 %4336  ;;  %v4580_v3 = vmul.f32 %v10128_v58, %v9946_v0  ;;  %v12607_v46 = vld [vmem:[#allocation39_spill] sm:$0xff] }
 0x29e   : > { %12591 = vst [vmem:[#allocation59_spill] sm:$0xff] %v10104_v26  ;;  %12594 = vst [vmem:[#allocation27_spill] sm:$0xff] %v10117_v21  ;;  %v10145_v2 = vadd.f32 %v4545_v56, %v12602_v41  ;;  %v12604_v37 = vld [vmem:[#allocation130_spill] sm:$0xff]  ;;  %v4198_v48 = vmul.f32 %v12606_v42, %v12600_v16  ;;  %v1117_v9 = vadd.f32 %v12607_v46, %v9513_v32  ;;  %v12608_v41 = vld [vmem:[#allocation111_spill] sm:$0xff]  ;;  %5677 = vmatpush1.bf16.msra.mxu0 %v6260_v27 }
 0x29f   : > { %12596 = vst [vmem:[#allocation114_spill] sm:$0xff] %v10120_v62  ;;  %12597 = vst [vmem:[#allocation84_spill] sm:$0xff] %v10124_v30  ;;  %v10148_v26 = vadd.f32 %v4546_v25, %v12604_v37  ;;  %v4579_v40 = vmul.f32 %v10124_v30, %v9946_v0  ;;  %v1119_v56 = vadd.f32 %v12608_v41, %v9551_v15  ;;  %v6263_v37 = vld [vmem:[%s11370_s7 + $0x30] ss:$8 sps:$4 sm:$0xff]   ;;  %v12611_v23 = vld [vmem:[#allocation199_spill] sm:$0xff]  ;;  %5678 = vmatprep.subr.bf16.mxu0 %v6265_v24 }
 0x2a0   : > { %12603 = vst [vmem:[#allocation7_spill] sm:$0xff] %v10145_v2  ;;  %v12609_v42 = vld [vmem:[#allocation149_spill] sm:$0xff]  ;;  %v12613_v0 = vld [vmem:[#allocation200_spill] sm:$0xff]  ;;  %v12621_v62 = vld [vmem:[#allocation42_spill] sm:$0xff] }
 0x2a1   : > { %12605 = vst [vmem:[#allocation61_spill] sm:$0xff] %v10148_v26  ;;  %v10166_v16 = vadd.f32 %v4197_v35, %v12609_v42  ;;  %v10170_v26 = vrot.slane %v12611_v23, %v9892_v54  ;;  %v10174_v46 = vrot.slane %v12613_v0, %v9892_v54  ;;  %v12615_v41 = vld [vmem:[#allocation100_spill] sm:$0xff]  ;;  %v12617_v2 = vld [vmem:[#allocation101_spill] sm:$0xff]  ;;  %v12620_v35 = vld [vmem:[#allocation26_spill] sm:$0xff]  ;;  %v10189_v21 = vadd.f32 %v4198_v48, %v12621_v62  ;;  %v10206_v62 = vpop.permute.xlu1 %4732 }
 0x2a2   : > { %v10177_v27 = vadd.f32 %v12615_v41, %v1117_v9  ;;  %v10180_v58 = vadd.f32 %v12617_v2, %v1119_v56  ;;  %v12619_v25 = vld [vmem:[#allocation37_spill] sm:$0xff]  ;;  %v4539_v42 = vmul.f32 %v10024_v49, %v12620_v35  ;;  %v1123_v2 = vadd.f32 %v9793_v20, %v9551_v15  ;;  %v12623_v56 = vld [vmem:[#allocation36_spill] sm:$0xff]  ;;  %5679 = vmatpush1.bf16.msra.mxu0 %v6263_v37 }
 0x2a3   : > { %12610 = vst [vmem:[#allocation63_spill] sm:$0xff] %v10166_v16  ;;  %12612 = vst [vmem:[#allocation16_spill] sm:$0xff] %v10170_v26  ;;  %v1121_v30 = vadd.f32 %v12619_v25, %v9513_v32  ;;  %v10186_v16 = vpop.f32.mrf.mxu0  ;;  %v4553_v24 = vmul.f32 %v10170_v26, %v10006_v19  ;;  %v4554_v9 = vmul.f32 %v10174_v46, %v10006_v19  ;;  %v12625_v25 = vld [vmem:[#allocation9_spill] sm:$0xff]  ;;  %v12627_v19 = vld [vmem:[#allocation192_spill] sm:$0xff] }
 0x2a4   : > { %12614 = vst [vmem:[#allocation68_spill] sm:$0xff] %v10174_v46  ;;  %12616 = vst [vmem:[#allocation8_spill] sm:$0xff] %v10177_v27  ;;  %v10198_v41 = vadd.f32 %v4579_v40, %v12623_v56  ;;  %v10201_v0 = vadd.f32 %v4580_v3, %v12625_v25  ;;  %v4540_v48 = vmul.f32 %v10028_v55, %v12620_v35  ;;  %v12629_v20 = vld [vmem:[#allocation104_spill] sm:$0xff]  ;;  %v12631_v40 = vld [vmem:[#allocation71_spill] sm:$0xff]  ;;  %v4661_v3 = vpop.permute.xlu0 %4660 }
 0x2a5   : > { %12618 = vst [vmem:[#allocation17_spill] sm:$0xff] %v10180_v58  ;;  %12622 = vst [vmem:[#allocation18_spill] sm:$0xff] %v10189_v21  ;;  %v10210_v46 = vadd.f32 %v4553_v24, %v12627_v19  ;;  %v10213_v21 = vadd.f32 %v12629_v20, %v1121_v30  ;;  %v10216_v56 = vadd.f32 %v4539_v42, %v12631_v40  ;;  %v12633_v25 = vld [vmem:[#allocation105_spill] sm:$0xff]  ;;  %v12635_v55 = vld [vmem:[#allocation203_spill] sm:$0xff]  ;;  %v10231_v30 = vpop.f32.mrf.mxu0 }
 0x2a6   : > { %12624 = vst [vmem:[#allocation123_spill] sm:$0xff] %v10198_v41  ;;  %12626 = vst [vmem:[#allocation65_spill] sm:$0xff] %v10201_v0  ;;  %v10219_v49 = vadd.f32 %v12633_v25, %v1123_v2  ;;  %v10223_v35 = vrot.slane %v12635_v55, %v9892_v54  ;;  %v12637_v37 = vld [vmem:[#allocation205_spill] sm:$0xff]  ;;  %v1127_v24 = vadd.f32 %v9838_v14, %v9513_v32  ;;  %v12639_v19 = vld [vmem:[#allocation110_spill] sm:$0xff] }
 0x2a7   : > { %12628 = vst [vmem:[#allocation67_spill] sm:$0xff] %v10210_v46  ;;  %12630 = vst [vmem:[#allocation118_spill] sm:$0xff] %v10213_v21  ;;  %v10227_v26 = vrot.slane %v12637_v37, %v9892_v54  ;;  %v10234_v42 = vadd.f32 %v4554_v9, %v12639_v19  ;;  %v12641_v20 = vld [vmem:[#allocation218_spill] sm:$0xff]  ;;  %v12642_v40 = vld [vmem:[#allocation219_spill] sm:$0xff]  ;;  %v1129_v58 = vadd.f32 %v9880_v8, %v9551_v15  ;;  %v10268_v37 = vpop.f32.mrf.mxu0 }
 0x2a8   : > { %12632 = vst [vmem:[#allocation10_spill] sm:$0xff] %v10216_v56  ;;  %12634 = vst [vmem:[#allocation69_spill] sm:$0xff] %v10219_v49  ;;  %v4486_v2 = vrot.slane %v12641_v20, %v9892_v54  ;;  %v4490_v25 = vrot.slane %v12642_v40, %v9892_v54  ;;  %v4557_v27 = vmul.f32 %v10223_v35, %v10068_v60  ;;  %v12643_v46 = vld [vmem:[#allocation108_spill] sm:$0xff]  ;;  %v12644_v9 = vld [vmem:[#allocation206_spill] sm:$0xff] }
 0x2a9   : > { %12636 = vst [vmem:[#allocation201_spill] sm:$0xff] %v10223_v35  ;;  %12638 = vst [vmem:[#allocation227_spill] sm:$0xff] %v10227_v26  ;;  %v4558_v14 = vmul.f32 %v10227_v26, %v10068_v60  ;;  %v10247_v0 = vadd.f32 %v12643_v46, %v1127_v24  ;;  %v10251_v19 = vrot.slane %v12644_v9, %v9892_v54  ;;  %v12648_v40 = vld [vmem:[#allocation165_spill] sm:$0xff]  ;;  %v12649_v56 = vld [vmem:[#allocation155_spill] sm:$0xff]  ;;  %v4673_v46 = vpop.permute.xlu0 %4672  ;;  %v10315_v49 = vpop.f32.mrf.mxu0 }
 0x2aa   : > { %12640 = vst [vmem:[#allocation90_spill] sm:$0xff] %v10234_v42  ;;  %v12646_v42 = vld [vmem:[#allocation134_spill] sm:$0xff]  ;;  %v4571_v20 = vmul.f32 %v4486_v2, %v12648_v40  ;;  %v4572_v8 = vmul.f32 %v4490_v25, %v12648_v40  ;;  %v10260_v35 = vrot.slane %v12649_v56, %v9892_v54  ;;  %v12651_v24 = vld [vmem:[#allocation109_spill] sm:$0xff]  ;;  %v12654_v40 = vld [vmem:[#allocation127_spill] sm:$0xff] }
 0x2ab   : > { %12645 = vst [vmem:[#allocation70_spill] sm:$0xff] %v10251_v19  ;;  %v10254_v41 = vadd.f32 %v4540_v48, %v12646_v42  ;;  %v10265_v26 = vadd.f32 %v12651_v24, %v1129_v58  ;;  %v4561_v9 = vmul.f32 %v10251_v19, %v4337_v13  ;;  %v10270_v48 = vpop.permute.xlu1 %4004  ;;  %v12652_v42 = vld [vmem:[#allocation184_spill] sm:$0xff]  ;;  %v10276_v55 = vadd.f32 %v4558_v14, %v12654_v40  ;;  %v6266_v58 = vld [vmem:[%s11370_s7 + $0x20] ss:$8 sps:$4 sm:$0xff]   ;;  %v6268_v24 = vld [vmem:[%s11370_s7 + $0x24] ss:$8 sps:$4 sm:$0xff]   ;;  %v10369_v21 = vpop.f32.mrf.mxu0 }
 0x2ac   : > { %12650 = vst [vmem:[#allocation72_spill] sm:$0xff] %v10260_v35  ;;  %v4562_v60 = vmul.f32 %v10260_v35, %v4337_v13  ;;  %v10287_v19 = vadd.f32 %v4571_v20, %v9841_v36  ;;  %v12657_v14 = vld [vmem:[#allocation5_spill] sm:$0xff]  ;;  %v10297_v56 = vadd.f32 %v4572_v8, %v9844_v12  ;;  %v1133_v35 = vadd.f32 %v9957_v59, %v9551_v15  ;;  %v12662_v12 = vld [vmem:[#allocation87_spill] sm:$0xff]  ;;  %v12664_v59 = vld [vmem:[#allocation138_spill] sm:$0xff] }
 0x2ad   : > { %12647 = vst [vmem:[#allocation122_spill] sm:$0xff] %v10254_v41  ;;  %v10273_v41 = vadd.f32 %v4557_v27, %v12652_v42  ;;  %12655 = vst [vmem:[#allocation41_spill] sm:$0xff] %v10276_v55  ;;  %v1131_v27 = vadd.f32 %v9924_v28, %v9513_v32  ;;  %v4573_v42 = vmul.f32 %v4486_v2, %v12657_v14  ;;  %v6271_v13 = vld [vmem:[%s11370_s7 + $0x14] ss:$8 sps:$4 sm:$0xff]   ;;  %v10302_v36 = vsub.s32 7, %v12296_v38  ;;  %v12663_v8 = vld [vmem:[#allocation55_spill] sm:$0xff] }
 0x2ae   : > { %12656 = vst [vmem:[#allocation12_spill] sm:$0xff] %v10287_v19  ;;  %v4574_v40 = vmul.f32 %v4490_v25, %v12657_v14  ;;  %12658 = vst [vmem:[#allocation211_spill] sm:$0xff] %v10297_v56  ;;  %v1137_v28 = vadd.f32 %v9991_v17, %v9513_v32  ;;  %5680 = vmatprep.subr.bf16.mxu0 %v6268_v24  ;;  %v12659_v2 = vld [vmem:[#allocation21_spill] sm:$0xff]  ;;  %v12661_v14 = vld [vmem:[#allocation112_spill] sm:$0xff]  ;;  %v4201_v56 = vmul.f32 %v12663_v8, %v12662_v12 }
 0x2af   : > { %12653 = vst [vmem:[#allocation106_spill] sm:$0xff] %v10273_v41  ;;  %v10308_v25 = vadd.f32 %v4561_v9, %v12659_v2  ;;  %v10311_v19 = vadd.f32 %v12661_v14, %v1131_v27  ;;  %5681 = vmatpush1.bf16.msra.mxu0 %v6266_v58  ;;  %v6269_v38 = vld [vmem:[%s11370_s7 + $0x10] ss:$8 sps:$4 sm:$0xff]   ;;  %v10321_v17 = vadd.f32 %v4562_v60, %v12664_v59  ;;  %v6274_v58 = vld [vmem:[%s11370_s7 + $0x4] ss:$8 sps:$4 sm:$0xff]  }
 0x2b0   : > { %v12666_v24 = vld [vmem:[#allocation224_spill] sm:$0xff]  ;;  %v10328_v9 = vrot.slane %v12543_v7, %v10302_v36  ;;  %v10332_v27 = vrot.slane %v12544_v43, %v10302_v36  ;;  %5682 = vmatprep.subr.bf16.mxu0 %v6271_v13  ;;  %v12668_v2 = vld [vmem:[#allocation53_spill] sm:$0xff]  ;;  %v1139_v7 = vadd.f32 %v10038_v18, %v9551_v15  ;;  %v10363_v18 = vrot.slane %v12307_v22, %v10302_v36 }
 0x2b1   : > { %12660 = vst [vmem:[#allocation222_spill] sm:$0xff] %v10308_v25  ;;  %12665 = vst [vmem:[#allocation131_spill] sm:$0xff] %v10321_v17  ;;  %v10324_v20 = vadd.f32 %v4573_v42, %v12666_v24  ;;  %v10338_v14 = vadd.f32 %v4574_v40, %v12668_v2  ;;  %v12670_v60 = vld [vmem:[#allocation113_spill] sm:$0xff]  ;;  %v12671_v42 = vld [vmem:[#allocation116_spill] sm:$0xff]  ;;  %v10348_v24 = vpop.permute.xlu1 %4308  ;;  %v1432_v43 = vmax.f32 %v10311_v19, 0.0  ;;  %v10367_v19 = vrot.slane %v12308_v53, %v10302_v36 }
 0x2b2   : > { %v10341_v8 = vadd.f32 %v12670_v60, %v1133_v35  ;;  %v10344_v59 = vadd.f32 %v12671_v42, %v1137_v28  ;;  %12672 = vst [vmem:[#allocation156_spill] sm:$0xff] %v10348_v24  ;;  %v4915_v13 = vmul.f32 %v10328_v9, %v4661_v3  ;;  %v12673_v40 = vld [vmem:[#allocation51_spill] sm:$0xff]  ;;  %v12674_v35 = vld [vmem:[#allocation126_spill] sm:$0xff]  ;;  %v12676_v28 = vld [vmem:[#allocation117_spill] sm:$0xff]  ;;  %v1143_v22 = vadd.f32 %v10140_v47, %v9551_v15 }
 0x2b3   : > { %12667 = vst [vmem:[#allocation74_spill] sm:$0xff] %v10324_v20  ;;  %12669 = vst [vmem:[#allocation76_spill] sm:$0xff] %v10338_v14  ;;  %v4916_v20 = vmul.f32 %v10332_v27, %v4661_v3  ;;  %v4202_v2 = vmul.f32 %v12673_v40, %v12662_v12  ;;  %v4729_v14 = vpop.permute.xlu0 %4728  ;;  %v10356_v60 = vadd.f32 %v4201_v56, %v12674_v35  ;;  %5683 = vmatpush1.bf16.msra.mxu0 %v6269_v38  ;;  %v6272_v3 = vld [vmem:[%s11370_s7] ss:$8 sps:$4 sm:$0xff]  }
 0x2b4   : > { %v10359_v42 = vadd.f32 %v12676_v28, %v1139_v7  ;;  %v4979_v56 = vadd.f32 %v4915_v13, %v9949_v51  ;;  %v1141_v7 = vadd.f32 %v10090_v33, %v9513_v32  ;;  %5684 = vmatprep.subr.bf16.mxu0 %v6274_v58  ;;  %v1433_v53 = vmax.f32 %v10341_v8, 0.0  ;;  %v12677_v35 = vld [vmem:[#allocation179_spill] sm:$0xff]  ;;  %v12678_v13 = vld [vmem:[#allocation228_spill] sm:$0xff] }
 0x2b5   : > { %12675 = vst [vmem:[#allocation20_spill] sm:$0xff] %v10356_v60  ;;  %v4980_v12 = vadd.f32 %v4916_v20, %v9952_v29  ;;  %v4921_v40 = vmul.f32 %v10363_v18, %v4673_v46  ;;  %v4922_v38 = vmul.f32 %v10367_v19, %v4673_v46  ;;  %v4543_v28 = vmul.f32 %v10084_v52, %v12677_v35  ;;  %v12680_v20 = vld [vmem:[#allocation120_spill] sm:$0xff]  ;;  %v12681_v60 = vld [vmem:[#allocation121_spill] sm:$0xff]  ;;  %v12684_v25 = vld [vmem:[#allocation15_spill] sm:$0xff] }
 0x2b6   : > { %v10387_v29 = vadd.f32 %v4202_v2, %v12678_v13  ;;  %v10390_v33 = vadd.f32 %v12680_v20, %v1141_v7  ;;  %v10393_v47 = vadd.f32 %v12681_v60, %v1143_v22  ;;  %v12682_v58 = vld [vmem:[#allocation32_spill] sm:$0xff]  ;;  %v12685_v46 = vmax.f32 %v12684_v25, 0.0  ;;  %v10405_v2 = vpop.f32.mrf.mxu0  ;;  %v10407_v13 = vpop.permute.xlu1 %4312 }
 0x2b7   : > { %v12683_v8 = vmax.f32 %v12682_v58, 0.0  ;;  %v4985_v51 = vadd.f32 %v4921_v40, %v9999_v34  ;;  %12686 = vst [vmem:[#allocation98_spill] sm:$0xff] %v10407_v13  ;;  %5685 = vmatpush1.bf16.msra.mxu0 %v6272_v3  ;;  %v4986_v60 = vadd.f32 %v4922_v38, %v10002_v44  ;;  %v4544_v7 = vmul.f32 %v10088_v63, %v12677_v35  ;;  %v12687_v40 = vld [vmem:[#allocation190_spill] sm:$0xff]  ;;  %v12689_v20 = vld [vmem:[#allocation124_spill] sm:$0xff] }
 0x2b8   : > { %12679 = vst [vmem:[#allocation48_spill] sm:$0xff] %v10387_v29  ;;  %v10401_v55 = vmul.f32 %v4980_v12, %v12685_v46  ;;  %v10418_v25 = vrot.slane %v12394_v31, %v10302_v36  ;;  %v4737_v12 = vpop.permute.xlu0 %4736  ;;  %v1436_v34 = vmax.f32 %v10390_v33, 0.0  ;;  %v1437_v22 = vmax.f32 %v10393_v47, 0.0  ;;  %v12688_v31 = vld [vmem:[#allocation91_spill] sm:$0xff]  ;;  %v12696_v29 = vld [vmem:[#allocation6_spill] sm:$0xff] }
 0x2b9   : > { %v10397_v17 = vmul.f32 %v4979_v56, %v12683_v8  ;;  %v10414_v56 = vrot.slane %v12393_v50, %v10302_v36  ;;  %v10423_v3 = vadd.f32 %v4543_v28, %v12687_v40  ;;  %v1147_v44 = vadd.f32 %v10186_v16, %v9513_v32  ;;  %v12691_v47 = vld [vmem:[#allocation3_spill] sm:$0xff] }
 0x2ba   : > { %v4950_v50 = vmul.f32 %v10418_v25, %v4729_v14  ;;  %v1149_v38 = vadd.f32 %v10231_v30, %v9551_v15  ;;  %v4494_v35 = vrot.slane %v12688_v31, %v9892_v54  ;;  %v4498_v28 = vrot.slane %v12691_v47, %v9892_v54  ;;  %v12692_v30 = vld [vmem:[#allocation208_spill] sm:$0xff] }
 0x2bb   : > { %v4949_v63 = vmul.f32 %v10414_v56, %v4729_v14  ;;  %v10434_v33 = vadd.f32 %v12689_v20, %v1147_v44  ;;  %v10440_v58 = vrot.slane %v12560_v4, %v10302_v36  ;;  %v10444_v16 = vrot.slane %v12422_v61, %v10302_v36  ;;  %v10446_v14 = vpop.f32.mrf.mxu0  ;;  %v12694_v20 = vld [vmem:[#allocation125_spill] sm:$0xff] }
 0x2bc   : > { %v12693_v8 = vmax.f32 %v12692_v30, 0.0  ;;  %v5014_v44 = vadd.f32 %v4950_v50, %v10064_v1  ;;  %v10455_v52 = vadd.f32 %v12694_v20, %v1149_v38  ;;  %v12697_v4 = vmax.f32 %v12696_v29, 0.0  ;;  %v10464_v30 = vpop.permute.xlu1 %4376  ;;  %v6277_v1 = vld [vmem:[%s11370_s7 + $0xf4] ss:$8 sps:$4 sm:$0xff]   ;;  %v6280_v38 = vld [vmem:[%s11370_s7 + $0xe4] ss:$8 sps:$4 sm:$0xff]  }
 0x2bd   : > { %12690 = vst [vmem:[#allocation78_spill] sm:$0xff] %v10434_v33  ;;  %v5013_v40 = vadd.f32 %v4949_v63, %v10047_v6  ;;  %v4575_v61 = vmul.f32 %v4494_v35, %v9882_v10  ;;  %v4953_v41 = vmul.f32 %v10440_v58, %v4737_v12  ;;  %v4954_v24 = vmul.f32 %v10444_v16, %v4737_v12  ;;  %v6275_v6 = vld [vmem:[%s11370_s7 + $0xf0] ss:$8 sps:$4 sm:$0xff]   ;;  %v4681_v12 = vpop.permute.xlu0 %4680  ;;  %v12729_v33 = vld [vmem:[#allocation195_spill] sm:$0xff] }
 0x2be   : > { %v10450_v46 = vmul.f32 %v4985_v51, %v12693_v8  ;;  %12695 = vst [vmem:[#allocation80_spill] sm:$0xff] %v10455_v52  ;;  %v10459_v13 = vmul.f32 %v4986_v60, %v12697_v4  ;;  %v12698_v51 = vld [vmem:[#allocation75_spill] sm:$0xff]  ;;  %v4576_v50 = vmul.f32 %v4498_v28, %v9882_v10  ;;  %v10482_v8 = vmul.f32 %v5014_v44, %v1433_v53 }
 0x2bf   : > { %v10473_v29 = vadd.f32 %v4544_v7, %v12698_v51  ;;  %v10475_v60 = vmul.f32 %v5013_v40, %v1432_v43  ;;  %v5017_v20 = vadd.f32 %v4953_v41, %v10107_v39  ;;  %v5018_v4 = vadd.f32 %v4954_v24, %v10136_v11  ;;  %v1162_v43 = vpop.f32.mrf.mxu0  ;;  %5686 = vmatprep.subr.bf16.mxu0 %v6277_v1  ;;  %v6278_v39 = vld [vmem:[%s11370_s7 + $0xe0] ss:$8 sps:$4 sm:$0xff]   ;;  %v12699_v11 = vld [vmem:[#allocation161_spill] sm:$0xff] }
 0x2c0   : > { %v1151_v7 = vadd.f32 %v10268_v37, %v9513_v32  ;;  %v1153_v10 = vadd.f32 %v10315_v49, %v9551_v15  ;;  %v4577_v51 = vmul.f32 %v4494_v35, %v9937_v45  ;;  %v10494_v53 = vrot.slane %v12568_v57, %v10302_v36  ;;  %5687 = vmatpush2.bf16.msra.mxu0 %v6275_v6  ;;  %v12701_v37 = vld [vmem:[#allocation128_spill] sm:$0xff]  ;;  %v12703_v49 = vld [vmem:[#allocation181_spill] sm:$0xff]  ;;  %v12704_v57 = vld [vmem:[#allocation119_spill] sm:$0xff] }
 0x2c1   : > { %v10500_v41 = vadd.f32 %v4575_v61, %v12699_v11  ;;  %v4578_v44 = vmul.f32 %v4498_v28, %v9937_v45  ;;  %v10508_v35 = vrot.slane %v12703_v49, %v10302_v36  ;;  %v10510_v1 = vpop.f32.mrf.mxu0  ;;  %5688 = vmatprep.subr.bf16.mxu0 %v6280_v38  ;;  %v10513_v6 = vadd.f32 %v4576_v50, %v12704_v57  ;;  %v12708_v50 = vld [vmem:[#allocation223_spill] sm:$0xff] }
 0x2c2   : > { %v10503_v24 = vadd.f32 %v12701_v37, %v1151_v7  ;;  %v10515_v40 = vmul.f32 %v5017_v20, %v1436_v34  ;;  %v10517_v63 = vmul.f32 %v5018_v4, %v1437_v22  ;;  %v4925_v61 = vmul.f32 %v10494_v53, %v4681_v12  ;;  %v12706_v7 = vld [vmem:[#allocation129_spill] sm:$0xff]  ;;  %v10528_v37 = vpop.permute.xlu1 %4676  ;;  %v12709_v20 = vld [vmem:[#allocation52_spill] sm:$0xff]  ;;  %v12710_v49 = vld [vmem:[#allocation107_spill] sm:$0xff] }
 0x2c3   : > { %12700 = vst [vmem:[#allocation81_spill] sm:$0xff] %v10500_v41  ;;  %12705 = vst [vmem:[#allocation175_spill] sm:$0xff] %v10513_v6  ;;  %v10521_v11 = vadd.f32 %v12706_v7, %v1153_v10  ;;  %v4926_v45 = vmul.f32 %v10508_v35, %v4681_v12  ;;  %v1157_v28 = vadd.f32 %v10369_v21, %v9513_v32  ;;  %v4685_v12 = vpop.permute.xlu0 %4684  ;;  %v12716_v6 = vld [vmem:[#allocation44_spill] sm:$0xff]  ;;  %v12718_v21 = vld [vmem:[#allocation194_spill] sm:$0xff] }
 0x2c4   : > { %12702 = vst [vmem:[#allocation172_spill] sm:$0xff] %v10503_v24  ;;  %v1159_v38 = vadd.f32 %v10405_v2, %v9551_v15  ;;  %v10531_v34 = vadd.f32 %v4577_v51, %v12708_v50  ;;  %v4989_v22 = vadd.f32 %v4925_v61, %v10097_v5  ;;  %v4917_v4 = vmul.f32 %v10328_v9, %v12709_v20  ;;  %v12711_v2 = vld [vmem:[#allocation59_spill] sm:$0xff]  ;;  %v12712_v51 = vld [vmem:[#allocation193_spill] sm:$0xff]  ;;  %v10547_v5 = vpop.f32.mrf.mxu0  ;;  %v12714_v61 = vld [vmem:[#allocation132_spill] sm:$0xff] }
 0x2c5   : > { %12707 = vst [vmem:[#allocation82_spill] sm:$0xff] %v10521_v11  ;;  %v4918_v10 = vmul.f32 %v10332_v27, %v12709_v20  ;;  %5689 = vmatpush2.bf16.msra.mxu0 %v6278_v39  ;;  %v10540_v57 = vadd.f32 %v4578_v44, %v12710_v49  ;;  %v4990_v7 = vadd.f32 %v4926_v45, %v12711_v2  ;;  %v12717_v20 = vld [vmem:[#allocation220_spill] sm:$0xff]  ;;  %v12719_v45 = vld [vmem:[#allocation58_spill] sm:$0xff] }
 0x2c6   : > { %v10545_v50 = vrot.slane %v12712_v51, %v10302_v36  ;;  %v10550_v9 = vadd.f32 %v12714_v61, %v1157_v28  ;;  %v4981_v27 = vadd.f32 %v4917_v4, %v12716_v6  ;;  %v10556_v41 = vrot.slane %v12718_v21, %v10302_v36  ;;  %v12721_v51 = vld [vmem:[#allocation133_spill] sm:$0xff] }
 0x2c7   : > { %v4982_v39 = vadd.f32 %v4918_v10, %v12717_v20  ;;  %v12720_v49 = vmax.f32 %v12719_v45, 0.0  ;;  %v10564_v24 = vadd.f32 %v12721_v51, %v1159_v38  ;;  %v6281_v6 = vld [vmem:[%s11370_s7 + $0xd0] ss:$8 sps:$4 sm:$0xff]   ;;  %v6283_v4 = vld [vmem:[%s11370_s7 + $0xd4] ss:$8 sps:$4 sm:$0xff]   ;;  %v12725_v20 = vld [vmem:[#allocation191_spill] sm:$0xff]  ;;  %v1161_v38 = vadd.f32 %v10446_v14, %v9513_v32 }
 0x2c8   : > { %12713 = vst [vmem:[#allocation62_spill] sm:$0xff] %v10545_v50  ;;  %12715 = vst [vmem:[#allocation83_spill] sm:$0xff] %v10550_v9  ;;  %v4927_v28 = vmul.f32 %v10545_v50, %v4685_v12  ;;  %v12723_v10 = vld [vmem:[#allocation177_spill] sm:$0xff]  ;;  %v12726_v45 = vmax.f32 %v12725_v20, 0.0  ;;  %v1163_v52 = vadd.f32 %v1162_v43, %v9551_v15  ;;  %5690 = vmatprep.subr.bf16.mxu0 %v6283_v4  ;;  %v12730_v43 = vld [vmem:[#allocation136_spill] sm:$0xff] }
 0x2c9   : > { %v10561_v2 = vmul.f32 %v4989_v22, %v12720_v49  ;;  %12722 = vst [vmem:[#allocation85_spill] sm:$0xff] %v10564_v24  ;;  %v12724_v21 = vmax.f32 %v12723_v10, 0.0  ;;  %v4928_v49 = vmul.f32 %v10556_v41, %v4685_v12  ;;  %v12727_v51 = vld [vmem:[#allocation189_spill] sm:$0xff]  ;;  %v4919_v10 = vmul.f32 %v10363_v18, %v12729_v33  ;;  %5691 = vmatpush2.bf16.msra.mxu0 %v6281_v6 }
 0x2ca   : > { %v5046_v22 = vmul.f32 %v4982_v39, %v12726_v45  ;;  %v12728_v44 = vmax.f32 %v12727_v51, 0.0  ;;  %v4991_v11 = vadd.f32 %v4927_v28, %v10423_v3  ;;  %v4920_v18 = vmul.f32 %v10367_v19, %v12729_v33  ;;  %v12731_v28 = vld [vmem:[#allocation187_spill] sm:$0xff]  ;;  %v12732_v51 = vld [vmem:[#allocation213_spill] sm:$0xff] }
 0x2cb   : > { %v5045_v61 = vmul.f32 %v4981_v27, %v12724_v21  ;;  %v10588_v27 = vpop.f32.mrf.mxu0  ;;  %v10590_v21 = vpop.permute.xlu1 %4740  ;;  %v4983_v20 = vadd.f32 %v4919_v10, %v12731_v28  ;;  %v12733_v12 = vmax.f32 %v12732_v51, 0.0  ;;  %v10615_v33 = vrot.slane %v12688_v31, %v10302_v36  ;;  %v12744_v28 = vld [vmem:[#allocation174_spill] sm:$0xff] }
 0x2cc   : > { %v10582_v50 = vmul.f32 %v4990_v7, %v12728_v44  ;;  %v5114_v39 = vadd.f32 %v5046_v22, %v10401_v55  ;;  %v4992_v7 = vadd.f32 %v4928_v49, %v10473_v29  ;;  %v1354_v44 = vadd.f32 %v12730_v43, %v1161_v38  ;;  %v12736_v29 = vld [vmem:[#allocation204_spill] sm:$0xff]  ;;  %v12739_v49 = vld [vmem:[#allocation34_spill] sm:$0xff] }
 0x2cd   : > { %v5107_v14 = vadd.f32 %v5045_v61, %v10397_v17  ;;  %v10603_v9 = vmul.f32 %v4991_v11, %v12733_v12  ;;  %v12735_v17 = vld [vmem:[#allocation137_spill] sm:$0xff]  ;;  %v4753_v61 = vpop.permute.xlu0 %4752  ;;  %v12737_v6 = vmax.f32 %v12736_v29, 0.0  ;;  %v4984_v38 = vadd.f32 %v4920_v18, %v12739_v49  ;;  %v12740_v43 = vld [vmem:[#allocation202_spill] sm:$0xff]  ;;  %12742 = vst [vmem:[#allocation166_spill] sm:$0xff] %v10615_v33  ;;  %v10617_v10 = vpop.f32.mrf.mxu0 }
 0x2ce   : > { %v5115_v4 = vrot.slane %v5114_v39, 4  ;;  %v1356_v55 = vadd.f32 %v12735_v17, %v1163_v52  ;;  %v12741_v3 = vmax.f32 %v12740_v43, 0.0  ;;  %v10621_v52 = vrot.slane %v12691_v47, %v10302_v36  ;;  %v12745_v51 = vld [vmem:[#allocation94_spill] sm:$0xff] }
 0x2cf   : > { %v5108_v45 = vrot.slane %v5107_v14, 4  ;;  %12734 = vst [vmem:[#allocation86_spill] sm:$0xff] %v10603_v9  ;;  %v10608_v22 = vmul.f32 %v4992_v7, %v12737_v6  ;;  %v4947_v7 = vmul.f32 %v10414_v56, %v12744_v28  ;;  %v12746_v18 = vmax.f32 %v12745_v51, 0.0  ;;  %v10631_v29 = vpop.permute.xlu1 %4744  ;;  %v6284_v47 = vld [vmem:[%s11370_s7 + $0xc0] ss:$8 sps:$4 sm:$0xff]  }
 0x2d0   : > { %v5047_v19 = vmul.f32 %v4983_v20, %v12741_v3  ;;  %v5116_v12 = vadd.f32 %v5115_v4, %v5114_v39  ;;  %12743 = vst [vmem:[#allocation13_spill] sm:$0xff] %v10621_v52  ;;  %v4961_v20 = vmul.f32 %v10615_v33, %v4753_v61  ;;  %v4948_v31 = vmul.f32 %v10418_v25, %v12744_v28  ;;  %v6286_v56 = vld [vmem:[%s11370_s7 + $0xc4] ss:$8 sps:$4 sm:$0xff]  }
 0x2d1   : > { %12738 = vst [vmem:[#allocation30_spill] sm:$0xff] %v10608_v22  ;;  %v5109_v11 = vadd.f32 %v5108_v45, %v5107_v14  ;;  %v5048_v17 = vmul.f32 %v4984_v38, %v12746_v18  ;;  %v4962_v45 = vmul.f32 %v10621_v52, %v4753_v61  ;;  %v1444_v6 = vmax.f32 %v1354_v44, 0.0  ;;  %v12748_v38 = vld [vmem:[#allocation170_spill] sm:$0xff]  ;;  %5692 = vmatprep.subr.bf16.mxu0 %v6286_v56 }
 0x2d2   : > { %v5121_v3 = vadd.f32 %v10450_v46, %v5047_v19  ;;  %v5117_v39 = vrot.slane %v5116_v12, 2  ;;  %v12747_v46 = vld [vmem:[#allocation54_spill] sm:$0xff]  ;;  %v5012_v43 = vadd.f32 %v4948_v31, %v12748_v38  ;;  %v10643_v19 = vpop.f32.mrf.mxu0  ;;  %v1445_v18 = vmax.f32 %v1356_v55, 0.0  ;;  %5693 = vmatpush2.bf16.msra.mxu0 %v6284_v47 }
 0x2d3   : > { %v5110_v14 = vrot.slane %v5109_v11, 2  ;;  %v5011_v4 = vadd.f32 %v4947_v7, %v12747_v46  ;;  %v5128_v25 = vadd.f32 %v10459_v13, %v5048_v17  ;;  %v12749_v24 = vmax.f32 %v10247_v0, 0.0  ;;  %v4693_v13 = vpop.permute.xlu0 %4692 }
 0x2d4   : > { %v5122_v49 = vrot.slane %v5121_v3, 4  ;;  %v5118_v51 = vadd.f32 %v5117_v39, %v5116_v12  ;;  %v5025_v7 = vadd.f32 %v4961_v20, %v10531_v34  ;;  %v12750_v44 = vmax.f32 %v10265_v26, 0.0  ;;  %v10657_v47 = vpop.f32.mrf.mxu0  ;;  %v10659_v34 = vpop.permute.xlu1 %4016 }
 0x2d5   : > { %v5111_v28 = vadd.f32 %v5110_v14, %v5109_v11  ;;  %v5075_v22 = vmul.f32 %v5011_v4, %v12749_v24  ;;  %v5129_v61 = vrot.slane %v5128_v25, 4  ;;  %v5026_v38 = vadd.f32 %v4962_v45, %v10540_v57  ;;  %v12751_v24 = vld [vmem:[#allocation197_spill] sm:$0xff]  ;;  %v12753_v14 = vld [vmem:[#allocation198_spill] sm:$0xff] }
 0x2d6   : > { %v5123_v33 = vadd.f32 %v5122_v49, %v5121_v3  ;;  %v5076_v46 = vmul.f32 %v5012_v43, %v12750_v44  ;;  %v5119_v31 = vrot.slane %v5118_v51, 1  ;;  %v10655_v3 = vrot.slane %v12751_v24, %v10302_v36 }
 0x2d7   : > { %v5112_v17 = vrot.slane %v5111_v28, 1  ;;  %v5219_v11 = vadd.f32 %v10475_v60, %v5075_v22  ;;  %v5130_v55 = vadd.f32 %v5129_v61, %v5128_v25  ;;  %v10663_v57 = vrot.slane %v12753_v14, %v10302_v36  ;;  %v4761_v44 = vpop.permute.xlu0 %4760 }
 0x2d8   : > { %v5124_v12 = vrot.slane %v5123_v33, 2  ;;  %v5226_v0 = vadd.f32 %v10482_v8, %v5076_v46  ;;  %12752 = vst [vmem:[#allocation29_spill] sm:$0xff] %v10655_v3  ;;  %v5120_v20 = vadd.f32 %v5119_v31, %v5118_v51  ;;  %v10665_v39 = vmul.f32 %v5025_v7, %v1444_v6 }
 0x2d9   : > { %v5113_v26 = vadd.f32 %v5112_v17, %v5111_v28  ;;  %v5220_v56 = vrot.slane %v5219_v11, 4  ;;  %12754 = vst [vmem:[#allocation22_spill] sm:$0xff] %v10663_v57  ;;  %v5131_v22 = vrot.slane %v5130_v55, 2  ;;  %v10667_v4 = vmul.f32 %v5026_v38, %v1445_v18 }
 0x2da   : > { %v5125_v60 = vadd.f32 %v5124_v12, %v5123_v33  ;;  %12755 = vst [vmem:[#allocation180_spill] sm:$0xff] %v10665_v39  ;;  %v5227_v8 = vrot.slane %v5226_v0, 4  ;;  %v10670_v25 = vmul.f32 %v10655_v3, %v4693_v13  ;;  %v1167_v61 = vadd.f32 %v10510_v1, %v9513_v32  ;;  %v10674_v33 = vpop.f32.mrf.mxu0  ;;  %v12798_v39 = vld [vmem:[#allocation196_spill] sm:$0xff] }
 0x2db   : > { %v5331_v45 = vpack.c.bf16 %v5113_v26, %v5113_v26  ;;  %12756 = vst [vmem:[#allocation178_spill] sm:$0xff] %v10667_v4  ;;  %v5221_v49 = vadd.f32 %v5220_v56, %v5219_v11  ;;  %v5132_v28 = vadd.f32 %v5131_v22, %v5130_v55  ;;  %v5332_v6 = vpack.c.bf16 %v5120_v20, %v5120_v20  ;;  %v12757_v11 = vld [vmem:[#allocation139_spill] sm:$0xff]  ;;  %v10684_v55 = vpop.permute.xlu1 %4316  ;;  %v12759_v20 = vld [vmem:[#allocation182_spill] sm:$0xff]  ;;  %v12797_v4 = vld [vmem:[#allocation221_spill] sm:$0xff] }
 0x2dc   : > { %v5126_v43 = vrot.slane %v5125_v60, 1  ;;  %v5228_v51 = vadd.f32 %v5227_v8, %v5226_v0  ;;  %v10677_v46 = vmul.f32 %v10663_v57, %v4693_v13  ;;  %v4951_v18 = vmul.f32 %v10440_v58, %v10206_v62  ;;  %v12760_v58 = vld [vmem:[#allocation33_spill] sm:$0xff] }
 0x2dd   : > { %v5222_v7 = vrot.slane %v5221_v49, 2  ;;  %v5133_v31 = vrot.slane %v5132_v28, 1  ;;  %v10682_v12 = vadd.f32 %v12757_v11, %v1167_v61  ;;  %v5439_v1 = vunpack.c.l.b16 %v5331_v45  ;;  %v12762_v11 = vld [vmem:[#allocation14_spill] sm:$0xff] }
 0x2de   : > { %v5127_v17 = vadd.f32 %v5126_v43, %v5125_v60  ;;  %v5229_v38 = vrot.slane %v5228_v51, 2  ;;  %v4952_v26 = vmul.f32 %v10444_v16, %v10206_v62  ;;  %v5015_v56 = vadd.f32 %v4951_v18, %v12759_v20  ;;  %v10693_v43 = vpop.f32.mrf.mxu0  ;;  %v6287_v16 = vld [vmem:[%s11370_s7 + $0xb0] ss:$8 sps:$4 sm:$0xff]  }
 0x2df   : > { %12758 = vst [vmem:[#allocation88_spill] sm:$0xff] %v10682_v12  ;;  %v5223_v0 = vadd.f32 %v5222_v7, %v5221_v49  ;;  %v5134_v13 = vadd.f32 %v5133_v31, %v5132_v28  ;;  %v10691_v60 = vrot.slane %v12760_v58, %v10302_v36  ;;  %v12763_v45 = vmax.f32 %v10344_v59, 0.0  ;;  %v12764_v7 = vld [vmem:[#allocation183_spill] sm:$0xff]  ;;  %v6289_v28 = vld [vmem:[%s11370_s7 + $0xb4] ss:$8 sps:$4 sm:$0xff]   ;;  %v4701_v59 = vpop.permute.xlu0 %4700  ;;  %v12786_v12 = vld [vmem:[#allocation226_spill] sm:$0xff] }
 0x2e0   : > { %v5333_v22 = vpack.c.bf16 %v5127_v17, %v5127_v17  ;;  %v5230_v8 = vadd.f32 %v5229_v38, %v5228_v51  ;;  %v5016_v57 = vadd.f32 %v4952_v26, %v12762_v11  ;;  %v10700_v62 = vrot.slane %v12764_v7, %v10302_v36  ;;  %5694 = vmatprep.subr.bf16.mxu0 %v6289_v28  ;;  %v10722_v7 = vpop.f32.mrf.mxu0 }
 0x2e1   : > { %12761 = vst [vmem:[#allocation89_spill] sm:$0xff] %v10691_v60  ;;  %v5224_v61 = vrot.slane %v5223_v0, 1  ;;  %v5079_v49 = vmul.f32 %v5015_v56, %v12763_v45  ;;  %v10708_v51 = vunpack.c.l.b16 %v5332_v6  ;;  %v5334_v18 = vpack.c.bf16 %v5134_v13, %v5134_v13  ;;  %5695 = vmatpush2.bf16.msra.mxu0 %v6287_v16 }
 0x2e2   : > { %12765 = vst [vmem:[#allocation212_spill] sm:$0xff] %v10700_v62  ;;  %v5231_v17 = vrot.slane %v5230_v8, 1  ;;  %v5441_v38 = vunpack.c.l.b16 %v5333_v22  ;;  %v12767_v20 = vmax.f32 %v10359_v42, 0.0  ;;  %v10715_v45 = vmul.f32 %v10691_v60, %v4761_v44  ;;  %v10724_v22 = vpop.permute.xlu1 %4380 }
 0x2e3   : > { %12766 = vst [vmem:[#allocation148_spill] sm:$0xff] %v10708_v51  ;;  %v5225_v26 = vadd.f32 %v5224_v61, %v5223_v0  ;;  %v5233_v58 = vadd.f32 %v10515_v40, %v5079_v49  ;;  %v10718_v6 = vmul.f32 %v10700_v62, %v4761_v44  ;;  %v1169_v13 = vadd.f32 %v10547_v5, %v9551_v15  ;;  %v6290_v44 = vld [vmem:[%s11370_s7 + $0xa0] ss:$8 sps:$4 sm:$0xff]   ;;  %v6292_v5 = vld [vmem:[%s11370_s7 + $0xa4] ss:$8 sps:$4 sm:$0xff]   ;;  %v12769_v49 = vld [vmem:[#allocation140_spill] sm:$0xff]  ;;  %v4769_v31 = vpop.permute.xlu0 %4768 }
 0x2e4   : > { %v5080_v56 = vmul.f32 %v5016_v57, %v12767_v20  ;;  %v5232_v11 = vadd.f32 %v5231_v17, %v5230_v8  ;;  %v1171_v0 = vadd.f32 %v10588_v27, %v9513_v32  ;;  %v10735_v8 = vunpack.c.l.b16 %v5334_v18  ;;  %v6295_v27 = vld [vmem:[%s11370_s7 + $0x94] ss:$8 sps:$4 sm:$0xff]   ;;  %5696 = vmatprep.subr.bf16.mxu0 %v6292_v5  ;;  %v12777_v5 = vld [vmem:[#allocation115_spill] sm:$0xff] }
 0x2e5   : > { %v5347_v42 = vpack.c.bf16 %v5225_v26, %v5225_v26  ;;  %v5234_v57 = vrot.slane %v5233_v58, 4  ;;  %v10738_v16 = vadd.f32 %v12769_v49, %v1169_v13  ;;  %v10748_v28 = vsel %vm5471_vm0, %v5441_v38, %v5439_v1  ;;  %v12773_v18 = vld [vmem:[#allocation200_spill] sm:$0xff]  ;;  %v12776_v13 = vld [vmem:[#allocation143_spill] sm:$0xff]  ;;  %5697 = vmatpush2.bf16.msra.mxu0 %v6290_v44 }
 0x2e6   : > { %v5240_v40 = vadd.f32 %v10517_v63, %v5080_v56  ;;  %12768 = vst [vmem:[#allocation95_spill] sm:$0xff] %v10735_v8  ;;  %v5348_v61 = vpack.c.bf16 %v5232_v11, %v5232_v11  ;;  %v10742_v63 = vrot.slane %v12611_v23, %v10302_v36  ;;  %12772 = vst [vmem:[#allocation77_spill] sm:$0xff] %v10748_v28  ;;  %v10762_v8 = vpop.f32.mrf.mxu0  ;;  %v6293_v1 = vld [vmem:[%s11370_s7 + $0x90] ss:$8 sps:$4 sm:$0xff]   ;;  %5698 = vmatprep.subr.bf16.mxu0 %v6295_v27  ;;  %v10785_v23 = vpop.permute.xlu1 %4384 }
 0x2e7   : > { %12770 = vst [vmem:[#allocation92_spill] sm:$0xff] %v10738_v16  ;;  %v5235_v17 = vadd.f32 %v5234_v57, %v5233_v58  ;;  %v10752_v20 = vrot.slane %v12773_v18, %v10302_v36  ;;  %v10754_v56 = vunpack.c.l.b16 %v5347_v42  ;;  %v10760_v49 = vadd.f32 %v12776_v13, %v1171_v0  ;;  %v6298_v0 = vld [vmem:[%s11370_s7 + $0x84] ss:$8 sps:$4 sm:$0xff]   ;;  %v12781_v51 = vld [vmem:[#allocation144_spill] sm:$0xff] }
 0x2e8   : > { %12771 = vst [vmem:[#allocation93_spill] sm:$0xff] %v10742_v63  ;;  %v5241_v26 = vrot.slane %v5240_v40, 4  ;;  %v10756_v11 = vunpack.c.l.b16 %v5348_v61  ;;  %v10768_v42 = vmul.f32 %v10742_v63, %v4701_v59  ;;  %v1173_v57 = vadd.f32 %v10617_v10, %v9551_v15  ;;  %v12778_v61 = vld [vmem:[#allocation216_spill] sm:$0xff] }
 0x2e9   : > { %12774 = vst [vmem:[#allocation215_spill] sm:$0xff] %v10752_v20  ;;  %v5236_v38 = vrot.slane %v5235_v17, 2  ;;  %v4203_v44 = vmul.f32 %v12777_v5, %v10270_v48  ;;  %v4204_v18 = vmul.f32 %v12778_v61, %v10270_v48  ;;  %v12782_v48 = vld [vmem:[#allocation73_spill] sm:$0xff]  ;;  %v10802_v62 = vrot.slane %v12786_v12, %v10302_v36  ;;  %5699 = vmatpush2.bf16.msra.mxu0 %v6293_v1 }
 0x2ea   : > { %12775 = vst [vmem:[#allocation28_spill] sm:$0xff] %v10756_v11  ;;  %v5242_v58 = vadd.f32 %v5241_v26, %v5240_v40  ;;  %v1177_v40 = vadd.f32 %v10643_v19, %v9513_v32  ;;  %v12779_v26 = vld [vmem:[#allocation225_spill] sm:$0xff]  ;;  %v10788_v11 = vmul.f32 %v10752_v20, %v4701_v59  ;;  %v10791_v63 = vadd.f32 %v12781_v51, %v1173_v57  ;;  %v12784_v19 = vld [vmem:[#allocation142_spill] sm:$0xff]  ;;  %v4713_v20 = vpop.permute.xlu0 %4712 }
 0x2eb   : > { %v10783_v13 = vrot.slane %v12779_v26, %v10302_v36  ;;  %v5237_v10 = vadd.f32 %v5236_v38, %v5235_v17  ;;  %v10795_v61 = vadd.f32 %v4203_v44, %v12782_v48  ;;  %v10798_v16 = vadd.f32 %v4204_v18, %v12784_v19  ;;  %v10804_v17 = vpop.f32.mrf.mxu0  ;;  %v6296_v51 = vld [vmem:[%s11370_s7 + $0x80] ss:$8 sps:$4 sm:$0xff]   ;;  %5700 = vmatprep.subr.bf16.mxu0 %v6298_v0 }
 0x2ec   : > { %v5243_v27 = vrot.slane %v5242_v58, 2  ;;  %v12787_v57 = vld [vmem:[#allocation146_spill] sm:$0xff]  ;;  %v1179_v48 = vadd.f32 %v10657_v47, %v9551_v15  ;;  %v4438_v1 = vrot.slane %v12751_v24, %v9892_v54  ;;  %v4442_v19 = vrot.slane %v12753_v14, %v9892_v54  ;;  %v12791_v18 = vld [vmem:[#allocation147_spill] sm:$0xff]  ;;  %v12793_v47 = vld [vmem:[#allocation156_spill] sm:$0xff] }
 0x2ed   : > { %12780 = vst [vmem:[#allocation135_spill] sm:$0xff] %v10783_v13  ;;  %12783 = vst [vmem:[#allocation141_spill] sm:$0xff] %v10795_v61  ;;  %v5238_v59 = vrot.slane %v5237_v10, 1  ;;  %v10810_v5 = vadd.f32 %v12787_v57, %v1177_v40  ;;  %v10813_v44 = vmul.f32 %v10783_v13, %v4769_v31  ;;  %v1181_v40 = vadd.f32 %v10674_v33, %v9513_v32  ;;  %v12789_v57 = vld [vmem:[#allocation203_spill] sm:$0xff]  ;;  %v12796_v61 = vld [vmem:[#allocation150_spill] sm:$0xff] }
 0x2ee   : > { %12785 = vst [vmem:[#allocation96_spill] sm:$0xff] %v10798_v16  ;;  %v5244_v38 = vadd.f32 %v5243_v27, %v5242_v58  ;;  %v10826_v0 = vrot.slane %v12789_v57, %v10302_v36  ;;  %v10829_v13 = vadd.f32 %v12791_v18, %v1179_v48  ;;  %v4547_v60 = vmul.f32 %v4438_v1, %v12793_v47  ;;  %v12794_v16 = vld [vmem:[#allocation205_spill] sm:$0xff] }
 0x2ef   : > { %12788 = vst [vmem:[#allocation97_spill] sm:$0xff] %v10810_v5  ;;  %v5239_v58 = vadd.f32 %v5238_v59, %v5237_v10  ;;  %v4548_v24 = vmul.f32 %v4442_v19, %v12793_v47  ;;  %v10835_v14 = vrot.slane %v12794_v16, %v10302_v36  ;;  %v1192_v10 = vpop.f32.mrf.mxu0  ;;  %v10837_v59 = vpop.permute.xlu1 %4688  ;;  %5701 = vmatpush2.bf16.msra.mxu0 %v6296_v51 }
 0x2f0   : > { %v5245_v27 = vrot.slane %v5244_v38, 1  ;;  %12790 = vst [vmem:[#allocation171_spill] sm:$0xff] %v10826_v0  ;;  %12792 = vst [vmem:[#allocation158_spill] sm:$0xff] %v10829_v13  ;;  %v10840_v57 = vadd.f32 %v12796_v61, %v1181_v40  ;;  %v4941_v18 = vmul.f32 %v10826_v0, %v4713_v20  ;;  %v10844_v48 = vmul.f32 %v10802_v62, %v4769_v31  ;;  %v12800_v40 = vld [vmem:[#allocation41_spill] sm:$0xff] }
 0x2f1   : > { %12795 = vst [vmem:[#allocation66_spill] sm:$0xff] %v10835_v14  ;;  %v5349_v3 = vpack.c.bf16 %v5239_v58, %v5239_v58  ;;  %v4611_v47 = vadd.f32 %v4547_v60, %v12797_v4  ;;  %v4612_v28 = vadd.f32 %v4548_v24, %v12798_v39  ;;  %v4942_v16 = vmul.f32 %v10835_v14, %v4713_v20  ;;  %v4777_v4 = vpop.permute.xlu0 %4776  ;;  %v1196_v60 = vpop.f32.mrf.mxu0  ;;  %v12801_v24 = vld [vmem:[#allocation98_spill] sm:$0xff]  ;;  %v12820_v20 = vld [vmem:[#allocation24_spill] sm:$0xff]  ;;  %v12826_v14 = vld [vmem:[#allocation63_spill] sm:$0xff] }
 0x2f2   : > { %v5246_v33 = vadd.f32 %v5245_v27, %v5244_v38  ;;  %v12799_v38 = vld [vmem:[#allocation106_spill] sm:$0xff]  ;;  %v1183_v31 = vadd.f32 %v10693_v43, %v9551_v15 }
 0x2f3   : > { %v5457_v9 = vunpack.c.l.b16 %v5349_v3  ;;  %v5005_v58 = vadd.f32 %v4941_v18, %v12799_v38  ;;  %v4995_v61 = vadd.f32 %v10670_v25, %v4611_v47  ;;  %v4996_v27 = vadd.f32 %v10677_v46, %v4612_v28  ;;  %v12803_v46 = vld [vmem:[#allocation31_spill] sm:$0xff] }
 0x2f4   : > { %v5350_v52 = vpack.c.bf16 %v5246_v33, %v5246_v33  ;;  %v5006_v0 = vadd.f32 %v4942_v16, %v12800_v40  ;;  %v4549_v33 = vmul.f32 %v4438_v1, %v12801_v24  ;;  %v12804_v28 = vmax.f32 %v12803_v46, 0.0  ;;  %v12805_v47 = vld [vmem:[#allocation27_spill] sm:$0xff] }
 0x2f5   : > { %v10858_v39 = vsel %vm5471_vm0, %v5457_v9, %v10754_v56  ;;  %v12806_v43 = vmax.f32 %v12805_v47, 0.0  ;;  %v12808_v38 = vld [vmem:[#allocation151_spill] sm:$0xff]  ;;  %v10876_v9 = vpop.permute.xlu1 %4748  ;;  %v12809_v56 = vld [vmem:[#allocation49_spill] sm:$0xff]  ;;  %v1187_v1 = vadd.f32 %v10722_v7, %v9513_v32  ;;  %v1191_v7 = vadd.f32 %v10804_v17, %v9513_v32  ;;  %v4721_v13 = vpop.permute.xlu0 %4720 }
 0x2f6   : > { %v10863_v25 = vunpack.c.l.b16 %v5350_v52  ;;  %v10867_v18 = vmul.f32 %v4995_v61, %v12804_v28  ;;  %v10874_v40 = vadd.f32 %v12808_v38, %v1183_v31  ;;  %v12810_v3 = vmax.f32 %v12809_v56, 0.0  ;;  %v12811_v61 = vld [vmem:[#allocation50_spill] sm:$0xff]  ;;  %v12832_v17 = vld [vmem:[#allocation157_spill] sm:$0xff] }
 0x2f7   : > { %v10871_v16 = vmul.f32 %v5005_v58, %v12806_v43  ;;  %v4550_v52 = vmul.f32 %v4442_v19, %v12801_v24  ;;  %v10887_v46 = vrot.slane %v12811_v61, %v10302_v36  ;;  %v12813_v58 = vld [vmem:[#allocation114_spill] sm:$0xff]  ;;  %v12818_v19 = vld [vmem:[#allocation84_spill] sm:$0xff]  ;;  %v1198_v24 = vpop.f32.mrf.mxu0 }
 0x2f8   : > { %12802 = vst [vmem:[#allocation130_spill] sm:$0xff] %v10863_v25  ;;  %v10880_v51 = vmul.f32 %v4996_v27, %v12810_v3  ;;  %v12814_v28 = vmax.f32 %v12813_v58, 0.0  ;;  %v12816_v31 = vld [vmem:[#allocation38_spill] sm:$0xff]  ;;  %v1189_v27 = vadd.f32 %v10762_v8, %v9551_v15  ;;  %v4581_v3 = vmul.f32 %v12818_v19, %v10464_v30  ;;  %v12822_v25 = vld [vmem:[#allocation153_spill] sm:$0xff] }
 0x2f9   : > { %12807 = vst [vmem:[#allocation25_spill] sm:$0xff] %v10871_v16  ;;  %12812 = vst [vmem:[#allocation39_spill] sm:$0xff] %v10887_v46  ;;  %v10895_v43 = vrot.slane %v12816_v31, %v10302_v36  ;;  %v12819_v38 = vld [vmem:[#allocation186_spill] sm:$0xff]  ;;  %v10906_v58 = vadd.f32 %v4550_v52, %v12820_v20 }
 0x2fa   : > { %v10891_v47 = vmul.f32 %v5006_v0, %v12814_v28  ;;  %v10903_v56 = vadd.f32 %v4549_v33, %v12819_v38  ;;  %v12821_v0 = vld [vmem:[#allocation23_spill] sm:$0xff]  ;;  %v12824_v16 = vld [vmem:[#allocation154_spill] sm:$0xff]  ;;  %v4645_v19 = vadd.f32 %v4581_v3, %v12826_v14  ;;  %v10920_v33 = vmul.f32 %v10887_v46, %v4777_v4 }
 0x2fb   : > { %12817 = vst [vmem:[#allocation149_spill] sm:$0xff] %v10895_v43  ;;  %v4582_v28 = vmul.f32 %v12821_v0, %v10464_v30  ;;  %v10914_v8 = vadd.f32 %v12824_v16, %v1189_v27  ;;  %v12827_v20 = vld [vmem:[#allocation18_spill] sm:$0xff]  ;;  %v10932_v16 = vmul.f32 %v10895_v43, %v4777_v4  ;;  %v10936_v27 = vadd.f32 %v12832_v17, %v1191_v7  ;;  %v1200_v0 = vpop.f32.mrf.mxu0 }
 0x2fc   : > { %12815 = vst [vmem:[#allocation111_spill] sm:$0xff] %v10891_v47  ;;  %v10911_v47 = vadd.f32 %v12822_v25, %v1187_v1  ;;  %v12828_v38 = vld [vmem:[#allocation206_spill] sm:$0xff]  ;;  %v12830_v25 = vld [vmem:[#allocation155_spill] sm:$0xff]  ;;  %v5029_v14 = vadd.f32 %v10715_v45, %v4645_v19  ;;  %v1193_v3 = vadd.f32 %v1192_v10, %v9551_v15  ;;  %v1197_v46 = vadd.f32 %v1196_v60, %v9513_v32 }
 0x2fd   : > { %12825 = vst [vmem:[#allocation100_spill] sm:$0xff] %v10914_v8  ;;  %v4646_v52 = vadd.f32 %v4582_v28, %v12827_v20  ;;  %v10925_v30 = vrot.slane %v12828_v38, %v10302_v36  ;;  %v10929_v1 = vrot.slane %v12830_v25, %v10302_v36  ;;  %v10939_v28 = vpop.permute.xlu1 %4324  ;;  %v12833_v7 = vmax.f32 %v10760_v49, 0.0  ;;  %v12834_v10 = vld [vmem:[#allocation159_spill] sm:$0xff] }
 0x2fe   : > { %12823 = vst [vmem:[#allocation199_spill] sm:$0xff] %v10911_v47  ;;  %v10952_v17 = vadd.f32 %v12834_v10, %v1193_v3  ;;  %v12839_v60 = vmax.f32 %v10791_v63, 0.0  ;;  %v4923_v49 = vmul.f32 %v10494_v53, %v10528_v37  ;;  %v1199_v3 = vadd.f32 %v1198_v24, %v9551_v15  ;;  %v12840_v10 = vld [vmem:[#allocation118_spill] sm:$0xff]  ;;  %v12857_v63 = vld [vmem:[#allocation217_spill] sm:$0xff] }
 0x2ff   : > { %12829 = vst [vmem:[#allocation101_spill] sm:$0xff] %v10925_v30  ;;  %12831 = vst [vmem:[#allocation37_spill] sm:$0xff] %v10929_v1  ;;  %v5030_v20 = vadd.f32 %v10718_v6, %v4646_v52  ;;  %v4945_v38 = vmul.f32 %v10925_v30, %v4721_v13  ;;  %v4946_v25 = vmul.f32 %v10929_v1, %v4721_v13  ;;  %v12835_v6 = vld [vmem:[#allocation222_spill] sm:$0xff]  ;;  %v12836_v30 = vld [vmem:[#allocation131_spill] sm:$0xff] }
 0x300   : > { %v10949_v19 = vmul.f32 %v5029_v14, %v12833_v7  ;;  %v12837_v13 = vld [vmem:[#allocation162_spill] sm:$0xff]  ;;  %v4924_v14 = vmul.f32 %v10508_v35, %v10528_v37  ;;  %v1202_v7 = vpop.f32.mrf.mxu0  ;;  %v12848_v35 = vld [vmem:[#allocation164_spill] sm:$0xff]  ;;  %v4209_v43 = vmul.f32 %v12857_v63, %v10659_v34  ;;  %v12860_v63 = vld [vmem:[#allocation211_spill] sm:$0xff] }
 0x301   : > { %v5009_v52 = vadd.f32 %v4945_v38, %v12835_v6  ;;  %v5010_v5 = vadd.f32 %v4946_v25, %v12836_v30  ;;  %v10958_v1 = vadd.f32 %v12837_v13, %v1197_v46  ;;  %v10962_v4 = vmul.f32 %v5030_v20, %v12839_v60  ;;  %v12843_v30 = vld [vmem:[#allocation69_spill] sm:$0xff]  ;;  %v12846_v13 = vld [vmem:[#allocation10_spill] sm:$0xff] }
 0x302   : > { %v12841_v38 = vmax.f32 %v12840_v10, 0.0  ;;  %v12844_v46 = vmax.f32 %v12843_v30, 0.0  ;;  %v1201_v20 = vadd.f32 %v1200_v0, %v9513_v32  ;;  %v4987_v53 = vadd.f32 %v4923_v49, %v12846_v13  ;;  %v12847_v60 = vld [vmem:[#allocation122_spill] sm:$0xff] }
 0x303   : > { %12838 = vst [vmem:[#allocation26_spill] sm:$0xff] %v10958_v1  ;;  %v4988_v45 = vadd.f32 %v4924_v14, %v12847_v60  ;;  %v10982_v37 = vadd.f32 %v12848_v35, %v1199_v3  ;;  %v12850_v24 = vld [vmem:[#allocation218_spill] sm:$0xff]  ;;  %v1203_v0 = vadd.f32 %v1202_v7, %v9551_v15 }
 0x304   : > { %v10971_v6 = vmul.f32 %v5009_v52, %v12841_v38  ;;  %v10975_v25 = vmul.f32 %v5010_v5, %v12844_v46  ;;  %v4870_v10 = vrot.slane %v12850_v24, %v10302_v36  ;;  %v10986_v52 = vpop.permute.xlu1 %4388  ;;  %v12851_v5 = vld [vmem:[#allocation168_spill] sm:$0xff]  ;;  %v12852_v46 = vld [vmem:[#allocation219_spill] sm:$0xff]  ;;  %v12853_v49 = vld [vmem:[#allocation46_spill] sm:$0xff] }
 0x305   : > { %12849 = vst [vmem:[#allocation9_spill] sm:$0xff] %v10982_v37  ;;  %v10990_v30 = vadd.f32 %v12851_v5, %v1201_v20  ;;  %v4874_v32 = vrot.slane %v12852_v46, %v10302_v36  ;;  %v12854_v14 = vmax.f32 %v12853_v49, 0.0  ;;  %v12855_v3 = vld [vmem:[#allocation2_spill] sm:$0xff]  ;;  %v12858_v5 = vld [vmem:[#allocation169_spill] sm:$0xff]  ;;  %v12859_v46 = vld [vmem:[#allocation12_spill] sm:$0xff] }
 0x306   : > { %12842 = vst [vmem:[#allocation42_spill] sm:$0xff] %v10971_v6  ;;  %12845 = vst [vmem:[#allocation36_spill] sm:$0xff] %v10975_v25  ;;  %v12856_v60 = vmax.f32 %v12855_v3, 0.0  ;;  %v4955_v24 = vmul.f32 %v4870_v10, %v10590_v21  ;;  %v11005_v1 = vadd.f32 %v12858_v5, %v1203_v0  ;;  %v4957_v15 = vmul.f32 %v4870_v10, %v10631_v29  ;;  %v12862_v37 = vld [vmem:[#allocation76_spill] sm:$0xff]  ;;  %v12870_v25 = vld [vmem:[#allocation207_spill] sm:$0xff] }
 0x307   : > { %v5051_v13 = vmul.f32 %v4987_v53, %v12854_v14  ;;  %v4956_v20 = vmul.f32 %v4874_v32, %v10590_v21  ;;  %v4958_v49 = vmul.f32 %v4874_v32, %v10631_v29  ;;  %v12861_v21 = vld [vmem:[#allocation74_spill] sm:$0xff]  ;;  %v12866_v32 = vld [vmem:[#allocation80_spill] sm:$0xff] }
 0x308   : > { %v5052_v35 = vmul.f32 %v4988_v45, %v12856_v60  ;;  %v5019_v45 = vadd.f32 %v4955_v24, %v12859_v46  ;;  %v5021_v38 = vadd.f32 %v4957_v15, %v12861_v21  ;;  %v12867_v46 = vmax.f32 %v12866_v32, 0.0 }
 0x309   : > { %v5135_v7 = vadd.f32 %v10561_v2, %v5051_v13  ;;  %v5020_v3 = vadd.f32 %v4956_v20, %v12860_v63  ;;  %v5022_v10 = vadd.f32 %v4958_v49, %v12862_v37  ;;  %v12863_v2 = vld [vmem:[#allocation56_spill] sm:$0xff]  ;;  %v11028_v15 = vadd.f32 %v4209_v43, %v12870_v25  ;;  %v12871_v37 = vld [vmem:[#allocation82_spill] sm:$0xff] }
 0x30a   : > { %v5142_v53 = vadd.f32 %v10582_v50, %v5052_v35  ;;  %v4210_v13 = vmul.f32 %v12863_v2, %v10659_v34  ;;  %v11019_v50 = vpop.permute.xlu1 %4392  ;;  %v12864_v35 = vld [vmem:[#allocation78_spill] sm:$0xff]  ;;  %v12868_v20 = vld [vmem:[#allocation172_spill] sm:$0xff]  ;;  %v12872_v49 = vmax.f32 %v12871_v37, 0.0 }
 0x30b   : > { %v5136_v0 = vrot.slane %v5135_v7, 4  ;;  %v12865_v24 = vmax.f32 %v12864_v35, 0.0  ;;  %v5084_v14 = vmul.f32 %v5020_v3, %v12867_v46  ;;  %v12869_v63 = vmax.f32 %v12868_v20, 0.0  ;;  %v12873_v34 = vld [vmem:[#allocation16_spill] sm:$0xff]  ;;  %v12878_v37 = vld [vmem:[#allocation210_spill] sm:$0xff] }
 0x30c   : > { %v5143_v5 = vrot.slane %v5142_v53, 4  ;;  %v5086_v8 = vmul.f32 %v5022_v10, %v12872_v49  ;;  %v4551_v2 = vmul.f32 %v12873_v34, %v10684_v55  ;;  %v4510_v3 = vrot.slane %v12779_v26, %v9892_v54  ;;  %v12876_v10 = vld [vmem:[#allocation4_spill] sm:$0xff] }
 0x30d   : > { %v5083_v29 = vmul.f32 %v5019_v45, %v12865_v24  ;;  %v5085_v60 = vmul.f32 %v5021_v38, %v12869_v63  ;;  %v5137_v21 = vadd.f32 %v5136_v0, %v5135_v7  ;;  %v12874_v45 = vld [vmem:[#allocation68_spill] sm:$0xff]  ;;  %v4514_v38 = vrot.slane %v12786_v12, %v9892_v54  ;;  %v12877_v63 = vld [vmem:[#allocation99_spill] sm:$0xff] }
 0x30e   : > { %v5144_v6 = vadd.f32 %v5143_v5, %v5142_v53  ;;  %v4552_v35 = vmul.f32 %v12874_v45, %v10684_v55  ;;  %v5254_v7 = vadd.f32 %v5086_v8, %v5084_v14  ;;  %v12875_v53 = vld [vmem:[#allocation79_spill] sm:$0xff]  ;;  %v4583_v32 = vmul.f32 %v4510_v3, %v10724_v22  ;;  %v11045_v20 = vpop.permute.xlu1 %4696 }
 0x30f   : > { %v5247_v47 = vadd.f32 %v5085_v60, %v5083_v29  ;;  %v5138_v43 = vrot.slane %v5137_v21, 2  ;;  %v4615_v0 = vadd.f32 %v4551_v2, %v12875_v53  ;;  %v4584_v60 = vmul.f32 %v4514_v38, %v10724_v22 }
 0x310   : > { %v5145_v25 = vrot.slane %v5144_v6, 2  ;;  %v4616_v24 = vadd.f32 %v4552_v35, %v12876_v10  ;;  %v5255_v46 = vrot.slane %v5254_v7, 4  ;;  %v11048_v8 = vadd.f32 %v4210_v13, %v12877_v63 }
 0x311   : > { %v5248_v5 = vrot.slane %v5247_v47, 4  ;;  %v5139_v29 = vadd.f32 %v5138_v43, %v5137_v21  ;;  %v4999_v26 = vadd.f32 %v10768_v42, %v4615_v0  ;;  %v11052_v49 = vadd.f32 %v4583_v32, %v12878_v37  ;;  %v12879_v21 = vld [vmem:[#allocation185_spill] sm:$0xff]  ;;  %v12882_v0 = vld [vmem:[#allocation62_spill] sm:$0xff]  ;;  %v12884_v32 = vld [vmem:[#allocation48_spill] sm:$0xff] }
 0x312   : > { %v5146_v55 = vadd.f32 %v5145_v25, %v5144_v6  ;;  %v5000_v14 = vadd.f32 %v10788_v11, %v4616_v24  ;;  %v5256_v22 = vadd.f32 %v5255_v46, %v5254_v7  ;;  %v11055_v6 = vadd.f32 %v4584_v60, %v12879_v21  ;;  %v12880_v42 = vld [vmem:[#allocation145_spill] sm:$0xff]  ;;  %v12883_v7 = vld [vmem:[#allocation20_spill] sm:$0xff] }
 0x313   : > { %v5249_v12 = vadd.f32 %v5248_v5, %v5247_v47  ;;  %v5140_v34 = vrot.slane %v5139_v29, 1  ;;  %v12881_v35 = vmax.f32 %v12880_v42, 0.0  ;;  %v4585_v47 = vmul.f32 %v4510_v3, %v10785_v23  ;;  %v12885_v3 = vld [vmem:[#allocation7_spill] sm:$0xff]  ;;  %v12887_v42 = vld [vmem:[#allocation188_spill] sm:$0xff] }
 0x314   : > { %v5147_v2 = vrot.slane %v5146_v55, 1  ;;  %v4586_v13 = vmul.f32 %v4514_v38, %v10785_v23  ;;  %v5257_v53 = vrot.slane %v5256_v22, 2  ;;  %v4929_v5 = vmul.f32 %v12882_v0, %v10837_v59  ;;  %v11070_v23 = vpop.permute.xlu1 %4756 }
 0x315   : > { %v5250_v45 = vrot.slane %v5249_v12, 2  ;;  %v11059_v43 = vmul.f32 %v4999_v26, %v12881_v35  ;;  %v5141_v25 = vadd.f32 %v5140_v34, %v5139_v29  ;;  %v4649_v24 = vadd.f32 %v4585_v47, %v12883_v7 }
 0x316   : > { %v5148_v11 = vadd.f32 %v5147_v2, %v5146_v55  ;;  %v4650_v60 = vadd.f32 %v4586_v13, %v12884_v32  ;;  %v4930_v46 = vmul.f32 %v10556_v41, %v10837_v59  ;;  %v5258_v37 = vadd.f32 %v5257_v53, %v5256_v22  ;;  %v12889_v41 = vld [vmem:[#allocation103_spill] sm:$0xff] }
 0x317   : > { %v5251_v10 = vadd.f32 %v5250_v45, %v5249_v12  ;;  %v5335_v26 = vpack.c.bf16 %v5141_v25, %v5141_v25  ;;  %v4993_v21 = vadd.f32 %v4929_v5, %v12885_v3  ;;  %v5033_v29 = vadd.f32 %v10813_v44, %v4649_v24  ;;  %v12886_v12 = vld [vmem:[#allocation61_spill] sm:$0xff]  ;;  %v12892_v44 = vld [vmem:[#allocation60_spill] sm:$0xff] }
 0x318   : > { %v5336_v63 = vpack.c.bf16 %v5148_v11, %v5148_v11  ;;  %v5034_v55 = vadd.f32 %v10844_v48, %v4650_v60  ;;  %v4994_v34 = vadd.f32 %v4930_v46, %v12886_v12  ;;  %v5259_v45 = vrot.slane %v5258_v37, 1  ;;  %v12896_v60 = vld [vmem:[#allocation166_spill] sm:$0xff] }
 0x319   : > { %v5252_v38 = vrot.slane %v5251_v10, 1  ;;  %v5443_v2 = vunpack.c.l.b16 %v5335_v26  ;;  %v12888_v35 = vmax.f32 %v12887_v42, 0.0  ;;  %v12890_v59 = vmax.f32 %v12889_v41, 0.0  ;;  %v11108_v42 = vpop.permute.xlu1 %4332 }
 0x31a   : > { %v11081_v13 = vunpack.c.l.b16 %v5336_v63  ;;  %v12891_v11 = vmax.f32 %v10840_v57, 0.0  ;;  %v12893_v48 = vmax.f32 %v12892_v44, 0.0  ;;  %v5260_v5 = vadd.f32 %v5259_v45, %v5258_v37  ;;  %v12897_v63 = vld [vmem:[#allocation30_spill] sm:$0xff]  ;;  %v12898_v57 = vld [vmem:[#allocation13_spill] sm:$0xff] }
 0x31b   : > { %v11077_v47 = vmul.f32 %v5000_v14, %v12888_v35  ;;  %v5057_v22 = vmul.f32 %v4993_v21, %v12890_v59  ;;  %v5253_v25 = vadd.f32 %v5252_v38, %v5251_v10  ;;  %v12894_v7 = vmax.f32 %v10874_v40, 0.0  ;;  %v12895_v14 = vld [vmem:[#allocation86_spill] sm:$0xff]  ;;  %v4785_v21 = vpop.permute.xlu0 %4784  ;;  %v12899_v38 = vld [vmem:[#allocation176_spill] sm:$0xff]  ;;  %v12900_v37 = vld [vmem:[#allocation77_spill] sm:$0xff] }
 0x31c   : > { %v11085_v53 = vmul.f32 %v5033_v29, %v12891_v11  ;;  %v5058_v0 = vmul.f32 %v4994_v34, %v12893_v48  ;;  %v4959_v46 = vmul.f32 %v12896_v60, %v10876_v9  ;;  %v4960_v3 = vmul.f32 %v12898_v57, %v10876_v9  ;;  %v12902_v34 = vld [vmem:[#allocation81_spill] sm:$0xff]  ;;  %v12903_v59 = vld [vmem:[#allocation175_spill] sm:$0xff]  ;;  %v12904_v9 = vld [vmem:[#allocation40_spill] sm:$0xff] }
 0x31d   : > { %v11091_v24 = vmul.f32 %v5034_v55, %v12894_v7  ;;  %v5149_v32 = vadd.f32 %v5057_v22, %v12895_v14  ;;  %v5351_v26 = vpack.c.bf16 %v5253_v25, %v5253_v25  ;;  %v11101_v29 = vrot.slane %v12899_v38, %v10302_v36  ;;  %v12905_v48 = vld [vmem:[#allocation83_spill] sm:$0xff]  ;;  %v12908_v60 = vld [vmem:[#allocation85_spill] sm:$0xff] }
 0x31e   : > { %v5156_v10 = vadd.f32 %v5058_v0, %v12897_v63  ;;  %v11105_v40 = vsel %vm5473_vm1, %v5443_v2, %v12900_v37  ;;  %v5352_v55 = vpack.c.bf16 %v5260_v5, %v5260_v5  ;;  %v5023_v45 = vadd.f32 %v4959_v46, %v12902_v34  ;;  %v12912_v37 = vld [vmem:[#allocation227_spill] sm:$0xff] }
 0x31f   : > { %12901 = vst [vmem:[#allocation192_spill] sm:$0xff] %v11105_v40  ;;  %v5150_v12 = vrot.slane %v5149_v32, 4  ;;  %v5459_v35 = vunpack.c.l.b16 %v5351_v26  ;;  %v5024_v22 = vadd.f32 %v4960_v3, %v12903_v59  ;;  %v11113_v25 = vrot.slane %v12904_v9, %v10302_v36  ;;  %v12910_v36 = vld [vmem:[#allocation201_spill] sm:$0xff]  ;;  %v12911_v3 = vld [vmem:[#allocation180_spill] sm:$0xff] }
 0x320   : > { %v5157_v41 = vrot.slane %v5156_v10, 4  ;;  %v11115_v11 = vunpack.c.l.b16 %v5352_v55  ;;  %v12906_v2 = vmax.f32 %v12905_v48, 0.0  ;;  %v11120_v5 = vmul.f32 %v11101_v29, %v4785_v21 }
 0x321   : > { %v5151_v44 = vadd.f32 %v5150_v12, %v5149_v32  ;;  %v11124_v7 = vsel %vm5473_vm1, %v5459_v35, %v10858_v39  ;;  %v12909_v46 = vmax.f32 %v12908_v60, 0.0  ;;  %v4555_v63 = vmul.f32 %v12910_v36, %v10939_v28  ;;  %v12915_v60 = vld [vmem:[#allocation152_spill] sm:$0xff] }
 0x322   : > { %v5087_v0 = vmul.f32 %v5023_v45, %v12906_v2  ;;  %12907 = vst [vmem:[#allocation104_spill] sm:$0xff] %v11124_v7  ;;  %v5158_v14 = vadd.f32 %v5157_v41, %v5156_v10  ;;  %v4556_v55 = vmul.f32 %v12912_v37, %v10939_v28  ;;  %v4518_v12 = vrot.slane %v12811_v61, %v9892_v54  ;;  %v12913_v45 = vld [vmem:[#allocation178_spill] sm:$0xff]  ;;  %v11145_v28 = vpop.permute.xlu1 %4396  ;;  %v12918_v7 = vld [vmem:[#allocation45_spill] sm:$0xff] }
 0x323   : > { %v5088_v26 = vmul.f32 %v5024_v22, %v12909_v46  ;;  %v5152_v57 = vrot.slane %v5151_v44, 2  ;;  %v11137_v10 = vmul.f32 %v11113_v25, %v4785_v21  ;;  %v4522_v35 = vrot.slane %v12816_v31, %v9892_v54  ;;  %v12914_v22 = vld [vmem:[#allocation102_spill] sm:$0xff] }
 0x324   : > { %v5261_v32 = vadd.f32 %v12911_v3, %v5087_v0  ;;  %v5159_v34 = vrot.slane %v5158_v14, 2  ;;  %v11142_v48 = vadd.f32 %v4555_v63, %v12914_v22  ;;  %v4587_v2 = vmul.f32 %v4518_v12, %v10986_v52  ;;  %v12916_v3 = vld [vmem:[#allocation141_spill] sm:$0xff] }
 0x325   : > { %v5268_v39 = vadd.f32 %v12913_v45, %v5088_v26  ;;  %v5153_v41 = vadd.f32 %v5152_v57, %v5151_v44  ;;  %v11148_v46 = vadd.f32 %v4556_v55, %v12915_v60  ;;  %v4589_v21 = vmul.f32 %v4518_v12, %v11019_v50  ;;  %v12917_v45 = vld [vmem:[#allocation160_spill] sm:$0xff]  ;;  %v12919_v60 = vld [vmem:[#allocation29_spill] sm:$0xff] }
 0x326   : > { %v5262_v59 = vrot.slane %v5261_v32, 4  ;;  %v5160_v0 = vadd.f32 %v5159_v34, %v5158_v14  ;;  %v4588_v31 = vmul.f32 %v4522_v35, %v10986_v52  ;;  %v4590_v44 = vmul.f32 %v4522_v35, %v11019_v50  ;;  %v12920_v50 = vld [vmem:[#allocation22_spill] sm:$0xff] }
 0x327   : > { %v5269_v61 = vrot.slane %v5268_v39, 4  ;;  %v5154_v26 = vrot.slane %v5153_v41, 1  ;;  %v11154_v37 = vadd.f32 %v4587_v2, %v12916_v3  ;;  %v4653_v22 = vadd.f32 %v4589_v21, %v12917_v45 }
 0x328   : > { %v5263_v36 = vadd.f32 %v5262_v59, %v5261_v32  ;;  %v5161_v57 = vrot.slane %v5160_v0, 1  ;;  %v4654_v55 = vadd.f32 %v4590_v44, %v12918_v7  ;;  %v4933_v12 = vmul.f32 %v12919_v60, %v11045_v20  ;;  %v12921_v7 = vld [vmem:[#allocation96_spill] sm:$0xff] }
 0x329   : > { %v5270_v63 = vadd.f32 %v5269_v61, %v5268_v39  ;;  %v5155_v14 = vadd.f32 %v5154_v26, %v5153_v41  ;;  %v5037_v52 = vadd.f32 %v10920_v33, %v4653_v22  ;;  %v4934_v35 = vmul.f32 %v12920_v50, %v11045_v20  ;;  %v4401_v41 = vpop.permute.xlu1 %4400 }
 0x32a   : > { %v5264_v34 = vrot.slane %v5263_v36, 2  ;;  %v5162_v40 = vadd.f32 %v5161_v57, %v5160_v0  ;;  %v5038_v2 = vadd.f32 %v10932_v16, %v4654_v55  ;;  %v4997_v61 = vadd.f32 %v4933_v12, %v10903_v56 }
 0x32b   : > { %v5271_v32 = vrot.slane %v5270_v63, 2  ;;  %v5337_v39 = vpack.c.bf16 %v5155_v14, %v5155_v14  ;;  %v11166_v44 = vadd.f32 %v4588_v31, %v12921_v7  ;;  %v4998_v0 = vadd.f32 %v4934_v35, %v10906_v58  ;;  %v12928_v58 = vld [vmem:[#allocation89_spill] sm:$0xff]  ;;  %v12931_v35 = vld [vmem:[#allocation123_spill] sm:$0xff] }
 0x32c   : > { %v5265_v59 = vadd.f32 %v5264_v34, %v5263_v36  ;;  %v5338_v21 = vpack.c.bf16 %v5162_v40, %v5162_v40  ;;  %v12922_v3 = vmax.f32 %v10936_v27, 0.0  ;;  %v12923_v36 = vld [vmem:[#allocation47_spill] sm:$0xff]  ;;  %v12925_v56 = vmax.f32 %v10952_v17, 0.0  ;;  %v12929_v27 = vld [vmem:[#allocation212_spill] sm:$0xff] }
 0x32d   : > { %v5272_v26 = vadd.f32 %v5271_v32, %v5270_v63  ;;  %v11169_v57 = vunpack.c.l.b16 %v5337_v39  ;;  %v12924_v45 = vmax.f32 %v12923_v36, 0.0  ;;  %v12926_v63 = vld [vmem:[#allocation64_spill] sm:$0xff]  ;;  %v4963_v34 = vmul.f32 %v12928_v58, %v11070_v23  ;;  %v12930_v32 = vld [vmem:[#allocation70_spill] sm:$0xff] }
 0x32e   : > { %v5266_v33 = vrot.slane %v5265_v59, 1  ;;  %v11173_v20 = vmul.f32 %v5037_v52, %v12922_v3  ;;  %v11179_v40 = vmul.f32 %v5038_v2, %v12925_v56  ;;  %v12927_v31 = vmax.f32 %v12926_v63, 0.0  ;;  %v12932_v2 = vld [vmem:[#allocation72_spill] sm:$0xff]  ;;  %v4705_v3 = vpop.permute.xlu1 %4704 }
 0x32f   : > { %v5061_v16 = vmul.f32 %v4997_v61, %v12924_v45  ;;  %v5273_v22 = vrot.slane %v5272_v26, 1  ;;  %v4964_v12 = vmul.f32 %v12929_v27, %v11070_v23  ;;  %v4559_v52 = vmul.f32 %v12930_v32, %v11108_v42  ;;  %v12934_v45 = vld [vmem:[#allocation88_spill] sm:$0xff] }
 0x330   : > { %v5062_v14 = vmul.f32 %v4998_v0, %v12927_v31  ;;  %v5267_v55 = vadd.f32 %v5266_v33, %v5265_v59  ;;  %v5027_v39 = vadd.f32 %v4963_v34, %v12931_v35  ;;  %v4560_v61 = vmul.f32 %v12932_v2, %v11108_v42  ;;  %v12933_v33 = vld [vmem:[#allocation65_spill] sm:$0xff]  ;;  %v12937_v63 = vld [vmem:[#allocation92_spill] sm:$0xff] }
 0x331   : > { %v5163_v60 = vadd.f32 %v5061_v16, %v10867_v18  ;;  %v5274_v50 = vadd.f32 %v5273_v22, %v5272_v26  ;;  %v11194_v7 = vunpack.c.l.b16 %v5338_v21  ;;  %v5028_v18 = vadd.f32 %v4964_v12, %v12933_v33  ;;  %v12936_v26 = vld [vmem:[#allocation209_spill] sm:$0xff] }
 0x332   : > { %v5170_v17 = vadd.f32 %v5062_v14, %v10880_v51  ;;  %v5353_v0 = vpack.c.bf16 %v5267_v55, %v5267_v55  ;;  %v12935_v16 = vmax.f32 %v12934_v45, 0.0  ;;  %v11200_v22 = vadd.f32 %v4559_v52, %v12936_v26  ;;  %v12939_v42 = vld [vmem:[#allocation173_spill] sm:$0xff] }
 0x333   : > { %v5164_v59 = vrot.slane %v5163_v60, 4  ;;  %v5354_v36 = vpack.c.bf16 %v5274_v50, %v5274_v50  ;;  %v12938_v31 = vmax.f32 %v12937_v63, 0.0  ;;  %v11205_v21 = vadd.f32 %v4560_v61, %v12939_v42 }
 0x334   : > { %v5171_v23 = vrot.slane %v5170_v17, 4  ;;  %v5091_v56 = vmul.f32 %v5027_v39, %v12935_v16  ;;  %v4526_v58 = vrot.slane %v12899_v38, %v9892_v54  ;;  %v11209_v34 = vunpack.c.l.b16 %v5353_v0  ;;  %v12941_v16 = vld [vmem:[#allocation93_spill] sm:$0xff] }
 0x335   : > { %v5165_v51 = vadd.f32 %v5164_v59, %v5163_v60  ;;  %v5092_v14 = vmul.f32 %v5028_v18, %v12938_v31  ;;  %v4530_v12 = vrot.slane %v12904_v9, %v9892_v54  ;;  %v11216_v35 = vunpack.c.l.b16 %v5354_v36  ;;  %v4765_v59 = vpop.permute.xlu1 %4764  ;;  %v12940_v9 = vld [vmem:[#allocation11_spill] sm:$0xff] }
 0x336   : > { %v5172_v55 = vadd.f32 %v5171_v23, %v5170_v17  ;;  %v5275_v27 = vadd.f32 %v10949_v19, %v5091_v56  ;;  %v4591_v52 = vmul.f32 %v4526_v58, %v11145_v28  ;;  %v4593_v50 = vmul.f32 %v4526_v58, %v4401_v41  ;;  %v12944_v58 = vld [vmem:[#allocation67_spill] sm:$0xff] }
 0x337   : > { %v5166_v32 = vrot.slane %v5165_v51, 2  ;;  %v5282_v60 = vadd.f32 %v10962_v4, %v5092_v14  ;;  %v4594_v61 = vmul.f32 %v4530_v12, %v4401_v41  ;;  %v4592_v17 = vmul.f32 %v4530_v12, %v11145_v28  ;;  %v12943_v14 = vld [vmem:[#allocation214_spill] sm:$0xff] }
 0x338   : > { %v5173_v39 = vrot.slane %v5172_v55, 2  ;;  %v5276_v2 = vrot.slane %v5275_v27, 4  ;;  %v4657_v19 = vadd.f32 %v4593_v50, %v11028_v15  ;;  %v11221_v18 = vadd.f32 %v4591_v52, %v12940_v9 }
 0x339   : > { %v5167_v38 = vadd.f32 %v5166_v32, %v5165_v51  ;;  %v5283_v0 = vrot.slane %v5282_v60, 4  ;;  %v4658_v4 = vadd.f32 %v4594_v61, %v11048_v8  ;;  %v4937_v41 = vmul.f32 %v12941_v16, %v4705_v3  ;;  %v12942_v51 = vld [vmem:[#allocation215_spill] sm:$0xff]  ;;  %v12946_v32 = vld [vmem:[#allocation90_spill] sm:$0xff] }
 0x33a   : > { %v5174_v33 = vadd.f32 %v5173_v39, %v5172_v55  ;;  %v5277_v54 = vadd.f32 %v5276_v2, %v5275_v27  ;;  %v5041_v45 = vadd.f32 %v11120_v5, %v4657_v19  ;;  %v4938_v15 = vmul.f32 %v12942_v51, %v4705_v3  ;;  %v12949_v2 = vld [vmem:[#allocation135_spill] sm:$0xff]  ;;  %v12953_v51 = vld [vmem:[#allocation97_spill] sm:$0xff] }
 0x33b   : > { %v5168_v23 = vrot.slane %v5167_v38, 1  ;;  %v5284_v36 = vadd.f32 %v5283_v0, %v5282_v60  ;;  %v5042_v28 = vadd.f32 %v11137_v10, %v4658_v4  ;;  %v11229_v42 = vadd.f32 %v4592_v17, %v12943_v14  ;;  %v12947_v10 = vld [vmem:[#allocation35_spill] sm:$0xff] }
 0x33c   : > { %v5175_v56 = vrot.slane %v5174_v33, 1  ;;  %v5278_v26 = vrot.slane %v5277_v54, 2  ;;  %v5001_v55 = vadd.f32 %v4937_v41, %v12944_v58  ;;  %v12945_v12 = vmax.f32 %v10990_v30, 0.0  ;;  %v12956_v58 = vld [vmem:[#allocation158_spill] sm:$0xff] }
 0x33d   : > { %v5169_v63 = vadd.f32 %v5168_v23, %v5167_v38  ;;  %v5285_v31 = vrot.slane %v5284_v36, 2  ;;  %v5002_v60 = vadd.f32 %v4938_v15, %v12946_v32  ;;  %v12948_v39 = vmax.f32 %v12947_v10, 0.0  ;;  %v4709_v38 = vpop.permute.xlu1 %4708 }
 0x33e   : > { %v5176_v8 = vadd.f32 %v5175_v56, %v5174_v33  ;;  %v5279_v27 = vadd.f32 %v5278_v26, %v5277_v54  ;;  %v11234_v5 = vmul.f32 %v5041_v45, %v12945_v12  ;;  %v4967_v61 = vmul.f32 %v12949_v2, %v4765_v59  ;;  %v12951_v33 = vld [vmem:[#allocation43_spill] sm:$0xff] }
 0x33f   : > { %v5339_v52 = vpack.c.bf16 %v5169_v63, %v5169_v63  ;;  %v5286_v50 = vadd.f32 %v5285_v31, %v5284_v36  ;;  %v5065_v3 = vmul.f32 %v5001_v55, %v12948_v39  ;;  %v12950_v17 = vmax.f32 %v11005_v1, 0.0  ;;  %v12955_v31 = vld [vmem:[#allocation171_spill] sm:$0xff] }
 0x340   : > { %v5280_v0 = vrot.slane %v5279_v27, 1  ;;  %v12952_v54 = vmax.f32 %v12951_v33, 0.0  ;;  %v4968_v9 = vmul.f32 %v10802_v62, %v4765_v59  ;;  %v5340_v4 = vpack.c.bf16 %v5176_v8, %v5176_v8 }
 0x341   : > { %v11242_v19 = vmul.f32 %v5042_v28, %v12950_v17  ;;  %v5287_v23 = vrot.slane %v5286_v50, 1  ;;  %v5177_v36 = vadd.f32 %v5065_v3, %v11059_v43  ;;  %v5031_v45 = vadd.f32 %v4967_v61, %v11052_v49  ;;  %v12958_v49 = vld [vmem:[#allocation66_spill] sm:$0xff]  ;;  %v4773_v32 = vpop.permute.xlu1 %4772  ;;  %v12959_v61 = vld [vmem:[#allocation57_spill] sm:$0xff] }
 0x342   : > { %v5066_v30 = vmul.f32 %v5002_v60, %v12952_v54  ;;  %v11249_v16 = vunpack.c.l.b16 %v5339_v52  ;;  %v5281_v41 = vadd.f32 %v5280_v0, %v5279_v27  ;;  %v5032_v1 = vadd.f32 %v4968_v9, %v11055_v6  ;;  %v12961_v54 = vld [vmem:[#allocation19_spill] sm:$0xff] }
 0x343   : > { %v5288_v26 = vadd.f32 %v5287_v23, %v5286_v50  ;;  %v5178_v28 = vrot.slane %v5177_v36, 4  ;;  %v12954_v15 = vmax.f32 %v12953_v51, 0.0  ;;  %v4939_v62 = vmul.f32 %v12955_v31, %v4709_v38 }
 0x344   : > { %v5184_v56 = vadd.f32 %v5066_v30, %v11077_v47  ;;  %v5355_v59 = vpack.c.bf16 %v5281_v41, %v5281_v41  ;;  %v12957_v43 = vmax.f32 %v12956_v58, 0.0  ;;  %v4940_v8 = vmul.f32 %v12958_v49, %v4709_v38  ;;  %v12967_v58 = vld [vmem:[#allocation199_spill] sm:$0xff] }
 0x345   : > { %v5095_v63 = vmul.f32 %v5031_v45, %v12954_v15  ;;  %v11259_v12 = vunpack.c.l.b16 %v5340_v4  ;;  %v5179_v27 = vadd.f32 %v5178_v28, %v5177_v36  ;;  %v5003_v6 = vadd.f32 %v4939_v62, %v11142_v48  ;;  %v12963_v48 = vld [vmem:[#allocation39_spill] sm:$0xff]  ;;  %v12964_v36 = vld [vmem:[#allocation25_spill] sm:$0xff] }
 0x346   : > { %v5185_v14 = vrot.slane %v5184_v56, 4  ;;  %v5096_v55 = vmul.f32 %v5032_v1, %v12957_v43  ;;  %v5356_v60 = vpack.c.bf16 %v5288_v26, %v5288_v26  ;;  %v5004_v10 = vadd.f32 %v4940_v8, %v11148_v46  ;;  %v12965_v45 = vld [vmem:[#allocation149_spill] sm:$0xff]  ;;  %v12966_v1 = vld [vmem:[#allocation111_spill] sm:$0xff] }
 0x347   : > { %v5289_v47 = vadd.f32 %v11085_v53, %v5095_v63  ;;  %v11265_v39 = vunpack.c.l.b16 %v5355_v59  ;;  %v5180_v3 = vrot.slane %v5179_v27, 2  ;;  %v12960_v38 = vmax.f32 %v12959_v61, 0.0 }
 0x348   : > { %v5186_v52 = vadd.f32 %v5185_v14, %v5184_v56  ;;  %v5296_v50 = vadd.f32 %v11091_v24, %v5096_v55  ;;  %v12962_v53 = vmax.f32 %v12961_v54, 0.0  ;;  %v4971_v9 = vmul.f32 %v12963_v48, %v4773_v32 }
 0x349   : > { %v5290_v2 = vrot.slane %v5289_v47, 4  ;;  %v5067_v0 = vmul.f32 %v5003_v6, %v12960_v38  ;;  %v5181_v4 = vadd.f32 %v5180_v3, %v5179_v27  ;;  %v4972_v46 = vmul.f32 %v12965_v45, %v4773_v32 }
 0x34a   : > { %v5187_v17 = vrot.slane %v5186_v52, 2  ;;  %v5297_v33 = vrot.slane %v5296_v50, 4  ;;  %v5068_v30 = vmul.f32 %v5004_v10, %v12962_v53  ;;  %v5035_v28 = vadd.f32 %v4971_v9, %v11154_v37 }
 0x34b   : > { %v5291_v23 = vadd.f32 %v5290_v2, %v5289_v47  ;;  %v5191_v24 = vadd.f32 %v12964_v36, %v5067_v0  ;;  %v5182_v51 = vrot.slane %v5181_v4, 1  ;;  %v5036_v31 = vadd.f32 %v4972_v46, %v11166_v44  ;;  %v12969_v47 = vld [vmem:[#allocation100_spill] sm:$0xff] }
 0x34c   : > { %v5188_v41 = vadd.f32 %v5187_v17, %v5186_v52  ;;  %v5298_v56 = vadd.f32 %v5297_v33, %v5296_v50  ;;  %v5198_v26 = vadd.f32 %v12966_v1, %v5068_v30  ;;  %v12968_v43 = vmax.f32 %v12967_v58, 0.0  ;;  %v4717_v52 = vpop.permute.xlu1 %4716 }
 0x34d   : > { %v5292_v15 = vrot.slane %v5291_v23, 2  ;;  %v5192_v63 = vrot.slane %v5191_v24, 4  ;;  %v5183_v49 = vadd.f32 %v5182_v51, %v5181_v4  ;;  %v12970_v6 = vmax.f32 %v12969_v47, 0.0  ;;  %v12975_v47 = vld [vmem:[#allocation17_spill] sm:$0xff] }
 0x34e   : > { %v5189_v62 = vrot.slane %v5188_v41, 1  ;;  %v5299_v59 = vrot.slane %v5298_v56, 2  ;;  %v5199_v14 = vrot.slane %v5198_v26, 4  ;;  %v5099_v55 = vmul.f32 %v5035_v28, %v12968_v43 }
 0x34f   : > { %v5293_v8 = vadd.f32 %v5292_v15, %v5291_v23  ;;  %v5193_v27 = vadd.f32 %v5192_v63, %v5191_v24  ;;  %v5100_v32 = vmul.f32 %v5036_v31, %v12970_v6  ;;  %v5341_v2 = vpack.c.bf16 %v5183_v49, %v5183_v49  ;;  %v12971_v24 = vld [vmem:[#allocation101_spill] sm:$0xff] }
 0x350   : > { %v5190_v50 = vadd.f32 %v5189_v62, %v5188_v41  ;;  %v5300_v37 = vadd.f32 %v5299_v59, %v5298_v56  ;;  %v5200_v10 = vadd.f32 %v5199_v14, %v5198_v26  ;;  %v5303_v3 = vadd.f32 %v11173_v20, %v5099_v55  ;;  %v12972_v56 = vld [vmem:[#allocation37_spill] sm:$0xff]  ;;  %v12973_v14 = vld [vmem:[#allocation8_spill] sm:$0xff] }
 0x351   : > { %v5294_v44 = vrot.slane %v5293_v8, 1  ;;  %v5194_v61 = vrot.slane %v5193_v27, 2  ;;  %v5310_v38 = vadd.f32 %v11179_v40, %v5100_v32  ;;  %v11283_v0 = vunpack.c.l.b16 %v5356_v60  ;;  %v4781_v60 = vpop.permute.xlu1 %4780 }
 0x352   : > { %v5301_v17 = vrot.slane %v5300_v37, 1  ;;  %v5201_v33 = vrot.slane %v5200_v10, 2  ;;  %v5304_v54 = vrot.slane %v5303_v3, 4  ;;  %v5342_v53 = vpack.c.bf16 %v5190_v50, %v5190_v50  ;;  %v12977_v50 = vld [vmem:[#allocation42_spill] sm:$0xff] }
 0x353   : > { %v5295_v30 = vadd.f32 %v5294_v44, %v5293_v8  ;;  %v5195_v48 = vadd.f32 %v5194_v61, %v5193_v27  ;;  %v5311_v9 = vrot.slane %v5310_v38, 4  ;;  %v4943_v45 = vmul.f32 %v12971_v24, %v4717_v52  ;;  %v12978_v44 = vld [vmem:[#allocation36_spill] sm:$0xff] }
 0x354   : > { %v5302_v4 = vadd.f32 %v5301_v17, %v5300_v37  ;;  %v5202_v23 = vadd.f32 %v5201_v33, %v5200_v10  ;;  %v5305_v36 = vadd.f32 %v5304_v54, %v5303_v3  ;;  %v11286_v20 = vunpack.c.l.b16 %v5341_v2  ;;  %v12979_v17 = vld [vmem:[#allocation26_spill] sm:$0xff] }
 0x355   : > { %v5196_v46 = vrot.slane %v5195_v48, 1  ;;  %v5312_v41 = vadd.f32 %v5311_v9, %v5310_v38  ;;  %v4944_v40 = vmul.f32 %v12972_v56, %v4717_v52  ;;  %v5357_v1 = vpack.c.bf16 %v5295_v30, %v5295_v30  ;;  %v12981_v30 = vld [vmem:[#allocation9_spill] sm:$0xff] }
 0x356   : > { %v5203_v26 = vrot.slane %v5202_v23, 1  ;;  %v5306_v28 = vrot.slane %v5305_v36, 2  ;;  %v5007_v51 = vadd.f32 %v4943_v45, %v11200_v22  ;;  %v5358_v15 = vpack.c.bf16 %v5302_v4, %v5302_v4 }
 0x357   : > { %v5197_v63 = vadd.f32 %v5196_v46, %v5195_v48  ;;  %v5313_v31 = vrot.slane %v5312_v41, 2  ;;  %v5008_v62 = vadd.f32 %v4944_v40, %v11205_v21  ;;  %v12974_v58 = vmax.f32 %v12973_v14, 0.0 }
 0x358   : > { %v5307_v59 = vadd.f32 %v5306_v28, %v5305_v36  ;;  %v4975_v55 = vmul.f32 %v11101_v29, %v4781_v60  ;;  %v4976_v49 = vmul.f32 %v11113_v25, %v4781_v60  ;;  %v12976_v6 = vmax.f32 %v12975_v47, 0.0 }
 0x359   : > { %v5071_v43 = vmul.f32 %v5007_v51, %v12974_v58  ;;  %v5343_v8 = vpack.c.bf16 %v5197_v63, %v5197_v63  ;;  %v5314_v27 = vadd.f32 %v5313_v31, %v5312_v41  ;;  %v5204_v52 = vadd.f32 %v5203_v26, %v5202_v23 }
 0x35a   : > { %v5072_v32 = vmul.f32 %v5008_v62, %v12976_v6  ;;  %v5308_v22 = vrot.slane %v5307_v59, 1  ;;  %v5039_v10 = vadd.f32 %v4975_v55, %v11221_v18  ;;  %v5040_v21 = vadd.f32 %v4976_v49, %v11229_v42 }
 0x35b   : > { %v5205_v37 = vadd.f32 %v12977_v50, %v5071_v43  ;;  %v11300_v3 = vunpack.c.l.b16 %v5357_v1  ;;  %v5315_v2 = vrot.slane %v5314_v27, 1  ;;  %v5344_v61 = vpack.c.bf16 %v5204_v52, %v5204_v52  ;;  %v12985_v43 = vld [vmem:[#allocation28_spill] sm:$0xff] }
 0x35c   : > { %v5212_v29 = vadd.f32 %v12978_v44, %v5072_v32  ;;  %v5309_v25 = vadd.f32 %v5308_v22, %v5307_v59  ;;  %v12980_v33 = vmax.f32 %v12979_v17, 0.0  ;;  %v12982_v48 = vmax.f32 %v12981_v30, 0.0  ;;  %v12987_v44 = vld [vmem:[#allocation192_spill] sm:$0xff] }
 0x35d   : > { %v5206_v38 = vrot.slane %v5205_v37, 4  ;;  %v5451_v4 = vunpack.c.l.b16 %v5343_v8  ;;  %v5316_v36 = vadd.f32 %v5315_v2, %v5314_v27  ;;  %v5450_v18 = vunpack.c.l.b16 %v5342_v53 }
 0x35e   : > { %v5103_v54 = vmul.f32 %v5039_v10, %v12980_v33  ;;  %v5104_v9 = vmul.f32 %v5040_v21, %v12982_v48  ;;  %v5213_v23 = vrot.slane %v5212_v29, 4  ;;  %v5359_v24 = vpack.c.bf16 %v5309_v25, %v5309_v25  ;;  %v12988_v33 = vld [vmem:[#allocation104_spill] sm:$0xff] }
 0x35f   : > { %v5207_v42 = vadd.f32 %v5206_v38, %v5205_v37  ;;  %v5360_v56 = vpack.c.bf16 %v5316_v36, %v5316_v36  ;;  %v5452_v40 = vunpack.c.l.b16 %v5344_v61  ;;  %v5466_v60 = vunpack.c.l.b16 %v5358_v15  ;;  %v12986_v15 = vld [vmem:[#allocation130_spill] sm:$0xff] }
 0x360   : > { %v5317_v45 = vadd.f32 %v11234_v5, %v5103_v54  ;;  %v5324_v46 = vadd.f32 %v11242_v19, %v5104_v9  ;;  %v5214_v41 = vadd.f32 %v5213_v23, %v5212_v29  ;;  %v5467_v51 = vunpack.c.l.b16 %v5359_v24  ;;  %v12983_v5 = vld [vmem:[#allocation148_spill] sm:$0xff]  ;;  %v12984_v19 = vld [vmem:[#allocation95_spill] sm:$0xff] }
 0x361   : > { %v5208_v1 = vrot.slane %v5207_v42, 2  ;;  %v5468_v31 = vunpack.c.l.b16 %v5360_v56  ;;  %v5485_v58 = vsel %vm5471_vm0, %v12984_v19, %v12983_v5  ;;  %v5499_v55 = vsel %vm5471_vm0, %v12986_v15, %v12985_v43 }
 0x362   : > { %v5318_v26 = vrot.slane %v5317_v45, 4  ;;  %v5325_v28 = vrot.slane %v5324_v46, 4  ;;  %v5215_v63 = vrot.slane %v5214_v41, 2  ;;  %v5486_v47 = vsel %vm5473_vm1, %v11081_v13, %v5485_v58 }
 0x363   : > { %v5209_v62 = vadd.f32 %v5208_v1, %v5207_v42  ;;  %v5487_v32 = vsel %vm5475_vm2, %v11194_v7, %v5486_v47  ;;  %v5500_v52 = vsel %vm5473_vm1, %v11115_v11, %v5499_v55  ;;  %v5476_v29 = vsel %vm5475_vm2, %v11169_v57, %v12987_v44 }
 0x364   : > { %v5319_v53 = vadd.f32 %v5318_v26, %v5317_v45  ;;  %v5326_v59 = vadd.f32 %v5325_v28, %v5324_v46  ;;  %v5216_v14 = vadd.f32 %v5215_v63, %v5214_v41  ;;  %v5488_v10 = vsel %vm5477_vm3, %v11259_v12, %v5487_v32  ;;  %v12990_v26 = vld [vmem:[#allocation167_spill] sm:$0xff] }
 0x365   : > { %v5210_v49 = vrot.slane %v5209_v62, 1  ;;  %v5489_v2 = vsel %vm5479_vm4, %v5450_v18, %v5488_v10  ;;  %v5501_v13 = vsel %vm5475_vm2, %v11216_v35, %v5500_v52  ;;  %v5478_v11 = vsel %vm5477_vm3, %v11249_v16, %v5476_v29 }
 0x366   : > { %v5320_v8 = vrot.slane %v5319_v53, 2  ;;  %v5327_v27 = vrot.slane %v5326_v59, 2  ;;  %v5217_v6 = vrot.slane %v5216_v14, 1  ;;  %v5502_v12 = vsel %vm5477_vm3, %v11283_v0, %v5501_v13 }
 0x367   : > { %v5211_v22 = vadd.f32 %v5210_v49, %v5209_v62  ;;  %v5480_v17 = vsel %vm5479_vm4, %v11286_v20, %v5478_v11  ;;  %v5494_v35 = vsel %vm5475_vm2, %v11209_v34, %v12988_v33  ;;  %v5503_v48 = vsel %vm5479_vm4, %v5466_v60, %v5502_v12  ;;  %v12989_v60 = vld [vmem:[#allocation163_spill] sm:$0xff] }
 0x368   : > { %v5321_v50 = vadd.f32 %v5320_v8, %v5319_v53  ;;  %v5328_v37 = vadd.f32 %v5327_v27, %v5326_v59  ;;  %v5218_v21 = vadd.f32 %v5217_v6, %v5216_v14  ;;  %v5490_v23 = vsel %vm5481_vm5, %v5452_v40, %v5489_v2 }
 0x369   : > { %v5345_v7 = vpack.c.bf16 %v5211_v22, %v5211_v22  ;;  %v5482_v16 = vsel %vm5481_vm5, %v5451_v4, %v5480_v17  ;;  %v5495_v0 = vsel %vm5477_vm3, %v11265_v39, %v5494_v35  ;;  %v5504_v46 = vsel %vm5481_vm5, %v5468_v31, %v5503_v48 }
 0x36a   : > { %v5322_v61 = vrot.slane %v5321_v50, 1  ;;  %v5329_v25 = vrot.slane %v5328_v37, 1  ;;  %v5346_v38 = vpack.c.bf16 %v5218_v21, %v5218_v21  ;;  %v5496_v34 = vsel %vm5479_vm4, %v11300_v3, %v5495_v0  ;;  %v5395_v3 = vld [vmem:[%s11371_s8] sm:$0x3] }
 0x36b   : > { %v5453_v54 = vunpack.c.l.b16 %v5345_v7  ;;  %v5497_v41 = vsel %vm5481_vm5, %v5467_v51, %v5496_v34  ;;  %v5400_v1 = vrot.slane %v5395_v3, %v12989_v60  ;;  %v5404_v28 = vrot.slane %v5395_v3, %v12990_v26 }
 0x36c   : > { %v5323_v30 = vadd.f32 %v5322_v61, %v5321_v50  ;;  %v5330_v57 = vadd.f32 %v5329_v25, %v5328_v37  ;;  %v5454_v9 = vunpack.c.l.b16 %v5346_v38 }
 0x36d   : > { %v5484_v18 = vsel %vm5483_vm6, %v5453_v54, %v5482_v16 }
 0x36e   : > { %v5361_v36 = vpack.c.bf16 %v5323_v30, %v5323_v30  ;;  %v5362_v20 = vpack.c.bf16 %v5330_v57, %v5330_v57  ;;  %v5491_v24 = vsel %vm5483_vm6, %v5454_v9, %v5490_v23 }
 0x370   : > { %v5469_v42 = vunpack.c.l.b16 %v5361_v36  ;;  %v5470_v45 = vunpack.c.l.b16 %v5362_v20 }
 0x372   : > { %v5505_v4 = vsel %vm5483_vm6, %v5470_v45, %v5504_v46  ;;  %v5498_v39 = vsel %vm5483_vm6, %v5469_v42, %v5497_v41 }
 0x373   : > { %v5507_v56 = vpack.c.b16 %v5505_v4, %v5491_v24  ;;  %v5506_v40 = vpack.c.b16 %v5498_v39, %v5484_v18 }
 0x375   : > { %5702 = vmatprep.mubr.bf16.mxu0 %v5507_v56 }
 0x376   : > { %5703 = vmatmul.mubr.bf16.vlgmr.msra.gmra.mxu0 %v5506_v40 }
 0x436   : > { %v5704_v51 = vpop.f32.mrf.mxu0 }
 0x437   : > { %v5705_v63 = vadd.f32 %v5704_v51, %v5400_v1 }
 0x438   : > { %v5706_v31 = vpop.f32.mrf.mxu0 }
 0x439   : > { %5713 = vst [vmem:[%s389_s19] sm:$0xff] %v5705_v63  ;;  %v5707_v62 = vadd.f32 %v5706_v31, %v5404_v28 }
 0x43a   : > { %v5708_v53 = vpop.f32.mrf.mxu0 }
 0x43b   : > { %5714 = vst [vmem:[%s389_s19 + $0x8] sm:$0xff] %v5707_v62  ;;  %v5709_v59 = vadd.f32 %v5708_v53, %v5400_v1 }
 0x43c   : > { %v5710_v14 = vpop.f32.mrf.mxu0 }
 0x43d   : > { %5715 = vst [vmem:[%s389_s19 + $0x10] sm:$0xff] %v5709_v59  ;;  %v5711_v5 = vadd.f32 %v5710_v14, %v5404_v28 }
 0x43f   : > { %5716 = vst [vmem:[%s389_s19 + $0x18] sm:$0xff] %v5711_v5 }
 0x440 PF: > { %s19_s30 = sadd.s32 1, %s6372_s30  }
 0x441   : > { %p16_p6 = scmp.ge.s32.totalorder %s19_s30, 4  }
 0x443   :  { %18 = sbr.rel (!%p16_p6) target bundleno = 1 (0x1), region = 92 }

</bundles_post_ra>
